<compile_context>
chip_gen: v6e
topology: v6e:2x2x1
jax: 0.10.0
libtpu: 0.0.40
codegen_flags: <defaults>
</compile_context>

<pallas_src>
import functools

import jax
import jax.numpy as jnp
import numpy as np
from jax.experimental import pallas as pl
from jax.experimental.pallas import tpu as pltpu

HDIM = 128   # hidden_dim of the non-small DCEIFlow branch
CDIM = 128   # context_dim of the non-small DCEIFlow branch

VMEM_SPEC = pl.BlockSpec(memory_space=pltpu.MemorySpace.VMEM)


def _pick_tile(n, candidates=(512, 256, 128)):
    """Largest lane/row tile from `candidates` dividing n, else the full extent."""
    for c in candidates:
        if n % c == 0:
            return c
    return n


# ----------------------------------------------------------------------------
# Pallas kernels
# ----------------------------------------------------------------------------
def _eifusion_kernel(x1_ref, x2_ref, w1_ref, b1_ref, w2_ref, b2_ref,
                     wo1_ref, wo2_ref, bo_ref, cm_ref, o_ref, *, H, W):
    """Fused EIFusion: relu(1x1 conv) x2 -> concat -> 3x3 conv -> relu -> +x1.

    x1: (HW, Cin) f32 (kept f32 for the residual), x2: (HW, Cin) bf16,
    w1/w2: (Cin, mid) bf16, wo1/wo2: (9, mid, Cout) bf16 (per-tap weights for
    the c1 / c2 halves of the concatenated input), cm: (HW, 3) column-validity
    mask for dj in {-1, 0, +1}.  The 3x3 conv is 9 shifted matmul
    accumulations directly into the output ref; no im2col is materialized.
    """
    HW = H * W
    x1 = x1_ref[...]                                               # f32 residual
    c1 = jnp.maximum(
        jnp.dot(x1.astype(jnp.bfloat16), w1_ref[...],
                preferred_element_type=jnp.float32) + b1_ref[...], 0.0)
    c2 = jnp.maximum(
        jnp.dot(x2_ref[...], w2_ref[...],
                preferred_element_type=jnp.float32) + b2_ref[...], 0.0)
    c1b = c1.astype(jnp.bfloat16)
    c2b = c2.astype(jnp.bfloat16)

    o_ref[...] = jnp.zeros_like(o_ref)                             # accumulator
    k = 0
    for di in (-1, 0, 1):
        # rows of the output for which the source row (i + di) is in range
        t0 = max(0, -di) * W
        t1 = (H - max(0, di)) * W
        for dj in (-1, 0, 1):
            s = di * W + dj                      # token shift of this tap
            a = max(t0, -s, 0)                   # clamp so p[a+s:b+s] is in range
            b = min(t1, HW - s, HW)              # (skipped tokens are masked-out anyway)
            # tap matmul on the two halves of the (virtual) concat
            p = (jnp.dot(c1b, wo1_ref[k], preferred_element_type=jnp.float32) +
                 jnp.dot(c2b, wo2_ref[k], preferred_element_type=jnp.float32))
            o_ref[a:b, :] = (o_ref[a:b, :] +
                             p[a + s:b + s, :] * cm_ref[a:b, dj + 1:dj + 2])
            k += 1
    o_ref[...] = jnp.maximum(o_ref[...] + bo_ref[...], 0.0) + x1


def _corr_kernel(f1_ref, f2t_ref, o_ref):
    # f1 tile: (tm, D) bf16 (1/sqrt(D) already folded in), f2t tile: (D, tn) bf16
    # TODO(synk): output could be emitted as bf16 if the downstream CorrBlock
    # pyramid tolerates it (halves the largest HBM write in the pipeline).
    o_ref[...] = jnp.dot(f1_ref[...], f2t_ref[...],
                         preferred_element_type=jnp.float32)


def _context_kernel(c_ref, net_ref, inp_ref, *, hdim):
    # c tile: (tm, hdim+cdim)  ->  net = tanh(first hdim), inp = relu(rest)
    c = c_ref[...]
    net_ref[...] = jnp.tanh(c[:, :hdim])
    inp_ref[...] = jnp.maximum(c[:, hdim:], 0.0)


def _upsample_kernel(mask_ref, fnb_ref, o_ref):
    # mask tile: (9, 64, T), fnb tile: (2, 9, T) (8*flow 3x3 neighbourhoods)
    # out tile:  (2, 64, T) = sum_k softmax_k(mask) * fnb
    m = mask_ref[...]
    m = m - jnp.max(m, axis=0, keepdims=True)
    e = jnp.exp(m)
    den = jnp.sum(e, axis=0)                             # (64, T)
    inv = pl.reciprocal(den, approx=True)                # EUP slot
    inv = inv * (2.0 - den * inv)                        # Newton refinement
    inv = inv * (2.0 - den * inv)
    f = fnb_ref[...]                                     # (2, 9, T)
    for c in range(2):                                   # per-channel (64,T) planes
        acc = jnp.zeros(o_ref.shape[1:], jnp.float32)
        for k in range(9):                               # 9 fixed taps, unrolled
            acc = acc + e[k] * f[c, k:k + 1, :]
        o_ref[c, :, :] = acc * inv                       # deferred normalization


# ----------------------------------------------------------------------------
# Pallas wrappers
# ----------------------------------------------------------------------------
def corr_volume(f1_scaled_bf16, f2t_bf16):
    hw, d = f1_scaled_bf16.shape
    hw2 = f2t_bf16.shape[1]
    tm = _pick_tile(hw)
    tn = _pick_tile(hw2)
    return pl.pallas_call(
        _corr_kernel,
        out_shape=jax.ShapeDtypeStruct((hw, hw2), jnp.float32),
        grid=(hw // tm, hw2 // tn),
        in_specs=[pl.BlockSpec((tm, d), lambda i, j: (i, 0)),
                  pl.BlockSpec((d, tn), lambda i, j: (0, j))],
        out_specs=pl.BlockSpec((tm, tn), lambda i, j: (i, j)),
        compiler_params=pltpu.CompilerParams(
            dimension_semantics=("parallel", "parallel"),
            vmem_limit_bytes=32 << 20),
    )(f1_scaled_bf16, f2t_bf16)


def context_split(cnet_tokens):
    # TODO(synk): fuse into the cnet encoder epilogue once that encoder exists.
    hw, ctot = cnet_tokens.shape
    tm = _pick_tile(hw)
    return pl.pallas_call(
        functools.partial(_context_kernel, hdim=HDIM),
        out_shape=(jax.ShapeDtypeStruct((hw, HDIM), jnp.float32),
                   jax.ShapeDtypeStruct((hw, CDIM), jnp.float32)),
        grid=(hw // tm,),
        in_specs=[pl.BlockSpec((tm, ctot), lambda i: (i, 0))],
        out_specs=[pl.BlockSpec((tm, HDIM), lambda i: (i, 0)),
                   pl.BlockSpec((tm, CDIM), lambda i: (i, 0))],
        compiler_params=pltpu.CompilerParams(
            dimension_semantics=("parallel",)),
    )(cnet_tokens)


# ----------------------------------------------------------------------------
# Glue (reshape / coords)
# ----------------------------------------------------------------------------
def nchw_to_tokens(x):  # (1, C, H, W) -> (H*W, C)
    _, c, h, w = x.shape
    return jnp.transpose(x[0], (1, 2, 0)).reshape(h * w, c)


def tokens_to_nchw(t, h, w):  # (H*W, C) -> (1, C, H, W)
    c = t.shape[1]
    return jnp.transpose(t.reshape(h, w, c), (2, 0, 1))[None]


def coords_grid(batch, ht, wd):
    ys, xs = jnp.meshgrid(jnp.arange(ht), jnp.arange(wd), indexing="ij")
    coords = jnp.stack([xs, ys], axis=0).astype(jnp.float32)   # (2, H, W), (x, y)
    return jnp.tile(coords[None], (batch, 1, 1, 1))


# ----------------------------------------------------------------------------
# EIFusion (exact semantics of the provided module; fused single kernel)
# ----------------------------------------------------------------------------
def init_eifusion_params(key, input_dim=256, mid=192, scale=0.02):
    ks = jax.random.split(key, 6)
    return dict(
        w1=scale * jax.random.normal(ks[0], (input_dim, mid), jnp.float32),
        b1=scale * jax.random.normal(ks[1], (1, mid), jnp.float32),
        w2=scale * jax.random.normal(ks[2], (input_dim, mid), jnp.float32),
        b2=scale * jax.random.normal(ks[3], (1, mid), jnp.float32),
        # wo is stored im2col-style: (ki, kj, Cin) x Cout
        wo=scale * jax.random.normal(ks[4], (9 * 2 * mid, input_dim), jnp.float32),
        bo=scale * jax.random.normal(ks[5], (1, input_dim), jnp.float32),
    )


def eifusion_forward(params, x1_nchw, x2_nchw):
    _, c, h, w = x1_nchw.shape
    hw = h * w
    mid = params["w1"].shape[1]

    x1 = nchw_to_tokens(x1_nchw)                               # (HW, C) f32
    x2b = nchw_to_tokens(x2_nchw).astype(jnp.bfloat16)         # bf16 MXU input
    w1b = params["w1"].astype(jnp.bfloat16)
    w2b = params["w2"].astype(jnp.bfloat16)
    wo = params["wo"].reshape(3, 3, 2 * mid, c)
    wo1 = wo[:, :, :mid, :].reshape(9, mid, c).astype(jnp.bfloat16)
    wo2 = wo[:, :, mid:, :].reshape(9, mid, c).astype(jnp.bfloat16)

    # column-validity mask for the 3 horizontal shifts (dj = -1, 0, +1)
    j = jnp.arange(hw, dtype=jnp.int32) % w
    cm = jnp.stack([(j >= 1).astype(jnp.float32),
                    jnp.ones((hw,), jnp.float32),
                    (j <= w - 2).astype(jnp.float32)], axis=1)  # (HW, 3)

    out = pl.pallas_call(
        functools.partial(_eifusion_kernel, H=h, W=w),
        out_shape=jax.ShapeDtypeStruct((hw, c), jnp.float32),
        in_specs=[VMEM_SPEC] * 10,
        out_specs=VMEM_SPEC,
        compiler_params=pltpu.CompilerParams(vmem_limit_bytes=64 << 20),
    )(x1, x2b, w1b, params["b1"], w2b, params["b2"], wo1, wo2, params["bo"], cm)
    return tokens_to_nchw(out, h, w)


# ----------------------------------------------------------------------------
# upsample_flow (exact semantics of DCEIFlow.upsample_flow)
# ----------------------------------------------------------------------------
def upsample_flow(flow, mask):
    n, _, h, w = flow.shape  # n == 1 here
    hw = h * w
    flow8 = 8.0 * flow[0]                                            # (2, H, W)
    fp = jnp.pad(flow8, ((0, 0), (1, 1), (1, 1)))
    nb = jnp.stack([fp[:, ki:ki + h, kj:kj + w]
                    for ki in range(3) for kj in range(3)], axis=1)  # (2, 9, H, W)
    flow_nb = nb.reshape(2, 9, hw)
    m = mask[0].reshape(9, 64, hw)                                   # view(1,9,8,8,H,W)

    t = _pick_tile(hw)   # lane-dense (>=128) blocks at realistic resolutions
    out = pl.pallas_call(
        _upsample_kernel,
        out_shape=jax.ShapeDtypeStruct((2, 64, hw), jnp.float32),
        grid=(hw // t,),
        in_specs=[pl.BlockSpec((9, 64, t), lambda i: (0, 0, i)),
                  pl.BlockSpec((2, 9, t), lambda i: (0, 0, i))],
        out_specs=pl.BlockSpec((2, 64, t), lambda i: (0, 0, i)),
        compiler_params=pltpu.CompilerParams(
            dimension_semantics=("parallel",)),
    )(m, flow_nb)
    out = out.reshape(2, 8, 8, h, w).transpose(0, 3, 1, 4, 2).reshape(2, 8 * h, 8 * w)
    return out[None]


# ----------------------------------------------------------------------------
# DCEIFlow forward (Pallas hot paths; missing sub-modules noted above)
# ----------------------------------------------------------------------------
def dceiflow_forward(params, fmap1, fmap2, emap, cnet_feat, up_mask, flow_init):
    n, d, h, w = fmap1.shape
    # pseudo_fmap2 = fusion(fmap1, emap)
    pseudo_fmap2 = eifusion_forward(params, fmap1, emap)

    # CorrBlock base volume: <fmap1, pseudo_fmap2> / sqrt(D)
    # scale folded into f1 (HW x D) instead of the (HW x HW) output; bf16 MXU inputs.
    inv_sqrt_d = 1.0 / float(np.sqrt(d))
    f1 = (nchw_to_tokens(fmap1) * inv_sqrt_d).astype(jnp.bfloat16)   # (HW, D)
    f2t = pseudo_fmap2[0].reshape(d, h * w).astype(jnp.bfloat16)     # (D, HW)
    corr = corr_volume(f1, f2t)                                      # (HW, HW) f32
    # TODO(synk): CorrBlock pyramid construction + bilinear coordinate lookup not provided.

    # context: net, inp = split(cnet); tanh / relu
    c_tokens = nchw_to_tokens(cnet_feat)              # (HW, hdim+cdim)
    net, inp = context_split(c_tokens)

    # initialize_flow
    coords0 = coords_grid(n, h, w)
    coords1 = coords_grid(n, h, w) + flow_init
    # TODO(synk): BasicUpdateBlockNoMask GRU iterations not provided; delta_flow := 0.
    flow = coords1 - coords0
    flow_up = upsample_flow(flow, up_mask)

    return dict(flow_preds=[flow_up], flow_init=flow, flow_final=flow_up,
                flow_final_bw=None, fmap2_pseudo=pseudo_fmap2, corr=corr,
                net=net, inp=inp)


# ----------------------------------------------------------------------------
# Pure-JAX references for correctness checks
# ----------------------------------------------------------------------------
def eifusion_ref(params, x1, x2):
    mid = params["w1"].shape[1]
    cin = params["w1"].shape[0]
    w1 = params["w1"].T[:, :, None, None]
    w2 = params["w2"].T[:, :, None, None]
    wo = jnp.transpose(params["wo"].reshape(3, 3, 2 * mid, cin), (3, 2, 0, 1))

    def conv(x, wt, b, pad):
        y = jax.lax.conv_general_dilated(
            x, wt, (1, 1), [(pad, pad), (pad, pad)],
            dimension_numbers=("NCHW", "OIHW", "NCHW"),
            precision=jax.lax.Precision.HIGHEST)
        return y + b.reshape(1, -1, 1, 1)

    c1 = jax.nn.relu(conv(x1, w1, params["b1"], 0))
    c2 = jax.nn.relu(conv(x2, w2, params["b2"], 0))
    out = jax.nn.relu(conv(jnp.concatenate([c1, c2], axis=1), wo, params["bo"], 1))
    return out + x1


def upsample_flow_ref(flow, mask):
    n, _, h, w = flow.shape
    m = jax.nn.softmax(mask.reshape(n, 1, 9, 8, 8, h, w), axis=2)
    fp = jnp.pad(8.0 * flow, ((0, 0), (0, 0), (1, 1), (1, 1)))
    nb = jnp.stack([fp[:, :, ki:ki + h, kj:kj + w]
                    for ki in range(3) for kj in range(3)], axis=2)
    uf = jnp.sum(m * nb.reshape(n, 2, 9, 1, 1, h, w), axis=2)
    uf = jnp.transpose(uf, (0, 1, 4, 2, 5, 3))
    return uf.reshape(n, 2, 8 * h, 8 * w)


# ----------------------------------------------------------------------------
if __name__ == "__main__":
    key = jax.random.PRNGKey(0)
    N, C, H, W = 1, 256, 8, 8          # 1/8-resolution feature maps (image 64x64)
    ks = jax.random.split(key, 8)
    fmap1 = jax.random.normal(ks[0], (N, C, H, W), jnp.float32)
    fmap2 = jax.random.normal(ks[1], (N, C, H, W), jnp.float32)
    emap = jax.random.normal(ks[2], (N, C, H, W), jnp.float32)
    cnet = jax.random.normal(ks[3], (N, HDIM + CDIM, H, W), jnp.float32)
    up_mask = jax.random.normal(ks[4], (N, 9 * 64, H, W), jnp.float32)
    flow_init = jax.random.normal(ks[5], (N, 2, H, W), jnp.float32)
    params = init_eifusion_params(ks[6], input_dim=C)

    fwd = jax.jit(dceiflow_forward)
    out = fwd(params, fmap1, fmap2, emap, cnet, up_mask, flow_init)
    jax.block_until_ready((out["flow_final"], out["corr"],
                           out["fmap2_pseudo"], out["net"], out["inp"]))

    # ---- correctness checks -------------------------------------------------
    # EIFusion vs. f32 reference (bf16 MXU inputs -> relaxed tolerance).
    pf2_ref = eifusion_ref(params, fmap1, emap)
    assert np.allclose(np.asarray(out["fmap2_pseudo"]), np.asarray(pf2_ref),
                       rtol=2.5e-2, atol=2.5e-2)

    # corr kernel vs. the same bf16-quantized operands (tight, apples-to-apples).
    inv_sqrt_d = 1.0 / float(np.sqrt(C))
    f1_chk = (nchw_to_tokens(fmap1) * inv_sqrt_d).astype(jnp.bfloat16).astype(jnp.float32)
    f2_chk = out["fmap2_pseudo"][0].reshape(C, H * W).astype(jnp.bfloat16).astype(jnp.float32)
    corr_ref = jnp.dot(f1_chk, f2_chk, precision=jax.lax.Precision.HIGHEST)
    assert np.allclose(np.asarray(out["corr"]), np.asarray(corr_ref),
                       rtol=1e-3, atol=1e-3)

    # convex upsampling vs. exact softmax reference.
    fu_ref = upsample_flow_ref(out["flow_init"], up_mask)
    assert np.allclose(np.asarray(out["flow_final"]), np.asarray(fu_ref),
                       rtol=5e-3, atol=2e-2)

    # context split.
    ctx_ref = nchw_to_tokens(cnet)
    assert np.allclose(np.asarray(out["net"]), np.tanh(np.asarray(ctx_ref[:, :HDIM])),
                       atol=1e-5)
    assert np.allclose(np.asarray(out["inp"]),
                       np.maximum(np.asarray(ctx_ref[:, HDIM:]), 0.0), atol=1e-5)

    print("KERNEL_OK")
</pallas_src>

<mosaic_0001>
module attributes {stable_mosaic.version = 11 : i64} {
  func.func @_upsample_kernel(%arg0: i32, %arg1: memref<9x64x64xf32, #tpu.memory_space<vmem>>, %arg2: memref<2x9x64xf32, #tpu.memory_space<vmem>>, %arg3: memref<2x64x64xf32, #tpu.memory_space<vmem>>) attributes {dimension_semantics = [#tpu.dimension_semantics<parallel>], iteration_bounds = array<i64: 1>, scalar_prefetch = 0 : i64, scratch_operands = 0 : i64, tpu.core_type = #tpu.core_type<tc>, window_params = [{transform_indices = @transform_0, window_bounds = array<i64: 9, 64, 64>}, {transform_indices = @transform_1, window_bounds = array<i64: 2, 9, 64>}, {transform_indices = @transform_2, window_bounds = array<i64: 2, 64, 64>}]} {
    %c0 = arith.constant 0 : index
    %c0_0 = arith.constant 0 : index
    %c0_1 = arith.constant 0 : index
    %0 = vector.load %arg1[%c0, %c0_0, %c0_1] : memref<9x64x64xf32, #tpu.memory_space<vmem>>, vector<9x64x64xf32>
    %cst = arith.constant dense<0xFF800000> : vector<64x64xf32>
    %1 = vector.multi_reduction <maximumf>, %0, %cst [0] : vector<9x64x64xf32> to vector<64x64xf32>
    %2 = vector.shape_cast %1 : vector<64x64xf32> to vector<1x64x64xf32>
    %3 = vector.broadcast %2 : vector<1x64x64xf32> to vector<9x64x64xf32>
    %4 = arith.subf %0, %3 : vector<9x64x64xf32>
    %5 = math.exp %4 : vector<9x64x64xf32>
    %cst_2 = arith.constant dense<0.000000e+00> : vector<64x64xf32>
    %6 = vector.multi_reduction <add>, %5, %cst_2 [0] : vector<9x64x64xf32> to vector<64x64xf32>
    %7 = tpu.reciprocal %6 {approx = true} : vector<64x64xf32> -> vector<64x64xf32>
    %8 = arith.mulf %6, %7 : vector<64x64xf32>
    %cst_3 = arith.constant 2.000000e+00 : f32
    %9 = vector.broadcast %cst_3 : f32 to vector<64x64xf32>
    %10 = arith.subf %9, %8 : vector<64x64xf32>
    %11 = arith.mulf %7, %10 : vector<64x64xf32>
    %12 = arith.mulf %6, %11 : vector<64x64xf32>
    %cst_4 = arith.constant 2.000000e+00 : f32
    %13 = vector.broadcast %cst_4 : f32 to vector<64x64xf32>
    %14 = arith.subf %13, %12 : vector<64x64xf32>
    %15 = arith.mulf %11, %14 : vector<64x64xf32>
    %c0_5 = arith.constant 0 : index
    %c0_6 = arith.constant 0 : index
    %c0_7 = arith.constant 0 : index
    %16 = vector.load %arg2[%c0_5, %c0_6, %c0_7] : memref<2x9x64xf32, #tpu.memory_space<vmem>>, vector<2x9x64xf32>
    %cst_8 = arith.constant 0.000000e+00 : f32
    %17 = vector.broadcast %cst_8 : f32 to vector<64x64xf32>
    %18 = vector.extract_strided_slice %5 {offsets = [0, 0, 0], sizes = [1, 64, 64], strides = [1, 1, 1]} : vector<9x64x64xf32> to vector<1x64x64xf32>
    %19 = vector.shape_cast %18 : vector<1x64x64xf32> to vector<64x64xf32>
    %20 = vector.extract_strided_slice %16 {offsets = [0, 0, 0], sizes = [1, 1, 64], strides = [1, 1, 1]} : vector<2x9x64xf32> to vector<1x1x64xf32>
    %21 = vector.shape_cast %20 : vector<1x1x64xf32> to vector<1x64xf32>
    %22 = vector.broadcast %21 : vector<1x64xf32> to vector<64x64xf32>
    %23 = arith.mulf %19, %22 : vector<64x64xf32>
    %24 = arith.addf %17, %23 : vector<64x64xf32>
    %25 = vector.extract_strided_slice %5 {offsets = [1, 0, 0], sizes = [1, 64, 64], strides = [1, 1, 1]} : vector<9x64x64xf32> to vector<1x64x64xf32>
    %26 = vector.shape_cast %25 : vector<1x64x64xf32> to vector<64x64xf32>
    %27 = vector.extract_strided_slice %16 {offsets = [0, 1, 0], sizes = [1, 1, 64], strides = [1, 1, 1]} : vector<2x9x64xf32> to vector<1x1x64xf32>
    %28 = vector.shape_cast %27 : vector<1x1x64xf32> to vector<1x64xf32>
    %29 = vector.broadcast %28 : vector<1x64xf32> to vector<64x64xf32>
    %30 = arith.mulf %26, %29 : vector<64x64xf32>
    %31 = arith.addf %24, %30 : vector<64x64xf32>
    %32 = vector.extract_strided_slice %5 {offsets = [2, 0, 0], sizes = [1, 64, 64], strides = [1, 1, 1]} : vector<9x64x64xf32> to vector<1x64x64xf32>
    %33 = vector.shape_cast %32 : vector<1x64x64xf32> to vector<64x64xf32>
    %34 = vector.extract_strided_slice %16 {offsets = [0, 2, 0], sizes = [1, 1, 64], strides = [1, 1, 1]} : vector<2x9x64xf32> to vector<1x1x64xf32>
    %35 = vector.shape_cast %34 : vector<1x1x64xf32> to vector<1x64xf32>
    %36 = vector.broadcast %35 : vector<1x64xf32> to vector<64x64xf32>
    %37 = arith.mulf %33, %36 : vector<64x64xf32>
    %38 = arith.addf %31, %37 : vector<64x64xf32>
    %39 = vector.extract_strided_slice %5 {offsets = [3, 0, 0], sizes = [1, 64, 64], strides = [1, 1, 1]} : vector<9x64x64xf32> to vector<1x64x64xf32>
    %40 = vector.shape_cast %39 : vector<1x64x64xf32> to vector<64x64xf32>
    %41 = vector.extract_strided_slice %16 {offsets = [0, 3, 0], sizes = [1, 1, 64], strides = [1, 1, 1]} : vector<2x9x64xf32> to vector<1x1x64xf32>
    %42 = vector.shape_cast %41 : vector<1x1x64xf32> to vector<1x64xf32>
    %43 = vector.broadcast %42 : vector<1x64xf32> to vector<64x64xf32>
    %44 = arith.mulf %40, %43 : vector<64x64xf32>
    %45 = arith.addf %38, %44 : vector<64x64xf32>
    %46 = vector.extract_strided_slice %5 {offsets = [4, 0, 0], sizes = [1, 64, 64], strides = [1, 1, 1]} : vector<9x64x64xf32> to vector<1x64x64xf32>
    %47 = vector.shape_cast %46 : vector<1x64x64xf32> to vector<64x64xf32>
    %48 = vector.extract_strided_slice %16 {offsets = [0, 4, 0], sizes = [1, 1, 64], strides = [1, 1, 1]} : vector<2x9x64xf32> to vector<1x1x64xf32>
    %49 = vector.shape_cast %48 : vector<1x1x64xf32> to vector<1x64xf32>
    %50 = vector.broadcast %49 : vector<1x64xf32> to vector<64x64xf32>
    %51 = arith.mulf %47, %50 : vector<64x64xf32>
    %52 = arith.addf %45, %51 : vector<64x64xf32>
    %53 = vector.extract_strided_slice %5 {offsets = [5, 0, 0], sizes = [1, 64, 64], strides = [1, 1, 1]} : vector<9x64x64xf32> to vector<1x64x64xf32>
    %54 = vector.shape_cast %53 : vector<1x64x64xf32> to vector<64x64xf32>
    %55 = vector.extract_strided_slice %16 {offsets = [0, 5, 0], sizes = [1, 1, 64], strides = [1, 1, 1]} : vector<2x9x64xf32> to vector<1x1x64xf32>
    %56 = vector.shape_cast %55 : vector<1x1x64xf32> to vector<1x64xf32>
    %57 = vector.broadcast %56 : vector<1x64xf32> to vector<64x64xf32>
    %58 = arith.mulf %54, %57 : vector<64x64xf32>
    %59 = arith.addf %52, %58 : vector<64x64xf32>
    %60 = vector.extract_strided_slice %5 {offsets = [6, 0, 0], sizes = [1, 64, 64], strides = [1, 1, 1]} : vector<9x64x64xf32> to vector<1x64x64xf32>
    %61 = vector.shape_cast %60 : vector<1x64x64xf32> to vector<64x64xf32>
    %62 = vector.extract_strided_slice %16 {offsets = [0, 6, 0], sizes = [1, 1, 64], strides = [1, 1, 1]} : vector<2x9x64xf32> to vector<1x1x64xf32>
    %63 = vector.shape_cast %62 : vector<1x1x64xf32> to vector<1x64xf32>
    %64 = vector.broadcast %63 : vector<1x64xf32> to vector<64x64xf32>
    %65 = arith.mulf %61, %64 : vector<64x64xf32>
    %66 = arith.addf %59, %65 : vector<64x64xf32>
    %67 = vector.extract_strided_slice %5 {offsets = [7, 0, 0], sizes = [1, 64, 64], strides = [1, 1, 1]} : vector<9x64x64xf32> to vector<1x64x64xf32>
    %68 = vector.shape_cast %67 : vector<1x64x64xf32> to vector<64x64xf32>
    %69 = vector.extract_strided_slice %16 {offsets = [0, 7, 0], sizes = [1, 1, 64], strides = [1, 1, 1]} : vector<2x9x64xf32> to vector<1x1x64xf32>
    %70 = vector.shape_cast %69 : vector<1x1x64xf32> to vector<1x64xf32>
    %71 = vector.broadcast %70 : vector<1x64xf32> to vector<64x64xf32>
    %72 = arith.mulf %68, %71 : vector<64x64xf32>
    %73 = arith.addf %66, %72 : vector<64x64xf32>
    %74 = vector.extract_strided_slice %5 {offsets = [8, 0, 0], sizes = [1, 64, 64], strides = [1, 1, 1]} : vector<9x64x64xf32> to vector<1x64x64xf32>
    %75 = vector.shape_cast %74 : vector<1x64x64xf32> to vector<64x64xf32>
    %76 = vector.extract_strided_slice %16 {offsets = [0, 8, 0], sizes = [1, 1, 64], strides = [1, 1, 1]} : vector<2x9x64xf32> to vector<1x1x64xf32>
    %77 = vector.shape_cast %76 : vector<1x1x64xf32> to vector<1x64xf32>
    %78 = vector.broadcast %77 : vector<1x64xf32> to vector<64x64xf32>
    %79 = arith.mulf %75, %78 : vector<64x64xf32>
    %80 = arith.addf %73, %79 : vector<64x64xf32>
    %81 = arith.mulf %80, %15 : vector<64x64xf32>
    %c0_9 = arith.constant 0 : index
    %c0_10 = arith.constant 0 : index
    %c0_11 = arith.constant 0 : index
    %82 = vector.load %arg3[%c0_9, %c0_10, %c0_11] : memref<2x64x64xf32, #tpu.memory_space<vmem>>, vector<1x64x64xf32>
    %83 = vector.shape_cast %82 : vector<1x64x64xf32> to vector<64x64xf32>
    %84 = vector.shape_cast %81 : vector<64x64xf32> to vector<1x64x64xf32>
    tpu.vector_store %arg3[%c0_9, %c0_10, %c0_11], %84 {strides = array<i32>} : memref<2x64x64xf32, #tpu.memory_space<vmem>>, vector<1x64x64xf32>,
    %cst_12 = arith.constant 0.000000e+00 : f32
    %85 = vector.broadcast %cst_12 : f32 to vector<64x64xf32>
    %86 = vector.extract_strided_slice %5 {offsets = [0, 0, 0], sizes = [1, 64, 64], strides = [1, 1, 1]} : vector<9x64x64xf32> to vector<1x64x64xf32>
    %87 = vector.shape_cast %86 : vector<1x64x64xf32> to vector<64x64xf32>
    %88 = vector.extract_strided_slice %16 {offsets = [1, 0, 0], sizes = [1, 1, 64], strides = [1, 1, 1]} : vector<2x9x64xf32> to vector<1x1x64xf32>
    %89 = vector.shape_cast %88 : vector<1x1x64xf32> to vector<1x64xf32>
    %90 = vector.broadcast %89 : vector<1x64xf32> to vector<64x64xf32>
    %91 = arith.mulf %87, %90 : vector<64x64xf32>
    %92 = arith.addf %85, %91 : vector<64x64xf32>
    %93 = vector.extract_strided_slice %5 {offsets = [1, 0, 0], sizes = [1, 64, 64], strides = [1, 1, 1]} : vector<9x64x64xf32> to vector<1x64x64xf32>
    %94 = vector.shape_cast %93 : vector<1x64x64xf32> to vector<64x64xf32>
    %95 = vector.extract_strided_slice %16 {offsets = [1, 1, 0], sizes = [1, 1, 64], strides = [1, 1, 1]} : vector<2x9x64xf32> to vector<1x1x64xf32>
    %96 = vector.shape_cast %95 : vector<1x1x64xf32> to vector<1x64xf32>
    %97 = vector.broadcast %96 : vector<1x64xf32> to vector<64x64xf32>
    %98 = arith.mulf %94, %97 : vector<64x64xf32>
    %99 = arith.addf %92, %98 : vector<64x64xf32>
    %100 = vector.extract_strided_slice %5 {offsets = [2, 0, 0], sizes = [1, 64, 64], strides = [1, 1, 1]} : vector<9x64x64xf32> to vector<1x64x64xf32>
    %101 = vector.shape_cast %100 : vector<1x64x64xf32> to vector<64x64xf32>
    %102 = vector.extract_strided_slice %16 {offsets = [1, 2, 0], sizes = [1, 1, 64], strides = [1, 1, 1]} : vector<2x9x64xf32> to vector<1x1x64xf32>
    %103 = vector.shape_cast %102 : vector<1x1x64xf32> to vector<1x64xf32>
    %104 = vector.broadcast %103 : vector<1x64xf32> to vector<64x64xf32>
    %105 = arith.mulf %101, %104 : vector<64x64xf32>
    %106 = arith.addf %99, %105 : vector<64x64xf32>
    %107 = vector.extract_strided_slice %5 {offsets = [3, 0, 0], sizes = [1, 64, 64], strides = [1, 1, 1]} : vector<9x64x64xf32> to vector<1x64x64xf32>
    %108 = vector.shape_cast %107 : vector<1x64x64xf32> to vector<64x64xf32>
    %109 = vector.extract_strided_slice %16 {offsets = [1, 3, 0], sizes = [1, 1, 64], strides = [1, 1, 1]} : vector<2x9x64xf32> to vector<1x1x64xf32>
    %110 = vector.shape_cast %109 : vector<1x1x64xf32> to vector<1x64xf32>
    %111 = vector.broadcast %110 : vector<1x64xf32> to vector<64x64xf32>
    %112 = arith.mulf %108, %111 : vector<64x64xf32>
    %113 = arith.addf %106, %112 : vector<64x64xf32>
    %114 = vector.extract_strided_slice %5 {offsets = [4, 0, 0], sizes = [1, 64, 64], strides = [1, 1, 1]} : vector<9x64x64xf32> to vector<1x64x64xf32>
    %115 = vector.shape_cast %114 : vector<1x64x64xf32> to vector<64x64xf32>
    %116 = vector.extract_strided_slice %16 {offsets = [1, 4, 0], sizes = [1, 1, 64], strides = [1, 1, 1]} : vector<2x9x64xf32> to vector<1x1x64xf32>
    %117 = vector.shape_cast %116 : vector<1x1x64xf32> to vector<1x64xf32>
    %118 = vector.broadcast %117 : vector<1x64xf32> to vector<64x64xf32>
    %119 = arith.mulf %115, %118 : vector<64x64xf32>
    %120 = arith.addf %113, %119 : vector<64x64xf32>
    %121 = vector.extract_strided_slice %5 {offsets = [5, 0, 0], sizes = [1, 64, 64], strides = [1, 1, 1]} : vector<9x64x64xf32> to vector<1x64x64xf32>
    %122 = vector.shape_cast %121 : vector<1x64x64xf32> to vector<64x64xf32>
    %123 = vector.extract_strided_slice %16 {offsets = [1, 5, 0], sizes = [1, 1, 64], strides = [1, 1, 1]} : vector<2x9x64xf32> to vector<1x1x64xf32>
    %124 = vector.shape_cast %123 : vector<1x1x64xf32> to vector<1x64xf32>
    %125 = vector.broadcast %124 : vector<1x64xf32> to vector<64x64xf32>
    %126 = arith.mulf %122, %125 : vector<64x64xf32>
    %127 = arith.addf %120, %126 : vector<64x64xf32>
    %128 = vector.extract_strided_slice %5 {offsets = [6, 0, 0], sizes = [1, 64, 64], strides = [1, 1, 1]} : vector<9x64x64xf32> to vector<1x64x64xf32>
    %129 = vector.shape_cast %128 : vector<1x64x64xf32> to vector<64x64xf32>
    %130 = vector.extract_strided_slice %16 {offsets = [1, 6, 0], sizes = [1, 1, 64], strides = [1, 1, 1]} : vector<2x9x64xf32> to vector<1x1x64xf32>
    %131 = vector.shape_cast %130 : vector<1x1x64xf32> to vector<1x64xf32>
    %132 = vector.broadcast %131 : vector<1x64xf32> to vector<64x64xf32>
    %133 = arith.mulf %129, %132 : vector<64x64xf32>
    %134 = arith.addf %127, %133 : vector<64x64xf32>
    %135 = vector.extract_strided_slice %5 {offsets = [7, 0, 0], sizes = [1, 64, 64], strides = [1, 1, 1]} : vector<9x64x64xf32> to vector<1x64x64xf32>
    %136 = vector.shape_cast %135 : vector<1x64x64xf32> to vector<64x64xf32>
    %137 = vector.extract_strided_slice %16 {offsets = [1, 7, 0], sizes = [1, 1, 64], strides = [1, 1, 1]} : vector<2x9x64xf32> to vector<1x1x64xf32>
    %138 = vector.shape_cast %137 : vector<1x1x64xf32> to vector<1x64xf32>
    %139 = vector.broadcast %138 : vector<1x64xf32> to vector<64x64xf32>
    %140 = arith.mulf %136, %139 : vector<64x64xf32>
    %141 = arith.addf %134, %140 : vector<64x64xf32>
    %142 = vector.extract_strided_slice %5 {offsets = [8, 0, 0], sizes = [1, 64, 64], strides = [1, 1, 1]} : vector<9x64x64xf32> to vector<1x64x64xf32>
    %143 = vector.shape_cast %142 : vector<1x64x64xf32> to vector<64x64xf32>
    %144 = vector.extract_strided_slice %16 {offsets = [1, 8, 0], sizes = [1, 1, 64], strides = [1, 1, 1]} : vector<2x9x64xf32> to vector<1x1x64xf32>
    %145 = vector.shape_cast %144 : vector<1x1x64xf32> to vector<1x64xf32>
    %146 = vector.broadcast %145 : vector<1x64xf32> to vector<64x64xf32>
    %147 = arith.mulf %143, %146 : vector<64x64xf32>
    %148 = arith.addf %141, %147 : vector<64x64xf32>
    %149 = arith.mulf %148, %15 : vector<64x64xf32>
    %c1 = arith.constant 1 : index
    %c0_13 = arith.constant 0 : index
    %c0_14 = arith.constant 0 : index
    %150 = vector.load %arg3[%c1, %c0_13, %c0_14] : memref<2x64x64xf32, #tpu.memory_space<vmem>>, vector<1x64x64xf32>
    %151 = vector.shape_cast %150 : vector<1x64x64xf32> to vector<64x64xf32>
    %152 = vector.shape_cast %149 : vector<64x64xf32> to vector<1x64x64xf32>
    tpu.vector_store %arg3[%c1, %c0_13, %c0_14], %152 {strides = array<i32>} : memref<2x64x64xf32, #tpu.memory_space<vmem>>, vector<1x64x64xf32>,
    return
  }
  func.func @transform_0(%arg0: i32) -> (i32, i32, i32) {
    %c0_i32 = arith.constant 0 : i32
    %c0_i32_0 = arith.constant 0 : i32
    %c0_i32_1 = arith.constant 0 : i32
    return %c0_i32, %c0_i32_0, %arg0 : i32, i32, i32
  }
  func.func @transform_1(%arg0: i32) -> (i32, i32, i32) {
    %c0_i32 = arith.constant 0 : i32
    %c0_i32_0 = arith.constant 0 : i32
    %c0_i32_1 = arith.constant 0 : i32
    return %c0_i32, %c0_i32_0, %arg0 : i32, i32, i32
  }
  func.func @transform_2(%arg0: i32) -> (i32, i32, i32) {
    %c0_i32 = arith.constant 0 : i32
    %c0_i32_0 = arith.constant 0 : i32
    %c0_i32_1 = arith.constant 0 : i32
    return %c0_i32, %c0_i32_0, %arg0 : i32, i32, i32
  }
}

module attributes {stable_mosaic.version = 11 : i64} {
  func.func @_eifusion_kernel(%arg0: memref<64x256xf32, #tpu.memory_space<vmem>>, %arg1: memref<64x256xbf16, #tpu.memory_space<vmem>>, %arg2: memref<256x192xbf16, #tpu.memory_space<vmem>>, %arg3: memref<1x192xf32, #tpu.memory_space<vmem>>, %arg4: memref<256x192xbf16, #tpu.memory_space<vmem>>, %arg5: memref<1x192xf32, #tpu.memory_space<vmem>>, %arg6: memref<9x192x256xbf16, #tpu.memory_space<vmem>>, %arg7: memref<9x192x256xbf16, #tpu.memory_space<vmem>>, %arg8: memref<1x256xf32, #tpu.memory_space<vmem>>, %arg9: memref<64x3xf32, #tpu.memory_space<vmem>>, %arg10: memref<64x256xf32, #tpu.memory_space<vmem>>) attributes {dimension_semantics = [], scalar_prefetch = 0 : i64, scratch_operands = 0 : i64, tpu.core_type = #tpu.core_type<tc>} {
    %c0 = arith.constant 0 : index
    %c0_0 = arith.constant 0 : index
    %0 = vector.load %arg0[%c0, %c0_0] : memref<64x256xf32, #tpu.memory_space<vmem>>, vector<64x256xf32>
    %1 = arith.truncf %0 : vector<64x256xf32> to vector<64x256xbf16>
    %c0_1 = arith.constant 0 : index
    %c0_2 = arith.constant 0 : index
    %2 = vector.load %arg2[%c0_1, %c0_2] : memref<256x192xbf16, #tpu.memory_space<vmem>>, vector<256x192xbf16>
    %cst = arith.constant dense<0.000000e+00> : vector<64x192xf32>
    %3 = tpu.matmul %1, %2, %cst {dimension_numbers = #tpu.dot_dimension_numbers<[1], [0], [0], [1], [0, 0, 1, 1], [], []>} : vector<64x256xbf16>, vector<256x192xbf16>, vector<64x192xf32> -> vector<64x192xf32>
    %c0_3 = arith.constant 0 : index
    %c0_4 = arith.constant 0 : index
    %4 = vector.load %arg3[%c0_3, %c0_4] : memref<1x192xf32, #tpu.memory_space<vmem>>, vector<1x192xf32>
    %5 = vector.broadcast %4 : vector<1x192xf32> to vector<64x192xf32>
    %6 = arith.addf %3, %5 : vector<64x192xf32>
    %cst_5 = arith.constant 0.000000e+00 : f32
    %7 = vector.broadcast %cst_5 : f32 to vector<64x192xf32>
    %8 = arith.maximumf %6, %7 : vector<64x192xf32>
    %c0_6 = arith.constant 0 : index
    %c0_7 = arith.constant 0 : index
    %9 = vector.load %arg1[%c0_6, %c0_7] : memref<64x256xbf16, #tpu.memory_space<vmem>>, vector<64x256xbf16>
    %c0_8 = arith.constant 0 : index
    %c0_9 = arith.constant 0 : index
    %10 = vector.load %arg4[%c0_8, %c0_9] : memref<256x192xbf16, #tpu.memory_space<vmem>>, vector<256x192xbf16>
    %cst_10 = arith.constant dense<0.000000e+00> : vector<64x192xf32>
    %11 = tpu.matmul %9, %10, %cst_10 {dimension_numbers = #tpu.dot_dimension_numbers<[1], [0], [0], [1], [0, 0, 1, 1], [], []>} : vector<64x256xbf16>, vector<256x192xbf16>, vector<64x192xf32> -> vector<64x192xf32>
    %c0_11 = arith.constant 0 : index
    %c0_12 = arith.constant 0 : index
    %12 = vector.load %arg5[%c0_11, %c0_12] : memref<1x192xf32, #tpu.memory_space<vmem>>, vector<1x192xf32>
    %13 = vector.broadcast %12 : vector<1x192xf32> to vector<64x192xf32>
    %14 = arith.addf %11, %13 : vector<64x192xf32>
    %cst_13 = arith.constant 0.000000e+00 : f32
    %15 = vector.broadcast %cst_13 : f32 to vector<64x192xf32>
    %16 = arith.maximumf %14, %15 : vector<64x192xf32>
    %17 = arith.truncf %8 : vector<64x192xf32> to vector<64x192xbf16>
    %18 = arith.truncf %16 : vector<64x192xf32> to vector<64x192xbf16>
    %cst_14 = arith.constant 0.000000e+00 : f32
    %19 = vector.broadcast %cst_14 : f32 to vector<64x256xf32>
    %c0_15 = arith.constant 0 : index
    %c0_16 = arith.constant 0 : index
    %20 = vector.load %arg10[%c0_15, %c0_16] : memref<64x256xf32, #tpu.memory_space<vmem>>, vector<64x256xf32>
    tpu.vector_store %arg10[%c0_15, %c0_16], %19 {strides = array<i32>} : memref<64x256xf32, #tpu.memory_space<vmem>>, vector<64x256xf32>,
    %c0_17 = arith.constant 0 : index
    %c0_18 = arith.constant 0 : index
    %c0_19 = arith.constant 0 : index
    %21 = vector.load %arg6[%c0_17, %c0_18, %c0_19] : memref<9x192x256xbf16, #tpu.memory_space<vmem>>, vector<1x192x256xbf16>
    %22 = vector.shape_cast %21 : vector<1x192x256xbf16> to vector<192x256xbf16>
    %cst_20 = arith.constant dense<0.000000e+00> : vector<64x256xf32>
    %23 = tpu.matmul %17, %22, %cst_20 {dimension_numbers = #tpu.dot_dimension_numbers<[1], [0], [0], [1], [0, 0, 1, 1], [], []>} : vector<64x192xbf16>, vector<192x256xbf16>, vector<64x256xf32> -> vector<64x256xf32>
    %c0_21 = arith.constant 0 : index
    %c0_22 = arith.constant 0 : index
    %c0_23 = arith.constant 0 : index
    %24 = vector.load %arg7[%c0_21, %c0_22, %c0_23] : memref<9x192x256xbf16, #tpu.memory_space<vmem>>, vector<1x192x256xbf16>
    %25 = vector.shape_cast %24 : vector<1x192x256xbf16> to vector<192x256xbf16>
    %cst_24 = arith.constant dense<0.000000e+00> : vector<64x256xf32>
    %26 = tpu.matmul %18, %25, %cst_24 {dimension_numbers = #tpu.dot_dimension_numbers<[1], [0], [0], [1], [0, 0, 1, 1], [], []>} : vector<64x192xbf16>, vector<192x256xbf16>, vector<64x256xf32> -> vector<64x256xf32>
    %27 = arith.addf %23, %26 : vector<64x256xf32>
    %c9 = arith.constant 9 : index
    %c0_25 = arith.constant 0 : index
    %28 = vector.load %arg10[%c9, %c0_25] : memref<64x256xf32, #tpu.memory_space<vmem>>, vector<55x256xf32>
    %29 = vector.extract_strided_slice %27 {offsets = [0, 0], sizes = [55, 256], strides = [1, 1]} : vector<64x256xf32> to vector<55x256xf32>
    %c9_26 = arith.constant 9 : index
    %c0_27 = arith.constant 0 : index
    %30 = vector.load %arg9[%c9_26, %c0_27] : memref<64x3xf32, #tpu.memory_space<vmem>>, vector<55x1xf32>
    %31 = vector.broadcast %30 : vector<55x1xf32> to vector<55x256xf32>
    %32 = arith.mulf %29, %31 : vector<55x256xf32>
    %33 = arith.addf %28, %32 : vector<55x256xf32>
    %c9_28 = arith.constant 9 : index
    %c0_29 = arith.constant 0 : index
    %34 = vector.load %arg10[%c9_28, %c0_29] : memref<64x256xf32, #tpu.memory_space<vmem>>, vector<55x256xf32>
    tpu.vector_store %arg10[%c9_28, %c0_29], %33 {strides = array<i32>} : memref<64x256xf32, #tpu.memory_space<vmem>>, vector<55x256xf32>,
    %c1 = arith.constant 1 : index
    %c0_30 = arith.constant 0 : index
    %c0_31 = arith.constant 0 : index
    %35 = vector.load %arg6[%c1, %c0_30, %c0_31] : memref<9x192x256xbf16, #tpu.memory_space<vmem>>, vector<1x192x256xbf16>
    %36 = vector.shape_cast %35 : vector<1x192x256xbf16> to vector<192x256xbf16>
    %cst_32 = arith.constant dense<0.000000e+00> : vector<64x256xf32>
    %37 = tpu.matmul %17, %36, %cst_32 {dimension_numbers = #tpu.dot_dimension_numbers<[1], [0], [0], [1], [0, 0, 1, 1], [], []>} : vector<64x192xbf16>, vector<192x256xbf16>, vector<64x256xf32> -> vector<64x256xf32>
    %c1_33 = arith.constant 1 : index
    %c0_34 = arith.constant 0 : index
    %c0_35 = arith.constant 0 : index
    %38 = vector.load %arg7[%c1_33, %c0_34, %c0_35] : memref<9x192x256xbf16, #tpu.memory_space<vmem>>, vector<1x192x256xbf16>
    %39 = vector.shape_cast %38 : vector<1x192x256xbf16> to vector<192x256xbf16>
    %cst_36 = arith.constant dense<0.000000e+00> : vector<64x256xf32>
    %40 = tpu.matmul %18, %39, %cst_36 {dimension_numbers = #tpu.dot_dimension_numbers<[1], [0], [0], [1], [0, 0, 1, 1], [], []>} : vector<64x192xbf16>, vector<192x256xbf16>, vector<64x256xf32> -> vector<64x256xf32>
    %41 = arith.addf %37, %40 : vector<64x256xf32>
    %c8 = arith.constant 8 : index
    %c0_37 = arith.constant 0 : index
    %42 = vector.load %arg10[%c8, %c0_37] : memref<64x256xf32, #tpu.memory_space<vmem>>, vector<56x256xf32>
    %43 = vector.extract_strided_slice %41 {offsets = [0, 0], sizes = [56, 256], strides = [1, 1]} : vector<64x256xf32> to vector<56x256xf32>
    %c8_38 = arith.constant 8 : index
    %c1_39 = arith.constant 1 : index
    %44 = vector.load %arg9[%c8_38, %c1_39] : memref<64x3xf32, #tpu.memory_space<vmem>>, vector<56x1xf32>
    %45 = vector.broadcast %44 : vector<56x1xf32> to vector<56x256xf32>
    %46 = arith.mulf %43, %45 : vector<56x256xf32>
    %47 = arith.addf %42, %46 : vector<56x256xf32>
    %c8_40 = arith.constant 8 : index
    %c0_41 = arith.constant 0 : index
    %48 = vector.load %arg10[%c8_40, %c0_41] : memref<64x256xf32, #tpu.memory_space<vmem>>, vector<56x256xf32>
    tpu.vector_store %arg10[%c8_40, %c0_41], %47 {strides = array<i32>} : memref<64x256xf32, #tpu.memory_space<vmem>>, vector<56x256xf32>,
    %c2 = arith.constant 2 : index
    %c0_42 = arith.constant 0 : index
    %c0_43 = arith.constant 0 : index
    %49 = vector.load %arg6[%c2, %c0_42, %c0_43] : memref<9x192x256xbf16, #tpu.memory_space<vmem>>, vector<1x192x256xbf16>
    %50 = vector.shape_cast %49 : vector<1x192x256xbf16> to vector<192x256xbf16>
    %cst_44 = arith.constant dense<0.000000e+00> : vector<64x256xf32>
    %51 = tpu.matmul %17, %50, %cst_44 {dimension_numbers = #tpu.dot_dimension_numbers<[1], [0], [0], [1], [0, 0, 1, 1], [], []>} : vector<64x192xbf16>, vector<192x256xbf16>, vector<64x256xf32> -> vector<64x256xf32>
    %c2_45 = arith.constant 2 : index
    %c0_46 = arith.constant 0 : index
    %c0_47 = arith.constant 0 : index
    %52 = vector.load %arg7[%c2_45, %c0_46, %c0_47] : memref<9x192x256xbf16, #tpu.memory_space<vmem>>, vector<1x192x256xbf16>
    %53 = vector.shape_cast %52 : vector<1x192x256xbf16> to vector<192x256xbf16>
    %cst_48 = arith.constant dense<0.000000e+00> : vector<64x256xf32>
    %54 = tpu.matmul %18, %53, %cst_48 {dimension_numbers = #tpu.dot_dimension_numbers<[1], [0], [0], [1], [0, 0, 1, 1], [], []>} : vector<64x192xbf16>, vector<192x256xbf16>, vector<64x256xf32> -> vector<64x256xf32>
    %55 = arith.addf %51, %54 : vector<64x256xf32>
    %c8_49 = arith.constant 8 : index
    %c0_50 = arith.constant 0 : index
    %56 = vector.load %arg10[%c8_49, %c0_50] : memref<64x256xf32, #tpu.memory_space<vmem>>, vector<56x256xf32>
    %57 = vector.extract_strided_slice %55 {offsets = [1, 0], sizes = [56, 256], strides = [1, 1]} : vector<64x256xf32> to vector<56x256xf32>
    %c8_51 = arith.constant 8 : index
    %c2_52 = arith.constant 2 : index
    %58 = vector.load %arg9[%c8_51, %c2_52] : memref<64x3xf32, #tpu.memory_space<vmem>>, vector<56x1xf32>
    %59 = vector.broadcast %58 : vector<56x1xf32> to vector<56x256xf32>
    %60 = arith.mulf %57, %59 : vector<56x256xf32>
    %61 = arith.addf %56, %60 : vector<56x256xf32>
    %c8_53 = arith.constant 8 : index
    %c0_54 = arith.constant 0 : index
    %62 = vector.load %arg10[%c8_53, %c0_54] : memref<64x256xf32, #tpu.memory_space<vmem>>, vector<56x256xf32>
    tpu.vector_store %arg10[%c8_53, %c0_54], %61 {strides = array<i32>} : memref<64x256xf32, #tpu.memory_space<vmem>>, vector<56x256xf32>,
    %c3 = arith.constant 3 : index
    %c0_55 = arith.constant 0 : index
    %c0_56 = arith.constant 0 : index
    %63 = vector.load %arg6[%c3, %c0_55, %c0_56] : memref<9x192x256xbf16, #tpu.memory_space<vmem>>, vector<1x192x256xbf16>
    %64 = vector.shape_cast %63 : vector<1x192x256xbf16> to vector<192x256xbf16>
    %cst_57 = arith.constant dense<0.000000e+00> : vector<64x256xf32>
    %65 = tpu.matmul %17, %64, %cst_57 {dimension_numbers = #tpu.dot_dimension_numbers<[1], [0], [0], [1], [0, 0, 1, 1], [], []>} : vector<64x192xbf16>, vector<192x256xbf16>, vector<64x256xf32> -> vector<64x256xf32>
    %c3_58 = arith.constant 3 : index
    %c0_59 = arith.constant 0 : index
    %c0_60 = arith.constant 0 : index
    %66 = vector.load %arg7[%c3_58, %c0_59, %c0_60] : memref<9x192x256xbf16, #tpu.memory_space<vmem>>, vector<1x192x256xbf16>
    %67 = vector.shape_cast %66 : vector<1x192x256xbf16> to vector<192x256xbf16>
    %cst_61 = arith.constant dense<0.000000e+00> : vector<64x256xf32>
    %68 = tpu.matmul %18, %67, %cst_61 {dimension_numbers = #tpu.dot_dimension_numbers<[1], [0], [0], [1], [0, 0, 1, 1], [], []>} : vector<64x192xbf16>, vector<192x256xbf16>, vector<64x256xf32> -> vector<64x256xf32>
    %69 = arith.addf %65, %68 : vector<64x256xf32>
    %c1_62 = arith.constant 1 : index
    %c0_63 = arith.constant 0 : index
    %70 = vector.load %arg10[%c1_62, %c0_63] : memref<64x256xf32, #tpu.memory_space<vmem>>, vector<63x256xf32>
    %71 = vector.extract_strided_slice %69 {offsets = [0, 0], sizes = [63, 256], strides = [1, 1]} : vector<64x256xf32> to vector<63x256xf32>
    %c1_64 = arith.constant 1 : index
    %c0_65 = arith.constant 0 : index
    %72 = vector.load %arg9[%c1_64, %c0_65] : memref<64x3xf32, #tpu.memory_space<vmem>>, vector<63x1xf32>
    %73 = vector.broadcast %72 : vector<63x1xf32> to vector<63x256xf32>
    %74 = arith.mulf %71, %73 : vector<63x256xf32>
    %75 = arith.addf %70, %74 : vector<63x256xf32>
    %c1_66 = arith.constant 1 : index
    %c0_67 = arith.constant 0 : index
    %76 = vector.load %arg10[%c1_66, %c0_67] : memref<64x256xf32, #tpu.memory_space<vmem>>, vector<63x256xf32>
    tpu.vector_store %arg10[%c1_66, %c0_67], %75 {strides = array<i32>} : memref<64x256xf32, #tpu.memory_space<vmem>>, vector<63x256xf32>,
    %c4 = arith.constant 4 : index
    %c0_68 = arith.constant 0 : index
    %c0_69 = arith.constant 0 : index
    %77 = vector.load %arg6[%c4, %c0_68, %c0_69] : memref<9x192x256xbf16, #tpu.memory_space<vmem>>, vector<1x192x256xbf16>
    %78 = vector.shape_cast %77 : vector<1x192x256xbf16> to vector<192x256xbf16>
    %cst_70 = arith.constant dense<0.000000e+00> : vector<64x256xf32>
    %79 = tpu.matmul %17, %78, %cst_70 {dimension_numbers = #tpu.dot_dimension_numbers<[1], [0], [0], [1], [0, 0, 1, 1], [], []>} : vector<64x192xbf16>, vector<192x256xbf16>, vector<64x256xf32> -> vector<64x256xf32>
    %c4_71 = arith.constant 4 : index
    %c0_72 = arith.constant 0 : index
    %c0_73 = arith.constant 0 : index
    %80 = vector.load %arg7[%c4_71, %c0_72, %c0_73] : memref<9x192x256xbf16, #tpu.memory_space<vmem>>, vector<1x192x256xbf16>
    %81 = vector.shape_cast %80 : vector<1x192x256xbf16> to vector<192x256xbf16>
    %cst_74 = arith.constant dense<0.000000e+00> : vector<64x256xf32>
    %82 = tpu.matmul %18, %81, %cst_74 {dimension_numbers = #tpu.dot_dimension_numbers<[1], [0], [0], [1], [0, 0, 1, 1], [], []>} : vector<64x192xbf16>, vector<192x256xbf16>, vector<64x256xf32> -> vector<64x256xf32>
    %83 = arith.addf %79, %82 : vector<64x256xf32>
    %c0_75 = arith.constant 0 : index
    %c0_76 = arith.constant 0 : index
    %84 = vector.load %arg10[%c0_75, %c0_76] : memref<64x256xf32, #tpu.memory_space<vmem>>, vector<64x256xf32>
    %c0_77 = arith.constant 0 : index
    %c1_78 = arith.constant 1 : index
    %85 = vector.load %arg9[%c0_77, %c1_78] : memref<64x3xf32, #tpu.memory_space<vmem>>, vector<64x1xf32>
    %86 = vector.broadcast %85 : vector<64x1xf32> to vector<64x256xf32>
    %87 = arith.mulf %83, %86 : vector<64x256xf32>
    %88 = arith.addf %84, %87 : vector<64x256xf32>
    %c0_79 = arith.constant 0 : index
    %c0_80 = arith.constant 0 : index
    %89 = vector.load %arg10[%c0_79, %c0_80] : memref<64x256xf32, #tpu.memory_space<vmem>>, vector<64x256xf32>
    tpu.vector_store %arg10[%c0_79, %c0_80], %88 {strides = array<i32>} : memref<64x256xf32, #tpu.memory_space<vmem>>, vector<64x256xf32>,
    %c5 = arith.constant 5 : index
    %c0_81 = arith.constant 0 : index
    %c0_82 = arith.constant 0 : index
    %90 = vector.load %arg6[%c5, %c0_81, %c0_82] : memref<9x192x256xbf16, #tpu.memory_space<vmem>>, vector<1x192x256xbf16>
    %91 = vector.shape_cast %90 : vector<1x192x256xbf16> to vector<192x256xbf16>
    %cst_83 = arith.constant dense<0.000000e+00> : vector<64x256xf32>
    %92 = tpu.matmul %17, %91, %cst_83 {dimension_numbers = #tpu.dot_dimension_numbers<[1], [0], [0], [1], [0, 0, 1, 1], [], []>} : vector<64x192xbf16>, vector<192x256xbf16>, vector<64x256xf32> -> vector<64x256xf32>
    %c5_84 = arith.constant 5 : index
    %c0_85 = arith.constant 0 : index
    %c0_86 = arith.constant 0 : index
    %93 = vector.load %arg7[%c5_84, %c0_85, %c0_86] : memref<9x192x256xbf16, #tpu.memory_space<vmem>>, vector<1x192x256xbf16>
    %94 = vector.shape_cast %93 : vector<1x192x256xbf16> to vector<192x256xbf16>
    %cst_87 = arith.constant dense<0.000000e+00> : vector<64x256xf32>
    %95 = tpu.matmul %18, %94, %cst_87 {dimension_numbers = #tpu.dot_dimension_numbers<[1], [0], [0], [1], [0, 0, 1, 1], [], []>} : vector<64x192xbf16>, vector<192x256xbf16>, vector<64x256xf32> -> vector<64x256xf32>
    %96 = arith.addf %92, %95 : vector<64x256xf32>
    %c0_88 = arith.constant 0 : index
    %c0_89 = arith.constant 0 : index
    %97 = vector.load %arg10[%c0_88, %c0_89] : memref<64x256xf32, #tpu.memory_space<vmem>>, vector<63x256xf32>
    %98 = vector.extract_strided_slice %96 {offsets = [1, 0], sizes = [63, 256], strides = [1, 1]} : vector<64x256xf32> to vector<63x256xf32>
    %c0_90 = arith.constant 0 : index
    %c2_91 = arith.constant 2 : index
    %99 = vector.load %arg9[%c0_90, %c2_91] : memref<64x3xf32, #tpu.memory_space<vmem>>, vector<63x1xf32>
    %100 = vector.broadcast %99 : vector<63x1xf32> to vector<63x256xf32>
    %101 = arith.mulf %98, %100 : vector<63x256xf32>
    %102 = arith.addf %97, %101 : vector<63x256xf32>
    %c0_92 = arith.constant 0 : index
    %c0_93 = arith.constant 0 : index
    %103 = vector.load %arg10[%c0_92, %c0_93] : memref<64x256xf32, #tpu.memory_space<vmem>>, vector<63x256xf32>
    tpu.vector_store %arg10[%c0_92, %c0_93], %102 {strides = array<i32>} : memref<64x256xf32, #tpu.memory_space<vmem>>, vector<63x256xf32>,
    %c6 = arith.constant 6 : index
    %c0_94 = arith.constant 0 : index
    %c0_95 = arith.constant 0 : index
    %104 = vector.load %arg6[%c6, %c0_94, %c0_95] : memref<9x192x256xbf16, #tpu.memory_space<vmem>>, vector<1x192x256xbf16>
    %105 = vector.shape_cast %104 : vector<1x192x256xbf16> to vector<192x256xbf16>
    %cst_96 = arith.constant dense<0.000000e+00> : vector<64x256xf32>
    %106 = tpu.matmul %17, %105, %cst_96 {dimension_numbers = #tpu.dot_dimension_numbers<[1], [0], [0], [1], [0, 0, 1, 1], [], []>} : vector<64x192xbf16>, vector<192x256xbf16>, vector<64x256xf32> -> vector<64x256xf32>
    %c6_97 = arith.constant 6 : index
    %c0_98 = arith.constant 0 : index
    %c0_99 = arith.constant 0 : index
    %107 = vector.load %arg7[%c6_97, %c0_98, %c0_99] : memref<9x192x256xbf16, #tpu.memory_space<vmem>>, vector<1x192x256xbf16>
    %108 = vector.shape_cast %107 : vector<1x192x256xbf16> to vector<192x256xbf16>
    %cst_100 = arith.constant dense<0.000000e+00> : vector<64x256xf32>
    %109 = tpu.matmul %18, %108, %cst_100 {dimension_numbers = #tpu.dot_dimension_numbers<[1], [0], [0], [1], [0, 0, 1, 1], [], []>} : vector<64x192xbf16>, vector<192x256xbf16>, vector<64x256xf32> -> vector<64x256xf32>
    %110 = arith.addf %106, %109 : vector<64x256xf32>
    %c0_101 = arith.constant 0 : index
    %c0_102 = arith.constant 0 : index
    %111 = vector.load %arg10[%c0_101, %c0_102] : memref<64x256xf32, #tpu.memory_space<vmem>>, vector<56x256xf32>
    %112 = vector.extract_strided_slice %110 {offsets = [7, 0], sizes = [56, 256], strides = [1, 1]} : vector<64x256xf32> to vector<56x256xf32>
    %c0_103 = arith.constant 0 : index
    %c0_104 = arith.constant 0 : index
    %113 = vector.load %arg9[%c0_103, %c0_104] : memref<64x3xf32, #tpu.memory_space<vmem>>, vector<56x1xf32>
    %114 = vector.broadcast %113 : vector<56x1xf32> to vector<56x256xf32>
    %115 = arith.mulf %112, %114 : vector<56x256xf32>
    %116 = arith.addf %111, %115 : vector<56x256xf32>
    %c0_105 = arith.constant 0 : index
    %c0_106 = arith.constant 0 : index
    %117 = vector.load %arg10[%c0_105, %c0_106] : memref<64x256xf32, #tpu.memory_space<vmem>>, vector<56x256xf32>
    tpu.vector_store %arg10[%c0_105, %c0_106], %116 {strides = array<i32>} : memref<64x256xf32, #tpu.memory_space<vmem>>, vector<56x256xf32>,
    %c7 = arith.constant 7 : index
    %c0_107 = arith.constant 0 : index
    %c0_108 = arith.constant 0 : index
    %118 = vector.load %arg6[%c7, %c0_107, %c0_108] : memref<9x192x256xbf16, #tpu.memory_space<vmem>>, vector<1x192x256xbf16>
    %119 = vector.shape_cast %118 : vector<1x192x256xbf16> to vector<192x256xbf16>
    %cst_109 = arith.constant dense<0.000000e+00> : vector<64x256xf32>
    %120 = tpu.matmul %17, %119, %cst_109 {dimension_numbers = #tpu.dot_dimension_numbers<[1], [0], [0], [1], [0, 0, 1, 1], [], []>} : vector<64x192xbf16>, vector<192x256xbf16>, vector<64x256xf32> -> vector<64x256xf32>
    %c7_110 = arith.constant 7 : index
    %c0_111 = arith.constant 0 : index
    %c0_112 = arith.constant 0 : index
    %121 = vector.load %arg7[%c7_110, %c0_111, %c0_112] : memref<9x192x256xbf16, #tpu.memory_space<vmem>>, vector<1x192x256xbf16>
    %122 = vector.shape_cast %121 : vector<1x192x256xbf16> to vector<192x256xbf16>
    %cst_113 = arith.constant dense<0.000000e+00> : vector<64x256xf32>
    %123 = tpu.matmul %18, %122, %cst_113 {dimension_numbers = #tpu.dot_dimension_numbers<[1], [0], [0], [1], [0, 0, 1, 1], [], []>} : vector<64x192xbf16>, vector<192x256xbf16>, vector<64x256xf32> -> vector<64x256xf32>
    %124 = arith.addf %120, %123 : vector<64x256xf32>
    %c0_114 = arith.constant 0 : index
    %c0_115 = arith.constant 0 : index
    %125 = vector.load %arg10[%c0_114, %c0_115] : memref<64x256xf32, #tpu.memory_space<vmem>>, vector<56x256xf32>
    %126 = vector.extract_strided_slice %124 {offsets = [8, 0], sizes = [56, 256], strides = [1, 1]} : vector<64x256xf32> to vector<56x256xf32>
    %c0_116 = arith.constant 0 : index
    %c1_117 = arith.constant 1 : index
    %127 = vector.load %arg9[%c0_116, %c1_117] : memref<64x3xf32, #tpu.memory_space<vmem>>, vector<56x1xf32>
    %128 = vector.broadcast %127 : vector<56x1xf32> to vector<56x256xf32>
    %129 = arith.mulf %126, %128 : vector<56x256xf32>
    %130 = arith.addf %125, %129 : vector<56x256xf32>
    %c0_118 = arith.constant 0 : index
    %c0_119 = arith.constant 0 : index
    %131 = vector.load %arg10[%c0_118, %c0_119] : memref<64x256xf32, #tpu.memory_space<vmem>>, vector<56x256xf32>
    tpu.vector_store %arg10[%c0_118, %c0_119], %130 {strides = array<i32>} : memref<64x256xf32, #tpu.memory_space<vmem>>, vector<56x256xf32>,
    %c8_120 = arith.constant 8 : index
    %c0_121 = arith.constant 0 : index
    %c0_122 = arith.constant 0 : index
    %132 = vector.load %arg6[%c8_120, %c0_121, %c0_122] : memref<9x192x256xbf16, #tpu.memory_space<vmem>>, vector<1x192x256xbf16>
    %133 = vector.shape_cast %132 : vector<1x192x256xbf16> to vector<192x256xbf16>
    %cst_123 = arith.constant dense<0.000000e+00> : vector<64x256xf32>
    %134 = tpu.matmul %17, %133, %cst_123 {dimension_numbers = #tpu.dot_dimension_numbers<[1], [0], [0], [1], [0, 0, 1, 1], [], []>} : vector<64x192xbf16>, vector<192x256xbf16>, vector<64x256xf32> -> vector<64x256xf32>
    %c8_124 = arith.constant 8 : index
    %c0_125 = arith.constant 0 : index
    %c0_126 = arith.constant 0 : index
    %135 = vector.load %arg7[%c8_124, %c0_125, %c0_126] : memref<9x192x256xbf16, #tpu.memory_space<vmem>>, vector<1x192x256xbf16>
    %136 = vector.shape_cast %135 : vector<1x192x256xbf16> to vector<192x256xbf16>
    %cst_127 = arith.constant dense<0.000000e+00> : vector<64x256xf32>
    %137 = tpu.matmul %18, %136, %cst_127 {dimension_numbers = #tpu.dot_dimension_numbers<[1], [0], [0], [1], [0, 0, 1, 1], [], []>} : vector<64x192xbf16>, vector<192x256xbf16>, vector<64x256xf32> -> vector<64x256xf32>
    %138 = arith.addf %134, %137 : vector<64x256xf32>
    %c0_128 = arith.constant 0 : index
    %c0_129 = arith.constant 0 : index
    %139 = vector.load %arg10[%c0_128, %c0_129] : memref<64x256xf32, #tpu.memory_space<vmem>>, vector<55x256xf32>
    %140 = vector.extract_strided_slice %138 {offsets = [9, 0], sizes = [55, 256], strides = [1, 1]} : vector<64x256xf32> to vector<55x256xf32>
    %c0_130 = arith.constant 0 : index
    %c2_131 = arith.constant 2 : index
    %141 = vector.load %arg9[%c0_130, %c2_131] : memref<64x3xf32, #tpu.memory_space<vmem>>, vector<55x1xf32>
    %142 = vector.broadcast %141 : vector<55x1xf32> to vector<55x256xf32>
    %143 = arith.mulf %140, %142 : vector<55x256xf32>
    %144 = arith.addf %139, %143 : vector<55x256xf32>
    %c0_132 = arith.constant 0 : index
    %c0_133 = arith.constant 0 : index
    %145 = vector.load %arg10[%c0_132, %c0_133] : memref<64x256xf32, #tpu.memory_space<vmem>>, vector<55x256xf32>
    tpu.vector_store %arg10[%c0_132, %c0_133], %144 {strides = array<i32>} : memref<64x256xf32, #tpu.memory_space<vmem>>, vector<55x256xf32>,
    %c0_134 = arith.constant 0 : index
    %c0_135 = arith.constant 0 : index
    %146 = vector.load %arg10[%c0_134, %c0_135] : memref<64x256xf32, #tpu.memory_space<vmem>>, vector<64x256xf32>
    %c0_136 = arith.constant 0 : index
    %c0_137 = arith.constant 0 : index
    %147 = vector.load %arg8[%c0_136, %c0_137] : memref<1x256xf32, #tpu.memory_space<vmem>>, vector<1x256xf32>
    %148 = vector.broadcast %147 : vector<1x256xf32> to vector<64x256xf32>
    %149 = arith.addf %146, %148 : vector<64x256xf32>
    %cst_138 = arith.constant 0.000000e+00 : f32
    %150 = vector.broadcast %cst_138 : f32 to vector<64x256xf32>
    %151 = arith.maximumf %149, %150 : vector<64x256xf32>
    %152 = arith.addf %151, %0 : vector<64x256xf32>
    %c0_139 = arith.constant 0 : index
    %c0_140 = arith.constant 0 : index
    %153 = vector.load %arg10[%c0_139, %c0_140] : memref<64x256xf32, #tpu.memory_space<vmem>>, vector<64x256xf32>
    tpu.vector_store %arg10[%c0_139, %c0_140], %152 {strides = array<i32>} : memref<64x256xf32, #tpu.memory_space<vmem>>, vector<64x256xf32>,
    return
  }
}

module attributes {stable_mosaic.version = 11 : i64} {
  func.func @_context_kernel(%arg0: i32, %arg1: memref<64x256xf32, #tpu.memory_space<vmem>>, %arg2: memref<64x128xf32, #tpu.memory_space<vmem>>, %arg3: memref<64x128xf32, #tpu.memory_space<vmem>>) attributes {dimension_semantics = [#tpu.dimension_semantics<parallel>], iteration_bounds = array<i64: 1>, scalar_prefetch = 0 : i64, scratch_operands = 0 : i64, tpu.core_type = #tpu.core_type<tc>, window_params = [{transform_indices = @transform_0, window_bounds = array<i64: 64, 256>}, {transform_indices = @transform_1, window_bounds = array<i64: 64, 128>}, {transform_indices = @transform_2, window_bounds = array<i64: 64, 128>}]} {
    %c0 = arith.constant 0 : index
    %c0_0 = arith.constant 0 : index
    %0 = vector.load %arg1[%c0, %c0_0] : memref<64x256xf32, #tpu.memory_space<vmem>>, vector<64x256xf32>
    %1 = vector.extract_strided_slice %0 {offsets = [0, 0], sizes = [64, 128], strides = [1, 1]} : vector<64x256xf32> to vector<64x128xf32>
    %2 = math.tanh %1 : vector<64x128xf32>
    %c0_1 = arith.constant 0 : index
    %c0_2 = arith.constant 0 : index
    %3 = vector.load %arg2[%c0_1, %c0_2] : memref<64x128xf32, #tpu.memory_space<vmem>>, vector<64x128xf32>
    tpu.vector_store %arg2[%c0_1, %c0_2], %2 {strides = array<i32>} : memref<64x128xf32, #tpu.memory_space<vmem>>, vector<64x128xf32>,
    %4 = vector.extract_strided_slice %0 {offsets = [0, 128], sizes = [64, 128], strides = [1, 1]} : vector<64x256xf32> to vector<64x128xf32>
    %cst = arith.constant 0.000000e+00 : f32
    %5 = vector.broadcast %cst : f32 to vector<64x128xf32>
    %6 = arith.maximumf %4, %5 : vector<64x128xf32>
    %c0_3 = arith.constant 0 : index
    %c0_4 = arith.constant 0 : index
    %7 = vector.load %arg3[%c0_3, %c0_4] : memref<64x128xf32, #tpu.memory_space<vmem>>, vector<64x128xf32>
    tpu.vector_store %arg3[%c0_3, %c0_4], %6 {strides = array<i32>} : memref<64x128xf32, #tpu.memory_space<vmem>>, vector<64x128xf32>,
    return
  }
  func.func @transform_0(%arg0: i32) -> (i32, i32) {
    %c0_i32 = arith.constant 0 : i32
    %c0_i32_0 = arith.constant 0 : i32
    return %arg0, %c0_i32 : i32, i32
  }
  func.func @transform_1(%arg0: i32) -> (i32, i32) {
    %c0_i32 = arith.constant 0 : i32
    %c0_i32_0 = arith.constant 0 : i32
    return %arg0, %c0_i32 : i32, i32
  }
  func.func @transform_2(%arg0: i32) -> (i32, i32) {
    %c0_i32 = arith.constant 0 : i32
    %c0_i32_0 = arith.constant 0 : i32
    return %arg0, %c0_i32 : i32, i32
  }
}

module attributes {stable_mosaic.version = 11 : i64} {
  func.func @_corr_kernel(%arg0: i32, %arg1: i32, %arg2: memref<64x256xbf16, #tpu.memory_space<vmem>>, %arg3: memref<256x64xbf16, #tpu.memory_space<vmem>>, %arg4: memref<64x64xf32, #tpu.memory_space<vmem>>) attributes {dimension_semantics = [#tpu.dimension_semantics<parallel>, #tpu.dimension_semantics<parallel>], iteration_bounds = array<i64: 1, 1>, scalar_prefetch = 0 : i64, scratch_operands = 0 : i64, tpu.core_type = #tpu.core_type<tc>, window_params = [{transform_indices = @transform_0, window_bounds = array<i64: 64, 256>}, {transform_indices = @transform_1, window_bounds = array<i64: 256, 64>}, {transform_indices = @transform_2, window_bounds = array<i64: 64, 64>}]} {
    %c0 = arith.constant 0 : index
    %c0_0 = arith.constant 0 : index
    %0 = vector.load %arg2[%c0, %c0_0] : memref<64x256xbf16, #tpu.memory_space<vmem>>, vector<64x256xbf16>
    %c0_1 = arith.constant 0 : index
    %c0_2 = arith.constant 0 : index
    %1 = vector.load %arg3[%c0_1, %c0_2] : memref<256x64xbf16, #tpu.memory_space<vmem>>, vector<256x64xbf16>
    %cst = arith.constant dense<0.000000e+00> : vector<64x64xf32>
    %2 = tpu.matmul %0, %1, %cst {dimension_numbers = #tpu.dot_dimension_numbers<[1], [0], [0], [1], [0, 0, 1, 1], [], []>} : vector<64x256xbf16>, vector<256x64xbf16>, vector<64x64xf32> -> vector<64x64xf32>
    %c0_3 = arith.constant 0 : index
    %c0_4 = arith.constant 0 : index
    %3 = vector.load %arg4[%c0_3, %c0_4] : memref<64x64xf32, #tpu.memory_space<vmem>>, vector<64x64xf32>
    tpu.vector_store %arg4[%c0_3, %c0_4], %2 {strides = array<i32>} : memref<64x64xf32, #tpu.memory_space<vmem>>, vector<64x64xf32>,
    return
  }
  func.func @transform_0(%arg0: i32, %arg1: i32) -> (i32, i32) {
    %c0_i32 = arith.constant 0 : i32
    %c0_i32_0 = arith.constant 0 : i32
    return %arg0, %c0_i32 : i32, i32
  }
  func.func @transform_1(%arg0: i32, %arg1: i32) -> (i32, i32) {
    %c0_i32 = arith.constant 0 : i32
    %c0_i32_0 = arith.constant 0 : i32
    return %c0_i32, %arg1 : i32, i32
  }
  func.func @transform_2(%arg0: i32, %arg1: i32) -> (i32, i32) {
    %c0_i32 = arith.constant 0 : i32
    return %arg0, %arg1 : i32, i32
  }
}

</mosaic_0001>

<bundles_post_ra>
// kernel: squeeze.11
= control target key start
LH: loop header
LB: loop body
LE: loop exit
PB: predicated region body
PF: predicated region fallthrough
CT: control target
= control target key end

     0   :  { %2 = vsyncpa [#allocation1], 0  ;;  %s1107_s6 = smov [#allocation0]   ;;  %s2106_s0 = inlined_call_operand.hbm [shape: f32[1,576,8,8], index: 0, kind: input, shape index: {}]   ;;  %s2107_s1 = inlined_call_operand.vmem [shape: f32[9,64,64], index: 1, kind: output, shape index: {}]  }
   0x1   :  { %s7_s7 = sshll.u32 %s1107_s6, 4  ;;  %s8_s7 = int_to_ptr.vmem [resolvable:$true] %s7_s7 }
   0x2   :  { %s1093_s8 = scalar_lea.vmem %s8_s7, 5120  ;;  %p1098_p1 = scmp.lt.s32.totalorder %s8_s7, %s8_s7 }
   0x3   :  { %p1094_p0 = scmp.ne.s32.totalorder %s8_s7, %s1093_s8  ;;  %p1099_p2 = scmp.lt.s32.totalorder %s1093_s8, %s1093_s8 }
   0x5   :  { %p1100_p3 = por %p1099_p2, %p1098_p1 }
   0x7   :  { %p1101_p4 = pnand %p1100_p3, %p1094_p0 }
   0x9   :  { %1104 = shalt.err (!%p1101_p4)
}
   0xa   :  { %10 = dma.hbm_to_vmem [thread:$0]  %s2106_s0, 5120, %s8_s7, [#allocation1]  }
   0xb   :  { %1105 = dma.done.wait [#allocation1], 5120  }
   0xc   :  { %1106 = vsyncadd [#allocation1], 4294962176  ;;  %vm450_vm0 = vcmask 1047556   ;;  %v473_v0 = vld [vmem:[#allocation0 + $0x4] ss:$8 sm:$0xf]  }
   0xd   :  { %v475_v1 = vld [vmem:[#allocation0 - $0x1b] ss:$8 sm:$0xf0]   ;;  %v447_v3 = vld [vmem:[#allocation0] ss:$8 sm:$0xf]  }
   0xe   :  { %v477_v2 = vsel %vm450_vm0, %v475_v1, %v473_v0  ;;  %v449_v4 = vld [vmem:[#allocation0 - $0x1f] ss:$8 sm:$0xf0]   ;;  %s1108_s0 = smov 64   ;;  %vm13_vm1 = vcmask 523264  }
   0xf   :  { %478 = vrot.lane.b32.xlu1 %v477_v2, %s1108_s0  ;;  %v451_v5 = vsel %vm450_vm0, %v449_v4, %v447_v3  ;;  %v486_v6 = vld [vmem:[#allocation0 + $0x6] ss:$8 sm:$0xf]   ;;  %v488_v7 = vld [vmem:[#allocation0 - $0x19] ss:$8 sm:$0xf0]  }
  0x10   :  { %452 = vrot.lane.b32.xlu0 %v451_v5, %s1108_s0  ;;  %v490_v8 = vsel %vm450_vm0, %v488_v7, %v486_v6  ;;  %v460_v9 = vld [vmem:[#allocation0 + $0x2] ss:$8 sm:$0xf]   ;;  %v462_v10 = vld [vmem:[#allocation0 - $0x1d] ss:$8 sm:$0xf0]  }
  0x11   :  { %v464_v11 = vsel %vm450_vm0, %v462_v10, %v460_v9  ;;  %v512_v12 = vld [vmem:[#allocation0 + $0x2a] ss:$8 sm:$0xf]   ;;  %v514_v13 = vld [vmem:[#allocation0 + $0xb] ss:$8 sm:$0xf0]  }
  0x12   :  { %v499_v14 = vld [vmem:[#allocation0 + $0x28] ss:$8 sm:$0xf]   ;;  %v501_v15 = vld [vmem:[#allocation0 + $0x9] ss:$8 sm:$0xf0]   ;;  %v516_v16 = vsel %vm450_vm0, %v514_v13, %v512_v12 }
  0x13   :  { %491 = vrot.lane.b32.xlu1 %v490_v8, %s1108_s0  ;;  %v503_v17 = vsel %vm450_vm0, %v501_v15, %v499_v14  ;;  %v538_v18 = vld [vmem:[#allocation0 + $0x2e] ss:$8 sm:$0xf]   ;;  %v540_v19 = vld [vmem:[#allocation0 + $0xf] ss:$8 sm:$0xf0]  }
  0x14   :  { %465 = vrot.lane.b32.xlu0 %v464_v11, %s1108_s0  ;;  %v525_v20 = vld [vmem:[#allocation0 + $0x2c] ss:$8 sm:$0xf]   ;;  %v527_v21 = vld [vmem:[#allocation0 + $0xd] ss:$8 sm:$0xf0]   ;;  %v542_v22 = vsel %vm450_vm0, %v540_v19, %v538_v18 }
  0x15   :  { %v529_v23 = vsel %vm450_vm0, %v527_v21, %v525_v20  ;;  %v564_v24 = vld [vmem:[#allocation0 + $0x52] ss:$8 sm:$0xf]   ;;  %v566_v25 = vld [vmem:[#allocation0 + $0x33] ss:$8 sm:$0xf0]  }
  0x16   :  { %v551_v26 = vld [vmem:[#allocation0 + $0x50] ss:$8 sm:$0xf]   ;;  %v553_v27 = vld [vmem:[#allocation0 + $0x31] ss:$8 sm:$0xf0]   ;;  %v568_v28 = vsel %vm450_vm0, %v566_v25, %v564_v24 }
  0x17   :  { %517 = vrot.lane.b32.xlu1 %v516_v16, %s1108_s0  ;;  %v555_v29 = vsel %vm450_vm0, %v553_v27, %v551_v26  ;;  %v590_v30 = vld [vmem:[#allocation0 + $0x56] ss:$8 sm:$0xf]   ;;  %v592_v31 = vld [vmem:[#allocation0 + $0x37] ss:$8 sm:$0xf0]  }
  0x18   :  { %504 = vrot.lane.b32.xlu0 %v503_v17, %s1108_s0  ;;  %v577_v32 = vld [vmem:[#allocation0 + $0x54] ss:$8 sm:$0xf]   ;;  %v579_v33 = vld [vmem:[#allocation0 + $0x35] ss:$8 sm:$0xf0]   ;;  %v594_v34 = vsel %vm450_vm0, %v592_v31, %v590_v30 }
  0x19   :  { %v581_v35 = vsel %vm450_vm0, %v579_v33, %v577_v32  ;;  %v616_v36 = vld [vmem:[#allocation0 + $0x7a] ss:$8 sm:$0xf]   ;;  %v618_v37 = vld [vmem:[#allocation0 + $0x5b] ss:$8 sm:$0xf0]  }
  0x1a   :  { %v603_v38 = vld [vmem:[#allocation0 + $0x78] ss:$8 sm:$0xf]   ;;  %v605_v39 = vld [vmem:[#allocation0 + $0x59] ss:$8 sm:$0xf0]   ;;  %v620_v40 = vsel %vm450_vm0, %v618_v37, %v616_v36 }
  0x1b   :  { %543 = vrot.lane.b32.xlu1 %v542_v22, %s1108_s0  ;;  %v607_v41 = vsel %vm450_vm0, %v605_v39, %v603_v38  ;;  %v642_v42 = vld [vmem:[#allocation0 + $0x7e] ss:$8 sm:$0xf]   ;;  %v644_v43 = vld [vmem:[#allocation0 + $0x5f] ss:$8 sm:$0xf0]  }
  0x1c   :  { %530 = vrot.lane.b32.xlu0 %v529_v23, %s1108_s0  ;;  %v629_v44 = vld [vmem:[#allocation0 + $0x7c] ss:$8 sm:$0xf]   ;;  %v631_v45 = vld [vmem:[#allocation0 + $0x5d] ss:$8 sm:$0xf0]   ;;  %v646_v46 = vsel %vm450_vm0, %v644_v43, %v642_v42 }
  0x1d   :  { %v633_v47 = vsel %vm450_vm0, %v631_v45, %v629_v44  ;;  %v668_v48 = vld [vmem:[#allocation0 + $0xa2] ss:$8 sm:$0xf]   ;;  %v670_v49 = vld [vmem:[#allocation0 + $0x83] ss:$8 sm:$0xf0]  }
  0x1e   :  { %v655_v50 = vld [vmem:[#allocation0 + $0xa0] ss:$8 sm:$0xf]   ;;  %v657_v51 = vld [vmem:[#allocation0 + $0x81] ss:$8 sm:$0xf0]   ;;  %v672_v52 = vsel %vm450_vm0, %v670_v49, %v668_v48 }
  0x1f   :  { %569 = vrot.lane.b32.xlu1 %v568_v28, %s1108_s0  ;;  %v659_v53 = vsel %vm450_vm0, %v657_v51, %v655_v50  ;;  %v694_v54 = vld [vmem:[#allocation0 + $0xa6] ss:$8 sm:$0xf]   ;;  %v696_v55 = vld [vmem:[#allocation0 + $0x87] ss:$8 sm:$0xf0]  }
  0x20   :  { %556 = vrot.lane.b32.xlu0 %v555_v29, %s1108_s0  ;;  %v681_v56 = vld [vmem:[#allocation0 + $0xa4] ss:$8 sm:$0xf]   ;;  %v683_v57 = vld [vmem:[#allocation0 + $0x85] ss:$8 sm:$0xf0]   ;;  %v698_v58 = vsel %vm450_vm0, %v696_v55, %v694_v54 }
  0x21   :  { %v685_v59 = vsel %vm450_vm0, %v683_v57, %v681_v56  ;;  %v720_v60 = vld [vmem:[#allocation0 + $0xca] ss:$8 sm:$0xf]   ;;  %v722_v61 = vld [vmem:[#allocation0 + $0xab] ss:$8 sm:$0xf0]  }
  0x22   :  { %v707_v62 = vld [vmem:[#allocation0 + $0xc8] ss:$8 sm:$0xf]   ;;  %v709_v63 = vld [vmem:[#allocation0 + $0xa9] ss:$8 sm:$0xf0]   ;;  %v724_v0 = vsel %vm450_vm0, %v722_v61, %v720_v60 }
  0x23   :  { %595 = vrot.lane.b32.xlu1 %v594_v34, %s1108_s0  ;;  %v711_v1 = vsel %vm450_vm0, %v709_v63, %v707_v62  ;;  %v746_v2 = vld [vmem:[#allocation0 + $0xce] ss:$8 sm:$0xf]   ;;  %v748_v3 = vld [vmem:[#allocation0 + $0xaf] ss:$8 sm:$0xf0]  }
  0x24   :  { %582 = vrot.lane.b32.xlu0 %v581_v35, %s1108_s0  ;;  %v733_v4 = vld [vmem:[#allocation0 + $0xcc] ss:$8 sm:$0xf]   ;;  %v735_v5 = vld [vmem:[#allocation0 + $0xad] ss:$8 sm:$0xf0]   ;;  %v750_v6 = vsel %vm450_vm0, %v748_v3, %v746_v2 }
  0x25   :  { %v737_v7 = vsel %vm450_vm0, %v735_v5, %v733_v4  ;;  %v772_v8 = vld [vmem:[#allocation0 + $0xf2] ss:$8 sm:$0xf]   ;;  %v774_v9 = vld [vmem:[#allocation0 + $0xd3] ss:$8 sm:$0xf0]  }
  0x26   :  { %v759_v10 = vld [vmem:[#allocation0 + $0xf0] ss:$8 sm:$0xf]   ;;  %v761_v11 = vld [vmem:[#allocation0 + $0xd1] ss:$8 sm:$0xf0]   ;;  %v776_v12 = vsel %vm450_vm0, %v774_v9, %v772_v8 }
  0x27   :  { %621 = vrot.lane.b32.xlu1 %v620_v40, %s1108_s0  ;;  %v798_v13 = vld [vmem:[#allocation0 + $0xf6] ss:$8 sm:$0xf]   ;;  %v800_v14 = vld [vmem:[#allocation0 + $0xd7] ss:$8 sm:$0xf0]   ;;  %v763_v15 = vsel %vm450_vm0, %v761_v11, %v759_v10 }
  0x28   :  { %608 = vrot.lane.b32.xlu0 %v607_v41, %s1108_s0  ;;  %v785_v16 = vld [vmem:[#allocation0 + $0xf4] ss:$8 sm:$0xf]   ;;  %v787_v17 = vld [vmem:[#allocation0 + $0xd5] ss:$8 sm:$0xf0]   ;;  %v802_v26 = vsel %vm450_vm0, %v800_v14, %v798_v13 }
  0x29   :  { %v12_v18 = vld [vmem:[#allocation0] sm:$0xff]   ;;  %v19_v19 = vld [vmem:[#allocation0 + $0x8] sm:$0xff]   ;;  %v30_v20 = vld [vmem:[#allocation0 + $0x10] sm:$0xff]   ;;  %v789_v32 = vsel %vm450_vm0, %v787_v17, %v785_v16 }
  0x2a   :  { %v1173_v21 = vld [vmem:[#allocation0 + $0x11a] ss:$8 sm:$0xf]   ;;  %v1175_v22 = vld [vmem:[#allocation0 + $0xfb] ss:$8 sm:$0xf0]  }
  0x2b   :  { %647 = vrot.lane.b32.xlu1 %v646_v46, %s1108_s0  ;;  %14 = vst.msk [vmem:[%s2107_s1] ss:$16 sm:$0x3] %vm13_vm1, %v12_v18   ;;  %15 = vst.msk [vmem:[%s2107_s1] ss:$16 sm:$0xc] %vm13_vm1, %v12_v18   ;;  %v828_v44 = vsel %vm450_vm0, %v1175_v22, %v1173_v21 }
  0x2c   :  { %634 = vrot.lane.b32.xlu0 %v633_v47, %s1108_s0  ;;  %16 = vst.msk [vmem:[%s2107_s1] ss:$16 sm:$0x30] %vm13_vm1, %v12_v18   ;;  %17 = vst.msk [vmem:[%s2107_s1] ss:$16 sm:$0xc0] %vm13_vm1, %v12_v18  }
  0x2d   :  { %863 = vst.msk [vmem:[%s2107_s1 + $0x2] ss:$16 sm:$0x3] %vm13_vm1, %v19_v19   ;;  %864 = vst.msk [vmem:[%s2107_s1 + $0x2] ss:$16 sm:$0xc] %vm13_vm1, %v19_v19  }
  0x2e   :  { %865 = vst.msk [vmem:[%s2107_s1 + $0x2] ss:$16 sm:$0x30] %vm13_vm1, %v19_v19   ;;  %866 = vst.msk [vmem:[%s2107_s1 + $0x2] ss:$16 sm:$0xc0] %vm13_vm1, %v19_v19  }
  0x2f   :  { %673 = vrot.lane.b32.xlu1 %v672_v52, %s1108_s0  ;;  %867 = vst.msk [vmem:[%s2107_s1 + $0x4] ss:$16 sm:$0x3] %vm13_vm1, %v30_v20   ;;  %868 = vst.msk [vmem:[%s2107_s1 + $0x4] ss:$16 sm:$0xc] %vm13_vm1, %v30_v20  }
  0x30   :  { %660 = vrot.lane.b32.xlu0 %v659_v53, %s1108_s0  ;;  %869 = vst.msk [vmem:[%s2107_s1 + $0x4] ss:$16 sm:$0x30] %vm13_vm1, %v30_v20   ;;  %870 = vst.msk [vmem:[%s2107_s1 + $0x4] ss:$16 sm:$0xc0] %vm13_vm1, %v30_v20  }
  0x31   :  { %v41_v23 = vld [vmem:[#allocation0 + $0x18] sm:$0xff]   ;;  %v52_v24 = vld [vmem:[#allocation0 + $0x20] sm:$0xff]   ;;  %v63_v25 = vld [vmem:[#allocation0 + $0x28] sm:$0xff]  }
  0x32   :  { %v1227_v27 = vld [vmem:[#allocation0 + $0x118] ss:$8 sm:$0xf]   ;;  %v1229_v28 = vld [vmem:[#allocation0 + $0xf9] ss:$8 sm:$0xf0]  }
  0x33   :  { %699 = vrot.lane.b32.xlu1 %v698_v58, %s1108_s0  ;;  %871 = vst.msk [vmem:[%s2107_s1 + $0x6] ss:$16 sm:$0x3] %vm13_vm1, %v41_v23   ;;  %872 = vst.msk [vmem:[%s2107_s1 + $0x6] ss:$16 sm:$0xc] %vm13_vm1, %v41_v23   ;;  %v815_v50 = vsel %vm450_vm0, %v1229_v28, %v1227_v27 }
  0x34   :  { %686 = vrot.lane.b32.xlu0 %v685_v59, %s1108_s0  ;;  %873 = vst.msk [vmem:[%s2107_s1 + $0x6] ss:$16 sm:$0x30] %vm13_vm1, %v41_v23   ;;  %874 = vst.msk [vmem:[%s2107_s1 + $0x6] ss:$16 sm:$0xc0] %vm13_vm1, %v41_v23  }
  0x35   :  { %875 = vst.msk [vmem:[%s2107_s1 + $0x8] ss:$16 sm:$0x3] %vm13_vm1, %v52_v24   ;;  %876 = vst.msk [vmem:[%s2107_s1 + $0x8] ss:$16 sm:$0xc] %vm13_vm1, %v52_v24  }
  0x36   :  { %877 = vst.msk [vmem:[%s2107_s1 + $0x8] ss:$16 sm:$0x30] %vm13_vm1, %v52_v24   ;;  %878 = vst.msk [vmem:[%s2107_s1 + $0x8] ss:$16 sm:$0xc0] %vm13_vm1, %v52_v24  }
  0x37   :  { %725 = vrot.lane.b32.xlu1 %v724_v0, %s1108_s0  ;;  %879 = vst.msk [vmem:[%s2107_s1 + $0x80] ss:$16 sm:$0x3] %vm13_vm1, %v63_v25   ;;  %880 = vst.msk [vmem:[%s2107_s1 + $0x80] ss:$16 sm:$0xc] %vm13_vm1, %v63_v25  }
  0x38   :  { %712 = vrot.lane.b32.xlu0 %v711_v1, %s1108_s0  ;;  %881 = vst.msk [vmem:[%s2107_s1 + $0x80] ss:$16 sm:$0x30] %vm13_vm1, %v63_v25   ;;  %882 = vst.msk [vmem:[%s2107_s1 + $0x80] ss:$16 sm:$0xc0] %vm13_vm1, %v63_v25  }
  0x39   :  { %v74_v29 = vld [vmem:[#allocation0 + $0x30] sm:$0xff]   ;;  %v85_v30 = vld [vmem:[#allocation0 + $0x38] sm:$0xff]   ;;  %v96_v31 = vld [vmem:[#allocation0 + $0x40] sm:$0xff]  }
  0x3a   :  { %883 = vst.msk [vmem:[%s2107_s1 + $0x82] ss:$16 sm:$0x3] %vm13_vm1, %v74_v29   ;;  %884 = vst.msk [vmem:[%s2107_s1 + $0x82] ss:$16 sm:$0xc] %vm13_vm1, %v74_v29  }
  0x3b   :  { %751 = vrot.lane.b32.xlu1 %v750_v6, %s1108_s0  ;;  %885 = vst.msk [vmem:[%s2107_s1 + $0x82] ss:$16 sm:$0x30] %vm13_vm1, %v74_v29   ;;  %886 = vst.msk [vmem:[%s2107_s1 + $0x82] ss:$16 sm:$0xc0] %vm13_vm1, %v74_v29  }
  0x3c   :  { %738 = vrot.lane.b32.xlu0 %v737_v7, %s1108_s0  ;;  %887 = vst.msk [vmem:[%s2107_s1 + $0x84] ss:$16 sm:$0x3] %vm13_vm1, %v85_v30   ;;  %888 = vst.msk [vmem:[%s2107_s1 + $0x84] ss:$16 sm:$0xc] %vm13_vm1, %v85_v30  }
  0x3d   :  { %889 = vst.msk [vmem:[%s2107_s1 + $0x84] ss:$16 sm:$0x30] %vm13_vm1, %v85_v30   ;;  %890 = vst.msk [vmem:[%s2107_s1 + $0x84] ss:$16 sm:$0xc0] %vm13_vm1, %v85_v30  }
  0x3e   :  { %891 = vst.msk [vmem:[%s2107_s1 + $0x86] ss:$16 sm:$0x3] %vm13_vm1, %v96_v31   ;;  %892 = vst.msk [vmem:[%s2107_s1 + $0x86] ss:$16 sm:$0xc] %vm13_vm1, %v96_v31  }
  0x3f   :  { %777 = vrot.lane.b32.xlu1 %v776_v12, %s1108_s0  ;;  %893 = vst.msk [vmem:[%s2107_s1 + $0x86] ss:$16 sm:$0x30] %vm13_vm1, %v96_v31   ;;  %894 = vst.msk [vmem:[%s2107_s1 + $0x86] ss:$16 sm:$0xc0] %vm13_vm1, %v96_v31  }
  0x40   :  { %764 = vrot.lane.b32.xlu0 %v763_v15, %s1108_s0  ;;  %v107_v33 = vld [vmem:[#allocation0 + $0x48] sm:$0xff]   ;;  %v118_v34 = vld [vmem:[#allocation0 + $0x50] sm:$0xff]   ;;  %v129_v35 = vld [vmem:[#allocation0 + $0x58] sm:$0xff]  }
  0x41   :  { %895 = vst.msk [vmem:[%s2107_s1 + $0x88] ss:$16 sm:$0x3] %vm13_vm1, %v107_v33   ;;  %896 = vst.msk [vmem:[%s2107_s1 + $0x88] ss:$16 sm:$0xc] %vm13_vm1, %v107_v33  }
  0x42   :  { %897 = vst.msk [vmem:[%s2107_s1 + $0x88] ss:$16 sm:$0x30] %vm13_vm1, %v107_v33   ;;  %898 = vst.msk [vmem:[%s2107_s1 + $0x88] ss:$16 sm:$0xc0] %vm13_vm1, %v107_v33  }
  0x43   :  { %899 = vst.msk [vmem:[%s2107_s1 + $0x100] ss:$16 sm:$0x3] %vm13_vm1, %v118_v34   ;;  %900 = vst.msk [vmem:[%s2107_s1 + $0x100] ss:$16 sm:$0xc] %vm13_vm1, %v118_v34   ;;  %803 = vrot.lane.b32.xlu1 %v802_v26, %s1108_s0 }
  0x44   :  { %901 = vst.msk [vmem:[%s2107_s1 + $0x100] ss:$16 sm:$0x30] %vm13_vm1, %v118_v34   ;;  %902 = vst.msk [vmem:[%s2107_s1 + $0x100] ss:$16 sm:$0xc0] %vm13_vm1, %v118_v34   ;;  %790 = vrot.lane.b32.xlu0 %v789_v32, %s1108_s0 }
  0x45   :  { %903 = vst.msk [vmem:[%s2107_s1 + $0x102] ss:$16 sm:$0x3] %vm13_vm1, %v129_v35   ;;  %904 = vst.msk [vmem:[%s2107_s1 + $0x102] ss:$16 sm:$0xc] %vm13_vm1, %v129_v35  }
  0x46   :  { %905 = vst.msk [vmem:[%s2107_s1 + $0x102] ss:$16 sm:$0x30] %vm13_vm1, %v129_v35   ;;  %906 = vst.msk [vmem:[%s2107_s1 + $0x102] ss:$16 sm:$0xc0] %vm13_vm1, %v129_v35  }
  0x47   :  { %v140_v36 = vld [vmem:[#allocation0 + $0x60] sm:$0xff]   ;;  %v151_v37 = vld [vmem:[#allocation0 + $0x68] sm:$0xff]   ;;  %v162_v38 = vld [vmem:[#allocation0 + $0x70] sm:$0xff]   ;;  %829 = vrot.lane.b32.xlu1 %v828_v44, %s1108_s0 }
  0x48   :  { %v1377_v39 = vld [vmem:[#allocation0 + $0x11e] ss:$8 sm:$0xf]   ;;  %v1379_v40 = vld [vmem:[#allocation0 + $0xff] ss:$8 sm:$0xf0]   ;;  %816 = vrot.lane.b32.xlu0 %v815_v50, %s1108_s0 }
  0x49   :  { %907 = vst.msk [vmem:[%s2107_s1 + $0x104] ss:$16 sm:$0x3] %vm13_vm1, %v140_v36   ;;  %908 = vst.msk [vmem:[%s2107_s1 + $0x104] ss:$16 sm:$0xc] %vm13_vm1, %v140_v36   ;;  %v854_v60 = vsel %vm450_vm0, %v1379_v40, %v1377_v39 }
  0x4a   :  { %909 = vst.msk [vmem:[%s2107_s1 + $0x104] ss:$16 sm:$0x30] %vm13_vm1, %v140_v36   ;;  %910 = vst.msk [vmem:[%s2107_s1 + $0x104] ss:$16 sm:$0xc0] %vm13_vm1, %v140_v36  }
  0x4b   :  { %911 = vst.msk [vmem:[%s2107_s1 + $0x106] ss:$16 sm:$0x3] %vm13_vm1, %v151_v37   ;;  %912 = vst.msk [vmem:[%s2107_s1 + $0x106] ss:$16 sm:$0xc] %vm13_vm1, %v151_v37   ;;  %855 = vrot.lane.b32.xlu1 %v854_v60, %s1108_s0 }
  0x4c   :  { %913 = vst.msk [vmem:[%s2107_s1 + $0x106] ss:$16 sm:$0x30] %vm13_vm1, %v151_v37   ;;  %914 = vst.msk [vmem:[%s2107_s1 + $0x106] ss:$16 sm:$0xc0] %vm13_vm1, %v151_v37  }
  0x4d   :  { %915 = vst.msk [vmem:[%s2107_s1 + $0x108] ss:$16 sm:$0x3] %vm13_vm1, %v162_v38   ;;  %916 = vst.msk [vmem:[%s2107_s1 + $0x108] ss:$16 sm:$0xc] %vm13_vm1, %v162_v38  }
  0x4e   :  { %917 = vst.msk [vmem:[%s2107_s1 + $0x108] ss:$16 sm:$0x30] %vm13_vm1, %v162_v38   ;;  %918 = vst.msk [vmem:[%s2107_s1 + $0x108] ss:$16 sm:$0xc0] %vm13_vm1, %v162_v38  }
  0x4f   :  { %v173_v41 = vld [vmem:[#allocation0 + $0x78] sm:$0xff]   ;;  %v184_v42 = vld [vmem:[#allocation0 + $0x80] sm:$0xff]   ;;  %v195_v43 = vld [vmem:[#allocation0 + $0x88] sm:$0xff]  }
  0x50   :  { %v1433_v45 = vld [vmem:[#allocation0 + $0x11c] ss:$8 sm:$0xf]   ;;  %v1435_v46 = vld [vmem:[#allocation0 + $0xfd] ss:$8 sm:$0xf0]  }
  0x51   :  { %919 = vst.msk [vmem:[%s2107_s1 + $0x180] ss:$16 sm:$0x3] %vm13_vm1, %v173_v41   ;;  %920 = vst.msk [vmem:[%s2107_s1 + $0x180] ss:$16 sm:$0xc] %vm13_vm1, %v173_v41   ;;  %v841_v0 = vsel %vm450_vm0, %v1435_v46, %v1433_v45 }
  0x52   :  { %921 = vst.msk [vmem:[%s2107_s1 + $0x180] ss:$16 sm:$0x30] %vm13_vm1, %v173_v41   ;;  %922 = vst.msk [vmem:[%s2107_s1 + $0x180] ss:$16 sm:$0xc0] %vm13_vm1, %v173_v41   ;;  %842 = vrot.lane.b32.xlu0 %v841_v0, %s1108_s0 }
  0x53   :  { %923 = vst.msk [vmem:[%s2107_s1 + $0x182] ss:$16 sm:$0x3] %vm13_vm1, %v184_v42   ;;  %924 = vst.msk [vmem:[%s2107_s1 + $0x182] ss:$16 sm:$0xc] %vm13_vm1, %v184_v42  }
  0x54   :  { %925 = vst.msk [vmem:[%s2107_s1 + $0x182] ss:$16 sm:$0x30] %vm13_vm1, %v184_v42   ;;  %926 = vst.msk [vmem:[%s2107_s1 + $0x182] ss:$16 sm:$0xc0] %vm13_vm1, %v184_v42  }
  0x55   :  { %927 = vst.msk [vmem:[%s2107_s1 + $0x184] ss:$16 sm:$0x3] %vm13_vm1, %v195_v43   ;;  %928 = vst.msk [vmem:[%s2107_s1 + $0x184] ss:$16 sm:$0xc] %vm13_vm1, %v195_v43  }
  0x56   :  { %929 = vst.msk [vmem:[%s2107_s1 + $0x184] ss:$16 sm:$0x30] %vm13_vm1, %v195_v43   ;;  %930 = vst.msk [vmem:[%s2107_s1 + $0x184] ss:$16 sm:$0xc0] %vm13_vm1, %v195_v43  }
  0x57   :  { %v206_v47 = vld [vmem:[#allocation0 + $0x90] sm:$0xff]   ;;  %v217_v48 = vld [vmem:[#allocation0 + $0x98] sm:$0xff]   ;;  %v228_v49 = vld [vmem:[#allocation0 + $0xa0] sm:$0xff]  }
  0x58   :  { %931 = vst.msk [vmem:[%s2107_s1 + $0x186] ss:$16 sm:$0x3] %vm13_vm1, %v206_v47   ;;  %932 = vst.msk [vmem:[%s2107_s1 + $0x186] ss:$16 sm:$0xc] %vm13_vm1, %v206_v47  }
  0x59   :  { %933 = vst.msk [vmem:[%s2107_s1 + $0x186] ss:$16 sm:$0x30] %vm13_vm1, %v206_v47   ;;  %934 = vst.msk [vmem:[%s2107_s1 + $0x186] ss:$16 sm:$0xc0] %vm13_vm1, %v206_v47  }
  0x5a   :  { %935 = vst.msk [vmem:[%s2107_s1 + $0x188] ss:$16 sm:$0x3] %vm13_vm1, %v217_v48   ;;  %936 = vst.msk [vmem:[%s2107_s1 + $0x188] ss:$16 sm:$0xc] %vm13_vm1, %v217_v48  }
  0x5b   :  { %937 = vst.msk [vmem:[%s2107_s1 + $0x188] ss:$16 sm:$0x30] %vm13_vm1, %v217_v48   ;;  %938 = vst.msk [vmem:[%s2107_s1 + $0x188] ss:$16 sm:$0xc0] %vm13_vm1, %v217_v48  }
  0x5c   :  { %939 = vst.msk [vmem:[%s2107_s1 + $0x200] ss:$16 sm:$0x3] %vm13_vm1, %v228_v49   ;;  %940 = vst.msk [vmem:[%s2107_s1 + $0x200] ss:$16 sm:$0xc] %vm13_vm1, %v228_v49  }
  0x5d   :  { %941 = vst.msk [vmem:[%s2107_s1 + $0x200] ss:$16 sm:$0x30] %vm13_vm1, %v228_v49   ;;  %942 = vst.msk [vmem:[%s2107_s1 + $0x200] ss:$16 sm:$0xc0] %vm13_vm1, %v228_v49  }
  0x5e   :  { %v239_v51 = vld [vmem:[#allocation0 + $0xa8] sm:$0xff]   ;;  %v250_v52 = vld [vmem:[#allocation0 + $0xb0] sm:$0xff]   ;;  %v261_v53 = vld [vmem:[#allocation0 + $0xb8] sm:$0xff]  }
  0x5f   :  { %943 = vst.msk [vmem:[%s2107_s1 + $0x202] ss:$16 sm:$0x3] %vm13_vm1, %v239_v51   ;;  %944 = vst.msk [vmem:[%s2107_s1 + $0x202] ss:$16 sm:$0xc] %vm13_vm1, %v239_v51  }
  0x60   :  { %945 = vst.msk [vmem:[%s2107_s1 + $0x202] ss:$16 sm:$0x30] %vm13_vm1, %v239_v51   ;;  %946 = vst.msk [vmem:[%s2107_s1 + $0x202] ss:$16 sm:$0xc0] %vm13_vm1, %v239_v51  }
  0x61   :  { %947 = vst.msk [vmem:[%s2107_s1 + $0x204] ss:$16 sm:$0x3] %vm13_vm1, %v250_v52   ;;  %948 = vst.msk [vmem:[%s2107_s1 + $0x204] ss:$16 sm:$0xc] %vm13_vm1, %v250_v52  }
  0x62   :  { %949 = vst.msk [vmem:[%s2107_s1 + $0x204] ss:$16 sm:$0x30] %vm13_vm1, %v250_v52   ;;  %950 = vst.msk [vmem:[%s2107_s1 + $0x204] ss:$16 sm:$0xc0] %vm13_vm1, %v250_v52  }
  0x63   :  { %951 = vst.msk [vmem:[%s2107_s1 + $0x206] ss:$16 sm:$0x3] %vm13_vm1, %v261_v53   ;;  %952 = vst.msk [vmem:[%s2107_s1 + $0x206] ss:$16 sm:$0xc] %vm13_vm1, %v261_v53  }
  0x64   :  { %953 = vst.msk [vmem:[%s2107_s1 + $0x206] ss:$16 sm:$0x30] %vm13_vm1, %v261_v53   ;;  %954 = vst.msk [vmem:[%s2107_s1 + $0x206] ss:$16 sm:$0xc0] %vm13_vm1, %v261_v53  }
  0x65   :  { %v272_v54 = vld [vmem:[#allocation0 + $0xc0] sm:$0xff]   ;;  %v283_v55 = vld [vmem:[#allocation0 + $0xc8] sm:$0xff]   ;;  %v294_v56 = vld [vmem:[#allocation0 + $0xd0] sm:$0xff]  }
  0x66   :  { %955 = vst.msk [vmem:[%s2107_s1 + $0x208] ss:$16 sm:$0x3] %vm13_vm1, %v272_v54   ;;  %956 = vst.msk [vmem:[%s2107_s1 + $0x208] ss:$16 sm:$0xc] %vm13_vm1, %v272_v54  }
  0x67   :  { %957 = vst.msk [vmem:[%s2107_s1 + $0x208] ss:$16 sm:$0x30] %vm13_vm1, %v272_v54   ;;  %958 = vst.msk [vmem:[%s2107_s1 + $0x208] ss:$16 sm:$0xc0] %vm13_vm1, %v272_v54  }
  0x68   :  { %959 = vst.msk [vmem:[%s2107_s1 + $0x280] ss:$16 sm:$0x3] %vm13_vm1, %v283_v55   ;;  %960 = vst.msk [vmem:[%s2107_s1 + $0x280] ss:$16 sm:$0xc] %vm13_vm1, %v283_v55  }
  0x69   :  { %961 = vst.msk [vmem:[%s2107_s1 + $0x280] ss:$16 sm:$0x30] %vm13_vm1, %v283_v55   ;;  %962 = vst.msk [vmem:[%s2107_s1 + $0x280] ss:$16 sm:$0xc0] %vm13_vm1, %v283_v55  }
  0x6a   :  { %963 = vst.msk [vmem:[%s2107_s1 + $0x282] ss:$16 sm:$0x3] %vm13_vm1, %v294_v56   ;;  %964 = vst.msk [vmem:[%s2107_s1 + $0x282] ss:$16 sm:$0xc] %vm13_vm1, %v294_v56  }
  0x6b   :  { %965 = vst.msk [vmem:[%s2107_s1 + $0x282] ss:$16 sm:$0x30] %vm13_vm1, %v294_v56   ;;  %966 = vst.msk [vmem:[%s2107_s1 + $0x282] ss:$16 sm:$0xc0] %vm13_vm1, %v294_v56  }
  0x6c   :  { %v305_v57 = vld [vmem:[#allocation0 + $0xd8] sm:$0xff]   ;;  %v316_v58 = vld [vmem:[#allocation0 + $0xe0] sm:$0xff]   ;;  %v327_v59 = vld [vmem:[#allocation0 + $0xe8] sm:$0xff]  }
  0x6d   :  { %967 = vst.msk [vmem:[%s2107_s1 + $0x284] ss:$16 sm:$0x3] %vm13_vm1, %v305_v57   ;;  %968 = vst.msk [vmem:[%s2107_s1 + $0x284] ss:$16 sm:$0xc] %vm13_vm1, %v305_v57  }
  0x6e   :  { %969 = vst.msk [vmem:[%s2107_s1 + $0x284] ss:$16 sm:$0x30] %vm13_vm1, %v305_v57   ;;  %970 = vst.msk [vmem:[%s2107_s1 + $0x284] ss:$16 sm:$0xc0] %vm13_vm1, %v305_v57  }
  0x6f   :  { %971 = vst.msk [vmem:[%s2107_s1 + $0x286] ss:$16 sm:$0x3] %vm13_vm1, %v316_v58   ;;  %972 = vst.msk [vmem:[%s2107_s1 + $0x286] ss:$16 sm:$0xc] %vm13_vm1, %v316_v58  }
  0x70   :  { %973 = vst.msk [vmem:[%s2107_s1 + $0x286] ss:$16 sm:$0x30] %vm13_vm1, %v316_v58   ;;  %974 = vst.msk [vmem:[%s2107_s1 + $0x286] ss:$16 sm:$0xc0] %vm13_vm1, %v316_v58  }
  0x71   :  { %975 = vst.msk [vmem:[%s2107_s1 + $0x288] ss:$16 sm:$0x3] %vm13_vm1, %v327_v59   ;;  %976 = vst.msk [vmem:[%s2107_s1 + $0x288] ss:$16 sm:$0xc] %vm13_vm1, %v327_v59  }
  0x72   :  { %977 = vst.msk [vmem:[%s2107_s1 + $0x288] ss:$16 sm:$0x30] %vm13_vm1, %v327_v59   ;;  %978 = vst.msk [vmem:[%s2107_s1 + $0x288] ss:$16 sm:$0xc0] %vm13_vm1, %v327_v59  }
  0x73   :  { %v338_v61 = vld [vmem:[#allocation0 + $0xf0] sm:$0xff]   ;;  %v349_v62 = vld [vmem:[#allocation0 + $0xf8] sm:$0xff]   ;;  %v360_v63 = vld [vmem:[#allocation0 + $0x100] sm:$0xff]  }
  0x74   :  { %979 = vst.msk [vmem:[%s2107_s1 + $0x300] ss:$16 sm:$0x3] %vm13_vm1, %v338_v61   ;;  %980 = vst.msk [vmem:[%s2107_s1 + $0x300] ss:$16 sm:$0xc] %vm13_vm1, %v338_v61  }
  0x75   :  { %981 = vst.msk [vmem:[%s2107_s1 + $0x300] ss:$16 sm:$0x30] %vm13_vm1, %v338_v61   ;;  %982 = vst.msk [vmem:[%s2107_s1 + $0x300] ss:$16 sm:$0xc0] %vm13_vm1, %v338_v61  }
  0x76   :  { %983 = vst.msk [vmem:[%s2107_s1 + $0x302] ss:$16 sm:$0x3] %vm13_vm1, %v349_v62   ;;  %984 = vst.msk [vmem:[%s2107_s1 + $0x302] ss:$16 sm:$0xc] %vm13_vm1, %v349_v62  }
  0x77   :  { %985 = vst.msk [vmem:[%s2107_s1 + $0x302] ss:$16 sm:$0x30] %vm13_vm1, %v349_v62   ;;  %986 = vst.msk [vmem:[%s2107_s1 + $0x302] ss:$16 sm:$0xc0] %vm13_vm1, %v349_v62  }
  0x78   :  { %987 = vst.msk [vmem:[%s2107_s1 + $0x304] ss:$16 sm:$0x3] %vm13_vm1, %v360_v63   ;;  %988 = vst.msk [vmem:[%s2107_s1 + $0x304] ss:$16 sm:$0xc] %vm13_vm1, %v360_v63  }
  0x79   :  { %989 = vst.msk [vmem:[%s2107_s1 + $0x304] ss:$16 sm:$0x30] %vm13_vm1, %v360_v63   ;;  %990 = vst.msk [vmem:[%s2107_s1 + $0x304] ss:$16 sm:$0xc0] %vm13_vm1, %v360_v63  }
  0x7a   :  { %v371_v1 = vld [vmem:[#allocation0 + $0x108] sm:$0xff]   ;;  %v382_v2 = vld [vmem:[#allocation0 + $0x110] sm:$0xff]   ;;  %v393_v3 = vld [vmem:[#allocation0 + $0x118] sm:$0xff]  }
  0x7b   :  { %991 = vst.msk [vmem:[%s2107_s1 + $0x306] ss:$16 sm:$0x3] %vm13_vm1, %v371_v1   ;;  %992 = vst.msk [vmem:[%s2107_s1 + $0x306] ss:$16 sm:$0xc] %vm13_vm1, %v371_v1  }
  0x7c   :  { %993 = vst.msk [vmem:[%s2107_s1 + $0x306] ss:$16 sm:$0x30] %vm13_vm1, %v371_v1   ;;  %994 = vst.msk [vmem:[%s2107_s1 + $0x306] ss:$16 sm:$0xc0] %vm13_vm1, %v371_v1  }
  0x7d   :  { %995 = vst.msk [vmem:[%s2107_s1 + $0x308] ss:$16 sm:$0x3] %vm13_vm1, %v382_v2   ;;  %996 = vst.msk [vmem:[%s2107_s1 + $0x308] ss:$16 sm:$0xc] %vm13_vm1, %v382_v2  }
  0x7e   :  { %997 = vst.msk [vmem:[%s2107_s1 + $0x308] ss:$16 sm:$0x30] %vm13_vm1, %v382_v2   ;;  %998 = vst.msk [vmem:[%s2107_s1 + $0x308] ss:$16 sm:$0xc0] %vm13_vm1, %v382_v2  }
  0x7f   :  { %999 = vst.msk [vmem:[%s2107_s1 + $0x380] ss:$16 sm:$0x3] %vm13_vm1, %v393_v3   ;;  %1000 = vst.msk [vmem:[%s2107_s1 + $0x380] ss:$16 sm:$0xc] %vm13_vm1, %v393_v3  }
  0x80   :  { %1001 = vst.msk [vmem:[%s2107_s1 + $0x380] ss:$16 sm:$0x30] %vm13_vm1, %v393_v3   ;;  %1002 = vst.msk [vmem:[%s2107_s1 + $0x380] ss:$16 sm:$0xc0] %vm13_vm1, %v393_v3  }
  0x81   :  { %v404_v4 = vld [vmem:[#allocation0 + $0x120] sm:$0xff]   ;;  %v415_v5 = vld [vmem:[#allocation0 + $0x128] sm:$0xff]   ;;  %v426_v6 = vld [vmem:[#allocation0 + $0x130] sm:$0xff]   ;;  %v479_v8 = vpop.permute.xlu1 %478  }
  0x82   :  { %1003 = vst.msk [vmem:[%s2107_s1 + $0x382] ss:$16 sm:$0x3] %vm13_vm1, %v404_v4   ;;  %1004 = vst.msk [vmem:[%s2107_s1 + $0x382] ss:$16 sm:$0xc] %vm13_vm1, %v404_v4   ;;  %v453_v9 = vpop.permute.xlu0 %452  }
  0x83   :  { %1005 = vst.msk [vmem:[%s2107_s1 + $0x382] ss:$16 sm:$0x30] %vm13_vm1, %v404_v4   ;;  %1006 = vst.msk [vmem:[%s2107_s1 + $0x382] ss:$16 sm:$0xc0] %vm13_vm1, %v404_v4  }
  0x84   :  { %1007 = vst.msk [vmem:[%s2107_s1 + $0x384] ss:$16 sm:$0x3] %vm13_vm1, %v415_v5   ;;  %1008 = vst.msk [vmem:[%s2107_s1 + $0x384] ss:$16 sm:$0xc] %vm13_vm1, %v415_v5  }
  0x85   :  { %1009 = vst.msk [vmem:[%s2107_s1 + $0x384] ss:$16 sm:$0x30] %vm13_vm1, %v415_v5   ;;  %1010 = vst.msk [vmem:[%s2107_s1 + $0x384] ss:$16 sm:$0xc0] %vm13_vm1, %v415_v5   ;;  %v492_v10 = vpop.permute.xlu1 %491  }
  0x86   :  { %1011 = vst.msk [vmem:[%s2107_s1 + $0x386] ss:$16 sm:$0x3] %vm13_vm1, %v426_v6   ;;  %1012 = vst.msk [vmem:[%s2107_s1 + $0x386] ss:$16 sm:$0xc] %vm13_vm1, %v426_v6   ;;  %v466_v11 = vpop.permute.xlu0 %465  }
  0x87   :  { %1013 = vst.msk [vmem:[%s2107_s1 + $0x386] ss:$16 sm:$0x30] %vm13_vm1, %v426_v6   ;;  %1014 = vst.msk [vmem:[%s2107_s1 + $0x386] ss:$16 sm:$0xc0] %vm13_vm1, %v426_v6  }
  0x88   :  { %v437_v7 = vld [vmem:[#allocation0 + $0x138] sm:$0xff]   ;;  %1023 = vst.msk [vmem:[%s2107_s1 + $0x41] ss:$2 sm:$0xf] %vm13_vm1, %v479_v8  }
  0x89   :  { %1015 = vst.msk [vmem:[%s2107_s1 + $0x388] ss:$16 sm:$0x3] %vm13_vm1, %v437_v7   ;;  %1016 = vst.msk [vmem:[%s2107_s1 + $0x388] ss:$16 sm:$0xc] %vm13_vm1, %v437_v7   ;;  %v518_v12 = vpop.permute.xlu1 %517  }
  0x8a   :  { %1017 = vst.msk [vmem:[%s2107_s1 + $0x388] ss:$16 sm:$0x30] %vm13_vm1, %v437_v7   ;;  %1018 = vst.msk [vmem:[%s2107_s1 + $0x388] ss:$16 sm:$0xc0] %vm13_vm1, %v437_v7   ;;  %v505_v13 = vpop.permute.xlu0 %504  }
  0x8b   :  { %1024 = vst.msk [vmem:[%s2107_s1 + $0x49] ss:$2 sm:$0xf0] %vm13_vm1, %v479_v8   ;;  %1019 = vst.msk [vmem:[%s2107_s1 + $0x1] ss:$2 sm:$0xf] %vm13_vm1, %v453_v9  }
  0x8c   :  { %1020 = vst.msk [vmem:[%s2107_s1 + $0x9] ss:$2 sm:$0xf0] %vm13_vm1, %v453_v9   ;;  %1025 = vst.msk [vmem:[%s2107_s1 + $0x61] ss:$2 sm:$0xf] %vm13_vm1, %v492_v10  }
  0x8d   :  { %1026 = vst.msk [vmem:[%s2107_s1 + $0x69] ss:$2 sm:$0xf0] %vm13_vm1, %v492_v10   ;;  %1021 = vst.msk [vmem:[%s2107_s1 + $0x21] ss:$2 sm:$0xf] %vm13_vm1, %v466_v11   ;;  %v544_v14 = vpop.permute.xlu1 %543  }
  0x8e   :  { %1022 = vst.msk [vmem:[%s2107_s1 + $0x29] ss:$2 sm:$0xf0] %vm13_vm1, %v466_v11   ;;  %1029 = vst.msk [vmem:[%s2107_s1 + $0xa1] ss:$2 sm:$0xf] %vm13_vm1, %v518_v12   ;;  %v531_v15 = vpop.permute.xlu0 %530  }
  0x8f   :  { %1030 = vst.msk [vmem:[%s2107_s1 + $0xa9] ss:$2 sm:$0xf0] %vm13_vm1, %v518_v12   ;;  %1027 = vst.msk [vmem:[%s2107_s1 + $0x81] ss:$2 sm:$0xf] %vm13_vm1, %v505_v13  }
  0x90   :  { %1028 = vst.msk [vmem:[%s2107_s1 + $0x89] ss:$2 sm:$0xf0] %vm13_vm1, %v505_v13   ;;  %1033 = vst.msk [vmem:[%s2107_s1 + $0xe1] ss:$2 sm:$0xf] %vm13_vm1, %v544_v14  }
  0x91   :  { %1034 = vst.msk [vmem:[%s2107_s1 + $0xe9] ss:$2 sm:$0xf0] %vm13_vm1, %v544_v14   ;;  %1031 = vst.msk [vmem:[%s2107_s1 + $0xc1] ss:$2 sm:$0xf] %vm13_vm1, %v531_v15   ;;  %v570_v16 = vpop.permute.xlu1 %569  }
  0x92   :  { %1032 = vst.msk [vmem:[%s2107_s1 + $0xc9] ss:$2 sm:$0xf0] %vm13_vm1, %v531_v15   ;;  %1037 = vst.msk [vmem:[%s2107_s1 + $0x121] ss:$2 sm:$0xf] %vm13_vm1, %v570_v16   ;;  %v557_v17 = vpop.permute.xlu0 %556  }
  0x93   :  { %1038 = vst.msk [vmem:[%s2107_s1 + $0x129] ss:$2 sm:$0xf0] %vm13_vm1, %v570_v16   ;;  %1035 = vst.msk [vmem:[%s2107_s1 + $0x101] ss:$2 sm:$0xf] %vm13_vm1, %v557_v17  }
  0x94   :  { %1036 = vst.msk [vmem:[%s2107_s1 + $0x109] ss:$2 sm:$0xf0] %vm13_vm1, %v557_v17  }
  0x95   :  { %v596_v18 = vpop.permute.xlu1 %595  }
  0x96   :  { %1041 = vst.msk [vmem:[%s2107_s1 + $0x161] ss:$2 sm:$0xf] %vm13_vm1, %v596_v18   ;;  %1042 = vst.msk [vmem:[%s2107_s1 + $0x169] ss:$2 sm:$0xf0] %vm13_vm1, %v596_v18   ;;  %v583_v19 = vpop.permute.xlu0 %582  }
  0x97   :  { %1039 = vst.msk [vmem:[%s2107_s1 + $0x141] ss:$2 sm:$0xf] %vm13_vm1, %v583_v19   ;;  %1040 = vst.msk [vmem:[%s2107_s1 + $0x149] ss:$2 sm:$0xf0] %vm13_vm1, %v583_v19  }
  0x99   :  { %v622_v20 = vpop.permute.xlu1 %621  }
  0x9a   :  { %1045 = vst.msk [vmem:[%s2107_s1 + $0x1a1] ss:$2 sm:$0xf] %vm13_vm1, %v622_v20   ;;  %1046 = vst.msk [vmem:[%s2107_s1 + $0x1a9] ss:$2 sm:$0xf0] %vm13_vm1, %v622_v20   ;;  %v609_v21 = vpop.permute.xlu0 %608  }
  0x9b   :  { %1043 = vst.msk [vmem:[%s2107_s1 + $0x181] ss:$2 sm:$0xf] %vm13_vm1, %v609_v21   ;;  %1044 = vst.msk [vmem:[%s2107_s1 + $0x189] ss:$2 sm:$0xf0] %vm13_vm1, %v609_v21  }
  0x9d   :  { %v648_v22 = vpop.permute.xlu1 %647  }
  0x9e   :  { %1049 = vst.msk [vmem:[%s2107_s1 + $0x1e1] ss:$2 sm:$0xf] %vm13_vm1, %v648_v22   ;;  %1050 = vst.msk [vmem:[%s2107_s1 + $0x1e9] ss:$2 sm:$0xf0] %vm13_vm1, %v648_v22   ;;  %v635_v23 = vpop.permute.xlu0 %634  }
  0x9f   :  { %1047 = vst.msk [vmem:[%s2107_s1 + $0x1c1] ss:$2 sm:$0xf] %vm13_vm1, %v635_v23   ;;  %1048 = vst.msk [vmem:[%s2107_s1 + $0x1c9] ss:$2 sm:$0xf0] %vm13_vm1, %v635_v23  }
  0xa1   :  { %v674_v24 = vpop.permute.xlu1 %673  }
  0xa2   :  { %1053 = vst.msk [vmem:[%s2107_s1 + $0x221] ss:$2 sm:$0xf] %vm13_vm1, %v674_v24   ;;  %1054 = vst.msk [vmem:[%s2107_s1 + $0x229] ss:$2 sm:$0xf0] %vm13_vm1, %v674_v24   ;;  %v661_v25 = vpop.permute.xlu0 %660  }
  0xa3   :  { %1051 = vst.msk [vmem:[%s2107_s1 + $0x201] ss:$2 sm:$0xf] %vm13_vm1, %v661_v25   ;;  %1052 = vst.msk [vmem:[%s2107_s1 + $0x209] ss:$2 sm:$0xf0] %vm13_vm1, %v661_v25  }
  0xa5   :  { %v700_v26 = vpop.permute.xlu1 %699  }
  0xa6   :  { %1057 = vst.msk [vmem:[%s2107_s1 + $0x261] ss:$2 sm:$0xf] %vm13_vm1, %v700_v26   ;;  %1058 = vst.msk [vmem:[%s2107_s1 + $0x269] ss:$2 sm:$0xf0] %vm13_vm1, %v700_v26   ;;  %v687_v27 = vpop.permute.xlu0 %686  }
  0xa7   :  { %1055 = vst.msk [vmem:[%s2107_s1 + $0x241] ss:$2 sm:$0xf] %vm13_vm1, %v687_v27   ;;  %1056 = vst.msk [vmem:[%s2107_s1 + $0x249] ss:$2 sm:$0xf0] %vm13_vm1, %v687_v27  }
  0xa9   :  { %v726_v28 = vpop.permute.xlu1 %725  }
  0xaa   :  { %1061 = vst.msk [vmem:[%s2107_s1 + $0x2a1] ss:$2 sm:$0xf] %vm13_vm1, %v726_v28   ;;  %1062 = vst.msk [vmem:[%s2107_s1 + $0x2a9] ss:$2 sm:$0xf0] %vm13_vm1, %v726_v28   ;;  %v713_v29 = vpop.permute.xlu0 %712  }
  0xab   :  { %1059 = vst.msk [vmem:[%s2107_s1 + $0x281] ss:$2 sm:$0xf] %vm13_vm1, %v713_v29   ;;  %1060 = vst.msk [vmem:[%s2107_s1 + $0x289] ss:$2 sm:$0xf0] %vm13_vm1, %v713_v29  }
  0xad   :  { %v752_v30 = vpop.permute.xlu1 %751  }
  0xae   :  { %1065 = vst.msk [vmem:[%s2107_s1 + $0x2e1] ss:$2 sm:$0xf] %vm13_vm1, %v752_v30   ;;  %1066 = vst.msk [vmem:[%s2107_s1 + $0x2e9] ss:$2 sm:$0xf0] %vm13_vm1, %v752_v30   ;;  %v739_v31 = vpop.permute.xlu0 %738  }
  0xaf   :  { %1063 = vst.msk [vmem:[%s2107_s1 + $0x2c1] ss:$2 sm:$0xf] %vm13_vm1, %v739_v31   ;;  %1064 = vst.msk [vmem:[%s2107_s1 + $0x2c9] ss:$2 sm:$0xf0] %vm13_vm1, %v739_v31  }
  0xb1   :  { %v778_v32 = vpop.permute.xlu1 %777  }
  0xb2   :  { %1069 = vst.msk [vmem:[%s2107_s1 + $0x321] ss:$2 sm:$0xf] %vm13_vm1, %v778_v32   ;;  %1070 = vst.msk [vmem:[%s2107_s1 + $0x329] ss:$2 sm:$0xf0] %vm13_vm1, %v778_v32   ;;  %v765_v33 = vpop.permute.xlu0 %764  }
  0xb3   :  { %1067 = vst.msk [vmem:[%s2107_s1 + $0x301] ss:$2 sm:$0xf] %vm13_vm1, %v765_v33   ;;  %1068 = vst.msk [vmem:[%s2107_s1 + $0x309] ss:$2 sm:$0xf0] %vm13_vm1, %v765_v33  }
  0xb5   :  { %v804_v34 = vpop.permute.xlu1 %803  }
  0xb6   :  { %1073 = vst.msk [vmem:[%s2107_s1 + $0x361] ss:$2 sm:$0xf] %vm13_vm1, %v804_v34   ;;  %1074 = vst.msk [vmem:[%s2107_s1 + $0x369] ss:$2 sm:$0xf0] %vm13_vm1, %v804_v34   ;;  %v791_v35 = vpop.permute.xlu0 %790  }
  0xb7   :  { %1071 = vst.msk [vmem:[%s2107_s1 + $0x341] ss:$2 sm:$0xf] %vm13_vm1, %v791_v35   ;;  %1072 = vst.msk [vmem:[%s2107_s1 + $0x349] ss:$2 sm:$0xf0] %vm13_vm1, %v791_v35  }
  0xb9   :  { %v830_v36 = vpop.permute.xlu1 %829  }
  0xba   :  { %1077 = vst.msk [vmem:[%s2107_s1 + $0x3a1] ss:$2 sm:$0xf] %vm13_vm1, %v830_v36   ;;  %1078 = vst.msk [vmem:[%s2107_s1 + $0x3a9] ss:$2 sm:$0xf0] %vm13_vm1, %v830_v36   ;;  %v817_v37 = vpop.permute.xlu0 %816  }
  0xbb   :  { %1075 = vst.msk [vmem:[%s2107_s1 + $0x381] ss:$2 sm:$0xf] %vm13_vm1, %v817_v37   ;;  %1076 = vst.msk [vmem:[%s2107_s1 + $0x389] ss:$2 sm:$0xf0] %vm13_vm1, %v817_v37  }
  0xbd   :  { %v856_v38 = vpop.permute.xlu1 %855  }
  0xbe   :  { %1081 = vst.msk [vmem:[%s2107_s1 + $0x3e1] ss:$2 sm:$0xf] %vm13_vm1, %v856_v38   ;;  %1082 = vst.msk [vmem:[%s2107_s1 + $0x3e9] ss:$2 sm:$0xf0] %vm13_vm1, %v856_v38  }
  0xc4   :  { %v843_v39 = vpop.permute.xlu0 %842  }
  0xc5   :  { %1079 = vst.msk [vmem:[%s2107_s1 + $0x3c1] ss:$2 sm:$0xf] %vm13_vm1, %v843_v39   ;;  %1080 = vst.msk [vmem:[%s2107_s1 + $0x3c9] ss:$2 sm:$0xf0] %vm13_vm1, %v843_v39  }
  0xc6   :  { %862 = vsyncpa [#allocation1], 1 }

// kernel: dceiflow_forward.7
= control target key start
LH: loop header
LB: loop body
LE: loop exit
PB: predicated region body
PF: predicated region fallthrough
CT: control target
= control target key end

     0   :  { %vm83_vm0 = vcmask 523264   ;;  %v632_v3 = vlaneseq  ;;  %s2820_s0 = inlined_call_operand.vmem [shape: f32[9,64,64], index: 0, kind: input, shape index: {}]   ;;  %s2821_s1 = inlined_call_operand.vmem [shape: f32[2,9,64], index: 1, kind: input, shape index: {}]   ;;  %s2822_s2 = inlined_call_operand.vmem [shape: f32[2,64,64], index: 2, kind: output, shape index: {}]  }
   0x1   :  { %v1219_v0 = vld [vmem:[%s2820_s0] sm:$0xff]  ;;  %v1259_v14 = vld [vmem:[%s2820_s0 + $0x8] sm:$0xff]  ;;  %v630_v40 = vld [vmem:[%s2821_s1 + $0x10] sm:$0xff] }
   0x2   :  { %v1224_v1 = vld [vmem:[%s2820_s0 + $0x40] sm:$0xff]  ;;  %v84_v5 = vsel %vm83_vm0, %v1219_v0, -inf  ;;  %v1254_v13 = vshrl.u32 %v632_v3, 7  ;;  %v1271_v17 = vld [vmem:[%s2820_s0 + $0x48] sm:$0xff]  ;;  %v101_v28 = vsel %vm83_vm0, %v1259_v14, -inf  ;;  %v1345_v49 = vld [vmem:[%s2820_s0 + $0x10] sm:$0xff] }
   0x3   :  { %v1229_v2 = vld [vmem:[%s2820_s0 + $0x80] sm:$0xff]  ;;  %v85_v6 = vsel %vm83_vm0, %v1224_v1, -inf  ;;  %v1300_v32 = vld [vmem:[%s2820_s0 + $0x88] sm:$0xff]  ;;  %v102_v33 = vsel %vm83_vm0, %v1271_v17, -inf  ;;  %v1350_v50 = vld [vmem:[%s2820_s0 + $0x50] sm:$0xff] }
   0x4   :  { %v1234_v4 = vld [vmem:[%s2820_s0 + $0xc0] sm:$0xff]  ;;  %v87_v7 = vsel %vm83_vm0, %v1229_v2, -inf  ;;  %v86_v9 = vmax.f32 %v84_v5, %v85_v6  ;;  %2891 = vst [vmem:[#allocation2_spill] sm:$0xff] %v1254_v13  ;;  %v634_v22 = vsub.s32 0, %v1254_v13  ;;  %v654_v23 = vsub.s32 1, %v1254_v13  ;;  %v1315_v38 = vld [vmem:[%s2820_s0 + $0xc8] sm:$0xff] }
   0x5   :  { %v1245_v8 = vld [vmem:[%s2820_s0 + $0x100] sm:$0xff]  ;;  %v89_v10 = vsel %vm83_vm0, %v1234_v4, -inf  ;;  %v2828_v24 = vsub.s32 2, %v1254_v13  ;;  %v2827_v26 = vsub.s32 3, %v1254_v13  ;;  %v2826_v27 = vsub.s32 4, %v1254_v13  ;;  %v1338_v46 = vld [vmem:[%s2820_s0 + $0x108] sm:$0xff] }
   0x6   :  { %v1252_v11 = vld [vmem:[%s2820_s0 + $0x140] sm:$0xff]  ;;  %v88_v12 = vmax.f32 %v86_v9, %v87_v7  ;;  %v91_v16 = vsel %vm83_vm0, %v1245_v8, -inf  ;;  %v2825_v30 = vsub.s32 5, %v1254_v13  ;;  %v2824_v31 = vsub.s32 6, %v1254_v13  ;;  %v1363_v54 = vld [vmem:[%s2820_s0 + $0x148] sm:$0xff]  ;;  %v1393_v63 = vld [vmem:[%s2820_s0 + $0x90] sm:$0xff] }
   0x7   :  { %v1264_v15 = vld [vmem:[%s2820_s0 + $0x180] sm:$0xff]  ;;  %v93_v25 = vsel %vm83_vm0, %v1252_v11, -inf  ;;  %v2823_v43 = vsub.s32 7, %v1254_v13  ;;  %v103_v47 = vmax.f32 %v101_v28, %v102_v33  ;;  %v104_v48 = vsel %vm83_vm0, %v1300_v32, -inf  ;;  %v1368_v55 = vld [vmem:[%s2820_s0 + $0x188] sm:$0xff]  ;;  %v1400_v6 = vld [vmem:[%s2820_s0 + $0xd0] sm:$0xff] }
   0x8   :  { %v1276_v18 = vld [vmem:[%s2820_s0 + $0x1c0] sm:$0xff]  ;;  %v90_v20 = vmax.f32 %v88_v12, %v89_v10  ;;  %v95_v34 = vsel %vm83_vm0, %v1264_v15, -inf  ;;  %v106_v56 = vsel %vm83_vm0, %v1315_v38, -inf  ;;  %v1376_v58 = vrot.slane %v630_v40, %v634_v22  ;;  %v1383_v60 = vld [vmem:[%s2820_s0 + $0x1c8] sm:$0xff]  ;;  %v1405_v7 = vld [vmem:[%s2820_s0 + $0x110] sm:$0xff] }
   0x9   :  { %v1281_v19 = vld [vmem:[%s2820_s0 + $0x200] sm:$0xff]  ;;  %v97_v35 = vsel %vm83_vm0, %v1276_v18, -inf  ;;  %v1378_v59 = vrot.slane %v630_v40, %v654_v23  ;;  %v1388_v61 = vld [vmem:[%s2820_s0 + $0x208] sm:$0xff]  ;;  %v105_v62 = vmax.f32 %v103_v47, %v104_v48  ;;  %v108_v5 = vsel %vm83_vm0, %v1338_v46, -inf  ;;  %v1410_v9 = vld [vmem:[%s2820_s0 + $0x150] sm:$0xff] }
   0xa   :  { %v628_v21 = vld [vmem:[%s2821_s1] sm:$0xff]  ;;  %v92_v29 = vmax.f32 %v90_v20, %v91_v16  ;;  %v99_v36 = vsel %vm83_vm0, %v1281_v19, -inf  ;;  %2892 = vst [vmem:[#allocation3_spill] sm:$0xff] %v1376_v58  ;;  %v118_v10 = vsel %vm83_vm0, %v1345_v49, -inf  ;;  %v119_v12 = vsel %vm83_vm0, %v1350_v50, -inf }
   0xb   :  { %v1310_v37 = vrot.slane %v628_v21, %v634_v22  ;;  %v1320_v41 = vrot.slane %v628_v21, %v654_v23  ;;  %v1324_v42 = vrot.slane %v628_v21, %v2828_v24  ;;  %v1329_v44 = vrot.slane %v628_v21, %v2827_v26  ;;  %2893 = vst [vmem:[#allocation4_spill] sm:$0xff] %v1378_v59 }
   0xc   :  { %v94_v39 = vmax.f32 %v92_v29, %v93_v25  ;;  %v1333_v45 = vrot.slane %v628_v21, %v2826_v27  ;;  %v1354_v52 = vrot.slane %v628_v21, %v2825_v30  ;;  %v1358_v53 = vrot.slane %v628_v21, %v2824_v31  ;;  %v1614_v31 = vld [vmem:[%s2821_s1 + $0x8] ss:$0 sm:$0xff] }
   0xd   :  { %v1374_v57 = vrot.slane %v628_v21, %v2823_v43  ;;  %v107_v16 = vmax.f32 %v105_v62, %v106_v56  ;;  %v110_v20 = vsel %vm83_vm0, %v1363_v54, -inf  ;;  %v112_v21 = vsel %vm83_vm0, %v1368_v55, -inf }
   0xe   :  { %v96_v51 = vmax.f32 %v94_v39, %v95_v34  ;;  %v120_v22 = vmax.f32 %v118_v10, %v119_v12  ;;  %v114_v25 = vsel %vm83_vm0, %v1383_v60, -inf  ;;  %v116_v28 = vsel %vm83_vm0, %v1388_v61, -inf }
   0xf   :  { %v121_v29 = vsel %vm83_vm0, %v1393_v63, -inf  ;;  %v109_v33 = vmax.f32 %v107_v16, %v108_v5  ;;  %v123_v34 = vsel %vm83_vm0, %v1400_v6, -inf  ;;  %v1432_v39 = vsel %vm83_vm0, %v1410_v9, -inf }
  0x10   :  { %v98_v3 = vmax.f32 %v96_v51, %v97_v35  ;;  %v125_v35 = vsel %vm83_vm0, %v1405_v7, -inf  ;;  %v1441_v51 = vld [vmem:[%s2820_s0 + $0x190] sm:$0xff]  ;;  %v122_v5 = vmax.f32 %v120_v22, %v121_v29 }
  0x11   :  { %v111_v43 = vmax.f32 %v109_v33, %v110_v20  ;;  %v1468_v20 = vld [vmem:[%s2820_s0 + $0x1d0] sm:$0xff] }
  0x12   :  { %v100_v23 = vmax.f32 %v98_v3, %v99_v36  ;;  %v124_v33 = vmax.f32 %v122_v5, %v123_v34 }
  0x14   :  { %v220_v36 = vsub.f32 %v1219_v0, %v100_v23  ;;  %v228_v40 = vsub.f32 %v1224_v1, %v100_v23  ;;  %v236_v47 = vsub.f32 %v1229_v2, %v100_v23  ;;  %v244_v48 = vsub.f32 %v1234_v4, %v100_v23  ;;  %v1449_v0 = vld [vmem:[%s2820_s0 + $0x18] sm:$0xff] }
  0x15   :  { %v252_v56 = vsub.f32 %v1245_v8, %v100_v23  ;;  %v260_v62 = vsub.f32 %v1252_v11, %v100_v23  ;;  %v268_v3 = vsub.f32 %v1264_v15, %v100_v23  ;;  %v276_v1 = vsub.f32 %v1276_v18, %v100_v23  ;;  %v1458_v11 = vld [vmem:[%s2820_s0 + $0x58] sm:$0xff] }
  0x16   :  { %v292_v2 = vmul.f32 1.442695, %v220_v36  ;;  %v308_v4 = vmul.f32 1.442695, %v228_v40  ;;  %v324_v10 = vmul.f32 1.442695, %v236_v47  ;;  %v284_v12 = vsub.f32 %v1281_v19, %v100_v23 }
  0x17   :  { %v340_v16 = vmul.f32 1.442695, %v244_v48  ;;  %v129_v8 = vsel %vm83_vm0, %v1441_v51, -inf  ;;  %v1463_v15 = vld [vmem:[%s2820_s0 + $0x98] sm:$0xff]  ;;  %v356_v18 = vmul.f32 1.442695, %v252_v56  ;;  %v113_v19 = vmax.f32 %v111_v43, %v112_v21 }
  0x18   :  { %1039 = vpow2.f32 %v292_v2  ;;  %v372_v22 = vmul.f32 1.442695, %v260_v62  ;;  %v388_v29 = vmul.f32 1.442695, %v268_v3  ;;  %v1473_v23 = vld [vmem:[%s2820_s0 + $0x210] sm:$0xff]  ;;  %v135_v36 = vsel %vm83_vm0, %v1449_v0, -inf }
  0x19   :  { %1041 = vpow2.f32 %v308_v4  ;;  %v404_v40 = vmul.f32 1.442695, %v276_v1  ;;  %v1480_v43 = vld [vmem:[%s2820_s0 + $0xd8] sm:$0xff]  ;;  %v136_v47 = vsel %vm83_vm0, %v1458_v11, -inf  ;;  %v138_v34 = vsel %vm83_vm0, %v1463_v15, -inf }
  0x1a   :  { %1043 = vpow2.f32 %v324_v10  ;;  %v1485_v21 = vld [vmem:[%s2820_s0 + $0x118] sm:$0xff]  ;;  %v115_v48 = vmax.f32 %v113_v19, %v114_v25  ;;  %v126_v56 = vmax.f32 %v124_v33, %v125_v35  ;;  %v137_v3 = vmax.f32 %v135_v36, %v136_v47 }
  0x1b   :  { %1045 = vpow2.f32 %v340_v16  ;;  %v1494_v62 = vld [vmem:[%s2820_s0 + $0x158] sm:$0xff]  ;;  %v420_v5 = vmul.f32 1.442695, %v284_v12  ;;  %v131_v1 = vsel %vm83_vm0, %v1468_v20, -inf  ;;  %v133_v2 = vsel %vm83_vm0, %v1473_v23, -inf }
  0x1c   :  { %1047 = vpow2.f32 %v356_v18  ;;  %v117_v4 = vmax.f32 %v115_v48, %v116_v28  ;;  %v1502_v25 = vsel %vm83_vm0, %v1480_v43, -inf  ;;  %v1506_v35 = vsel %vm83_vm0, %v1485_v21, -inf  ;;  %v1524_v33 = vld [vmem:[%s2820_s0 + $0x198] sm:$0xff] }
  0x1d   :  { %1049 = vpow2.f32 %v372_v22  ;;  %v128_v10 = vmax.f32 %v126_v56, %v1432_v39  ;;  %v1509_v12 = vmax.f32 %v137_v3, %v138_v34  ;;  %v1513_v16 = vsel %vm83_vm0, %v1494_v62, -inf }
  0x1e   :  { %1051 = vpow2.f32 %v388_v29  ;;  %v221_v28 = vsub.f32 %v1259_v14, %v117_v4  ;;  %v229_v18 = vsub.f32 %v1271_v17, %v117_v4  ;;  %v237_v22 = vsub.f32 %v1300_v32, %v117_v4  ;;  %v1529_v14 = vld [vmem:[%s2820_s0 + $0x1d8] sm:$0xff] }
  0x1f   :  { %1053 = vpow2.f32 %v404_v40  ;;  %v245_v19 = vsub.f32 %v1315_v38, %v117_v4  ;;  %v253_v29 = vsub.f32 %v1338_v46, %v117_v4  ;;  %v261_v39 = vsub.f32 %v1363_v54, %v117_v4  ;;  %v1537_v46 = vld [vmem:[%s2820_s0 + $0x20] sm:$0xff] }
  0x20   :  { %1055 = vpow2.f32 %v420_v5  ;;  %v269_v17 = vsub.f32 %v1368_v55, %v117_v4  ;;  %v277_v32 = vsub.f32 %v1383_v60, %v117_v4  ;;  %v285_v38 = vsub.f32 %v1388_v61, %v117_v4 }
  0x21   :  { %v294_v36 = vmul.f32 1.442695, %v221_v28  ;;  %v310_v54 = vmul.f32 1.442695, %v229_v18  ;;  %v326_v40 = vmul.f32 1.442695, %v237_v22  ;;  %v130_v34 = vmax.f32 %v128_v10, %v129_v8 }
  0x22   :  { %v342_v47 = vmul.f32 1.442695, %v245_v19  ;;  %v358_v48 = vmul.f32 1.442695, %v253_v29  ;;  %v1541_v56 = vsel %vm83_vm0, %v1524_v33, -inf  ;;  %v1545_v55 = vsel %vm83_vm0, %v1529_v14, -inf }
  0x23   :  { %1057 = vpow2.f32 %v294_v36  ;;  %v374_v60 = vmul.f32 1.442695, %v261_v39  ;;  %v132_v61 = vmax.f32 %v130_v34, %v131_v1  ;;  %v1549_v3 = vsel %vm83_vm0, %v1537_v46, -inf }
  0x24   :  { %1059 = vpow2.f32 %v310_v54  ;;  %v390_v8 = vmul.f32 1.442695, %v269_v17  ;;  %v406_v4 = vmul.f32 1.442695, %v277_v32  ;;  %v422_v10 = vmul.f32 1.442695, %v285_v38 }
  0x25   :  { %v1551_v5 = vpop.eup %1039  ;;  %1061 = vpow2.f32 %v326_v40  ;;  %v141_v1 = vmax.f32 %v1509_v12, %v1502_v25  ;;  %v1567_v17 = vmax.f32 %v132_v61, %v133_v2  ;;  %v1572_v32 = vld [vmem:[%s2820_s0 + $0x60] sm:$0xff] }
  0x26   :  { %2894 = vst [vmem:[#allocation5_spill] sm:$0xff] %v1551_v5  ;;  %v1553_v28 = vpop.eup %1041  ;;  %v436_v18 = vsel %vm83_vm0, %v1551_v5, 0.0  ;;  %v636_v22 = vmul.f32 %v1551_v5, %v1310_v37  ;;  %1063 = vpow2.f32 %v342_v47  ;;  %v1577_v25 = vld [vmem:[%s2820_s0 + $0xa0] sm:$0xff] }
  0x27   :  { %2895 = vst [vmem:[#allocation6_spill] sm:$0xff] %v1553_v28  ;;  %v1561_v19 = vpop.eup %1043  ;;  %v437_v29 = vsel %vm83_vm0, %v1553_v28, 0.0  ;;  %v656_v39 = vmul.f32 %v1553_v28, %v1320_v41  ;;  %1065 = vpow2.f32 %v358_v48  ;;  %v222_v27 = vsub.f32 %v1345_v49, %v1567_v17 }
  0x28   :  { %2896 = vst [vmem:[#allocation7_spill] sm:$0xff] %v1561_v19  ;;  %v1579_v12 = vpop.eup %1045  ;;  %v438_v38 = vadd.f32 %v437_v29, %v436_v18  ;;  %v439_v36 = vsel %vm83_vm0, %v1561_v19, 0.0  ;;  %v676_v2 = vmul.f32 %v1561_v19, %v1324_v42  ;;  %1067 = vpow2.f32 %v374_v60 }
  0x29   :  { %2897 = vst [vmem:[#allocation8_spill] sm:$0xff] %v1579_v12  ;;  %v1585_v54 = vpop.eup %1047  ;;  %v441_v40 = vsel %vm83_vm0, %v1579_v12, 0.0  ;;  %v664_v47 = vadd.f32 %v656_v39, %v636_v22  ;;  %v696_v34 = vmul.f32 %v1579_v12, %v1329_v44  ;;  %1069 = vpow2.f32 %v390_v8 }
  0x2a   :  { %2898 = vst [vmem:[#allocation9_spill] sm:$0xff] %v1585_v54  ;;  %v1591_v48 = vpop.eup %1049  ;;  %v440_v61 = vadd.f32 %v439_v36, %v438_v38  ;;  %1071 = vpow2.f32 %v406_v4  ;;  %v1595_v18 = vsel %vm83_vm0, %v1572_v32, -inf  ;;  %v1599_v60 = vsel %vm83_vm0, %v1577_v25, -inf }
  0x2b   :  { %2899 = vst [vmem:[#allocation10_spill] sm:$0xff] %v1591_v48  ;;  %v1601_v29 = vpop.eup %1051  ;;  %v443_v22 = vsel %vm83_vm0, %v1585_v54, 0.0  ;;  %v684_v39 = vadd.f32 %v676_v2, %v664_v47  ;;  %v716_v8 = vmul.f32 %v1585_v54, %v1333_v45  ;;  %1073 = vpow2.f32 %v422_v10 }
  0x2c   :  { %2900 = vst [vmem:[#allocation11_spill] sm:$0xff] %v1601_v29  ;;  %v1607_v38 = vpop.eup %1053  ;;  %v442_v4 = vadd.f32 %v441_v40, %v440_v61  ;;  %v445_v36 = vsel %vm83_vm0, %v1591_v48, 0.0  ;;  %v736_v30 = vmul.f32 %v1591_v48, %v1354_v52  ;;  %v1619_v2 = vmax.f32 %v141_v1, %v1506_v35 }
  0x2d   :  { %2901 = vst [vmem:[#allocation12_spill] sm:$0xff] %v1607_v38  ;;  %v1621_v47 = vpop.eup %1055  ;;  %v447_v10 = vsel %vm83_vm0, %v1601_v29, 0.0  ;;  %v704_v40 = vadd.f32 %v696_v34, %v684_v39  ;;  %v756_v61 = vmul.f32 %v1601_v29, %v1358_v53  ;;  %v449_v24 = vsel %vm83_vm0, %v1607_v38, 0.0 }
  0x2e   :  { %2902 = vst [vmem:[#allocation13_spill] sm:$0xff] %v1621_v47  ;;  %v444_v26 = vadd.f32 %v443_v22, %v442_v4  ;;  %v776_v35 = vmul.f32 %v1607_v38, %v1374_v57  ;;  %v230_v1 = vsub.f32 %v1350_v50, %v1567_v17  ;;  %v451_v48 = vsel %vm83_vm0, %v1621_v47, 0.0 }
  0x2f   :  { %v724_v34 = vadd.f32 %v716_v8, %v704_v40  ;;  %v1639_v39 = vmul.f32 %v1621_v47, %v1614_v31  ;;  %v238_v49 = vsub.f32 %v1393_v63, %v1567_v17  ;;  %v246_v38 = vsub.f32 %v1400_v6, %v1567_v17 }
  0x30   :  { %v1643_v22 = vpop.eup %1057  ;;  %v446_v4 = vadd.f32 %v445_v36, %v444_v26  ;;  %v254_v50 = vsub.f32 %v1405_v7, %v1567_v17  ;;  %v262_v29 = vsub.f32 %v1410_v9, %v1567_v17  ;;  %v270_v26 = vsub.f32 %v1441_v51, %v1567_v17 }
  0x31   :  { %2903 = vst [vmem:[#allocation14_spill] sm:$0xff] %v1643_v22  ;;  %v1651_v8 = vpop.eup %1059  ;;  %v744_v40 = vadd.f32 %v736_v30, %v724_v34  ;;  %v453_v47 = vsel %vm83_vm0, %v1643_v22, 0.0  ;;  %v637_v63 = vmul.f32 %v1643_v22, %v1310_v37  ;;  %v278_v30 = vsub.f32 %v1468_v20, %v1567_v17 }
  0x32   :  { %2904 = vst [vmem:[#allocation15_spill] sm:$0xff] %v1651_v8  ;;  %v1659_v36 = vpop.eup %1061  ;;  %v448_v6 = vadd.f32 %v447_v10, %v446_v4  ;;  %v454_v7 = vsel %vm83_vm0, %v1651_v8, 0.0  ;;  %v657_v9 = vmul.f32 %v1651_v8, %v1320_v41 }
  0x33   :  { %2905 = vst [vmem:[#allocation16_spill] sm:$0xff] %v1659_v36  ;;  %v1667_v34 = vpop.eup %1063  ;;  %v764_v54 = vadd.f32 %v756_v61, %v744_v40  ;;  %v455_v12 = vadd.f32 %v454_v7, %v453_v47  ;;  %v456_v22 = vsel %vm83_vm0, %v1659_v36, 0.0  ;;  %v677_v51 = vmul.f32 %v1659_v36, %v1324_v42 }
  0x34   :  { %2906 = vst [vmem:[#allocation17_spill] sm:$0xff] %v1667_v34  ;;  %v1673_v10 = vpop.eup %1065  ;;  %v450_v4 = vadd.f32 %v449_v24, %v448_v6  ;;  %v458_v19 = vsel %vm83_vm0, %v1667_v34, 0.0  ;;  %v665_v8 = vadd.f32 %v657_v9, %v637_v63  ;;  %v697_v20 = vmul.f32 %v1667_v34, %v1329_v44 }
  0x35   :  { %2907 = vst [vmem:[#allocation18_spill] sm:$0xff] %v1673_v10  ;;  %v1679_v28 = vpop.eup %1067  ;;  %v457_v61 = vadd.f32 %v456_v22, %v455_v12  ;;  %v286_v47 = vsub.f32 %v1473_v23, %v1567_v17  ;;  %v296_v40 = vmul.f32 1.442695, %v222_v27  ;;  %v312_v7 = vmul.f32 1.442695, %v230_v1 }
  0x36   :  { %2908 = vst [vmem:[#allocation19_spill] sm:$0xff] %v1679_v28  ;;  %v1683_v59 = vpop.eup %1069  ;;  %v1685_v36 = vadd.f32 %v451_v48, %v450_v4  ;;  %v460_v24 = vsel %vm83_vm0, %v1673_v10, 0.0  ;;  %v685_v6 = vadd.f32 %v677_v51, %v665_v8  ;;  %v717_v63 = vmul.f32 %v1673_v10, %v1333_v45 }
  0x37   :  { %2909 = vst [vmem:[#allocation20_spill] sm:$0xff] %v1683_v59  ;;  %v1691_v9 = vpop.eup %1071  ;;  %v784_v34 = vadd.f32 %v776_v35, %v764_v54  ;;  %v459_v12 = vadd.f32 %v458_v19, %v457_v61  ;;  %v462_v23 = vsel %vm83_vm0, %v1679_v28, 0.0  ;;  %v737_v27 = vmul.f32 %v1679_v28, %v1354_v52 }
  0x38   :  { %2910 = vst [vmem:[#allocation21_spill] sm:$0xff] %v1691_v9  ;;  %v1697_v17 = vpop.eup %1073  ;;  %1075 = vrcp.f32 %v1685_v36  ;;  %v464_v48 = vsel %vm83_vm0, %v1683_v59, 0.0  ;;  %v705_v1 = vadd.f32 %v697_v20, %v685_v6  ;;  %v757_v22 = vmul.f32 %v1683_v59, %v1358_v53 }
  0x39   :  { %2911 = vst [vmem:[#allocation22_spill] sm:$0xff] %v1697_v17  ;;  %v461_v8 = vadd.f32 %v460_v24, %v459_v12  ;;  %v466_v19 = vsel %vm83_vm0, %v1691_v9, 0.0  ;;  %v777_v54 = vmul.f32 %v1691_v9, %v1374_v57  ;;  %1077 = vpow2.f32 %v296_v40  ;;  %v1713_v24 = vld [vmem:[%s2820_s0 + $0xe0] sm:$0xff] }
  0x3a   :  { %v725_v35 = vadd.f32 %v717_v63, %v705_v1  ;;  %1079 = vpow2.f32 %v312_v7  ;;  %v328_v51 = vmul.f32 1.442695, %v238_v49  ;;  %v344_v4 = vmul.f32 1.442695, %v246_v38  ;;  %v1718_v38 = vld [vmem:[%s2820_s0 + $0x218] sm:$0xff]  ;;  %v1771_v1 = vld [vmem:[%s2820_s0 + $0x68] sm:$0xff] }
  0x3b   :  { %v463_v61 = vadd.f32 %v462_v23, %v461_v8  ;;  %v468_v28 = vsel %vm83_vm0, %v1697_v17, 0.0  ;;  %v360_v20 = vmul.f32 1.442695, %v254_v50  ;;  %v376_v6 = vmul.f32 1.442695, %v262_v29  ;;  %v1725_v29 = vld [vmem:[%s2820_s0 + $0x120] sm:$0xff] }
  0x3c   :  { %v745_v12 = vadd.f32 %v737_v27, %v725_v35  ;;  %1081 = vpow2.f32 %v328_v51  ;;  %v392_v59 = vmul.f32 1.442695, %v270_v26  ;;  %v408_v9 = vmul.f32 1.442695, %v278_v30 }
  0x3d   :  { %v465_v40 = vadd.f32 %v464_v48, %v463_v61  ;;  %1083 = vpow2.f32 %v344_v4  ;;  %v145_v49 = vmax.f32 %v1619_v2, %v1513_v16  ;;  %v154_v50 = vmax.f32 %v1549_v3, %v1595_v18  ;;  %v1735_v16 = vld [vmem:[%s2820_s0 + $0x160] sm:$0xff]  ;;  %v1766_v48 = vld [vmem:[%s2820_s0 + $0x28] sm:$0xff] }
  0x3e   :  { %v765_v26 = vadd.f32 %v757_v22, %v745_v12  ;;  %1085 = vpow2.f32 %v360_v20  ;;  %v424_v30 = vmul.f32 1.442695, %v286_v47  ;;  %v157_v7 = vsel %vm83_vm0, %v1713_v24, -inf  ;;  %v1746_v18 = vld [vmem:[%s2820_s0 + $0x1a0] sm:$0xff]  ;;  %v1786_v22 = vld [vmem:[%s2820_s0 + $0xa8] sm:$0xff] }
  0x3f   :  { %v467_v63 = vadd.f32 %v466_v19, %v465_v40  ;;  %1087 = vpow2.f32 %v376_v6  ;;  %v147_v23 = vmax.f32 %v145_v49, %v1541_v56  ;;  %v156_v2 = vmax.f32 %v154_v50, %v1599_v60  ;;  %v1751_v56 = vld [vmem:[%s2820_s0 + $0x1e0] sm:$0xff] }
  0x40   :  { %v1739_v27 = vadd.f32 %v1639_v39, %v784_v34  ;;  %1089 = vpow2.f32 %v392_v59  ;;  %v150_v3 = vsel %vm83_vm0, %v1718_v38, -inf  ;;  %v159_v60 = vsel %vm83_vm0, %v1725_v29, -inf  ;;  %v1761_v39 = vld [vmem:[%s2820_s0 + $0x220] sm:$0xff] }
  0x41   :  { %v1755_v47 = vadd.f32 %v468_v28, %v467_v63  ;;  %1091 = vpow2.f32 %v408_v9  ;;  %v149_v59 = vmax.f32 %v147_v23, %v1545_v55  ;;  %v158_v34 = vmax.f32 %v156_v2, %v157_v7 }
  0x42   :  { %v1773_v28 = vadd.f32 %v777_v54, %v765_v26  ;;  %v1777_v55 = vmul.f32 %v1697_v17, %v1614_v31  ;;  %1093 = vpow2.f32 %v424_v30  ;;  %v1781_v9 = vsel %vm83_vm0, %v1735_v16, -inf }
  0x43   :  { %1095 = vrcp.f32 %v1755_v47  ;;  %v1789_v8 = vmax.f32 %v149_v59, %v150_v3  ;;  %v1793_v19 = vsel %vm83_vm0, %v1746_v18, -inf  ;;  %v1797_v54 = vsel %vm83_vm0, %v1751_v56, -inf }
  0x44   :  { %v1799_v35 = vmax.f32 %v158_v34, %v159_v60  ;;  %v1803_v51 = vsel %vm83_vm0, %v1761_v39, -inf  ;;  %v1807_v4 = vsel %vm83_vm0, %v1766_v48, -inf  ;;  %v1811_v61 = vsel %vm83_vm0, %v1771_v1, -inf }
  0x45   :  { %v1076_v20 = vpop.eup %1075  ;;  %v223_v6 = vsub.f32 %v1449_v0, %v1789_v8  ;;  %v231_v12 = vsub.f32 %v1458_v11, %v1789_v8  ;;  %v239_v40 = vsub.f32 %v1463_v15, %v1789_v8  ;;  %v1821_v49 = vsel %vm83_vm0, %v1786_v22, -inf }
  0x46   :  { %v1823_v50 = vpop.eup %1077  ;;  %v580_v26 = vmul.f32 %v1076_v20, %v1685_v36  ;;  %v247_v30 = vsub.f32 %v1480_v43, %v1789_v8  ;;  %v255_v0 = vsub.f32 %v1485_v21, %v1789_v8  ;;  %v263_v11 = vsub.f32 %v1494_v62, %v1789_v8 }
  0x47   :  { %2912 = vst [vmem:[#allocation23_spill] sm:$0xff] %v1823_v50  ;;  %v1832_v7 = vpop.eup %1079  ;;  %v470_v15 = vsel %vm83_vm0, %v1823_v50, 0.0  ;;  %v638_v63 = vmul.f32 %v1823_v50, %v1310_v37  ;;  %v271_v23 = vsub.f32 %v1524_v33, %v1789_v8  ;;  %v279_v43 = vsub.f32 %v1529_v14, %v1789_v8 }
  0x48   :  { %2913 = vst [vmem:[#allocation24_spill] sm:$0xff] %v1832_v7  ;;  %v588_v2 = vsub.f32 2.0, %v580_v26  ;;  %v471_v21 = vsel %vm83_vm0, %v1832_v7, 0.0  ;;  %v658_v62 = vmul.f32 %v1832_v7, %v1320_v41  ;;  %v298_v3 = vmul.f32 1.442695, %v223_v6 }
  0x49   :  { %v1846_v60 = vpop.eup %1081  ;;  %v472_v59 = vadd.f32 %v471_v21, %v470_v15  ;;  %v287_v34 = vsub.f32 %v1718_v38, %v1789_v8  ;;  %v314_v17 = vmul.f32 1.442695, %v231_v12  ;;  %v330_v10 = vmul.f32 1.442695, %v239_v40 }
  0x4a   :  { %2914 = vst [vmem:[#allocation25_spill] sm:$0xff] %v1846_v60  ;;  %v1850_v33 = vpop.eup %1083  ;;  %v596_v50 = vmul.f32 %v1076_v20, %v588_v2  ;;  %v473_v14 = vsel %vm83_vm0, %v1846_v60, 0.0  ;;  %v666_v26 = vadd.f32 %v658_v62, %v638_v63  ;;  %v678_v5 = vmul.f32 %v1846_v60, %v1324_v42 }
  0x4b   :  { %2915 = vst [vmem:[#allocation26_spill] sm:$0xff] %v1850_v33  ;;  %v1856_v7 = vpop.eup %1085  ;;  %v474_v6 = vadd.f32 %v473_v14, %v472_v59  ;;  %v475_v15 = vsel %vm83_vm0, %v1850_v33, 0.0  ;;  %v698_v38 = vmul.f32 %v1850_v33, %v1329_v44  ;;  %1097 = vpow2.f32 %v298_v3 }
  0x4c   :  { %2916 = vst [vmem:[#allocation27_spill] sm:$0xff] %v1856_v7  ;;  %v1862_v8 = vpop.eup %1087  ;;  %v604_v20 = vmul.f32 %v596_v50, %v1685_v36  ;;  %v477_v12 = vsel %vm83_vm0, %v1856_v7, 0.0  ;;  %v686_v40 = vadd.f32 %v678_v5, %v666_v26  ;;  %v718_v63 = vmul.f32 %v1856_v7, %v1333_v45 }
  0x4d   :  { %2917 = vst [vmem:[#allocation28_spill] sm:$0xff] %v1862_v8  ;;  %v1869_v2 = vpop.eup %1089  ;;  %v476_v21 = vadd.f32 %v475_v15, %v474_v6  ;;  %v479_v62 = vsel %vm83_vm0, %v1862_v8, 0.0  ;;  %1099 = vpow2.f32 %v314_v17  ;;  %v346_v59 = vmul.f32 1.442695, %v247_v30 }
  0x4e   :  { %2918 = vst [vmem:[#allocation29_spill] sm:$0xff] %v1869_v2  ;;  %v1873_v3 = vpop.eup %1091  ;;  %v612_v14 = vsub.f32 2.0, %v604_v20  ;;  %v481_v36 = vsel %vm83_vm0, %v1869_v2, 0.0  ;;  %v706_v33 = vadd.f32 %v698_v38, %v686_v40  ;;  %v738_v5 = vmul.f32 %v1862_v8, %v1354_v52 }
  0x4f   :  { %2919 = vst [vmem:[#allocation30_spill] sm:$0xff] %v1873_v3  ;;  %v1879_v26 = vpop.eup %1093  ;;  %v478_v7 = vadd.f32 %v477_v12, %v476_v21  ;;  %v483_v6 = vsel %vm83_vm0, %v1873_v3, 0.0  ;;  %v758_v17 = vmul.f32 %v1869_v2, %v1358_v53  ;;  %1101 = vpow2.f32 %v330_v10 }
  0x50   :  { %2920 = vst [vmem:[#allocation31_spill] sm:$0xff] %v1879_v26  ;;  %v1096_v30 = vpop.eup %1095  ;;  %v1885_v15 = vmul.f32 %v612_v14, %v596_v50  ;;  %v485_v20 = vsel %vm83_vm0, %v1879_v26, 0.0  ;;  %v726_v38 = vadd.f32 %v718_v63, %v706_v33  ;;  %v778_v40 = vmul.f32 %v1873_v3, %v1374_v57 }
  0x51   :  { %v581_v8 = vmul.f32 %v1096_v30, %v1755_v47  ;;  %v480_v12 = vadd.f32 %v479_v62, %v478_v7  ;;  %1103 = vpow2.f32 %v346_v59  ;;  %v362_v21 = vmul.f32 1.442695, %v255_v0 }
  0x52   :  { %2921 = vst [vmem:[#allocation32_spill] sm:$0xff] %v1885_v15  ;;  %v812_v60 = vmul.f32 %v1739_v27, %v1885_v15  ;;  %v746_v2 = vadd.f32 %v738_v5, %v726_v38  ;;  %v378_v10 = vmul.f32 1.442695, %v263_v11  ;;  %v394_v58 = vmul.f32 1.442695, %v271_v23  ;;  %v1903_v11 = vld [vmem:[%s2820_s0 + $0xe8] sm:$0xff] }
  0x53   :  { %v589_v50 = vsub.f32 2.0, %v581_v8  ;;  %v482_v14 = vadd.f32 %v481_v36, %v480_v12  ;;  %1105 = vpow2.f32 %v362_v21  ;;  %v410_v13 = vmul.f32 1.442695, %v279_v43  ;;  %v1908_v23 = vld [vmem:[%s2820_s0 + $0x128] sm:$0xff] }
  0x54   :  { %820 = vst.msk [vmem:[%s2822_s2] sm:$0xff] %vm83_vm0, %v812_v60  ;;  %v766_v33 = vadd.f32 %v758_v17, %v746_v2  ;;  %1107 = vpow2.f32 %v378_v10  ;;  %v426_v7 = vmul.f32 1.442695, %v287_v34  ;;  %v162_v0 = vmax.f32 %v1799_v35, %v1781_v9  ;;  %v1921_v8 = vld [vmem:[%s2820_s0 + $0x168] sm:$0xff] }
  0x55   :  { %v597_v63 = vmul.f32 %v1096_v30, %v589_v50  ;;  %v484_v27 = vadd.f32 %v483_v6, %v482_v14  ;;  %1109 = vpow2.f32 %v394_v58  ;;  %v171_v43 = vmax.f32 %v1807_v4, %v1811_v61  ;;  %v1926_v4 = vld [vmem:[%s2820_s0 + $0x1a8] sm:$0xff] }
  0x56   :  { %v786_v60 = vadd.f32 %v778_v40, %v766_v33  ;;  %v798_v9 = vmul.f32 %v1879_v26, %v1614_v31  ;;  %1111 = vpow2.f32 %v410_v13  ;;  %v164_v58 = vmax.f32 %v162_v0, %v1793_v19  ;;  %v1980_v40 = vld [vmem:[%s2820_s0 + $0x70] sm:$0xff] }
  0x57   :  { %v605_v35 = vmul.f32 %v597_v63, %v1755_v47  ;;  %v1916_v34 = vadd.f32 %v485_v20, %v484_v27  ;;  %1113 = vpow2.f32 %v426_v7  ;;  %v1929_v61 = vmax.f32 %v171_v43, %v1821_v49 }
  0x58   :  { %v1931_v13 = vpop.eup %1097  ;;  %v805_v47 = vadd.f32 %v1777_v55, %v1773_v28  ;;  %v166_v19 = vmax.f32 %v164_v58, %v1797_v54  ;;  %v1938_v2 = vsel %vm83_vm0, %v1903_v11, -inf  ;;  %v1942_v62 = vsel %vm83_vm0, %v1908_v23, -inf  ;;  %v1952_v28 = vld [vmem:[%s2820_s0 + $0x30] sm:$0xff] }
  0x59   :  { %2922 = vst [vmem:[#allocation33_spill] sm:$0xff] %v1931_v13  ;;  %v613_v59 = vsub.f32 2.0, %v605_v35  ;;  %1115 = vrcp.f32 %v1916_v34  ;;  %v487_v49 = vsel %vm83_vm0, %v1931_v13, 0.0  ;;  %v639_v36 = vmul.f32 %v1931_v13, %v1310_v37 }
  0x5a   :  { %v1954_v55 = vpop.eup %1099  ;;  %v1956_v54 = vadd.f32 %v798_v9, %v786_v60  ;;  %v1959_v5 = vmax.f32 %v166_v19, %v1803_v51  ;;  %v1963_v6 = vsel %vm83_vm0, %v1921_v8, -inf  ;;  %v1967_v17 = vsel %vm83_vm0, %v1926_v4, -inf }
  0x5b   :  { %2923 = vst [vmem:[#allocation34_spill] sm:$0xff] %v1954_v55  ;;  %v1969_v30 = vmul.f32 %v613_v59, %v597_v63  ;;  %v488_v20 = vsel %vm83_vm0, %v1954_v55, 0.0  ;;  %v659_v38 = vmul.f32 %v1954_v55, %v1320_v41  ;;  %v1990_v14 = vsel %vm83_vm0, %v1952_v28, -inf }
  0x5c   :  { %v1982_v12 = vpop.eup %1101  ;;  %v489_v21 = vadd.f32 %v488_v20, %v487_v49  ;;  %v224_v10 = vsub.f32 %v1537_v46, %v1959_v5  ;;  %v232_v50 = vsub.f32 %v1572_v32, %v1959_v5  ;;  %v240_v46 = vsub.f32 %v1577_v25, %v1959_v5 }
  0x5d   :  { %2924 = vst [vmem:[#allocation35_spill] sm:$0xff] %v1969_v30  ;;  %2925 = vst [vmem:[#allocation36_spill] sm:$0xff] %v1982_v12  ;;  %v813_v33 = vmul.f32 %v805_v47, %v1969_v30  ;;  %v490_v7 = vsel %vm83_vm0, %v1982_v12, 0.0  ;;  %v667_v0 = vadd.f32 %v659_v38, %v639_v36  ;;  %v679_v63 = vmul.f32 %v1982_v12, %v1324_v42 }
  0x5e   :  { %v1997_v27 = vpop.eup %1103  ;;  %v491_v43 = vadd.f32 %v490_v7, %v489_v21  ;;  %v248_v32 = vsub.f32 %v1713_v24, %v1959_v5  ;;  %v2005_v60 = vsel %vm83_vm0, %v1980_v40, -inf  ;;  %v256_v25 = vsub.f32 %v1725_v29, %v1959_v5 }
  0x5f   :  { %2926 = vst [vmem:[#allocation37_spill] sm:$0xff] %v1997_v27  ;;  %821 = vst.msk [vmem:[%s2822_s2 + $0x8] sm:$0xff] %vm83_vm0, %v813_v33  ;;  %v492_v9 = vsel %vm83_vm0, %v1997_v27, 0.0  ;;  %v687_v58 = vadd.f32 %v679_v63, %v667_v0  ;;  %v699_v35 = vmul.f32 %v1997_v27, %v1329_v44  ;;  %v264_v19 = vsub.f32 %v1735_v16, %v1959_v5 }
  0x60   :  { %v2017_v24 = vpop.eup %1105  ;;  %v493_v47 = vadd.f32 %v492_v9, %v491_v43  ;;  %v272_v59 = vsub.f32 %v1746_v18, %v1959_v5  ;;  %v300_v49 = vmul.f32 1.442695, %v224_v10  ;;  %v316_v29 = vmul.f32 1.442695, %v232_v50 }
  0x61   :  { %2927 = vst [vmem:[#allocation38_spill] sm:$0xff] %v2017_v24  ;;  %v2023_v36 = vpop.eup %1107  ;;  %v494_v20 = vsel %vm83_vm0, %v2017_v24, 0.0  ;;  %v707_v38 = vadd.f32 %v699_v35, %v687_v58  ;;  %v719_v21 = vmul.f32 %v2017_v24, %v1333_v45  ;;  %v280_v43 = vsub.f32 %v1751_v56, %v1959_v5 }
  0x62   :  { %2928 = vst [vmem:[#allocation39_spill] sm:$0xff] %v2023_v36  ;;  %v2029_v33 = vpop.eup %1109  ;;  %v495_v7 = vadd.f32 %v494_v20, %v493_v47  ;;  %v496_v16 = vsel %vm83_vm0, %v2023_v36, 0.0  ;;  %v739_v18 = vmul.f32 %v2023_v36, %v1354_v52  ;;  %1117 = vpow2.f32 %v300_v49 }
  0x63   :  { %2929 = vst [vmem:[#allocation40_spill] sm:$0xff] %v2029_v33  ;;  %v2035_v10 = vpop.eup %1111  ;;  %v498_v0 = vsel %vm83_vm0, %v2029_v33, 0.0  ;;  %v727_v63 = vadd.f32 %v719_v21, %v707_v38  ;;  %1119 = vpow2.f32 %v316_v29  ;;  %v759_v58 = vmul.f32 %v2029_v33, %v1358_v53 }
  0x64   :  { %2930 = vst [vmem:[#allocation41_spill] sm:$0xff] %v2035_v10  ;;  %v2041_v50 = vpop.eup %1113  ;;  %v497_v9 = vadd.f32 %v496_v16, %v495_v7  ;;  %v288_v35 = vsub.f32 %v1761_v39, %v1959_v5  ;;  %v332_v47 = vmul.f32 1.442695, %v240_v46  ;;  %v500_v49 = vsel %vm83_vm0, %v2035_v10, 0.0  ;;  %v2057_v5 = vld [vmem:[%s2820_s0 + $0xb0] sm:$0xff] }
  0x65   :  { %2931 = vst [vmem:[#allocation42_spill] sm:$0xff] %v2041_v50  ;;  %v747_v20 = vadd.f32 %v739_v18, %v727_v63  ;;  %v779_v38 = vmul.f32 %v2035_v10, %v1374_v57  ;;  %v348_v21 = vmul.f32 1.442695, %v248_v32  ;;  %v364_v51 = vmul.f32 1.442695, %v256_v25  ;;  %v2062_v25 = vld [vmem:[%s2820_s0 + $0x1e8] sm:$0xff] }
  0x66   :  { %v1116_v56 = vpop.eup %1115  ;;  %v499_v29 = vadd.f32 %v498_v0, %v497_v9  ;;  %1121 = vpow2.f32 %v332_v47  ;;  %v380_v7 = vmul.f32 1.442695, %v264_v19  ;;  %v502_v33 = vsel %vm83_vm0, %v2041_v50, 0.0  ;;  %v2095_v47 = vld [vmem:[%s2820_s0 + $0x170] sm:$0xff] }
  0x67   :  { %v582_v16 = vmul.f32 %v1116_v56, %v1916_v34  ;;  %1123 = vpow2.f32 %v348_v21  ;;  %v396_v39 = vmul.f32 1.442695, %v272_v59  ;;  %v767_v18 = vadd.f32 %v759_v58, %v747_v20  ;;  %v2067_v59 = vld [vmem:[%s2820_s0 + $0x228] sm:$0xff]  ;;  %v2083_v58 = vld [vmem:[%s2820_s0 + $0x130] sm:$0xff]  ;;  %v2110_v20 = vld [vmem:[%s2820_s0 + $0x78] sm:$0xff] }
  0x68   :  { %v501_v46 = vadd.f32 %v500_v49, %v499_v29  ;;  %1125 = vpow2.f32 %v364_v51  ;;  %v412_v32 = vmul.f32 1.442695, %v280_v43  ;;  %v428_v0 = vmul.f32 1.442695, %v288_v35  ;;  %v2076_v51 = vld [vmem:[%s2820_s0 + $0xf0] sm:$0xff] }
  0x69   :  { %v590_v19 = vsub.f32 2.0, %v582_v16  ;;  %1127 = vpow2.f32 %v380_v7  ;;  %v2932_v63 = vmax.f32 %v1929_v61, %v1938_v2  ;;  %v188_v35 = vmax.f32 %v1990_v14, %v2005_v60  ;;  %v2121_v7 = vld [vmem:[%s2820_s0 + $0x1b0] sm:$0xff] }
  0x6a   :  { %v2078_v43 = vadd.f32 %v502_v33, %v501_v46  ;;  %1129 = vpow2.f32 %v396_v39  ;;  %v189_v61 = vsel %vm83_vm0, %v2057_v5, -inf  ;;  %v182_v33 = vsel %vm83_vm0, %v2062_v25, -inf }
  0x6b   :  { %v177_v9 = vmax.f32 %v2932_v63, %v1942_v62  ;;  %v598_v2 = vmul.f32 %v1116_v56, %v590_v19  ;;  %1131 = vpow2.f32 %v412_v32  ;;  %v184_v14 = vsel %vm83_vm0, %v2067_v59, -inf  ;;  %v2136_v63 = vld [vmem:[%s2820_s0 + $0x1f0] sm:$0xff] }
  0x6c   :  { %1133 = vrcp.f32 %v2078_v43  ;;  %v190_v60 = vmax.f32 %v188_v35, %v189_v61  ;;  %v191_v49 = vsel %vm83_vm0, %v2076_v51, -inf  ;;  %v2115_v56 = vmul.f32 %v2041_v50, %v1614_v31 }
  0x6d   :  { %v179_v62 = vmax.f32 %v177_v9, %v1963_v6  ;;  %v2105_v6 = vld [vmem:[%s2820_s0 + $0x38] sm:$0xff]  ;;  %v606_v21 = vmul.f32 %v598_v2, %v1916_v34  ;;  %v193_v16 = vsel %vm83_vm0, %v2083_v58, -inf  ;;  %v2125_v39 = vadd.f32 %v779_v38, %v767_v18  ;;  %v2141_v38 = vld [vmem:[%s2820_s0 + $0x230] sm:$0xff] }
  0x6e   :  { %1135 = vpow2.f32 %v428_v0  ;;  %v192_v46 = vmax.f32 %v190_v60, %v191_v49  ;;  %v2129_v34 = vsel %vm83_vm0, %v2095_v47, -inf  ;;  %v2145_v18 = vsel %vm83_vm0, %v2105_v6, -inf  ;;  %v2166_v60 = vld [vmem:[%s2820_s0 + $0xb8] sm:$0xff] }
  0x6f   :  { %v181_v29 = vmax.f32 %v179_v62, %v1967_v17  ;;  %v2131_v32 = vpop.eup %1117  ;;  %v614_v19 = vsub.f32 2.0, %v606_v21  ;;  %v2149_v0 = vsel %vm83_vm0, %v2110_v20, -inf  ;;  %2935 = vst [vmem:[#allocation45_spill] sm:$0xff] %v2166_v60  ;;  %v2183_v10 = vsel %vm83_vm0, %v2136_v63, -inf }
  0x70   :  { %2933 = vst [vmem:[#allocation43_spill] sm:$0xff] %v2131_v32  ;;  %v2151_v9 = vpop.eup %1119  ;;  %v504_v35 = vsel %vm83_vm0, %v2131_v32, 0.0  ;;  %v640_v61 = vmul.f32 %v2131_v32, %v1310_v37  ;;  %v2157_v62 = vmax.f32 %v192_v46, %v193_v16  ;;  %v2179_v16 = vld [vmem:[%s2820_s0 + $0xf8] sm:$0xff] }
  0x71   :  { %v183_v17 = vmax.f32 %v181_v29, %v182_v33  ;;  %2934 = vst [vmem:[#allocation44_spill] sm:$0xff] %v2151_v9  ;;  %v2161_v33 = vsel %vm83_vm0, %v2121_v7, -inf  ;;  %v2168_v49 = vmul.f32 %v614_v19, %v598_v2  ;;  %v505_v21 = vsel %vm83_vm0, %v2151_v9, 0.0  ;;  %2937 = vst [vmem:[#allocation47_spill] sm:$0xff] %v2179_v16 }
  0x72   :  { %v660_v29 = vmul.f32 %v2151_v9, %v1320_v41  ;;  %v506_v46 = vadd.f32 %v505_v21, %v504_v35  ;;  %v2187_v2 = vsel %vm83_vm0, %v2141_v38, -inf  ;;  %v196_v35 = vmax.f32 %v2157_v62, %v2129_v34 }
  0x73   :  { %2936 = vst [vmem:[#allocation46_spill] sm:$0xff] %v2168_v49  ;;  %v2174_v50 = vmax.f32 %v183_v17, %v184_v14  ;;  %v2191_v9 = vpop.eup %1121  ;;  %v814_v14 = vmul.f32 %v1956_v54, %v2168_v49  ;;  %v2199_v21 = vsel %vm83_vm0, %v2166_v60, -inf  ;;  %v2211_v54 = vsel %vm83_vm0, %v2179_v16, -inf }
  0x74   :  { %2938 = vst [vmem:[#allocation48_spill] sm:$0xff] %v2191_v9  ;;  %v668_v17 = vadd.f32 %v660_v29, %v640_v61  ;;  %v2201_v36 = vpop.eup %1123  ;;  %v507_v32 = vsel %vm83_vm0, %v2191_v9, 0.0  ;;  %v680_v19 = vmul.f32 %v2191_v9, %v1324_v42 }
  0x75   :  { %2939 = vst [vmem:[#allocation49_spill] sm:$0xff] %v2201_v36  ;;  %v225_v24 = vsub.f32 %v1766_v48, %v2174_v50  ;;  %v2213_v34 = vpop.eup %1125  ;;  %822 = vst.msk [vmem:[%s2822_s2 + $0x10] sm:$0xff] %vm83_vm0, %v814_v14  ;;  %v508_v61 = vadd.f32 %v507_v32, %v506_v46  ;;  %v509_v62 = vsel %vm83_vm0, %v2201_v36, 0.0  ;;  %v700_v29 = vmul.f32 %v2201_v36, %v1329_v44 }
  0x76   :  { %2940 = vst [vmem:[#allocation50_spill] sm:$0xff] %v2213_v34  ;;  %v233_v48 = vsub.f32 %v1771_v1, %v2174_v50  ;;  %v2225_v49 = vpop.eup %1127  ;;  %v511_v9 = vsel %vm83_vm0, %v2213_v34, 0.0  ;;  %v688_v26 = vadd.f32 %v680_v19, %v668_v17  ;;  %v720_v27 = vmul.f32 %v2213_v34, %v1333_v45 }
  0x77   :  { %2941 = vst [vmem:[#allocation51_spill] sm:$0xff] %v2225_v49  ;;  %v241_v32 = vsub.f32 %v1786_v22, %v2174_v50  ;;  %v2233_v46 = vpop.eup %1129  ;;  %v510_v14 = vadd.f32 %v509_v62, %v508_v61  ;;  %v249_v36 = vsub.f32 %v1903_v11, %v2174_v50  ;;  %v257_v1 = vsub.f32 %v1908_v23, %v2174_v50 }
  0x78   :  { %2942 = vst [vmem:[#allocation52_spill] sm:$0xff] %v2233_v46  ;;  %v265_v30 = vsub.f32 %v1921_v8, %v2174_v50  ;;  %v2241_v3 = vpop.eup %1131  ;;  %v513_v19 = vsel %vm83_vm0, %v2225_v49, 0.0  ;;  %v708_v17 = vadd.f32 %v700_v29, %v688_v26  ;;  %v740_v22 = vmul.f32 %v2225_v49, %v1354_v52 }
  0x79   :  { %v273_v61 = vsub.f32 %v1926_v4, %v2174_v50  ;;  %v1134_v62 = vpop.eup %1133  ;;  %v512_v11 = vadd.f32 %v511_v9, %v510_v14  ;;  %v515_v23 = vsel %vm83_vm0, %v2233_v46, 0.0  ;;  %v760_v8 = vmul.f32 %v2233_v46, %v1358_v53 }
  0x7a   :  { %v281_v34 = vsub.f32 %v2062_v25, %v2174_v50  ;;  %v583_v12 = vmul.f32 %v1134_v62, %v2078_v43  ;;  %v728_v26 = vadd.f32 %v720_v27, %v708_v17  ;;  %v302_v29 = vmul.f32 1.442695, %v225_v24 }
  0x7b   :  { %v318_v55 = vmul.f32 1.442695, %v233_v48  ;;  %v2256_v49 = vpop.eup %1135  ;;  %v514_v13 = vadd.f32 %v513_v19, %v512_v11  ;;  %v517_v4 = vsel %vm83_vm0, %v2241_v3, 0.0  ;;  %v289_v9 = vsub.f32 %v2067_v59, %v2174_v50 }
  0x7c   :  { %v334_v14 = vmul.f32 1.442695, %v241_v32  ;;  %v591_v15 = vsub.f32 2.0, %v583_v12  ;;  %v748_v46 = vadd.f32 %v740_v22, %v728_v26  ;;  %1137 = vpow2.f32 %v302_v29 }
  0x7d   :  { %v350_v16 = vmul.f32 1.442695, %v249_v36  ;;  %v516_v25 = vadd.f32 %v515_v23, %v514_v13  ;;  %1139 = vpow2.f32 %v318_v55  ;;  %v366_v60 = vmul.f32 1.442695, %v257_v1 }
  0x7e   :  { %v382_v27 = vmul.f32 1.442695, %v265_v30  ;;  %v599_v24 = vmul.f32 %v1134_v62, %v591_v15  ;;  %v519_v48 = vsel %vm83_vm0, %v2256_v49, 0.0  ;;  %1141 = vpow2.f32 %v334_v14 }
  0x7f   :  { %v398_v19 = vmul.f32 1.442695, %v273_v61  ;;  %v518_v17 = vadd.f32 %v517_v4, %v516_v25  ;;  %v768_v11 = vadd.f32 %v760_v8, %v748_v46  ;;  %v780_v50 = vmul.f32 %v2241_v3, %v1374_v57 }
  0x80   :  { %1143 = vpow2.f32 %v350_v16  ;;  %v607_v12 = vmul.f32 %v599_v24, %v2078_v43  ;;  %v414_v36 = vmul.f32 1.442695, %v281_v34  ;;  %v198_v13 = vmax.f32 %v196_v35, %v2161_v33  ;;  %v2280_v33 = vld [vmem:[%s2820_s0 + $0x138] sm:$0xff] }
  0x81   :  { %1145 = vpow2.f32 %v366_v60  ;;  %v2268_v55 = vadd.f32 %v519_v48, %v518_v17  ;;  %v430_v15 = vmul.f32 1.442695, %v289_v9  ;;  %v2943_v30 = vmax.f32 %v2145_v18, %v2149_v0  ;;  %v2285_v60 = vld [vmem:[%s2820_s0 + $0x178] sm:$0xff]  ;;  %v2290_v18 = vld [vmem:[%s2821_s1 + $0x10] sm:$0xff]  ;;  %v2944_v0 = vld [vmem:[#allocation2_spill] sm:$0xff] }
  0x82   :  { %1147 = vpow2.f32 %v382_v27  ;;  %v615_v32 = vsub.f32 2.0, %v607_v12  ;;  %v807_v46 = vadd.f32 %v2115_v56, %v2125_v39  ;;  %v200_v43 = vmax.f32 %v198_v13, %v2183_v10 }
  0x83   :  { %v207_v59 = vmax.f32 %v2943_v30, %v2199_v21  ;;  %1149 = vpow2.f32 %v398_v19  ;;  %v2945_v56 = vsub.s32 2, %v2944_v0  ;;  %v2946_v10 = vsub.s32 3, %v2944_v0 }
  0x84   :  { %1151 = vrcp.f32 %v2268_v55  ;;  %v2305_v35 = vmul.f32 %v2256_v49, %v1614_v31  ;;  %v2307_v21 = vmul.f32 %v615_v32, %v599_v24  ;;  %v2310_v34 = vmax.f32 %v200_v43, %v2187_v2 }
  0x85   :  { %v2295_v39 = vrot.slane %v2290_v18, %v2945_v56  ;;  %v2300_v16 = vrot.slane %v2290_v18, %v2946_v10  ;;  %1153 = vpow2.f32 %v414_v36  ;;  %v209_v1 = vmax.f32 %v207_v59, %v2211_v54 }
  0x86   :  { %2947 = vst [vmem:[#allocation2_spill] sm:$0xff] %v2307_v21  ;;  %v2313_v22 = vadd.f32 %v780_v50, %v768_v11  ;;  %1155 = vpow2.f32 %v430_v15  ;;  %v210_v61 = vsel %vm83_vm0, %v2280_v33, -inf  ;;  %v2319_v62 = vsel %vm83_vm0, %v2285_v60, -inf  ;;  %v2361_v11 = vld [vmem:[%s2820_s0 + $0x1b8] sm:$0xff] }
  0x87   :  { %v815_v31 = vmul.f32 %v807_v46, %v2307_v21  ;;  %v226_v23 = vsub.f32 %v1952_v28, %v2310_v34  ;;  %v234_v2 = vsub.f32 %v1980_v40, %v2310_v34  ;;  %v242_v54 = vsub.f32 %v2057_v5, %v2310_v34 }
  0x88   :  { %v250_v8 = vsub.f32 %v2076_v51, %v2310_v34  ;;  %v258_v26 = vsub.f32 %v2083_v58, %v2310_v34  ;;  %v266_v29 = vsub.f32 %v2095_v47, %v2310_v34  ;;  %v274_v4 = vsub.f32 %v2121_v7, %v2310_v34 }
  0x89   :  { %823 = vst.msk [vmem:[%s2822_s2 + $0x18] sm:$0xff] %vm83_vm0, %v815_v31  ;;  %v282_v28 = vsub.f32 %v2136_v63, %v2310_v34  ;;  %v304_v40 = vmul.f32 1.442695, %v226_v23  ;;  %v320_v5 = vmul.f32 1.442695, %v234_v2  ;;  %v211_v51 = vmax.f32 %v209_v1, %v210_v61  ;;  %v2342_v9 = vpop.eup %1137  ;;  %v2389_v23 = vld [vmem:[%s2820_s0 + $0x1f8] sm:$0xff] }
  0x8a   :  { %v290_v58 = vsub.f32 %v2141_v38, %v2310_v34  ;;  %v336_v47 = vmul.f32 1.442695, %v242_v54  ;;  %v352_v14 = vmul.f32 1.442695, %v250_v8  ;;  %v368_v25 = vmul.f32 1.442695, %v258_v26  ;;  %v2346_v7 = vpop.eup %1139 }
  0x8b   :  { %v521_v27 = vsel %vm83_vm0, %v2342_v9, 0.0  ;;  %v641_v24 = vmul.f32 %v2342_v9, %v1310_v37  ;;  %1157 = vpow2.f32 %v304_v40  ;;  %v384_v63 = vmul.f32 1.442695, %v266_v29  ;;  %v2352_v48 = vpop.eup %1141 }
  0x8c   :  { %v522_v19 = vsel %vm83_vm0, %v2346_v7, 0.0  ;;  %v661_v38 = vmul.f32 %v2346_v7, %v1320_v41  ;;  %1159 = vpow2.f32 %v320_v5  ;;  %v400_v17 = vmul.f32 1.442695, %v274_v4 }
  0x8d   :  { %v2363_v50 = vpop.eup %1143  ;;  %v523_v12 = vadd.f32 %v522_v19, %v521_v27  ;;  %v524_v36 = vsel %vm83_vm0, %v2352_v48, 0.0  ;;  %v681_v13 = vmul.f32 %v2352_v48, %v1324_v42  ;;  %1161 = vpow2.f32 %v336_v47  ;;  %v2952_v27 = vld [vmem:[#allocation3_spill] sm:$0xff] }
  0x8e   :  { %v2369_v15 = vpop.eup %1145  ;;  %v526_v30 = vsel %vm83_vm0, %v2363_v50, 0.0  ;;  %v669_v59 = vadd.f32 %v661_v38, %v641_v24  ;;  %v701_v32 = vmul.f32 %v2363_v50, %v1329_v44  ;;  %1163 = vpow2.f32 %v352_v14  ;;  %v2953_v24 = vld [vmem:[#allocation5_spill] sm:$0xff] }
  0x8f   :  { %v2375_v46 = vpop.eup %1147  ;;  %v525_v43 = vadd.f32 %v524_v36, %v523_v12  ;;  %1165 = vpow2.f32 %v368_v25  ;;  %v213_v56 = vmax.f32 %v211_v51, %v2319_v62  ;;  %v214_v10 = vsel %vm83_vm0, %v2361_v11, -inf }
  0x90   :  { %2948 = vst [vmem:[#allocation53_spill] sm:$0xff] %v2375_v46  ;;  %v2380_v34 = vpop.eup %1149  ;;  %v528_v1 = vsel %vm83_vm0, %v2369_v15, 0.0  ;;  %v689_v61 = vadd.f32 %v681_v13, %v669_v59  ;;  %v721_v31 = vmul.f32 %v2369_v15, %v1333_v45  ;;  %1167 = vpow2.f32 %v384_v63  ;;  %v2954_v13 = vld [vmem:[#allocation4_spill] sm:$0xff] }
  0x91   :  { %2949 = vst [vmem:[#allocation54_spill] sm:$0xff] %v2380_v34  ;;  %v1152_v2 = vpop.eup %1151  ;;  %v527_v62 = vadd.f32 %v526_v30, %v525_v43  ;;  %v530_v54 = vsel %vm83_vm0, %v2375_v46, 0.0  ;;  %v741_v8 = vmul.f32 %v2375_v46, %v1354_v52  ;;  %1169 = vpow2.f32 %v400_v17  ;;  %v2955_v30 = vld [vmem:[#allocation6_spill] sm:$0xff] }
  0x92   :  { %v2395_v26 = vpop.eup %1153  ;;  %v584_v29 = vmul.f32 %v1152_v2, %v2268_v55  ;;  %v709_v4 = vadd.f32 %v701_v32, %v689_v61  ;;  %v416_v40 = vmul.f32 1.442695, %v282_v28  ;;  %v432_v5 = vmul.f32 1.442695, %v290_v58  ;;  %v2411_v28 = vld [vmem:[%s2820_s0 + $0x238] sm:$0xff] }
  0x93   :  { %2950 = vst [vmem:[#allocation55_spill] sm:$0xff] %v2395_v26  ;;  %v2398_v51 = vpop.eup %1155  ;;  %v529_v47 = vadd.f32 %v528_v1, %v527_v62  ;;  %v215_v14 = vmax.f32 %v213_v56, %v214_v10  ;;  %v216_v25 = vsel %vm83_vm0, %v2389_v23, -inf  ;;  %v832_v63 = vmul.f32 %v2953_v24, %v2952_v27 }
  0x94   :  { %2951 = vst [vmem:[#allocation56_spill] sm:$0xff] %v2398_v51  ;;  %v592_v19 = vsub.f32 2.0, %v584_v29  ;;  %v532_v38 = vsel %vm83_vm0, %v2380_v34, 0.0  ;;  %v729_v17 = vadd.f32 %v721_v31, %v709_v4  ;;  %v761_v12 = vmul.f32 %v2380_v34, %v1358_v53 }
  0x95   :  { %v531_v58 = vadd.f32 %v530_v54, %v529_v47  ;;  %v534_v36 = vsel %vm83_vm0, %v2395_v26, 0.0  ;;  %1171 = vpow2.f32 %v416_v40  ;;  %v852_v59 = vmul.f32 %v2955_v30, %v2954_v13 }
  0x96   :  { %v600_v32 = vmul.f32 %v1152_v2, %v592_v19  ;;  %v749_v43 = vadd.f32 %v741_v8, %v729_v17  ;;  %1173 = vpow2.f32 %v432_v5  ;;  %v217_v56 = vmax.f32 %v215_v14, %v216_v25 }
  0x97   :  { %v808_v10 = vadd.f32 %v2305_v35, %v2313_v22  ;;  %v533_v1 = vadd.f32 %v532_v38, %v531_v58  ;;  %v218_v61 = vsel %vm83_vm0, %v2411_v28, -inf  ;;  %v2421_v31 = vadd.f32 %v852_v59, %v832_v63  ;;  %v2435_v22 = vld [vmem:[%s2821_s1 + $0x8] ss:$0 sm:$0xff] }
  0x98   :  { %v2423_v62 = vpop.eup %1157  ;;  %v608_v54 = vmul.f32 %v600_v32, %v2268_v55  ;;  %v536_v29 = vsel %vm83_vm0, %v2398_v51, 0.0  ;;  %v769_v2 = vadd.f32 %v761_v12, %v749_v43  ;;  %v781_v8 = vmul.f32 %v2395_v26, %v1374_v57 }
  0x99   :  { %v2430_v4 = vpop.eup %1159  ;;  %v535_v35 = vadd.f32 %v534_v36, %v533_v1  ;;  %v801_v40 = vmul.f32 %v2435_v22, %v2398_v51  ;;  %v538_v55 = vsel %vm83_vm0, %v2423_v62, 0.0  ;;  %v642_v5 = vmul.f32 %v2423_v62, %v1310_v37 }
  0x9a   :  { %v2443_v47 = vpop.eup %1161  ;;  %v616_v14 = vsub.f32 2.0, %v608_v54  ;;  %v539_v25 = vsel %vm83_vm0, %v2430_v4, 0.0  ;;  %v662_v24 = vmul.f32 %v2430_v4, %v1320_v41  ;;  %v2449_v63 = vmax.f32 %v217_v56, %v218_v61  ;;  %v2958_v54 = vld [vmem:[#allocation7_spill] sm:$0xff] }
  0x9b   :  { %v2451_v19 = vpop.eup %1163  ;;  %v2453_v38 = vadd.f32 %v536_v29, %v535_v35  ;;  %v540_v17 = vadd.f32 %v539_v25, %v538_v55  ;;  %v541_v12 = vsel %vm83_vm0, %v2443_v47, 0.0  ;;  %v682_v58 = vmul.f32 %v2443_v47, %v1324_v42 }
  0x9c   :  { %v2459_v36 = vpop.eup %1165  ;;  %v2461_v30 = vmul.f32 %v616_v14, %v600_v32  ;;  %v789_v59 = vadd.f32 %v781_v8, %v769_v2  ;;  %v543_v43 = vsel %vm83_vm0, %v2451_v19, 0.0  ;;  %v670_v56 = vadd.f32 %v662_v24, %v642_v5  ;;  %v2959_v8 = vld [vmem:[#allocation8_spill] sm:$0xff] }
  0x9d   :  { %2956 = vst [vmem:[#allocation3_spill] sm:$0xff] %v2459_v36  ;;  %v2465_v1 = vpop.eup %1167  ;;  %1175 = vrcp.f32 %v2453_v38  ;;  %v542_v61 = vadd.f32 %v541_v12, %v540_v17  ;;  %v872_v29 = vmul.f32 %v2958_v54, %v2295_v39  ;;  %v545_v32 = vsel %vm83_vm0, %v2459_v36, 0.0 }
  0x9e   :  { %2957 = vst [vmem:[#allocation5_spill] sm:$0xff] %v2461_v30  ;;  %v2470_v35 = vpop.eup %1169  ;;  %v816_v55 = vmul.f32 %v808_v10, %v2461_v30  ;;  %v227_v2 = vsub.f32 %v2105_v6, %v2449_v63  ;;  %v892_v5 = vmul.f32 %v2959_v8, %v2300_v16  ;;  %v690_v25 = vadd.f32 %v682_v58, %v670_v56  ;;  %v2962_v8 = vld [vmem:[#allocation45_spill] sm:$0xff] }
  0x9f   :  { %v544_v14 = vadd.f32 %v543_v43, %v542_v61  ;;  %v702_v24 = vmul.f32 %v2451_v19, %v1329_v44  ;;  %v2960_v17 = vsub.s32 4, %v2944_v0  ;;  %v2490_v10 = vadd.f32 %v801_v40, %v789_v59  ;;  %v2963_v40 = vld [vmem:[#allocation47_spill] sm:$0xff] }
  0xa0   :  { %824 = vst.msk [vmem:[%s2822_s2 + $0x20] sm:$0xff] %vm83_vm0, %v816_v55  ;;  %v547_v6 = vsel %vm83_vm0, %v2465_v1, 0.0  ;;  %v235_v58 = vsub.f32 %v2110_v20, %v2449_v63  ;;  %v2961_v43 = vsub.s32 5, %v2944_v0  ;;  %v722_v54 = vmul.f32 %v2459_v36, %v1333_v45 }
  0xa1   :  { %v2484_v12 = vrot.slane %v2290_v18, %v2960_v17  ;;  %v546_v61 = vadd.f32 %v545_v32, %v544_v14  ;;  %v243_v55 = vsub.f32 %v2962_v8, %v2449_v63  ;;  %v251_v59 = vsub.f32 %v2963_v40, %v2449_v63 }
  0xa2   :  { %v2499_v56 = vrot.slane %v2290_v18, %v2961_v43  ;;  %v2507_v17 = vpop.eup %1171  ;;  %v549_v20 = vsel %vm83_vm0, %v2470_v35, 0.0  ;;  %v259_v30 = vsub.f32 %v2280_v33, %v2449_v63  ;;  %v267_v32 = vsub.f32 %v2285_v60, %v2449_v63 }
  0xa3   :  { %v306_v14 = vmul.f32 1.442695, %v227_v2  ;;  %v2515_v43 = vpop.eup %1173  ;;  %v548_v51 = vadd.f32 %v547_v6, %v546_v61  ;;  %v710_v21 = vadd.f32 %v702_v24, %v690_v25  ;;  %v275_v8 = vsub.f32 %v2361_v11, %v2449_v63 }
  0xa4   :  { %2964 = vst [vmem:[#allocation4_spill] sm:$0xff] %v2515_v43  ;;  %v322_v40 = vmul.f32 1.442695, %v235_v58  ;;  %v551_v36 = vsel %vm83_vm0, %v2507_v17, 0.0  ;;  %v283_v26 = vsub.f32 %v2389_v23, %v2449_v63  ;;  %v291_v33 = vsub.f32 %v2411_v28, %v2449_v63 }
  0xa5   :  { %1177 = vpow2.f32 %v306_v14  ;;  %v550_v60 = vadd.f32 %v549_v20, %v548_v51  ;;  %v338_v2 = vmul.f32 1.442695, %v243_v55  ;;  %v354_v34 = vmul.f32 1.442695, %v251_v59  ;;  %v2965_v51 = vld [vmem:[#allocation9_spill] sm:$0xff] }
  0xa6   :  { %1179 = vpow2.f32 %v322_v40  ;;  %v553_v25 = vsel %vm83_vm0, %v2515_v43, 0.0  ;;  %v742_v11 = vmul.f32 %v2465_v1, %v1354_v52  ;;  %v370_v24 = vmul.f32 1.442695, %v259_v30 }
  0xa7   :  { %v386_v6 = vmul.f32 1.442695, %v267_v32  ;;  %v552_v58 = vadd.f32 %v551_v36, %v550_v60  ;;  %v730_v61 = vadd.f32 %v722_v54, %v710_v21  ;;  %1181 = vpow2.f32 %v338_v2  ;;  %v2971_v2 = vld [vmem:[#allocation15_spill] sm:$0xff] }
  0xa8   :  { %v402_v23 = vmul.f32 1.442695, %v275_v8  ;;  %1183 = vpow2.f32 %v354_v34  ;;  %v418_v46 = vmul.f32 1.442695, %v283_v26  ;;  %v880_v28 = vadd.f32 %v872_v29, %v2421_v31  ;;  %v2967_v34 = vld [vmem:[#allocation10_spill] sm:$0xff] }
  0xa9   :  { %v912_v63 = vmul.f32 %v2965_v51, %v2484_v12  ;;  %v2532_v55 = vadd.f32 %v553_v25, %v552_v58  ;;  %1185 = vpow2.f32 %v370_v24  ;;  %v434_v59 = vmul.f32 1.442695, %v291_v33  ;;  %v2970_v33 = vld [vmem:[#allocation14_spill] sm:$0xff] }
  0xaa   :  { %v2966_v20 = vsub.s32 6, %v2944_v0  ;;  %v1176_v36 = vpop.eup %1175  ;;  %1187 = vpow2.f32 %v386_v6  ;;  %v900_v21 = vadd.f32 %v892_v5, %v880_v28  ;;  %v932_v26 = vmul.f32 %v2967_v34, %v2499_v56  ;;  %v2969_v5 = vld [vmem:[#allocation11_spill] sm:$0xff] }
  0xab   :  { %v2968_v31 = vsub.s32 7, %v2944_v0  ;;  %v585_v54 = vmul.f32 %v1176_v36, %v2453_v38  ;;  %1189 = vrcp.f32 %v2532_v55  ;;  %v750_v32 = vadd.f32 %v742_v11, %v730_v61  ;;  %v2972_v11 = vld [vmem:[#allocation16_spill] sm:$0xff] }
  0xac   :  { %v2537_v30 = vrot.slane %v2290_v18, %v2966_v20  ;;  %v762_v14 = vmul.f32 %v2470_v35, %v1358_v53  ;;  %1191 = vpow2.f32 %v402_v23  ;;  %v920_v8 = vadd.f32 %v912_v63, %v900_v21  ;;  %v2973_v61 = vld [vmem:[#allocation12_spill] sm:$0xff]  ;;  %v2974_v63 = vld [vmem:[#allocation17_spill] sm:$0xff] }
  0xad   :  { %v2544_v29 = vrot.slane %v2290_v18, %v2968_v31  ;;  %v833_v60 = vmul.f32 %v2970_v33, %v2952_v27  ;;  %v593_v0 = vsub.f32 2.0, %v585_v54  ;;  %1193 = vpow2.f32 %v418_v46  ;;  %v2557_v18 = vld [vmem:[%s2821_s1 + $0x18] ss:$0 sm:$0xff]  ;;  %v2977_v33 = vld [vmem:[#allocation18_spill] sm:$0xff] }
  0xae   :  { %v952_v40 = vmul.f32 %v2969_v5, %v2537_v30  ;;  %v853_v25 = vmul.f32 %v2971_v2, %v2954_v13  ;;  %v873_v24 = vmul.f32 %v2972_v11, %v2295_v39  ;;  %v782_v6 = vmul.f32 %v2507_v17, %v1374_v57  ;;  %v2975_v31 = vld [vmem:[#allocation13_spill] sm:$0xff]  ;;  %v2976_v5 = vld [vmem:[#allocation23_spill] sm:$0xff] }
  0xaf   :  { %1195 = vpow2.f32 %v434_v59  ;;  %v940_v58 = vadd.f32 %v932_v26, %v920_v8  ;;  %v972_v23 = vmul.f32 %v2973_v61, %v2544_v29  ;;  %v601_v46 = vmul.f32 %v1176_v36, %v593_v0  ;;  %v2979_v11 = vld [vmem:[#allocation19_spill] sm:$0xff] }
  0xb0   :  { %v802_v28 = vmul.f32 %v2435_v22, %v2515_v43  ;;  %v861_v51 = vadd.f32 %v853_v25, %v833_v60  ;;  %v893_v20 = vmul.f32 %v2974_v63, %v2300_v16  ;;  %v770_v21 = vadd.f32 %v762_v14, %v750_v32  ;;  %v2978_v60 = vld [vmem:[#allocation24_spill] sm:$0xff] }
  0xb1   :  { %v960_v34 = vadd.f32 %v952_v40, %v940_v58  ;;  %v992_v54 = vmul.f32 %v2975_v31, %v2557_v18  ;;  %v834_v59 = vmul.f32 %v2976_v5, %v2952_v27  ;;  %v609_v8 = vmul.f32 %v601_v46, %v2453_v38 }
  0xb2   :  { %v2575_v26 = vpop.eup %1177  ;;  %v881_v36 = vadd.f32 %v873_v24, %v861_v51  ;;  %v913_v0 = vmul.f32 %v2977_v33, %v2484_v12  ;;  %v854_v2 = vmul.f32 %v2978_v60, %v2954_v13  ;;  %v933_v58 = vmul.f32 %v2979_v11, %v2499_v56  ;;  %v2980_v60 = vld [vmem:[#allocation25_spill] sm:$0xff] }
  0xb3   :  { %v2582_v25 = vpop.eup %1179  ;;  %v555_v32 = vsel %vm83_vm0, %v2575_v26, 0.0  ;;  %v643_v14 = vmul.f32 %v2575_v26, %v1310_v37  ;;  %v980_v40 = vadd.f32 %v972_v23, %v960_v34  ;;  %v617_v38 = vsub.f32 2.0, %v609_v8 }
  0xb4   :  { %v556_v24 = vsel %vm83_vm0, %v2582_v25, 0.0  ;;  %v663_v61 = vmul.f32 %v2582_v25, %v1320_v41  ;;  %v901_v51 = vadd.f32 %v893_v20, %v881_v36  ;;  %v2594_v63 = vpop.eup %1181  ;;  %v862_v33 = vadd.f32 %v854_v2, %v834_v59  ;;  %v2982_v2 = vld [vmem:[#allocation32_spill] sm:$0xff] }
  0xb5   :  { %v557_v31 = vadd.f32 %v556_v24, %v555_v32  ;;  %v1000_v5 = vadd.f32 %v992_v54, %v980_v40  ;;  %v874_v37 = vmul.f32 %v2980_v60, %v2295_v39  ;;  %v2598_v23 = vpop.eup %1183  ;;  %v2600_v34 = vmul.f32 %v617_v38, %v601_v46  ;;  %v2985_v60 = vld [vmem:[#allocation21_spill] sm:$0xff] }
  0xb6   :  { %v558_v8 = vsel %vm83_vm0, %v2594_v63, 0.0  ;;  %v671_v11 = vadd.f32 %v663_v61, %v643_v14  ;;  %v683_v41 = vmul.f32 %v2594_v63, %v1324_v42  ;;  %v2606_v20 = vpop.eup %1185  ;;  %v560_v54 = vsel %vm83_vm0, %v2598_v23, 0.0 }
  0xb7   :  { %2981 = vst [vmem:[#allocation6_spill] sm:$0xff] %v2600_v34  ;;  %v559_v36 = vadd.f32 %v558_v8, %v557_v31  ;;  %v703_v59 = vmul.f32 %v2598_v23, %v1329_v44  ;;  %v1008_v32 = vmul.f32 %v1000_v5, %v2982_v2  ;;  %v2613_v46 = vpop.eup %1187  ;;  %v817_v40 = vmul.f32 %v2490_v10, %v2600_v34  ;;  %v2984_v31 = vld [vmem:[#allocation20_spill] sm:$0xff] }
  0xb8   :  { %2983 = vst [vmem:[#allocation7_spill] sm:$0xff] %v2613_v46  ;;  %v790_v14 = vadd.f32 %v782_v6, %v770_v21  ;;  %v562_v42 = vsel %vm83_vm0, %v2606_v20, 0.0  ;;  %v691_v38 = vadd.f32 %v683_v41, %v671_v11  ;;  %v1190_v24 = vpop.eup %1189  ;;  %v921_v44 = vadd.f32 %v913_v0, %v901_v51  ;;  %v2986_v0 = vld [vmem:[#allocation26_spill] sm:$0xff] }
  0xb9   :  { %v561_v61 = vadd.f32 %v560_v54, %v559_v36  ;;  %1031 = vst.msk [vmem:[%s2822_s2 + $0x40] sm:$0xff] %vm83_vm0, %v1008_v32  ;;  %v953_v5 = vmul.f32 %v2984_v31, %v2537_v30  ;;  %v973_v8 = vmul.f32 %v2985_v60, %v2544_v29  ;;  %v2627_v10 = vpop.eup %1191  ;;  %825 = vst.msk [vmem:[%s2822_s2 + $0x28] sm:$0xff] %vm83_vm0, %v817_v40  ;;  %v564_v21 = vsel %vm83_vm0, %v2613_v46, 0.0 }
  0xba   :  { %v586_v6 = vmul.f32 %v1190_v24, %v2532_v55  ;;  %v882_v11 = vadd.f32 %v874_v37, %v862_v33  ;;  %v894_v51 = vmul.f32 %v2986_v0, %v2300_v16  ;;  %v2638_v41 = vpop.eup %1193  ;;  %v711_v54 = vadd.f32 %v703_v59, %v691_v38  ;;  %v2987_v33 = vld [vmem:[#allocation27_spill] sm:$0xff]  ;;  %v2988_v59 = vld [vmem:[#allocation22_spill] sm:$0xff] }
  0xbb   :  { %v563_v36 = vadd.f32 %v562_v42, %v561_v61  ;;  %v723_v2 = vmul.f32 %v2606_v20, %v1333_v45  ;;  %v941_v32 = vadd.f32 %v933_v58, %v921_v44  ;;  %v810_v60 = vadd.f32 %v802_v28, %v790_v14  ;;  %v2989_v28 = vld [vmem:[#allocation28_spill] sm:$0xff] }
  0xbc   :  { %v2642_v31 = vpop.eup %1195  ;;  %v594_v40 = vsub.f32 2.0, %v586_v6  ;;  %v566_v34 = vsel %vm83_vm0, %v2627_v10, 0.0  ;;  %v914_v37 = vmul.f32 %v2987_v33, %v2484_v12  ;;  %v743_v0 = vmul.f32 %v2613_v46, %v1354_v52 }
  0xbd   :  { %v565_v43 = vadd.f32 %v564_v21, %v563_v36  ;;  %v961_v42 = vadd.f32 %v953_v5, %v941_v32  ;;  %v993_v38 = vmul.f32 %v2988_v59, %v2557_v18  ;;  %v568_v58 = vsel %vm83_vm0, %v2638_v41, 0.0  ;;  %v2990_v32 = vld [vmem:[#allocation29_spill] sm:$0xff] }
  0xbe   :  { %v602_v45 = vmul.f32 %v1190_v24, %v594_v40  ;;  %v902_v61 = vadd.f32 %v894_v51, %v882_v11  ;;  %v934_v14 = vmul.f32 %v2989_v28, %v2499_v56  ;;  %v570_v6 = vsel %vm83_vm0, %v2642_v31, 0.0  ;;  %v2991_v24 = vld [vmem:[#allocation33_spill] sm:$0xff]  ;;  %v2992_v51 = vld [vmem:[#allocation34_spill] sm:$0xff] }
  0xbf   :  { %v567_v44 = vadd.f32 %v566_v34, %v565_v43  ;;  %v731_v21 = vadd.f32 %v723_v2, %v711_v54  ;;  %v981_v36 = vadd.f32 %v973_v8, %v961_v42  ;;  %v954_v33 = vmul.f32 %v2990_v32, %v2537_v30  ;;  %v2993_v43 = vld [vmem:[#allocation36_spill] sm:$0xff]  ;;  %v2994_v54 = vld [vmem:[#allocation30_spill] sm:$0xff]  ;;  %v2995_v42 = vld [vmem:[#allocation35_spill] sm:$0xff] }
  0xc0   :  { %v610_v52 = vmul.f32 %v602_v45, %v2532_v55  ;;  %v922_v5 = vadd.f32 %v914_v37, %v902_v61  ;;  %v835_v40 = vmul.f32 %v2991_v24, %v2952_v27  ;;  %v855_v28 = vmul.f32 %v2992_v51, %v2954_v13 }
  0xc1   :  { %v569_v59 = vadd.f32 %v568_v58, %v567_v44  ;;  %v1001_v11 = vadd.f32 %v993_v38, %v981_v36  ;;  %v875_v34 = vmul.f32 %v2993_v43, %v2295_v39  ;;  %v763_v8 = vmul.f32 %v2627_v10, %v1358_v53  ;;  %v2996_v38 = vld [vmem:[#allocation37_spill] sm:$0xff]  ;;  %v3002_v43 = vld [vmem:[#allocation48_spill] sm:$0xff] }
  0xc2   :  { %v618_v46 = vsub.f32 2.0, %v610_v52  ;;  %v942_v55 = vadd.f32 %v934_v14, %v922_v5  ;;  %v974_v2 = vmul.f32 %v2994_v54, %v2544_v29  ;;  %v863_v58 = vadd.f32 %v855_v28, %v835_v40  ;;  %v2997_v52 = vld [vmem:[#allocation31_spill] sm:$0xff] }
  0xc3   :  { %v2671_v37 = vadd.f32 %v570_v6, %v569_v59  ;;  %v1009_v61 = vmul.f32 %v1001_v11, %v2995_v42  ;;  %v895_v44 = vmul.f32 %v2996_v38, %v2300_v16  ;;  %v751_v32 = vadd.f32 %v743_v0, %v731_v21  ;;  %v2999_v5 = vld [vmem:[#allocation43_spill] sm:$0xff]  ;;  %v3001_v11 = vld [vmem:[#allocation44_spill] sm:$0xff] }
  0xc4   :  { %v2676_v36 = vmul.f32 %v618_v46, %v602_v45  ;;  %v962_v24 = vadd.f32 %v954_v33, %v942_v55  ;;  %v994_v51 = vmul.f32 %v2997_v52, %v2557_v18  ;;  %v2683_v53 = vmul.f32 %v2638_v41, %v1374_v57  ;;  %v2998_v46 = vld [vmem:[#allocation38_spill] sm:$0xff]  ;;  %v3000_v40 = vld [vmem:[#allocation39_spill] sm:$0xff]  ;;  %v3003_v55 = vld [vmem:[#allocation40_spill] sm:$0xff] }
  0xc5   :  { %1197 = vrcp.f32 %v2671_v37  ;;  %1032 = vst.msk [vmem:[%s2822_s2 + $0x48] sm:$0xff] %vm83_vm0, %v1009_v61  ;;  %v883_v14 = vadd.f32 %v875_v34, %v863_v58  ;;  %v915_v45 = vmul.f32 %v2998_v46, %v2484_v12  ;;  %v2694_v6 = vmul.f32 %v2435_v22, %v2642_v31  ;;  %v3005_v58 = vld [vmem:[#allocation42_spill] sm:$0xff] }
  0xc6   :  { %v818_v0 = vmul.f32 %v810_v60, %v2676_v36  ;;  %v982_v21 = vadd.f32 %v974_v2, %v962_v24  ;;  %v836_v57 = vmul.f32 %v2999_v5, %v2952_v27  ;;  %v935_v59 = vmul.f32 %v3000_v40, %v2499_v56  ;;  %v3004_v2 = vld [vmem:[#allocation41_spill] sm:$0xff] }
  0xc7   :  { %v903_v33 = vadd.f32 %v895_v44, %v883_v14  ;;  %v856_v28 = vmul.f32 %v3001_v11, %v2954_v13  ;;  %v876_v34 = vmul.f32 %v3002_v43, %v2295_v39  ;;  %v2708_v22 = vadd.f32 %v763_v8, %v751_v32  ;;  %v3006_v24 = vld [vmem:[#allocation49_spill] sm:$0xff]  ;;  %v3007_v14 = vld [vmem:[#allocation46_spill] sm:$0xff] }
  0xc8   :  { %826 = vst.msk [vmem:[%s2822_s2 + $0x30] sm:$0xff] %vm83_vm0, %v818_v0  ;;  %v1002_v60 = vadd.f32 %v994_v51, %v982_v21  ;;  %v955_v54 = vmul.f32 %v3003_v55, %v2537_v30  ;;  %v975_v42 = vmul.f32 %v3004_v2, %v2544_v29  ;;  %v995_v38 = vmul.f32 %v3005_v58, %v2557_v18  ;;  %v3008_v21 = vld [vmem:[#allocation50_spill] sm:$0xff] }
  0xc9   :  { %v923_v61 = vadd.f32 %v915_v45, %v903_v33  ;;  %v864_v44 = vadd.f32 %v856_v28, %v836_v57  ;;  %v896_v52 = vmul.f32 %v3006_v24, %v2300_v16  ;;  %v837_v8 = vmul.f32 %v2342_v9, %v2952_v27  ;;  %v3009_v9 = vld [vmem:[#allocation51_spill] sm:$0xff] }
  0xca   :  { %v1010_v46 = vmul.f32 %v1002_v60, %v3007_v14  ;;  %v857_v32 = vmul.f32 %v2346_v7, %v2954_v13  ;;  %v877_v51 = vmul.f32 %v2352_v48, %v2295_v39  ;;  %v916_v5 = vmul.f32 %v3008_v21, %v2484_v12  ;;  %v3010_v7 = vld [vmem:[#allocation52_spill] sm:$0xff] }
  0xcb   :  { %v943_v0 = vadd.f32 %v935_v59, %v923_v61  ;;  %v884_v45 = vadd.f32 %v876_v34, %v864_v44  ;;  %v897_v57 = vmul.f32 %v2363_v50, %v2300_v16  ;;  %v936_v33 = vmul.f32 %v3009_v9, %v2499_v56 }
  0xcc   :  { %1033 = vst.msk [vmem:[%s2822_s2 + $0x50] sm:$0xff] %vm83_vm0, %v1010_v46  ;;  %v956_v40 = vmul.f32 %v3010_v7, %v2537_v30  ;;  %v976_v48 = vmul.f32 %v2241_v3, %v2544_v29  ;;  %v865_v59 = vadd.f32 %v857_v32, %v837_v8  ;;  %v917_v50 = vmul.f32 %v2369_v15, %v2484_v12  ;;  %v3011_v15 = vld [vmem:[#allocation53_spill] sm:$0xff] }
  0xcd   :  { %v963_v11 = vadd.f32 %v955_v54, %v943_v0  ;;  %v904_v28 = vadd.f32 %v896_v52, %v884_v45  ;;  %v838_v43 = vmul.f32 %v2423_v62, %v2952_v27  ;;  %v858_v60 = vmul.f32 %v2430_v4, %v2954_v13  ;;  %v3012_v62 = vld [vmem:[#allocation54_spill] sm:$0xff]  ;;  %v3013_v4 = vld [vmem:[#allocation55_spill] sm:$0xff] }
  0xce   :  { %v885_v34 = vadd.f32 %v877_v51, %v865_v59  ;;  %v878_v55 = vmul.f32 %v2443_v47, %v2295_v39  ;;  %v898_v2 = vmul.f32 %v2451_v19, %v2300_v16  ;;  %v996_v54 = vmul.f32 %v2256_v49, %v2557_v18  ;;  %v3014_v19 = vld [vmem:[#allocation3_spill] sm:$0xff] }
  0xcf   :  { %v983_v3 = vadd.f32 %v975_v42, %v963_v11  ;;  %v924_v61 = vadd.f32 %v916_v5, %v904_v28  ;;  %v937_v58 = vmul.f32 %v3011_v15, %v2499_v56  ;;  %v957_v24 = vmul.f32 %v3012_v62, %v2537_v30  ;;  %v3015_v5 = vld [vmem:[#allocation2_spill] sm:$0xff] }
  0xd0   :  { %v905_v44 = vadd.f32 %v897_v57, %v885_v34  ;;  %v977_v52 = vmul.f32 %v3013_v4, %v2544_v29  ;;  %v866_v14 = vadd.f32 %v858_v60, %v838_v43  ;;  %v918_v42 = vmul.f32 %v3014_v19, %v2484_v12 }
  0xd1   :  { %v1003_v47 = vadd.f32 %v995_v38, %v983_v3  ;;  %v944_v46 = vadd.f32 %v936_v33, %v924_v61  ;;  %v839_v8 = vmul.f32 %v2575_v26, %v2952_v27  ;;  %v859_v0 = vmul.f32 %v2582_v25, %v2954_v13  ;;  %v3016_v13 = vld [vmem:[#allocation56_spill] sm:$0xff]  ;;  %v3018_v3 = vld [vmem:[#allocation5_spill] sm:$0xff] }
  0xd2   :  { %v1198_v49 = vpop.eup %1197  ;;  %v925_v32 = vadd.f32 %v917_v50, %v905_v44  ;;  %v886_v51 = vadd.f32 %v878_v55, %v866_v14  ;;  %v879_v45 = vmul.f32 %v2594_v63, %v2295_v39  ;;  %v899_v9 = vmul.f32 %v2598_v23, %v2300_v16  ;;  %v3017_v55 = vld [vmem:[#allocation7_spill] sm:$0xff] }
  0xd3   :  { %v587_v21 = vmul.f32 %v1198_v49, %v2671_v37  ;;  %v1011_v38 = vmul.f32 %v1003_v47, %v3015_v5  ;;  %v964_v57 = vadd.f32 %v956_v40, %v944_v46  ;;  %v938_v27 = vmul.f32 %v2465_v1, %v2499_v56 }
  0xd4   :  { %v945_v33 = vadd.f32 %v937_v58, %v925_v32  ;;  %v906_v7 = vadd.f32 %v898_v2, %v886_v51  ;;  %v867_v26 = vadd.f32 %v859_v0, %v839_v8  ;;  %v997_v25 = vmul.f32 %v3016_v13, %v2557_v18 }
  0xd5   :  { %v595_v59 = vsub.f32 2.0, %v587_v21  ;;  %1034 = vst.msk [vmem:[%s2822_s2 + $0x58] sm:$0xff] %vm83_vm0, %v1011_v38  ;;  %v984_v39 = vadd.f32 %v976_v48, %v964_v57  ;;  %v958_v63 = vmul.f32 %v2470_v35, %v2537_v30  ;;  %v919_v1 = vmul.f32 %v2606_v20, %v2484_v12  ;;  %v3019_v12 = vld [vmem:[#allocation4_spill] sm:$0xff] }
  0xd6   :  { %v965_v16 = vadd.f32 %v957_v24, %v945_v33  ;;  %v926_v23 = vadd.f32 %v918_v42, %v906_v7  ;;  %v887_v40 = vadd.f32 %v879_v45, %v867_v26  ;;  %v791_v28 = vadd.f32 %v2683_v53, %v2708_v22 }
  0xd7   :  { %v603_v11 = vmul.f32 %v1198_v49, %v595_v59  ;;  %v1004_v50 = vadd.f32 %v996_v54, %v984_v39  ;;  %v978_v48 = vmul.f32 %v2507_v17, %v2544_v29  ;;  %v939_v35 = vmul.f32 %v3017_v55, %v2499_v56  ;;  %v3020_v56 = vld [vmem:[#allocation6_spill] sm:$0xff] }
  0xd8   :  { %v985_v43 = vadd.f32 %v977_v52, %v965_v16  ;;  %v946_v34 = vadd.f32 %v938_v27, %v926_v23  ;;  %v907_v60 = vadd.f32 %v899_v9, %v887_v40  ;;  %v998_v20 = vmul.f32 %v3019_v12, %v2557_v18 }
  0xd9   :  { %v611_v2 = vmul.f32 %v603_v11, %v2671_v37  ;;  %v1012_v61 = vmul.f32 %v1004_v50, %v3018_v3  ;;  %v959_v22 = vmul.f32 %v2627_v10, %v2537_v30  ;;  %v811_v54 = vadd.f32 %v2694_v6, %v791_v28 }
  0xda   :  { %v1005_v15 = vadd.f32 %v997_v25, %v985_v43  ;;  %v966_v58 = vadd.f32 %v958_v63, %v946_v34  ;;  %v927_v53 = vadd.f32 %v919_v1, %v907_v60  ;;  %v979_v24 = vmul.f32 %v2638_v41, %v2544_v29 }
  0xdb   :  { %v619_v17 = vsub.f32 2.0, %v611_v2  ;;  %1035 = vst.msk [vmem:[%s2822_s2 + $0x60] sm:$0xff] %vm83_vm0, %v1012_v61  ;;  %v999_v6 = vmul.f32 %v2642_v31, %v2557_v18 }
  0xdc   :  { %v1013_v37 = vmul.f32 %v1005_v15, %v3020_v56  ;;  %v986_v44 = vadd.f32 %v978_v48, %v966_v58  ;;  %v947_v62 = vadd.f32 %v939_v35, %v927_v53 }
  0xdd   :  { %v627_v4 = vmul.f32 %v619_v17, %v603_v11 }
  0xde   :  { %1036 = vst.msk [vmem:[%s2822_s2 + $0x68] sm:$0xff] %vm83_vm0, %v1013_v37  ;;  %v1006_v30 = vadd.f32 %v998_v20, %v986_v44  ;;  %v967_v10 = vadd.f32 %v959_v22, %v947_v62 }
  0xdf   :  { %v819_v52 = vmul.f32 %v811_v54, %v627_v4 }
  0xe0   :  { %v1014_v14 = vmul.f32 %v1006_v30, %v2676_v36  ;;  %v987_v47 = vadd.f32 %v979_v24, %v967_v10 }
  0xe1   :  { %827 = vst.msk [vmem:[%s2822_s2 + $0x38] sm:$0xff] %vm83_vm0, %v819_v52 }
  0xe2   :  { %1037 = vst.msk [vmem:[%s2822_s2 + $0x70] sm:$0xff] %vm83_vm0, %v1014_v14  ;;  %v1007_v29 = vadd.f32 %v999_v6, %v987_v47 }
  0xe4   :  { %v1015_v41 = vmul.f32 %v1007_v29, %v627_v4 }
  0xe6   :  { %1038 = vst.msk [vmem:[%s2822_s2 + $0x78] sm:$0xff] %vm83_vm0, %v1015_v41 }

// kernel: dceiflow_forward.6
= control target key start
LH: loop header
LB: loop body
LE: loop exit
PB: predicated region body
PF: predicated region fallthrough
CT: control target
= control target key end

     0   :  { %8 = vsyncpa [#allocation3], 0  ;;  %s156_s5 = smov [#allocation4]   ;;  %s235_s0 = inlined_call_operand.vmem [shape: f32[64,256], index: 0, kind: input, shape index: {}]   ;;  %s236_s1 = inlined_call_operand.hbm [shape: f32[64,128], index: 1, kind: output, shape index: {0}]   ;;  %s237_s2 = inlined_call_operand.hbm [shape: f32[64,128], index: 2, kind: output, shape index: {1}]  }
   0x1   :  { %v12_v0 = vld [vmem:[%s235_s0] sm:$0xff]  ;;  %v14_v1 = vld [vmem:[%s235_s0 + $0x10] sm:$0xff]  ;;  %v13_v7 = vld [vmem:[%s235_s0 + $0x8] sm:$0xff]  ;;  %s77_s6 = sshll.u32 %s156_s5, 4  ;;  %s78_s6 = int_to_ptr.vmem [resolvable:$true] %s77_s6 }
   0x2   :  { %v16_v2 = vld [vmem:[%s235_s0 + $0x20] sm:$0xff]  ;;  %96 = vtanh.f32 %v12_v0  ;;  %v18_v3 = vld [vmem:[%s235_s0 + $0x30] sm:$0xff]  ;;  %v44_v9 = vmax.f32 %v13_v7, 0.0  ;;  %v15_v10 = vld [vmem:[%s235_s0 + $0x18] sm:$0xff] }
   0x3   :  { %v20_v4 = vld [vmem:[%s235_s0 + $0x40] sm:$0xff]  ;;  %98 = vtanh.f32 %v14_v1  ;;  %v22_v5 = vld [vmem:[%s235_s0 + $0x50] sm:$0xff]  ;;  %v17_v11 = vld [vmem:[%s235_s0 + $0x28] sm:$0xff]  ;;  %v45_v13 = vmax.f32 %v15_v10, 0.0 }
   0x4   :  { %v24_v6 = vld [vmem:[%s235_s0 + $0x60] sm:$0xff]  ;;  %100 = vtanh.f32 %v16_v2  ;;  %v26_v8 = vld [vmem:[%s235_s0 + $0x70] sm:$0xff]  ;;  %v19_v12 = vld [vmem:[%s235_s0 + $0x38] sm:$0xff]  ;;  %v46_v14 = vmax.f32 %v17_v11, 0.0  ;;  %52 = vst [vmem:[#allocation4] sm:$0xff] %v44_v9 }
   0x5   :  { %102 = vtanh.f32 %v18_v3  ;;  %v47_v15 = vmax.f32 %v19_v12, 0.0  ;;  %v21_v16 = vld [vmem:[%s235_s0 + $0x48] sm:$0xff]  ;;  %v23_v17 = vld [vmem:[%s235_s0 + $0x58] sm:$0xff] }
   0x6   :  { %v25_v18 = vld [vmem:[%s235_s0 + $0x68] sm:$0xff]  ;;  %104 = vtanh.f32 %v20_v4  ;;  %v48_v19 = vmax.f32 %v21_v16, 0.0  ;;  %v49_v20 = vmax.f32 %v23_v17, 0.0  ;;  %v27_v22 = vld [vmem:[%s235_s0 + $0x78] sm:$0xff] }
   0x7   :  { %v50_v21 = vmax.f32 %v25_v18, 0.0 }
   0x8   :  { %9 = vsyncpa [#allocation5], 0  ;;  %106 = vtanh.f32 %v22_v5  ;;  %53 = vst [vmem:[#allocation4 + $0x8] sm:$0xff] %v45_v13  ;;  %v51_v23 = vmax.f32 %v27_v22, 0.0  ;;  %s112_s15 = scalar_lea.vmem %s78_s6, 1024  ;;  %p117_p1 = scmp.lt.s32.totalorder %s78_s6, %s78_s6 }
   0x9   :  { %54 = vst [vmem:[#allocation4 + $0x10] sm:$0xff] %v46_v14  ;;  %55 = vst [vmem:[#allocation4 + $0x18] sm:$0xff] %v47_v15  ;;  %108 = vtanh.f32 %v24_v6  ;;  %p113_p0 = scmp.ne.s32.totalorder %s78_s6, %s112_s15  ;;  %p118_p2 = scmp.lt.s32.totalorder %s112_s15, %s112_s15 }
   0xa   :  { %56 = vst [vmem:[#allocation4 + $0x20] sm:$0xff] %v48_v19  ;;  %57 = vst [vmem:[#allocation4 + $0x28] sm:$0xff] %v49_v20  ;;  %110 = vtanh.f32 %v26_v8 }
   0xb   :  { %58 = vst [vmem:[#allocation4 + $0x30] sm:$0xff] %v50_v21  ;;  %59 = vst [vmem:[#allocation4 + $0x38] sm:$0xff] %v51_v23  ;;  %p119_p3 = por %p118_p2, %p117_p1 }
   0xd   :  { %p120_p4 = pnand %p119_p3, %p113_p0 }
   0xf   :  { %123 = shalt.err (!%p120_p4)
}
  0x10   :  { %s157_s0 = smov 128   ;;  %s158_s16 = smov 8   ;;  %v97_v24 = vpop.eup %96 }
  0x11   :  { %83 = dma.vmem_to_hbm [thread:$0]  %s78_s6, 1024, %s237_s2, [#allocation5], %s157_s0, %s157_s0, %s158_s16   ;;  %v99_v25 = vpop.eup %98  ;;  %36 = vst [vmem:[#allocation2] sm:$0xff] %v97_v24 }
  0x12   :  { %v101_v26 = vpop.eup %100  ;;  %37 = vst [vmem:[#allocation2 + $0x8] sm:$0xff] %v99_v25  ;;  %s159_s19 = smov [#allocation2]  }
  0x13   :  { %v103_v27 = vpop.eup %102  ;;  %38 = vst [vmem:[#allocation2 + $0x10] sm:$0xff] %v101_v26  ;;  %s65_s20 = sshll.u32 %s159_s19, 4  ;;  %s66_s20 = int_to_ptr.vmem [resolvable:$true] %s65_s20 }
  0x14   :  { %v105_v28 = vpop.eup %104  ;;  %39 = vst [vmem:[#allocation2 + $0x18] sm:$0xff] %v103_v27  ;;  %s132_s2 = scalar_lea.vmem %s66_s20, 1024  ;;  %p137_p6 = scmp.lt.s32.totalorder %s66_s20, %s66_s20 }
  0x15   :  { %v107_v29 = vpop.eup %106  ;;  %40 = vst [vmem:[#allocation2 + $0x20] sm:$0xff] %v105_v28  ;;  %p133_p5 = scmp.ne.s32.totalorder %s66_s20, %s132_s2  ;;  %p138_p7 = scmp.lt.s32.totalorder %s132_s2, %s132_s2 }
  0x16   :  { %v109_v30 = vpop.eup %108  ;;  %41 = vst [vmem:[#allocation2 + $0x28] sm:$0xff] %v107_v29 }
  0x17   :  { %v111_v31 = vpop.eup %110  ;;  %42 = vst [vmem:[#allocation2 + $0x30] sm:$0xff] %v109_v30  ;;  %p139_p8 = por %p138_p7, %p137_p6 }
  0x18   :  { %43 = vst [vmem:[#allocation2 + $0x38] sm:$0xff] %v111_v31 }
  0x19   :  { %p140_p9 = pnand %p139_p8, %p133_p5 }
  0x1b   :  { %143 = shalt.err (!%p140_p9)
}
  0x1c   :  { %71 = dma.vmem_to_hbm [thread:$0]  %s66_s20, 1024, %s236_s1, [#allocation3], %s157_s0, %s157_s0, %s158_s16  }
  0x1d   :  { %152 = dma.done.wait [#allocation3], 1024  }
  0x1e   :  { %153 = vsyncadd [#allocation3], 4294966272 }
  0x1f   :  { %154 = dma.done.wait [#allocation5], 1024  }
  0x20   :  { %155 = vsyncadd [#allocation5], 4294966272 }
  0x21   :  { %90 = vsyncpa [#allocation3], 1 }
  0x22   :  { %91 = vsyncpa [#allocation5], 1 }

// kernel: dceiflow_forward.5
= control target key start
LH: loop header
LB: loop body
LE: loop exit
PB: predicated region body
PF: predicated region fallthrough
CT: control target
= control target key end

     0   :  { %s513_s0 = inlined_call_operand.vmem [shape: bf16[64,256], index: 0, kind: input, shape index: {}]   ;;  %s514_s1 = inlined_call_operand.vmem [shape: bf16[256,64], index: 1, kind: input, shape index: {}]   ;;  %s515_s2 = inlined_call_operand.hbm [shape: f32[64,64], index: 2, kind: output, shape index: {}]  }
   0x1   :  { %v362_v0 = vld [vmem:[%s514_s1 + $0x78] sm:$0xff]   ;;  %v364_v2 = vld [vmem:[%s514_s1 + $0x70] sm:$0xff]   ;;  %v366_v4 = vld [vmem:[%s514_s1 + $0x68] sm:$0xff]  }
   0x2   :  { %v363_v1 = vld [vmem:[%s514_s1 + $0x38] sm:$0xff]   ;;  %303 = vmatprep.subr.bf16.mxu0 %v362_v0  ;;  %343 = vmatprep.subr.bf16.mxu1 %v362_v0  ;;  %v365_v3 = vld [vmem:[%s514_s1 + $0x30] sm:$0xff]   ;;  %v367_v5 = vld [vmem:[%s514_s1 + $0x28] sm:$0xff]  }
   0x3   :  { %304 = vmatpush3.bf16.msra.mxu0 %v363_v1  ;;  %351 = vmatpush3.bf16.msra.mxu1 %v363_v1  ;;  %v368_v6 = vld [vmem:[%s514_s1 + $0x60] sm:$0xff]   ;;  %v370_v8 = vld [vmem:[%s514_s1 + $0x58] sm:$0xff]   ;;  %v372_v10 = vld [vmem:[%s514_s1 + $0x50] sm:$0xff]  }
   0x4   :  { %305 = vmatprep.subr.bf16.mxu0 %v364_v2  ;;  %344 = vmatprep.subr.bf16.mxu1 %v364_v2  ;;  %v369_v7 = vld [vmem:[%s514_s1 + $0x20] sm:$0xff]   ;;  %v371_v9 = vld [vmem:[%s514_s1 + $0x18] sm:$0xff]   ;;  %v373_v13 = vld [vmem:[%s514_s1 + $0x10] sm:$0xff]  }
   0x5   :  { %v380_v11 = vld [vmem:[%s513_s0 + $0x4] ss:$8 sps:$4 sm:$0xff]  }
   0x6   :  { %v383_v12 = vld [vmem:[%s513_s0 + $0x24] ss:$8 sps:$4 sm:$0xff]   ;;  %221 = vmatprep.mubr.bf16.mxu0 %v380_v11 }
   0x7   :  { %306 = vmatpush3.bf16.msra.mxu0 %v365_v3  ;;  %352 = vmatpush3.bf16.msra.mxu1 %v365_v3  ;;  %v374_v14 = vld [vmem:[%s514_s1 + $0x48] sm:$0xff]  }
   0x8   :  { %307 = vmatprep.subr.bf16.mxu0 %v366_v4  ;;  %345 = vmatprep.subr.bf16.mxu1 %v366_v4 }
   0x9   :  { %237 = vmatprep.mubr.bf16.mxu1 %v383_v12 }
   0xb   :  { %308 = vmatpush3.bf16.msra.mxu0 %v367_v5  ;;  %353 = vmatpush3.bf16.msra.mxu1 %v367_v5 }
   0xc   :  { %309 = vmatprep.subr.bf16.mxu0 %v368_v6  ;;  %346 = vmatprep.subr.bf16.mxu1 %v368_v6 }
   0xf   :  { %310 = vmatpush3.bf16.msra.mxu0 %v369_v7  ;;  %354 = vmatpush3.bf16.msra.mxu1 %v369_v7 }
  0x10   :  { %311 = vmatprep.subr.bf16.mxu0 %v370_v8  ;;  %347 = vmatprep.subr.bf16.mxu1 %v370_v8 }
  0x13   :  { %312 = vmatpush3.bf16.msra.mxu0 %v371_v9  ;;  %355 = vmatpush3.bf16.msra.mxu1 %v371_v9 }
  0x14   :  { %313 = vmatprep.subr.bf16.mxu0 %v372_v10  ;;  %348 = vmatprep.subr.bf16.mxu1 %v372_v10 }
  0x15   :  { %7 = vsyncpa [#allocation3], 0  ;;  %v375_v15 = vld [vmem:[%s514_s1 + $0x8] sm:$0xff]   ;;  %v376_v16 = vld [vmem:[%s514_s1 + $0x40] sm:$0xff]   ;;  %vm254_vm0 = vcmask 523264  }
  0x16   :  { %v377_v17 = vld [vmem:[%s514_s1] sm:$0xff]   ;;  %v384_v20 = vld [vmem:[%s513_s0 + $0x14] ss:$8 sps:$4 sm:$0xff]   ;;  %v388_v22 = vld [vmem:[%s513_s0 + $0x10] ss:$8 sps:$4 sm:$0xff]  }
  0x17   :  { %314 = vmatpush3.bf16.msra.mxu0 %v373_v13  ;;  %356 = vmatpush3.bf16.msra.mxu1 %v373_v13  ;;  %v378_v18 = vld [vmem:[%s513_s0] ss:$8 sps:$4 sm:$0xff]   ;;  %v386_v21 = vld [vmem:[%s513_s0 + $0x34] ss:$8 sps:$4 sm:$0xff]   ;;  %v389_v23 = vld [vmem:[%s513_s0 + $0x30] ss:$8 sps:$4 sm:$0xff]  }
  0x18   :  { %315 = vmatprep.subr.bf16.mxu0 %v374_v14  ;;  %349 = vmatprep.subr.bf16.mxu1 %v374_v14  ;;  %v381_v19 = vld [vmem:[%s513_s0 + $0x20] ss:$8 sps:$4 sm:$0xff]   ;;  %s412_s0 = smov [#allocation2]  }
  0x19   :  { %s268_s28 = sshll.u32 %s412_s0, 4  ;;  %s269_s28 = int_to_ptr.vmem [resolvable:$true] %s268_s28 }
  0x1a   :  { %s390_s29 = scalar_lea.vmem %s269_s28, 1024  ;;  %p395_p1 = scmp.lt.s32.totalorder %s269_s28, %s269_s28 }
  0x1b   :  { %316 = vmatpush3.bf16.msra.mxu0 %v375_v15  ;;  %357 = vmatpush3.bf16.msra.mxu1 %v375_v15  ;;  %p391_p0 = scmp.ne.s32.totalorder %s269_s28, %s390_s29  ;;  %p396_p2 = scmp.lt.s32.totalorder %s390_s29, %s390_s29 }
  0x1c   :  { %317 = vmatprep.subr.bf16.mxu0 %v376_v16  ;;  %350 = vmatprep.subr.bf16.mxu1 %v376_v16 }
  0x1d   :  { %p397_p3 = por %p396_p2, %p395_p1 }
  0x1f   :  { %318 = vmatpush3.bf16.msra.mxu0 %v377_v17  ;;  %358 = vmatpush3.bf16.msra.mxu1 %v377_v17  ;;  %p398_p4 = pnand %p397_p3, %p391_p0 }
  0x22   :  { %222 = vmatmul.mubr.bf16.vlgmr.msra.gmra.mxu0 %v378_v18  ;;  %238 = vmatmul.mubr.bf16.vlgmr.msra.gmra.mxu1 %v381_v19 }
  0x23   :  { %229 = vmatprep.mubr.bf16.mxu0 %v384_v20  ;;  %245 = vmatprep.mubr.bf16.mxu1 %v386_v21 }
  0x2a   :  { %230 = vmatmul.mubr.bf16.gmra.mxu0 %v388_v22  ;;  %246 = vmatmul.mubr.bf16.gmra.mxu1 %v389_v23 }
  0xe2   :  { %v319_v24 = vpop.f32.mrf.mxu0  ;;  %v331_v25 = vpop.f32.mrf.mxu1 }
  0xe4   :  { %v320_v26 = vpop.f32.mrf.mxu0  ;;  %v332_v27 = vpop.f32.mrf.mxu1 }
  0xe5   :  { %v321_v28 = vadd.f32 %v320_v26, %v319_v24  ;;  %v333_v29 = vadd.f32 %v332_v27, %v331_v25 }
  0xe6   :  { %v322_v30 = vpop.f32.mrf.mxu0  ;;  %v334_v31 = vpop.f32.mrf.mxu1 }
  0xe7   :  { %255 = vst.msk [vmem:[#allocation2] sm:$0xff] %vm254_vm0, %v321_v28  ;;  %259 = vst.msk [vmem:[#allocation2 + $0x20] sm:$0xff] %vm254_vm0, %v333_v29 }
  0xe8   :  { %v323_v32 = vpop.f32.mrf.mxu0  ;;  %v335_v33 = vpop.f32.mrf.mxu1 }
  0xe9   :  { %v324_v34 = vadd.f32 %v323_v32, %v322_v30  ;;  %v336_v35 = vadd.f32 %v335_v33, %v334_v31 }
  0xea   :  { %v325_v36 = vpop.f32.mrf.mxu0  ;;  %v337_v37 = vpop.f32.mrf.mxu1 }
  0xeb   :  { %256 = vst.msk [vmem:[#allocation2 + $0x8] sm:$0xff] %vm254_vm0, %v324_v34  ;;  %260 = vst.msk [vmem:[#allocation2 + $0x28] sm:$0xff] %vm254_vm0, %v336_v35 }
  0xec   :  { %v326_v38 = vpop.f32.mrf.mxu0  ;;  %v338_v39 = vpop.f32.mrf.mxu1 }
  0xed   :  { %v327_v40 = vadd.f32 %v326_v38, %v325_v36  ;;  %v339_v41 = vadd.f32 %v338_v39, %v337_v37 }
  0xee   :  { %v328_v42 = vpop.f32.mrf.mxu0  ;;  %v340_v43 = vpop.f32.mrf.mxu1 }
  0xef   :  { %257 = vst.msk [vmem:[#allocation2 + $0x10] sm:$0xff] %vm254_vm0, %v327_v40  ;;  %261 = vst.msk [vmem:[#allocation2 + $0x30] sm:$0xff] %vm254_vm0, %v339_v41 }
  0xf0   :  { %v329_v44 = vpop.f32.mrf.mxu0  ;;  %v341_v45 = vpop.f32.mrf.mxu1 }
  0xf1   :  { %v330_v46 = vadd.f32 %v329_v44, %v328_v42  ;;  %v342_v47 = vadd.f32 %v341_v45, %v340_v43 }
  0xf3   :  { %258 = vst.msk [vmem:[#allocation2 + $0x18] sm:$0xff] %vm254_vm0, %v330_v46  ;;  %262 = vst.msk [vmem:[#allocation2 + $0x38] sm:$0xff] %vm254_vm0, %v342_v47 }
  0xf4   :  { %401 = shalt.err (!%p398_p4)
}
  0xf5   :  { %s413_s30 = smov 128   ;;  %s414_s3 = smov 8  }
  0xf6   :  { %274 = dma.vmem_to_hbm [thread:$0]  %s269_s28, 1024, %s515_s2, [#allocation3], %s413_s30, %s413_s30, %s414_s3  }
  0xf7   :  { %410 = dma.done.wait [#allocation3], 1024  }
  0xf8   :  { %411 = vsyncadd [#allocation3], 4294966272 }
  0xf9   :  { %278 = vsyncpa [#allocation3], 1 }

// kernel: dceiflow_forward.4
= control target key start
LH: loop header
LB: loop body
LE: loop exit
PB: predicated region body
PF: predicated region fallthrough
CT: control target
= control target key end

     0   :  { %vm894_vm0 = vcmask 523264   ;;  %vm1265_vm1 = vcmask 1040384   ;;  %vm2402_vm2 = vcmask 1046528   ;;  %s10929_s2 = inlined_call_operand.vmem [shape: bf16[256,192], index: 2, kind: input, shape index: {}]   ;;  %s10930_s4 = inlined_call_operand.vmem [shape: bf16[256,192], index: 4, kind: input, shape index: {}]   ;;  %s10931_s0 = inlined_call_operand.vmem [shape: f32[64,256], index: 0, kind: input, shape index: {}]   ;;  %s10932_s1 = inlined_call_operand.vmem [shape: bf16[64,256], index: 1, kind: input, shape index: {}]   ;;  %s10933_s7 = inlined_call_operand.vmem [shape: bf16[9,192,256], index: 7, kind: input, shape index: {}]   ;;  %s10934_s6 = inlined_call_operand.vmem [shape: bf16[9,192,256], index: 6, kind: input, shape index: {}]   ;;  %s10935_s9 = inlined_call_operand.vmem [shape: f32[64,3], index: 9, kind: input, shape index: {}]   ;;  %s10936_s3 = inlined_call_operand.vmem [shape: f32[1,192], index: 3, kind: input, shape index: {}]   ;;  %s10937_s5 = inlined_call_operand.vmem [shape: f32[1,192], index: 5, kind: input, shape index: {}]   ;;  %s10938_s10 = inlined_call_operand.vmem [shape: f32[64,256], index: 10, kind: output, shape index: {}]   ;;  %s10939_s8 = inlined_call_operand.vmem [shape: f32[1,256], index: 8, kind: input, shape index: {}]  }
   0x1   :  { %v7070_v0 = vld [vmem:[%s10929_s2 + $0x74] ss:$8 sps:$4 sm:$0xff]   ;;  %v7074_v2 = vld [vmem:[%s10929_s2 + $0x70] ss:$8 sps:$4 sm:$0xff]   ;;  %v7076_v4 = vld [vmem:[%s10929_s2 + $0x64] ss:$8 sps:$4 sm:$0xff]  }
   0x2   :  { %v7072_v1 = vld [vmem:[%s10930_s4 + $0x74] ss:$8 sps:$4 sm:$0xff]   ;;  %264 = vmatprep.subr.bf16.mxu0 %v7070_v0  ;;  %v7075_v3 = vld [vmem:[%s10930_s4 + $0x70] ss:$8 sps:$4 sm:$0xff]   ;;  %v7078_v5 = vld [vmem:[%s10930_s4 + $0x64] ss:$8 sps:$4 sm:$0xff]  }
   0x3   :  { %605 = vmatprep.subr.bf16.mxu1 %v7072_v1  ;;  %265 = vmatpush1.bf16.msra.mxu0 %v7074_v2  ;;  %v7080_v6 = vld [vmem:[%s10929_s2 + $0x60] ss:$8 sps:$4 sm:$0xff]   ;;  %v7082_v8 = vld [vmem:[%s10929_s2 + $0x54] ss:$8 sps:$4 sm:$0xff]   ;;  %v7086_v10 = vld [vmem:[%s10929_s2 + $0x50] ss:$8 sps:$4 sm:$0xff]  }
   0x4   :  { %606 = vmatpush1.bf16.msra.mxu1 %v7075_v3  ;;  %266 = vmatprep.subr.bf16.mxu0 %v7076_v4  ;;  %v7081_v7 = vld [vmem:[%s10930_s4 + $0x60] ss:$8 sps:$4 sm:$0xff]   ;;  %v7084_v9 = vld [vmem:[%s10930_s4 + $0x54] ss:$8 sps:$4 sm:$0xff]   ;;  %v7087_v11 = vld [vmem:[%s10930_s4 + $0x50] ss:$8 sps:$4 sm:$0xff]  }
   0x5   :  { %607 = vmatprep.subr.bf16.mxu1 %v7078_v5  ;;  %v7088_v12 = vld [vmem:[%s10929_s2 + $0x44] ss:$8 sps:$4 sm:$0xff]   ;;  %v7092_v14 = vld [vmem:[%s10929_s2 + $0x40] ss:$8 sps:$4 sm:$0xff]   ;;  %v7094_v16 = vld [vmem:[%s10929_s2 + $0x34] ss:$8 sps:$4 sm:$0xff]  }
   0x6   :  { %v7090_v13 = vld [vmem:[%s10930_s4 + $0x44] ss:$8 sps:$4 sm:$0xff]   ;;  %v7093_v15 = vld [vmem:[%s10930_s4 + $0x40] ss:$8 sps:$4 sm:$0xff]   ;;  %v7096_v17 = vld [vmem:[%s10930_s4 + $0x34] ss:$8 sps:$4 sm:$0xff]  }
   0x7   :  { %267 = vmatpush1.bf16.msra.mxu0 %v7080_v6  ;;  %v7098_v18 = vld [vmem:[%s10929_s2 + $0x30] ss:$8 sps:$4 sm:$0xff]   ;;  %v7100_v20 = vld [vmem:[%s10929_s2 + $0x24] ss:$8 sps:$4 sm:$0xff]   ;;  %v7104_v22 = vld [vmem:[%s10929_s2 + $0x20] ss:$8 sps:$4 sm:$0xff]  }
   0x8   :  { %608 = vmatpush1.bf16.msra.mxu1 %v7081_v7  ;;  %268 = vmatprep.subr.bf16.mxu0 %v7082_v8  ;;  %v7099_v19 = vld [vmem:[%s10930_s4 + $0x30] ss:$8 sps:$4 sm:$0xff]   ;;  %v7102_v21 = vld [vmem:[%s10930_s4 + $0x24] ss:$8 sps:$4 sm:$0xff]   ;;  %v7105_v23 = vld [vmem:[%s10930_s4 + $0x20] ss:$8 sps:$4 sm:$0xff]  }
   0x9   :  { %609 = vmatprep.subr.bf16.mxu1 %v7084_v9  ;;  %v7106_v24 = vld [vmem:[%s10929_s2 + $0x14] ss:$8 sps:$4 sm:$0xff]   ;;  %v7110_v26 = vld [vmem:[%s10929_s2 + $0x10] ss:$8 sps:$4 sm:$0xff]   ;;  %v7112_v28 = vld [vmem:[%s10929_s2 + $0x4] ss:$8 sps:$4 sm:$0xff]  }
   0xa   :  { %v7108_v25 = vld [vmem:[%s10930_s4 + $0x14] ss:$8 sps:$4 sm:$0xff]   ;;  %v7111_v27 = vld [vmem:[%s10930_s4 + $0x10] ss:$8 sps:$4 sm:$0xff]   ;;  %v7114_v29 = vld [vmem:[%s10930_s4 + $0x4] ss:$8 sps:$4 sm:$0xff]  }
   0xb   :  { %269 = vmatpush1.bf16.msra.mxu0 %v7086_v10  ;;  %v7116_v30 = vld [vmem:[%s10929_s2] ss:$8 sps:$4 sm:$0xff]   ;;  %v7118_v32 = vld [vmem:[%s10929_s2 + $0xf4] ss:$8 sps:$4 sm:$0xff]   ;;  %v7122_v34 = vld [vmem:[%s10929_s2 + $0xf0] ss:$8 sps:$4 sm:$0xff]  }
   0xc   :  { %610 = vmatpush1.bf16.msra.mxu1 %v7087_v11  ;;  %270 = vmatprep.subr.bf16.mxu0 %v7088_v12  ;;  %v7117_v31 = vld [vmem:[%s10930_s4] ss:$8 sps:$4 sm:$0xff]   ;;  %v7120_v33 = vld [vmem:[%s10930_s4 + $0xf4] ss:$8 sps:$4 sm:$0xff]   ;;  %v7123_v35 = vld [vmem:[%s10930_s4 + $0xf0] ss:$8 sps:$4 sm:$0xff]  }
   0xd   :  { %611 = vmatprep.subr.bf16.mxu1 %v7090_v13  ;;  %v7124_v36 = vld [vmem:[%s10929_s2 + $0xe4] ss:$8 sps:$4 sm:$0xff]   ;;  %v7128_v38 = vld [vmem:[%s10929_s2 + $0xe0] ss:$8 sps:$4 sm:$0xff]   ;;  %v7130_v40 = vld [vmem:[%s10929_s2 + $0xd4] ss:$8 sps:$4 sm:$0xff]  }
   0xe   :  { %v7126_v37 = vld [vmem:[%s10930_s4 + $0xe4] ss:$8 sps:$4 sm:$0xff]   ;;  %v7129_v39 = vld [vmem:[%s10930_s4 + $0xe0] ss:$8 sps:$4 sm:$0xff]   ;;  %v7132_v41 = vld [vmem:[%s10930_s4 + $0xd4] ss:$8 sps:$4 sm:$0xff]  }
   0xf   :  { %271 = vmatpush1.bf16.msra.mxu0 %v7092_v14  ;;  %v7134_v42 = vld [vmem:[%s10929_s2 + $0xd0] ss:$8 sps:$4 sm:$0xff]   ;;  %v7136_v44 = vld [vmem:[%s10929_s2 + $0xc4] ss:$8 sps:$4 sm:$0xff]   ;;  %v7140_v48 = vld [vmem:[%s10929_s2 + $0xc0] ss:$8 sps:$4 sm:$0xff]  }
  0x10   :  { %612 = vmatpush1.bf16.msra.mxu1 %v7093_v15  ;;  %272 = vmatprep.subr.bf16.mxu0 %v7094_v16  ;;  %v7135_v43 = vld [vmem:[%s10930_s4 + $0xd0] ss:$8 sps:$4 sm:$0xff]   ;;  %v7138_v45 = vld [vmem:[%s10930_s4 + $0xc4] ss:$8 sps:$4 sm:$0xff]   ;;  %v7141_v49 = vld [vmem:[%s10930_s4 + $0xc0] ss:$8 sps:$4 sm:$0xff]  }
  0x11   :  { %613 = vmatprep.subr.bf16.mxu1 %v7096_v17  ;;  %v37_v46 = vld [vmem:[%s10931_s0 + $0x8] sm:$0xff]  ;;  %v39_v47 = vld [vmem:[%s10931_s0 + $0x18] sm:$0xff]  ;;  %v36_v4 = vld [vmem:[%s10931_s0] sm:$0xff] }
  0x12   :  { %v53_v50 = vpack.c.bf16 %v39_v47, %v37_v46  ;;  %v7168_v51 = vld [vmem:[%s10932_s1 + $0x4] ss:$8 sps:$4 sm:$0xff]   ;;  %v7142_v52 = vld [vmem:[%s10929_s2 + $0xb4] ss:$8 sps:$4 sm:$0xff]   ;;  %v7146_v54 = vld [vmem:[%s10929_s2 + $0xb0] ss:$8 sps:$4 sm:$0xff]  }
  0x13   :  { %273 = vmatpush1.bf16.msra.mxu0 %v7098_v18  ;;  %v7144_v53 = vld [vmem:[%s10930_s4 + $0xb4] ss:$8 sps:$4 sm:$0xff]   ;;  %637 = vmatprep.mubr.bf16.mxu1 %v7168_v51  ;;  %v7147_v55 = vld [vmem:[%s10930_s4 + $0xb0] ss:$8 sps:$4 sm:$0xff]   ;;  %v7148_v56 = vld [vmem:[%s10929_s2 + $0xa4] ss:$8 sps:$4 sm:$0xff]  }
  0x14   :  { %614 = vmatpush1.bf16.msra.mxu1 %v7099_v19  ;;  %274 = vmatprep.subr.bf16.mxu0 %v7100_v20  ;;  %v7150_v57 = vld [vmem:[%s10930_s4 + $0xa4] ss:$8 sps:$4 sm:$0xff]   ;;  %v7152_v58 = vld [vmem:[%s10929_s2 + $0xa0] ss:$8 sps:$4 sm:$0xff]   ;;  %v7154_v60 = vld [vmem:[%s10929_s2 + $0x94] ss:$8 sps:$4 sm:$0xff]  }
  0x15   :  { %615 = vmatprep.subr.bf16.mxu1 %v7102_v21  ;;  %296 = vmatprep.mubr.bf16.mxu0 %v53_v50  ;;  %v7153_v59 = vld [vmem:[%s10930_s4 + $0xa0] ss:$8 sps:$4 sm:$0xff]   ;;  %v7156_v61 = vld [vmem:[%s10930_s4 + $0x94] ss:$8 sps:$4 sm:$0xff]   ;;  %v7158_v62 = vld [vmem:[%s10929_s2 + $0x90] ss:$8 sps:$4 sm:$0xff]  }
  0x16   :  { %v7159_v63 = vld [vmem:[%s10930_s4 + $0x90] ss:$8 sps:$4 sm:$0xff]   ;;  %v7160_v0 = vld [vmem:[%s10929_s2 + $0x84] ss:$8 sps:$4 sm:$0xff]   ;;  %v7164_v2 = vld [vmem:[%s10929_s2 + $0x80] ss:$8 sps:$4 sm:$0xff]  }
  0x17   :  { %275 = vmatpush1.bf16.msra.mxu0 %v7104_v22  ;;  %v7162_v1 = vld [vmem:[%s10930_s4 + $0x84] ss:$8 sps:$4 sm:$0xff]   ;;  %v7165_v3 = vld [vmem:[%s10930_s4 + $0x80] ss:$8 sps:$4 sm:$0xff]   ;;  %v38_v5 = vld [vmem:[%s10931_s0 + $0x10] sm:$0xff] }
  0x18   :  { %616 = vmatpush1.bf16.msra.mxu1 %v7105_v23  ;;  %276 = vmatprep.subr.bf16.mxu0 %v7106_v24  ;;  %v41_v6 = vld [vmem:[%s10931_s0 + $0x28] sm:$0xff]  ;;  %v43_v7 = vld [vmem:[%s10931_s0 + $0x38] sm:$0xff]  ;;  %v52_v11 = vpack.c.bf16 %v38_v5, %v36_v4  ;;  %v40_v16 = vld [vmem:[%s10931_s0 + $0x20] sm:$0xff] }
  0x19   :  { %617 = vmatprep.subr.bf16.mxu1 %v7108_v25  ;;  %v7180_v8 = vld [vmem:[%s10933_s7 + $0x74] ss:$8 sps:$4 sm:$0xff]   ;;  %v7166_v10 = vld [vmem:[%s10932_s1] ss:$8 sps:$4 sm:$0xff]   ;;  %v55_v13 = vpack.c.bf16 %v43_v7, %v41_v6  ;;  %v7178_v14 = vld [vmem:[%s10933_s7 + $0x70] ss:$8 sps:$4 sm:$0xff]  }
  0x1a   :  { %v7183_v9 = vld [vmem:[%s10934_s6 + $0x74] ss:$8 sps:$4 sm:$0xff]   ;;  %v7181_v15 = vld [vmem:[%s10934_s6 + $0x70] ss:$8 sps:$4 sm:$0xff]   ;;  %v7186_v18 = vld [vmem:[%s10933_s7 + $0x64] ss:$8 sps:$4 sm:$0xff]  }
  0x1b   :  { %277 = vmatpush1.bf16.msra.mxu0 %v7110_v26  ;;  %v7169_v12 = vld [vmem:[%s10932_s1 + $0x14] ss:$8 sps:$4 sm:$0xff]   ;;  %v7189_v19 = vld [vmem:[%s10934_s6 + $0x64] ss:$8 sps:$4 sm:$0xff]   ;;  %v7184_v22 = vld [vmem:[%s10933_s7 + $0x60] ss:$8 sps:$4 sm:$0xff]  }
  0x1c   :  { %618 = vmatpush1.bf16.msra.mxu1 %v7111_v27  ;;  %278 = vmatprep.subr.bf16.mxu0 %v7112_v28  ;;  %v42_v17 = vld [vmem:[%s10931_s0 + $0x30] sm:$0xff]  ;;  %v45_v20 = vld [vmem:[%s10931_s0 + $0x48] sm:$0xff]  ;;  %v47_v21 = vld [vmem:[%s10931_s0 + $0x58] sm:$0xff] }
  0x1d   :  { %619 = vmatprep.subr.bf16.mxu1 %v7114_v29  ;;  %v7187_v23 = vld [vmem:[%s10934_s6 + $0x60] ss:$8 sps:$4 sm:$0xff]   ;;  %v7192_v24 = vld [vmem:[%s10933_s7 + $0x54] ss:$8 sps:$4 sm:$0xff]   ;;  %v54_v26 = vpack.c.bf16 %v42_v17, %v40_v16  ;;  %v7171_v27 = vld [vmem:[%s10932_s1 + $0x10] ss:$8 sps:$4 sm:$0xff]   ;;  %v57_v29 = vpack.c.bf16 %v47_v21, %v45_v20 }
  0x1e   :  { %v7195_v25 = vld [vmem:[%s10934_s6 + $0x54] ss:$8 sps:$4 sm:$0xff]   ;;  %v7172_v28 = vld [vmem:[%s10932_s1 + $0x24] ss:$8 sps:$4 sm:$0xff]   ;;  %v7205_v46 = vld [vmem:[%s10934_s6 + $0x30] ss:$8 sps:$4 sm:$0xff]  }
  0x1f   :  { %279 = vmatpush1.bf16.msra.mxu0 %v7116_v30  ;;  %v7190_v30 = vld [vmem:[%s10933_s7 + $0x50] ss:$8 sps:$4 sm:$0xff]   ;;  %v48_v50 = vld [vmem:[%s10931_s0 + $0x60] sm:$0xff]  ;;  %v7252_v16 = vld [vmem:[%s10933_s7 + $0x134] ss:$8 sps:$4 sm:$0xff]  }
  0x20   :  { %620 = vmatpush1.bf16.msra.mxu1 %v7117_v31  ;;  %280 = vmatprep.subr.bf16.mxu0 %v7118_v32  ;;  %v7193_v31 = vld [vmem:[%s10934_s6 + $0x50] ss:$8 sps:$4 sm:$0xff]   ;;  %v44_v32 = vld [vmem:[%s10931_s0 + $0x40] sm:$0xff]  ;;  %v7255_v17 = vld [vmem:[%s10934_s6 + $0x134] ss:$8 sps:$4 sm:$0xff]  }
  0x21   :  { %621 = vmatprep.subr.bf16.mxu1 %v7120_v33  ;;  %v46_v33 = vld [vmem:[%s10931_s0 + $0x50] sm:$0xff]  ;;  %v7234_v4 = vld [vmem:[%s10933_s7 + $0xa4] ss:$8 sps:$4 sm:$0xff]   ;;  %v7232_v6 = vld [vmem:[%s10933_s7 + $0xa0] ss:$8 sps:$4 sm:$0xff]  }
  0x22   :  { %v50_v51 = vld [vmem:[%s10931_s0 + $0x70] sm:$0xff]  ;;  %v7237_v5 = vld [vmem:[%s10934_s6 + $0xa4] ss:$8 sps:$4 sm:$0xff]   ;;  %v7235_v7 = vld [vmem:[%s10934_s6 + $0xa0] ss:$8 sps:$4 sm:$0xff]  }
  0x23   :  { %281 = vmatpush2.bf16.msra.mxu0 %v7122_v34  ;;  %v7198_v34 = vld [vmem:[%s10933_s7 + $0x44] ss:$8 sps:$4 sm:$0xff]   ;;  %v1196_v20 = vld [vmem:[%s10935_s9 + $0x11] sm:$0xff] }
  0x24   :  { %622 = vmatpush2.bf16.msra.mxu1 %v7123_v35  ;;  %282 = vmatprep.subr.bf16.mxu0 %v7124_v36  ;;  %v7201_v35 = vld [vmem:[%s10934_s6 + $0x44] ss:$8 sps:$4 sm:$0xff]  }
  0x25   :  { %623 = vmatprep.subr.bf16.mxu1 %v7126_v37  ;;  %v49_v36 = vld [vmem:[%s10931_s0 + $0x68] sm:$0xff]  ;;  %v51_v37 = vld [vmem:[%s10931_s0 + $0x78] sm:$0xff] }
  0x26   :  { %v59_v47 = vpack.c.bf16 %v51_v37, %v49_v36  ;;  %v1199_v21 = vld [vmem:[%s10935_s9 + $0x29] sm:$0xff]  ;;  %v94_v36 = vlaneseq }
  0x27   :  { %283 = vmatpush2.bf16.msra.mxu0 %v7128_v38  ;;  %v7196_v38 = vld [vmem:[%s10933_s7 + $0x40] ss:$8 sps:$4 sm:$0xff]  }
  0x28   :  { %624 = vmatpush2.bf16.msra.mxu1 %v7129_v39  ;;  %284 = vmatprep.subr.bf16.mxu0 %v7130_v40  ;;  %v7199_v39 = vld [vmem:[%s10934_s6 + $0x40] ss:$8 sps:$4 sm:$0xff]   ;;  %v95_v37 = vshrl.u32 %v94_v36, 7 }
  0x29   :  { %625 = vmatprep.subr.bf16.mxu1 %v7132_v41  ;;  %v7174_v40 = vld [vmem:[%s10932_s1 + $0x20] ss:$8 sps:$4 sm:$0xff]   ;;  %v7204_v41 = vld [vmem:[%s10933_s7 + $0x34] ss:$8 sps:$4 sm:$0xff]  }
  0x2b   :  { %285 = vmatpush2.bf16.msra.mxu0 %v7134_v42  ;;  %v7207_v42 = vld [vmem:[%s10934_s6 + $0x34] ss:$8 sps:$4 sm:$0xff]  }
  0x2c   :  { %626 = vmatpush2.bf16.msra.mxu1 %v7135_v43  ;;  %286 = vmatprep.subr.bf16.mxu0 %v7136_v44  ;;  %v7175_v43 = vld [vmem:[%s10932_s1 + $0x34] ss:$8 sps:$4 sm:$0xff]   ;;  %v56_v44 = vpack.c.bf16 %v46_v33, %v44_v32  ;;  %v1198_v32 = vld [vmem:[%s10935_s9 + $0x21] sm:$0xff] }
  0x2d   :  { %627 = vmatprep.subr.bf16.mxu1 %v7138_v45  ;;  %v7202_v45 = vld [vmem:[%s10933_s7 + $0x30] ss:$8 sps:$4 sm:$0xff]  }
  0x2e   :  { %v8365_v33 = vld [vmem:[%s10935_s9 + $0x30] sm:$0xff] }
  0x2f   :  { %287 = vmatpush2.bf16.msra.mxu0 %v7140_v48  ;;  %v7210_v48 = vld [vmem:[%s10933_s7 + $0x24] ss:$8 sps:$4 sm:$0xff]  }
  0x30   :  { %628 = vmatpush2.bf16.msra.mxu1 %v7141_v49  ;;  %288 = vmatprep.subr.bf16.mxu0 %v7142_v52  ;;  %v7213_v49 = vld [vmem:[%s10934_s6 + $0x24] ss:$8 sps:$4 sm:$0xff]   ;;  %v7208_v52 = vld [vmem:[%s10933_s7 + $0x20] ss:$8 sps:$4 sm:$0xff]  }
  0x31   :  { %629 = vmatprep.subr.bf16.mxu1 %v7144_v53  ;;  %v7211_v53 = vld [vmem:[%s10934_s6 + $0x20] ss:$8 sps:$4 sm:$0xff]  }
  0x33   :  { %289 = vmatpush2.bf16.msra.mxu0 %v7146_v54  ;;  %v7216_v54 = vld [vmem:[%s10933_s7 + $0x14] ss:$8 sps:$4 sm:$0xff]  }
  0x34   :  { %630 = vmatpush2.bf16.msra.mxu1 %v7147_v55  ;;  %290 = vmatprep.subr.bf16.mxu0 %v7148_v56  ;;  %v7219_v55 = vld [vmem:[%s10934_s6 + $0x14] ss:$8 sps:$4 sm:$0xff]   ;;  %v7177_v56 = vld [vmem:[%s10932_s1 + $0x30] ss:$8 sps:$4 sm:$0xff]  }
  0x35   :  { %631 = vmatprep.subr.bf16.mxu1 %v7150_v57  ;;  %v58_v57 = vpack.c.bf16 %v50_v51, %v48_v50 }
  0x37   :  { %291 = vmatpush2.bf16.msra.mxu0 %v7152_v58  ;;  %v7214_v58 = vld [vmem:[%s10933_s7 + $0x10] ss:$8 sps:$4 sm:$0xff]  }
  0x38   :  { %632 = vmatpush2.bf16.msra.mxu1 %v7153_v59  ;;  %292 = vmatprep.subr.bf16.mxu0 %v7154_v60  ;;  %v7217_v59 = vld [vmem:[%s10934_s6 + $0x10] ss:$8 sps:$4 sm:$0xff]   ;;  %v7222_v60 = vld [vmem:[%s10933_s7 + $0x4] ss:$8 sps:$4 sm:$0xff]  }
  0x39   :  { %633 = vmatprep.subr.bf16.mxu1 %v7156_v61  ;;  %v7225_v61 = vld [vmem:[%s10934_s6 + $0x4] ss:$8 sps:$4 sm:$0xff]  }
  0x3b   :  { %293 = vmatpush2.bf16.msra.mxu0 %v7158_v62  ;;  %v7220_v62 = vld [vmem:[%s10933_s7] ss:$8 sps:$4 sm:$0xff]  }
  0x3c   :  { %634 = vmatpush2.bf16.msra.mxu1 %v7159_v63  ;;  %294 = vmatprep.subr.bf16.mxu0 %v7160_v0  ;;  %v7223_v63 = vld [vmem:[%s10934_s6] ss:$8 sps:$4 sm:$0xff]   ;;  %v7228_v0 = vld [vmem:[%s10933_s7 + $0xb4] ss:$8 sps:$4 sm:$0xff]  }
  0x3d   :  { %635 = vmatprep.subr.bf16.mxu1 %v7162_v1  ;;  %v7231_v1 = vld [vmem:[%s10934_s6 + $0xb4] ss:$8 sps:$4 sm:$0xff]  }
  0x3f   :  { %295 = vmatpush2.bf16.msra.mxu0 %v7164_v2  ;;  %v7226_v2 = vld [vmem:[%s10933_s7 + $0xb0] ss:$8 sps:$4 sm:$0xff]  }
  0x40   :  { %636 = vmatpush2.bf16.msra.mxu1 %v7165_v3  ;;  %907 = vmatprep.subr.bf16.mxu0 %v7180_v8  ;;  %v7229_v3 = vld [vmem:[%s10934_s6 + $0xb0] ss:$8 sps:$4 sm:$0xff]   ;;  %v7240_v8 = vld [vmem:[%s10933_s7 + $0x94] ss:$8 sps:$4 sm:$0xff]  }
  0x41   :  { %1110 = vmatprep.subr.bf16.mxu1 %v7183_v9  ;;  %v7243_v9 = vld [vmem:[%s10934_s6 + $0x94] ss:$8 sps:$4 sm:$0xff]  }
  0x42   :  { %297 = vmatmul.mubr.bf16.vlgmr.msra.gmra.mxu0 %v52_v11  ;;  %v7241_v11 = vld [vmem:[%s10934_s6 + $0x90] ss:$8 sps:$4 sm:$0xff]  }
  0x43   :  { %638 = vmatmul.mubr.bf16.vlgmr.msra.gmra.mxu1 %v7166_v10  ;;  %306 = vmatprep.mubr.bf16.mxu0 %v55_v13  ;;  %v7238_v10 = vld [vmem:[%s10933_s7 + $0x90] ss:$8 sps:$4 sm:$0xff]   ;;  %v7249_v13 = vld [vmem:[%s10934_s6 + $0x84] ss:$8 sps:$4 sm:$0xff]  }
  0x44   :  { %647 = vmatprep.mubr.bf16.mxu1 %v7169_v12  ;;  %908 = vmatpush1.bf16.msra.mxu0 %v7178_v14  ;;  %v7246_v12 = vld [vmem:[%s10933_s7 + $0x84] ss:$8 sps:$4 sm:$0xff]   ;;  %v7244_v14 = vld [vmem:[%s10933_s7 + $0x80] ss:$8 sps:$4 sm:$0xff]  }
  0x45   :  { %1111 = vmatpush1.bf16.msra.mxu1 %v7181_v15  ;;  %909 = vmatprep.subr.bf16.mxu0 %v7186_v18  ;;  %v7247_v15 = vld [vmem:[%s10934_s6 + $0x80] ss:$8 sps:$4 sm:$0xff]   ;;  %v10945_v18 = vmov 0  }
  0x46   :  { %1112 = vmatprep.subr.bf16.mxu1 %v7189_v19  ;;  %7055 = vset.pattern.permute.xlu0 %v10945_v18  ;;  %v1195_v19 = vld [vmem:[%s10935_s9 + $0x9] sm:$0xff] }
  0x47   :  { %7056 = vset.pattern.permute.xlu1 %v10945_v18  ;;  %1204 = vperm.xlu0 %7055, %v1195_v19  }
  0x48   :  { %910 = vmatpush1.bf16.msra.mxu0 %v7184_v22  ;;  %v1781_v22 = vld [vmem:[%s10935_s9 + $0x10] sm:$0xff] }
  0x49   :  { %1113 = vmatpush1.bf16.msra.mxu1 %v7187_v23  ;;  %911 = vmatprep.subr.bf16.mxu0 %v7192_v24  ;;  %v10944_v23 = vmov 1   ;;  %v1784_v24 = vld [vmem:[%s10935_s9 + $0x28] sm:$0xff] }
  0x4a   :  { %1114 = vmatprep.subr.bf16.mxu1 %v7195_v25  ;;  %307 = vmatmul.mubr.bf16.gmra.mxu0 %v54_v26  ;;  %v1786_v25 = vld [vmem:[%s10935_s9 + $0x38] sm:$0xff]  ;;  %v3537_v26 = vld [vmem:[%s10935_s9] sm:$0xff] }
  0x4b   :  { %648 = vmatmul.mubr.bf16.gmra.mxu1 %v7171_v27  ;;  %316 = vmatprep.mubr.bf16.mxu0 %v57_v29  ;;  %v8343_v27 = vld [vmem:[%s10935_s9 + $0x18] sm:$0xff] }
  0x4c   :  { %657 = vmatprep.mubr.bf16.mxu1 %v7172_v28  ;;  %912 = vmatpush1.bf16.msra.mxu0 %v7190_v30  ;;  %v10941_v28 = vmov 2   ;;  %v1197_v29 = vld [vmem:[%s10935_s9 + $0x19] sm:$0xff]  ;;  %v4086_v30 = vld [vmem:[%s10935_s9 + $0x8] sm:$0xff] }
  0x4d   :  { %1115 = vmatpush1.bf16.msra.mxu1 %v7193_v31  ;;  %913 = vmatprep.subr.bf16.mxu0 %v7198_v34  ;;  %v8356_v31 = vld [vmem:[%s10935_s9 + $0x20] sm:$0xff]  ;;  %v1200_v34 = vld [vmem:[%s10935_s9 + $0x31] sm:$0xff] }
  0x4e   :  { %1116 = vmatprep.subr.bf16.mxu1 %v7201_v35  ;;  %1209 = vperm.xlu0 %7055, %v1196_v20   ;;  %v1201_v35 = vld [vmem:[%s10935_s9 + $0x39] sm:$0x7f] }
  0x4f   :  { %1214 = vperm.xlu1 %7056, %v1197_v29  }
  0x50   :  { %914 = vmatpush1.bf16.msra.mxu0 %v7196_v38  ;;  %v8377_v38 = vsub.s32 1, %v95_v37 }
  0x51   :  { %1117 = vmatpush1.bf16.msra.mxu1 %v7199_v39  ;;  %915 = vmatprep.subr.bf16.mxu0 %v7204_v41  ;;  %v8379_v39 = vsub.s32 0, %v95_v37  ;;  %v393_v41 = vld [vmem:[%s10937_s5] sm:$0x3] }
  0x52   :  { %1118 = vmatprep.subr.bf16.mxu1 %v7207_v42  ;;  %317 = vmatmul.mubr.bf16.gmra.mxu0 %v56_v44  ;;  %10973 = vst [vmem:[#allocation2_spill] sm:$0xff] %v8377_v38 }
  0x53   :  { %658 = vmatmul.mubr.bf16.gmra.mxu1 %v7174_v40  ;;  %326 = vmatprep.mubr.bf16.mxu0 %v59_v47  ;;  %10974 = vst [vmem:[#allocation3_spill] sm:$0xff] %v8379_v39  ;;  %v92_v40 = vld [vmem:[%s10936_s3] sm:$0x3]  ;;  %v8398_v47 = vrot.slane %v393_v41, %v8379_v39 }
  0x54   :  { %667 = vmatprep.mubr.bf16.mxu1 %v7175_v43  ;;  %916 = vmatpush1.bf16.msra.mxu0 %v7202_v45  ;;  %v8389_v44 = vrot.slane %v92_v40, %v8377_v38  ;;  %v8392_v45 = vrot.slane %v393_v41, %v8377_v38 }
  0x55   :  { %1119 = vmatpush1.bf16.msra.mxu1 %v7205_v46  ;;  %917 = vmatprep.subr.bf16.mxu0 %v7210_v48  ;;  %v8395_v46 = vrot.slane %v92_v40, %v8379_v39 }
  0x56   :  { %1120 = vmatprep.subr.bf16.mxu1 %v7213_v49  ;;  %1224 = vperm.xlu0 %7055, %v1199_v21  }
  0x57   :  { %1219 = vperm.xlu1 %7056, %v1198_v32  }
  0x58   :  { %918 = vmatpush1.bf16.msra.mxu0 %v7208_v52 }
  0x59   :  { %1121 = vmatpush1.bf16.msra.mxu1 %v7211_v53  ;;  %919 = vmatprep.subr.bf16.mxu0 %v7216_v54 }
  0x5a   :  { %1122 = vmatprep.subr.bf16.mxu1 %v7219_v55  ;;  %327 = vmatmul.mubr.bf16.gmra.mxu0 %v58_v57 }
  0x5b   :  { %668 = vmatmul.mubr.bf16.gmra.mxu1 %v7177_v56  ;;  %7058 = vset.pattern.permute.xlu0 %v10944_v23 }
  0x5c   :  { %920 = vmatpush1.bf16.msra.mxu0 %v7214_v58  ;;  %1794 = vperm.xlu0 %7058, %v1781_v22  }
  0x5d   :  { %1123 = vmatpush1.bf16.msra.mxu1 %v7217_v59  ;;  %921 = vmatprep.subr.bf16.mxu0 %v7222_v60 }
  0x5e   :  { %1124 = vmatprep.subr.bf16.mxu1 %v7225_v61  ;;  %1229 = vperm.xlu1 %7056, %v1200_v34  }
  0x60   :  { %922 = vmatpush1.bf16.msra.mxu0 %v7220_v62  ;;  %1809 = vperm.xlu0 %7058, %v1784_v24  }
  0x61   :  { %1125 = vmatpush1.bf16.msra.mxu1 %v7223_v63  ;;  %931 = vmatprep.subr.bf16.mxu0 %v7228_v0 }
  0x62   :  { %1134 = vmatprep.subr.bf16.mxu1 %v7231_v1  ;;  %7057 = vset.pattern.permute.xlu1 %v10944_v23 }
  0x63   :  { %1789 = vperm.xlu1 %7057, %v4086_v30  }
  0x64   :  { %932 = vmatpush2.bf16.msra.mxu0 %v7226_v2  ;;  %1819 = vperm.xlu0 %7058, %v1786_v25  }
  0x65   :  { %1135 = vmatpush2.bf16.msra.mxu1 %v7229_v3  ;;  %933 = vmatprep.subr.bf16.mxu0 %v7234_v4 }
  0x66   :  { %1136 = vmatprep.subr.bf16.mxu1 %v7237_v5 }
  0x67   :  { %1799 = vperm.xlu1 %7057, %v8343_v27  }
  0x68   :  { %934 = vmatpush2.bf16.msra.mxu0 %v7232_v6  ;;  %3547 = vperm.xlu0 %7058, %v3537_v26  }
  0x69   :  { %1137 = vmatpush2.bf16.msra.mxu1 %v7235_v7  ;;  %935 = vmatprep.subr.bf16.mxu0 %v7240_v8 }
  0x6a   :  { %1138 = vmatprep.subr.bf16.mxu1 %v7243_v9 }
  0x6b   :  { %1804 = vperm.xlu1 %7057, %v8356_v31  }
  0x6c   :  { %936 = vmatpush2.bf16.msra.mxu0 %v7238_v10  ;;  %3562 = vperm.xlu0 %7058, %v8343_v27  }
  0x6d   :  { %1139 = vmatpush2.bf16.msra.mxu1 %v7241_v11  ;;  %937 = vmatprep.subr.bf16.mxu0 %v7246_v12 }
  0x6e   :  { %1140 = vmatprep.subr.bf16.mxu1 %v7249_v13 }
  0x6f   :  { %1814 = vperm.xlu1 %7057, %v8365_v33  }
  0x70   :  { %938 = vmatpush2.bf16.msra.mxu0 %v7244_v14  ;;  %3572 = vperm.xlu0 %7058, %v1784_v24  }
  0x71   :  { %1141 = vmatpush2.bf16.msra.mxu1 %v7247_v15  ;;  %1504 = vmatprep.subr.bf16.mxu0 %v7252_v16  ;;  %v7250_v16 = vld [vmem:[%s10933_s7 + $0x130] ss:$8 sps:$4 sm:$0xff]  }
  0x72   :  { %1695 = vmatprep.subr.bf16.mxu1 %v7255_v17  ;;  %v7253_v17 = vld [vmem:[%s10934_s6 + $0x130] ss:$8 sps:$4 sm:$0xff]  }
  0x73   :  { %7059 = vset.pattern.permute.xlu1 %v10941_v28 }
  0x74   :  { %7062 = vset.pattern.permute.xlu0 %v10941_v28  ;;  %2323 = vperm.xlu1 %7059, %v4086_v30  }
  0x75   :  { %2327 = vperm.xlu0 %7062, %v1781_v22  }
  0x78   :  { %2331 = vperm.xlu1 %7059, %v8343_v27  }
  0x79   :  { %2339 = vperm.xlu0 %7062, %v1784_v24   ;;  %v7258_v24 = vld [vmem:[%s10933_s7 + $0x124] ss:$8 sps:$4 sm:$0xff]  }
  0x7c   :  { %2335 = vperm.xlu1 %7059, %v8356_v31  }
  0x7d   :  { %2347 = vperm.xlu0 %7062, %v1786_v25   ;;  %v7261_v25 = vld [vmem:[%s10934_s6 + $0x124] ss:$8 sps:$4 sm:$0xff]  }
  0x80   :  { %2343 = vperm.xlu1 %7059, %v8365_v33  }
  0x81   :  { %4099 = vperm.xlu0 %7062, %v4086_v30  }
  0x84   :  { %7060 = vset.pattern.permute.xlu1 %v10945_v18 }
  0x85   :  { %4111 = vperm.xlu0 %7062, %v8356_v31  }
  0x89   :  { %4119 = vperm.xlu0 %7062, %v8365_v33  }
  0x8d   :  { %7064 = vset.pattern.permute.xlu0 %v10945_v18 }
  0x8e   :  { %1234 = vperm.xlu0 %7064, %v1201_v35  }
 0x102   :  { %v298_v42 = vpop.f32.mrf.mxu0 }
 0x103   :  { %v639_v43 = vpop.f32.mrf.mxu1  ;;  %v299_v56 = vadd.f32 %v298_v42, %v8395_v46 }
 0x104   :  { %v300_v48 = vpop.f32.mrf.mxu0  ;;  %v640_v57 = vadd.f32 %v639_v43, %v8398_v47  ;;  %v7256_v43 = vld [vmem:[%s10933_s7 + $0x120] ss:$8 sps:$4 sm:$0xff]  }
 0x105   :  { %v641_v49 = vpop.f32.mrf.mxu1  ;;  %v301_v52 = vadd.f32 %v300_v48, %v8389_v44  ;;  %v337_v6 = vmax.f32 %v299_v56, 0.0 }
 0x106   :  { %v302_v50 = vpop.f32.mrf.mxu0  ;;  %v642_v53 = vadd.f32 %v641_v49, %v8392_v45  ;;  %v678_v7 = vmax.f32 %v640_v57, 0.0 }
 0x107   :  { %v643_v51 = vpop.f32.mrf.mxu1  ;;  %v303_v54 = vadd.f32 %v302_v50, %v8395_v46  ;;  %v338_v2 = vmax.f32 %v301_v52, 0.0  ;;  %v7259_v50 = vld [vmem:[%s10934_s6 + $0x120] ss:$8 sps:$4 sm:$0xff]  }
 0x108   :  { %v644_v55 = vadd.f32 %v643_v51, %v8398_v47  ;;  %v304_v58 = vpop.f32.mrf.mxu0  ;;  %v679_v3 = vmax.f32 %v642_v53, 0.0  ;;  %v7264_v51 = vld [vmem:[%s10933_s7 + $0x114] ss:$8 sps:$4 sm:$0xff]  }
 0x109   :  { %v645_v59 = vpop.f32.mrf.mxu1  ;;  %v305_v60 = vadd.f32 %v304_v58, %v8389_v44  ;;  %v339_v62 = vmax.f32 %v303_v54, 0.0 }
 0x10a   :  { %v646_v61 = vadd.f32 %v645_v59, %v8392_v45  ;;  %v680_v63 = vmax.f32 %v644_v55, 0.0  ;;  %v308_v0 = vpop.f32.mrf.mxu0 }
 0x10b   :  { %v649_v1 = vpop.f32.mrf.mxu1  ;;  %v340_v4 = vmax.f32 %v305_v60, 0.0  ;;  %v309_v8 = vadd.f32 %v308_v0, %v8395_v46  ;;  %v8425_v19 = vpack.c.bf16 %v339_v62, %v337_v6  ;;  %v7267_v60 = vld [vmem:[%s10934_s6 + $0x114] ss:$8 sps:$4 sm:$0xff]   ;;  %v7262_v0 = vld [vmem:[%s10933_s7 + $0x110] ss:$8 sps:$4 sm:$0xff]  }
 0x10c   :  { %v681_v5 = vmax.f32 %v646_v61, 0.0  ;;  %v650_v9 = vadd.f32 %v649_v1, %v8398_v47  ;;  %v310_v10 = vpop.f32.mrf.mxu0  ;;  %v8427_v20 = vpack.c.bf16 %v680_v63, %v678_v7  ;;  %v7273_v7 = vld [vmem:[%s10934_s6 + $0x104] ss:$8 sps:$4 sm:$0xff]  }
 0x10d   :  { %v651_v11 = vpop.f32.mrf.mxu1  ;;  %v8412_v12 = vpack.c.bf16 %v340_v4, %v338_v2  ;;  %v311_v14 = vadd.f32 %v310_v10, %v8389_v44  ;;  %v341_v27 = vmax.f32 %v309_v8, 0.0  ;;  %v7270_v4 = vld [vmem:[%s10933_s7 + $0x104] ss:$8 sps:$4 sm:$0xff]  }
 0x10e   :  { %v8414_v13 = vpack.c.bf16 %v681_v5, %v679_v3  ;;  %v652_v15 = vadd.f32 %v651_v11, %v8392_v45  ;;  %v312_v21 = vpop.f32.mrf.mxu0  ;;  %v682_v30 = vmax.f32 %v650_v9, 0.0  ;;  %v7265_v3 = vld [vmem:[%s10934_s6 + $0x110] ss:$8 sps:$4 sm:$0xff]  }
 0x10f   :  { %v653_v22 = vpop.f32.mrf.mxu1  ;;  %v313_v26 = vadd.f32 %v312_v21, %v8395_v46  ;;  %6215 = vmatprep.mubr.msk.bf16.mxu1 %vm894_vm0, %v8412_v12  ;;  %v342_v32 = vmax.f32 %v311_v14, 0.0 }
 0x110   :  { %v654_v29 = vadd.f32 %v653_v22, %v8398_v47  ;;  %6187 = vmatprep.mubr.msk.bf16.mxu0 %vm894_vm0, %v8414_v13  ;;  %v683_v34 = vmax.f32 %v652_v15, 0.0  ;;  %v314_v35 = vpop.f32.mrf.mxu0  ;;  %1143 = vmatmul.mubr.bf16.vlgmr.msra.gmra.mxu1 %v8425_v19 }
 0x111   :  { %v655_v36 = vpop.f32.mrf.mxu1  ;;  %940 = vmatmul.mubr.bf16.vlgmr.msra.gmra.mxu0 %v8427_v20  ;;  %v343_v37 = vmax.f32 %v313_v26, 0.0  ;;  %v315_v41 = vadd.f32 %v314_v35, %v8389_v44  ;;  %1696 = vmatpush1.bf16.msra.mxu1 %v7253_v17 }
 0x112   :  { %v684_v40 = vmax.f32 %v654_v29, 0.0  ;;  %v656_v42 = vadd.f32 %v655_v36, %v8392_v45  ;;  %1505 = vmatpush1.bf16.msra.mxu0 %v7250_v16  ;;  %v318_v48 = vpop.f32.mrf.mxu0  ;;  %1697 = vmatprep.subr.bf16.mxu1 %v7261_v25  ;;  %v7271_v29 = vld [vmem:[%s10934_s6 + $0x100] ss:$8 sps:$4 sm:$0xff]  }
 0x113   :  { %v659_v49 = vpop.f32.mrf.mxu1  ;;  %1506 = vmatprep.subr.bf16.mxu0 %v7258_v24  ;;  %v344_v52 = vmax.f32 %v315_v41, 0.0  ;;  %v8455_v54 = vpack.c.bf16 %v343_v37, %v341_v27  ;;  %v319_v56 = vadd.f32 %v318_v48, %v8395_v46  ;;  %v7268_v24 = vld [vmem:[%s10933_s7 + $0x100] ss:$8 sps:$4 sm:$0xff]   ;;  %v7276_v27 = vld [vmem:[%s10933_s7 + $0xf4] ss:$8 sps:$4 sm:$0xff]  }
 0x114   :  { %v685_v53 = vmax.f32 %v656_v42, 0.0  ;;  %v8457_v55 = vpack.c.bf16 %v684_v40, %v682_v30  ;;  %v660_v57 = vadd.f32 %v659_v49, %v8398_v47  ;;  %v320_v58 = vpop.f32.mrf.mxu0  ;;  %v7279_v42 = vld [vmem:[%s10934_s6 + $0xf4] ss:$8 sps:$4 sm:$0xff]  }
 0x115   :  { %v661_v59 = vpop.f32.mrf.mxu1  ;;  %v8464_v61 = vpack.c.bf16 %v344_v52, %v342_v32  ;;  %v321_v31 = vadd.f32 %v320_v58, %v8389_v44  ;;  %1698 = vmatpush1.bf16.msra.mxu1 %v7259_v50  ;;  %v345_v8 = vmax.f32 %v319_v56, 0.0  ;;  %v7274_v50 = vld [vmem:[%s10933_s7 + $0xf0] ss:$8 sps:$4 sm:$0xff]   ;;  %v7282_v56 = vld [vmem:[%s10933_s7 + $0xe4] ss:$8 sps:$4 sm:$0xff]  }
 0x116   :  { %v8466_v62 = vpack.c.bf16 %v685_v53, %v683_v34  ;;  %v662_v63 = vadd.f32 %v661_v59, %v8392_v45  ;;  %1507 = vmatpush1.bf16.msra.mxu0 %v7256_v43  ;;  %v322_v1 = vpop.f32.mrf.mxu0  ;;  %v686_v9 = vmax.f32 %v660_v57, 0.0  ;;  %1699 = vmatprep.subr.bf16.mxu1 %v7267_v60  ;;  %v7277_v53 = vld [vmem:[%s10934_s6 + $0xf0] ss:$8 sps:$4 sm:$0xff]   ;;  %v7285_v59 = vld [vmem:[%s10934_s6 + $0xe4] ss:$8 sps:$4 sm:$0xff]  }
 0x117   :  { %10975 = vst [vmem:[#allocation4_spill] sm:$0xff] %v8464_v61  ;;  %v663_v2 = vpop.f32.mrf.mxu1  ;;  %1508 = vmatprep.subr.bf16.mxu0 %v7264_v51  ;;  %v323_v5 = vadd.f32 %v322_v1, %v8395_v46  ;;  %6216 = vmatprep.mubr.msk.bf16.mxu1 %vm894_vm0, %v8464_v61  ;;  %v346_v10 = vmax.f32 %v321_v31, 0.0 }
 0x118   :  { %10976 = vst [vmem:[#allocation5_spill] sm:$0xff] %v8466_v62  ;;  %v664_v6 = vadd.f32 %v663_v2, %v8398_v47  ;;  %6188 = vmatprep.mubr.msk.bf16.mxu0 %vm894_vm0, %v8466_v62  ;;  %v687_v11 = vmax.f32 %v662_v63, 0.0  ;;  %v324_v14 = vpop.f32.mrf.mxu0  ;;  %1153 = vmatmul.mubr.bf16.gmra.mxu1 %v8455_v54 }
 0x119   :  { %v665_v15 = vpop.f32.mrf.mxu1  ;;  %950 = vmatmul.mubr.bf16.gmra.mxu0 %v8457_v55  ;;  %v347_v16 = vmax.f32 %v323_v5, 0.0  ;;  %v325_v21 = vadd.f32 %v324_v14, %v8389_v44  ;;  %1700 = vmatpush1.bf16.msra.mxu1 %v7265_v3  ;;  %v7280_v5 = vld [vmem:[%s10933_s7 + $0xe0] ss:$8 sps:$4 sm:$0xff]  }
 0x11a   :  { %v688_v17 = vmax.f32 %v664_v6, 0.0  ;;  %v666_v22 = vadd.f32 %v665_v15, %v8392_v45  ;;  %1509 = vmatpush1.bf16.msra.mxu0 %v7262_v0  ;;  %v328_v25 = vpop.f32.mrf.mxu0  ;;  %1701 = vmatprep.subr.bf16.mxu1 %v7273_v7  ;;  %v7283_v6 = vld [vmem:[%s10934_s6 + $0xe0] ss:$8 sps:$4 sm:$0xff]   ;;  %v7288_v7 = vld [vmem:[%s10933_s7 + $0xd4] ss:$8 sps:$4 sm:$0xff]  }
 0x11b   :  { %v669_v26 = vpop.f32.mrf.mxu1  ;;  %1510 = vmatprep.subr.bf16.mxu0 %v7270_v4  ;;  %v348_v30 = vmax.f32 %v325_v21, 0.0  ;;  %v8502_v34 = vpack.c.bf16 %v347_v16, %v345_v8  ;;  %v329_v36 = vadd.f32 %v328_v25, %v8395_v46  ;;  %v7286_v15 = vld [vmem:[%s10933_s7 + $0xd0] ss:$8 sps:$4 sm:$0xff]   ;;  %v7297_v21 = vld [vmem:[%s10934_s6 + $0xc4] ss:$8 sps:$4 sm:$0xff]  }
 0x11c   :  { %v689_v32 = vmax.f32 %v666_v22, 0.0  ;;  %v8504_v35 = vpack.c.bf16 %v688_v17, %v686_v9  ;;  %v670_v37 = vadd.f32 %v669_v26, %v8398_v47  ;;  %v330_v40 = vpop.f32.mrf.mxu0  ;;  %v7291_v9 = vld [vmem:[%s10934_s6 + $0xd4] ss:$8 sps:$4 sm:$0xff]   ;;  %v7289_v16 = vld [vmem:[%s10934_s6 + $0xd0] ss:$8 sps:$4 sm:$0xff]  }
 0x11d   :  { %v671_v41 = vpop.f32.mrf.mxu1  ;;  %v8511_v43 = vpack.c.bf16 %v348_v30, %v346_v10  ;;  %v331_v33 = vadd.f32 %v330_v40, %v8389_v44  ;;  %1702 = vmatpush1.bf16.msra.mxu1 %v7271_v29  ;;  %v349_v60 = vmax.f32 %v329_v36, 0.0  ;;  %v7294_v17 = vld [vmem:[%s10933_s7 + $0xc4] ss:$8 sps:$4 sm:$0xff]   ;;  %v7292_v22 = vld [vmem:[%s10933_s7 + $0xc0] ss:$8 sps:$4 sm:$0xff]  }
 0x11e   :  { %v8513_v48 = vpack.c.bf16 %v689_v32, %v687_v11  ;;  %v672_v49 = vadd.f32 %v671_v41, %v8392_v45  ;;  %1511 = vmatpush1.bf16.msra.mxu0 %v7268_v24  ;;  %v332_v51 = vpop.f32.mrf.mxu0  ;;  %v690_v31 = vmax.f32 %v670_v37, 0.0  ;;  %1703 = vmatprep.subr.bf16.mxu1 %v7279_v42  ;;  %v7295_v24 = vld [vmem:[%s10934_s6 + $0xc0] ss:$8 sps:$4 sm:$0xff]   ;;  %v7300_v25 = vld [vmem:[%s10933_s7 + $0x174] ss:$8 sps:$4 sm:$0xff]  }
 0x11f   :  { %v673_v52 = vpop.f32.mrf.mxu1  ;;  %1512 = vmatprep.subr.bf16.mxu0 %v7276_v27  ;;  %v333_v57 = vadd.f32 %v332_v51, %v8395_v46  ;;  %6217 = vmatprep.mubr.msk.bf16.mxu1 %vm894_vm0, %v8511_v43  ;;  %v350_v63 = vmax.f32 %v331_v33, 0.0  ;;  %v7303_v26 = vld [vmem:[%s10934_s6 + $0x174] ss:$8 sps:$4 sm:$0xff]   ;;  %v7298_v29 = vld [vmem:[%s10933_s7 + $0x170] ss:$8 sps:$4 sm:$0xff]  }
 0x120   :  { %v674_v58 = vadd.f32 %v673_v52, %v8398_v47  ;;  %6189 = vmatprep.mubr.msk.bf16.mxu0 %vm894_vm0, %v8513_v48  ;;  %v691_v0 = vmax.f32 %v672_v49, 0.0  ;;  %v334_v1 = vpop.f32.mrf.mxu0  ;;  %1163 = vmatmul.mubr.bf16.gmra.mxu1 %v8502_v34  ;;  %v7301_v27 = vld [vmem:[%s10934_s6 + $0x170] ss:$8 sps:$4 sm:$0xff]   ;;  %v7306_v30 = vld [vmem:[%s10933_s7 + $0x164] ss:$8 sps:$4 sm:$0xff]  }
 0x121   :  { %v675_v2 = vpop.f32.mrf.mxu1  ;;  %960 = vmatmul.mubr.bf16.gmra.mxu0 %v8504_v35  ;;  %v351_v46 = vmax.f32 %v333_v57, 0.0  ;;  %v335_v3 = vadd.f32 %v334_v1, %v8389_v44  ;;  %1704 = vmatpush1.bf16.msra.mxu1 %v7277_v53  ;;  %v7309_v32 = vld [vmem:[%s10934_s6 + $0x164] ss:$8 sps:$4 sm:$0xff]   ;;  %v7304_v36 = vld [vmem:[%s10933_s7 + $0x160] ss:$8 sps:$4 sm:$0xff]  }
 0x122   :  { %v692_v47 = vmax.f32 %v674_v58, 0.0  ;;  %v676_v4 = vadd.f32 %v675_v2, %v8392_v45  ;;  %1513 = vmatpush1.bf16.msra.mxu0 %v7274_v50  ;;  %1705 = vmatprep.subr.bf16.mxu1 %v7285_v59  ;;  %v7307_v37 = vld [vmem:[%s10934_s6 + $0x160] ss:$8 sps:$4 sm:$0xff]   ;;  %v7312_v40 = vld [vmem:[%s10933_s7 + $0x154] ss:$8 sps:$4 sm:$0xff]  }
 0x123   :  { %1514 = vmatprep.subr.bf16.mxu0 %v7282_v56  ;;  %v352_v44 = vmax.f32 %v335_v3, 0.0  ;;  %v8554_v10 = vpack.c.bf16 %v351_v46, %v349_v60  ;;  %v7315_v41 = vld [vmem:[%s10934_s6 + $0x154] ss:$8 sps:$4 sm:$0xff]   ;;  %v7310_v42 = vld [vmem:[%s10933_s7 + $0x150] ss:$8 sps:$4 sm:$0xff]  }
 0x124   :  { %v693_v8 = vmax.f32 %v676_v4, 0.0  ;;  %v8549_v45 = vpack.c.bf16 %v692_v47, %v690_v31  ;;  %v7313_v33 = vld [vmem:[%s10934_s6 + $0x150] ss:$8 sps:$4 sm:$0xff]   ;;  %v7318_v49 = vld [vmem:[%s10933_s7 + $0x144] ss:$8 sps:$4 sm:$0xff]  }
 0x125   :  { %v8556_v11 = vpack.c.bf16 %v352_v44, %v350_v63  ;;  %1706 = vmatpush1.bf16.msra.mxu1 %v7283_v6  ;;  %v7321_v50 = vld [vmem:[%s10934_s6 + $0x144] ss:$8 sps:$4 sm:$0xff]   ;;  %v7316_v51 = vld [vmem:[%s10933_s7 + $0x140] ss:$8 sps:$4 sm:$0xff]   ;;  %v7324_v53 = vld [vmem:[%s10933_s7 + $0x1f4] ss:$8 sps:$4 sm:$0xff]  }
 0x126   :  { %v8558_v14 = vpack.c.bf16 %v693_v8, %v691_v0  ;;  %1515 = vmatpush1.bf16.msra.mxu0 %v7280_v5  ;;  %1707 = vmatprep.subr.bf16.mxu1 %v7291_v9  ;;  %v7319_v52 = vld [vmem:[%s10934_s6 + $0x140] ss:$8 sps:$4 sm:$0xff]   ;;  %v7327_v56 = vld [vmem:[%s10934_s6 + $0x1f4] ss:$8 sps:$4 sm:$0xff]   ;;  %v7322_v57 = vld [vmem:[%s10933_s7 + $0x1f0] ss:$8 sps:$4 sm:$0xff]  }
 0x127   :  { %1516 = vmatprep.subr.bf16.mxu0 %v7288_v7  ;;  %6218 = vmatprep.mubr.msk.bf16.mxu1 %vm894_vm0, %v8556_v11  ;;  %v7325_v58 = vld [vmem:[%s10934_s6 + $0x1f0] ss:$8 sps:$4 sm:$0xff]   ;;  %v7330_v59 = vld [vmem:[%s10933_s7 + $0x1e4] ss:$8 sps:$4 sm:$0xff]   ;;  %v7328_v31 = vld [vmem:[%s10933_s7 + $0x1e0] ss:$8 sps:$4 sm:$0xff]  }
 0x128   :  { %6190 = vmatprep.mubr.msk.bf16.mxu0 %vm894_vm0, %v8558_v14  ;;  %1173 = vmatmul.mubr.bf16.gmra.mxu1 %v8554_v10  ;;  %v7333_v60 = vld [vmem:[%s10934_s6 + $0x1e4] ss:$8 sps:$4 sm:$0xff]   ;;  %v7331_v63 = vld [vmem:[%s10934_s6 + $0x1e0] ss:$8 sps:$4 sm:$0xff]   ;;  %v7336_v0 = vld [vmem:[%s10933_s7 + $0x1d4] ss:$8 sps:$4 sm:$0xff]  }
 0x129   :  { %970 = vmatmul.mubr.bf16.gmra.mxu0 %v8549_v45  ;;  %1708 = vmatpush1.bf16.msra.mxu1 %v7289_v16  ;;  %v7339_v1 = vld [vmem:[%s10934_s6 + $0x1d4] ss:$8 sps:$4 sm:$0xff]   ;;  %v7334_v2 = vld [vmem:[%s10933_s7 + $0x1d0] ss:$8 sps:$4 sm:$0xff]   ;;  %v7342_v47 = vld [vmem:[%s10933_s7 + $0x1c4] ss:$8 sps:$4 sm:$0xff]  }
 0x12a   :  { %1517 = vmatpush1.bf16.msra.mxu0 %v7286_v15  ;;  %6291 = vmatprep.mubr.msk.bf16.mxu0 %vm894_vm0, %v8414_v13  ;;  %v7337_v46 = vld [vmem:[%s10934_s6 + $0x1d0] ss:$8 sps:$4 sm:$0xff]   ;;  %v7345_v3 = vld [vmem:[%s10934_s6 + $0x1c4] ss:$8 sps:$4 sm:$0xff]   ;;  %v7340_v4 = vld [vmem:[%s10933_s7 + $0x1c0] ss:$8 sps:$4 sm:$0xff]  }
 0x12b   :  { %6319 = vmatprep.mubr.msk.bf16.mxu1 %vm894_vm0, %v8412_v12  ;;  %1518 = vmatprep.subr.bf16.mxu0 %v7294_v17  ;;  %v7343_v5 = vld [vmem:[%s10934_s6 + $0x1c0] ss:$8 sps:$4 sm:$0xff]   ;;  %v7348_v6 = vld [vmem:[%s10933_s7 + $0x1b4] ss:$8 sps:$4 sm:$0xff]   ;;  %v7346_v44 = vld [vmem:[%s10933_s7 + $0x1b0] ss:$8 sps:$4 sm:$0xff]  }
 0x12c   :  { %1709 = vmatprep.subr.bf16.mxu1 %v7297_v21  ;;  %v7351_v7 = vld [vmem:[%s10934_s6 + $0x1b4] ss:$8 sps:$4 sm:$0xff]   ;;  %v7349_v8 = vld [vmem:[%s10934_s6 + $0x1b0] ss:$8 sps:$4 sm:$0xff]   ;;  %v7354_v9 = vld [vmem:[%s10933_s7 + $0x1a4] ss:$8 sps:$4 sm:$0xff]  }
 0x12d   :  { %1710 = vmatpush1.bf16.msra.mxu1 %v7295_v24  ;;  %v7357_v15 = vld [vmem:[%s10934_s6 + $0x1a4] ss:$8 sps:$4 sm:$0xff]   ;;  %v7352_v16 = vld [vmem:[%s10933_s7 + $0x1a0] ss:$8 sps:$4 sm:$0xff]   ;;  %v7360_v21 = vld [vmem:[%s10933_s7 + $0x194] ss:$8 sps:$4 sm:$0xff]  }
 0x12e   :  { %1519 = vmatpush1.bf16.msra.mxu0 %v7292_v22  ;;  %1719 = vmatprep.subr.bf16.mxu1 %v7303_v26  ;;  %v7355_v17 = vld [vmem:[%s10934_s6 + $0x1a0] ss:$8 sps:$4 sm:$0xff]   ;;  %v7363_v22 = vld [vmem:[%s10934_s6 + $0x194] ss:$8 sps:$4 sm:$0xff]   ;;  %v7846_v24 = vmov 0.0  }
 0x12f   :  { %1528 = vmatprep.subr.bf16.mxu0 %v7300_v25  ;;  %712 = vst [vmem:[%s10938_s10 + $0x10] sm:$0xff] %v7846_v24  ;;  %710 = vst [vmem:[%s10938_s10] sm:$0xff] %v7846_v24  ;;  %v7358_v25 = vld [vmem:[%s10933_s7 + $0x190] ss:$8 sps:$4 sm:$0xff]  }
 0x130   :  { %711 = vst [vmem:[%s10938_s10 + $0x8] sm:$0xff] %v7846_v24  ;;  %713 = vst [vmem:[%s10938_s10 + $0x18] sm:$0xff] %v7846_v24  ;;  %v7361_v26 = vld [vmem:[%s10934_s6 + $0x190] ss:$8 sps:$4 sm:$0xff]   ;;  %v7415_v24 = vld [vmem:[%s10934_s6 + $0x280] ss:$8 sps:$4 sm:$0xff]  }
 0x131   :  { %1720 = vmatpush2.bf16.msra.mxu1 %v7301_v27  ;;  %v7369_v27 = vld [vmem:[%s10934_s6 + $0x184] ss:$8 sps:$4 sm:$0xff]  }
 0x132   :  { %1529 = vmatpush2.bf16.msra.mxu0 %v7298_v29  ;;  %1721 = vmatprep.subr.bf16.mxu1 %v7309_v32  ;;  %v7366_v29 = vld [vmem:[%s10933_s7 + $0x184] ss:$8 sps:$4 sm:$0xff]   ;;  %v7367_v32 = vld [vmem:[%s10934_s6 + $0x180] ss:$8 sps:$4 sm:$0xff]  }
 0x133   :  { %1530 = vmatprep.subr.bf16.mxu0 %v7306_v30  ;;  %v7364_v30 = vld [vmem:[%s10933_s7 + $0x180] ss:$8 sps:$4 sm:$0xff]  }
 0x135   :  { %1722 = vmatpush2.bf16.msra.mxu1 %v7307_v37  ;;  %v7375_v37 = vld [vmem:[%s10934_s6 + $0x234] ss:$8 sps:$4 sm:$0xff]  }
 0x136   :  { %1531 = vmatpush2.bf16.msra.mxu0 %v7304_v36  ;;  %1723 = vmatprep.subr.bf16.mxu1 %v7315_v41  ;;  %v7372_v36 = vld [vmem:[%s10933_s7 + $0x234] ss:$8 sps:$4 sm:$0xff]   ;;  %v7373_v41 = vld [vmem:[%s10934_s6 + $0x230] ss:$8 sps:$4 sm:$0xff]  }
 0x137   :  { %1532 = vmatprep.subr.bf16.mxu0 %v7312_v40  ;;  %v7370_v40 = vld [vmem:[%s10933_s7 + $0x230] ss:$8 sps:$4 sm:$0xff]  }
 0x139   :  { %1724 = vmatpush2.bf16.msra.mxu1 %v7313_v33  ;;  %v7381_v33 = vld [vmem:[%s10934_s6 + $0x224] ss:$8 sps:$4 sm:$0xff]  }
 0x13a   :  { %1533 = vmatpush2.bf16.msra.mxu0 %v7310_v42  ;;  %1725 = vmatprep.subr.bf16.mxu1 %v7321_v50  ;;  %v7378_v42 = vld [vmem:[%s10933_s7 + $0x224] ss:$8 sps:$4 sm:$0xff]   ;;  %v7379_v50 = vld [vmem:[%s10934_s6 + $0x220] ss:$8 sps:$4 sm:$0xff]  }
 0x13b   :  { %1534 = vmatprep.subr.bf16.mxu0 %v7318_v49  ;;  %v7376_v49 = vld [vmem:[%s10933_s7 + $0x220] ss:$8 sps:$4 sm:$0xff]  }
 0x13d   :  { %1726 = vmatpush2.bf16.msra.mxu1 %v7319_v52  ;;  %v7387_v52 = vld [vmem:[%s10934_s6 + $0x214] ss:$8 sps:$4 sm:$0xff]  }
 0x13e   :  { %1535 = vmatpush2.bf16.msra.mxu0 %v7316_v51  ;;  %2227 = vmatprep.subr.bf16.mxu1 %v7327_v56  ;;  %v7384_v51 = vld [vmem:[%s10933_s7 + $0x214] ss:$8 sps:$4 sm:$0xff]   ;;  %v7385_v56 = vld [vmem:[%s10934_s6 + $0x210] ss:$8 sps:$4 sm:$0xff]  }
 0x13f   :  { %2034 = vmatprep.subr.bf16.mxu0 %v7324_v53  ;;  %v7382_v53 = vld [vmem:[%s10933_s7 + $0x210] ss:$8 sps:$4 sm:$0xff]  }
 0x140   :  { %1728 = vmatmul.mubr.bf16.vlgmr.msra.gmra.mxu1 %v8425_v19 }
 0x141   :  { %1537 = vmatmul.mubr.bf16.vlgmr.msra.gmra.mxu0 %v8427_v20  ;;  %6320 = vmatprep.mubr.msk.bf16.mxu1 %vm894_vm0, %v8464_v61 }
 0x142   :  { %6292 = vmatprep.mubr.msk.bf16.mxu0 %vm894_vm0, %v8466_v62  ;;  %2035 = vmatpush1.bf16.msra.mxu0 %v7322_v57  ;;  %v7390_v57 = vld [vmem:[%s10933_s7 + $0x204] ss:$8 sps:$4 sm:$0xff]  }
 0x143   :  { %2228 = vmatpush1.bf16.msra.mxu1 %v7325_v58  ;;  %2036 = vmatprep.subr.bf16.mxu0 %v7330_v59  ;;  %v7393_v58 = vld [vmem:[%s10934_s6 + $0x204] ss:$8 sps:$4 sm:$0xff]   ;;  %v7388_v59 = vld [vmem:[%s10933_s7 + $0x200] ss:$8 sps:$4 sm:$0xff]  }
 0x144   :  { %2229 = vmatprep.subr.bf16.mxu1 %v7333_v60  ;;  %v7391_v60 = vld [vmem:[%s10934_s6 + $0x200] ss:$8 sps:$4 sm:$0xff]  }
 0x146   :  { %2037 = vmatpush1.bf16.msra.mxu0 %v7328_v31  ;;  %v7396_v31 = vld [vmem:[%s10933_s7 + $0x2b4] ss:$8 sps:$4 sm:$0xff]  }
 0x147   :  { %2230 = vmatpush1.bf16.msra.mxu1 %v7331_v63  ;;  %2038 = vmatprep.subr.bf16.mxu0 %v7336_v0  ;;  %v2927_v63 = vld [vmem:[%s10935_s9 + $0x1] sm:$0xff]  ;;  %v7399_v0 = vld [vmem:[%s10934_s6 + $0x2b4] ss:$8 sps:$4 sm:$0xff]  }
 0x148   :  { %2231 = vmatprep.subr.bf16.mxu1 %v7339_v1  ;;  %1738 = vmatmul.mubr.bf16.gmra.mxu1 %v8455_v54  ;;  %v2928_v1 = vld [vmem:[%s10935_s9 + $0x9] sm:$0xff] }
 0x149   :  { %1547 = vmatmul.mubr.bf16.gmra.mxu0 %v8457_v55  ;;  %6321 = vmatprep.mubr.msk.bf16.mxu1 %vm894_vm0, %v8511_v43 }
 0x14a   :  { %6293 = vmatprep.mubr.msk.bf16.mxu0 %vm894_vm0, %v8513_v48  ;;  %2039 = vmatpush1.bf16.msra.mxu0 %v7334_v2  ;;  %v7394_v2 = vld [vmem:[%s10933_s7 + $0x2b0] ss:$8 sps:$4 sm:$0xff]  }
 0x14b   :  { %2232 = vmatpush1.bf16.msra.mxu1 %v7337_v46  ;;  %2040 = vmatprep.subr.bf16.mxu0 %v7342_v47  ;;  %v7397_v46 = vld [vmem:[%s10934_s6 + $0x2b0] ss:$8 sps:$4 sm:$0xff]   ;;  %v7402_v47 = vld [vmem:[%s10933_s7 + $0x2a4] ss:$8 sps:$4 sm:$0xff]  }
 0x14c   :  { %2233 = vmatprep.subr.bf16.mxu1 %v7345_v3  ;;  %2937 = vperm.xlu1 %7060, %v2927_v63   ;;  %v7405_v3 = vld [vmem:[%s10934_s6 + $0x2a4] ss:$8 sps:$4 sm:$0xff]   ;;  %v7447_v63 = vld [vmem:[%s10934_s6 + $0x2f4] ss:$8 sps:$4 sm:$0xff]  }
 0x14d   :  { %2942 = vperm.xlu0 %7064, %v2928_v1   ;;  %v7445_v1 = vld [vmem:[%s10934_s6 + $0x2f0] ss:$8 sps:$4 sm:$0xff]  }
 0x14e   :  { %2041 = vmatpush1.bf16.msra.mxu0 %v7340_v4  ;;  %v7400_v4 = vld [vmem:[%s10933_s7 + $0x2a0] ss:$8 sps:$4 sm:$0xff]  }
 0x14f   :  { %2234 = vmatpush1.bf16.msra.mxu1 %v7343_v5  ;;  %2042 = vmatprep.subr.bf16.mxu0 %v7348_v6  ;;  %v2929_v5 = vld [vmem:[%s10935_s9 + $0x11] sm:$0xff]  ;;  %v7403_v6 = vld [vmem:[%s10934_s6 + $0x2a0] ss:$8 sps:$4 sm:$0xff]  }
 0x150   :  { %2235 = vmatprep.subr.bf16.mxu1 %v7351_v7  ;;  %1748 = vmatmul.mubr.bf16.gmra.mxu1 %v8502_v34  ;;  %v7408_v7 = vld [vmem:[%s10933_s7 + $0x294] ss:$8 sps:$4 sm:$0xff]  }
 0x151   :  { %1557 = vmatmul.mubr.bf16.gmra.mxu0 %v8504_v35  ;;  %6322 = vmatprep.mubr.msk.bf16.mxu1 %vm894_vm0, %v8556_v11 }
 0x152   :  { %6294 = vmatprep.mubr.msk.bf16.mxu0 %vm894_vm0, %v8558_v14  ;;  %2043 = vmatpush1.bf16.msra.mxu0 %v7346_v44  ;;  %v7411_v44 = vld [vmem:[%s10934_s6 + $0x294] ss:$8 sps:$4 sm:$0xff]  }
 0x153   :  { %2236 = vmatpush1.bf16.msra.mxu1 %v7349_v8  ;;  %2044 = vmatprep.subr.bf16.mxu0 %v7354_v9  ;;  %v7406_v8 = vld [vmem:[%s10933_s7 + $0x290] ss:$8 sps:$4 sm:$0xff]  }
 0x154   :  { %2237 = vmatprep.subr.bf16.mxu1 %v7357_v15  ;;  %2947 = vperm.xlu1 %7060, %v2929_v5   ;;  %v7409_v9 = vld [vmem:[%s10934_s6 + $0x290] ss:$8 sps:$4 sm:$0xff]   ;;  %v7414_v15 = vld [vmem:[%s10933_s7 + $0x284] ss:$8 sps:$4 sm:$0xff]   ;;  %v7456_v5 = vld [vmem:[%s10933_s7 + $0x2d4] ss:$8 sps:$4 sm:$0xff]  }
 0x156   :  { %2045 = vmatpush1.bf16.msra.mxu0 %v7352_v16  ;;  %v7417_v16 = vld [vmem:[%s10934_s6 + $0x284] ss:$8 sps:$4 sm:$0xff]  }
 0x157   :  { %2238 = vmatpush1.bf16.msra.mxu1 %v7355_v17  ;;  %2046 = vmatprep.subr.bf16.mxu0 %v7360_v21  ;;  %v2930_v17 = vld [vmem:[%s10935_s9 + $0x19] sm:$0xff] }
 0x158   :  { %2239 = vmatprep.subr.bf16.mxu1 %v7363_v22  ;;  %1758 = vmatmul.mubr.bf16.gmra.mxu1 %v8554_v10  ;;  %v7412_v21 = vld [vmem:[%s10933_s7 + $0x280] ss:$8 sps:$4 sm:$0xff]  }
 0x159   :  { %1567 = vmatmul.mubr.bf16.gmra.mxu0 %v8549_v45  ;;  %6423 = vmatprep.mubr.msk.bf16.mxu1 %vm894_vm0, %v8412_v12  ;;  %v2931_v22 = vld [vmem:[%s10935_s9 + $0x21] sm:$0xff] }
 0x15a   :  { %6395 = vmatprep.mubr.msk.bf16.mxu0 %vm894_vm0, %v8414_v13  ;;  %2047 = vmatpush1.bf16.msra.mxu0 %v7358_v25  ;;  %v7420_v25 = vld [vmem:[%s10933_s7 + $0x274] ss:$8 sps:$4 sm:$0xff]  }
 0x15b   :  { %2240 = vmatpush1.bf16.msra.mxu1 %v7361_v26  ;;  %2048 = vmatprep.subr.bf16.mxu0 %v7366_v29  ;;  %v7423_v26 = vld [vmem:[%s10934_s6 + $0x274] ss:$8 sps:$4 sm:$0xff]   ;;  %v8897_v29 = vpop.permute.xlu0 %1204 }
 0x15c   :  { %2241 = vmatprep.subr.bf16.mxu1 %v7369_v27  ;;  %2952 = vperm.xlu1 %7060, %v2930_v17   ;;  %v7418_v27 = vld [vmem:[%s10933_s7 + $0x270] ss:$8 sps:$4 sm:$0xff]  }
 0x15d   :  { %2957 = vperm.xlu0 %7064, %v2931_v22   ;;  %v7463_v22 = vld [vmem:[%s10934_s6 + $0x2c0] ss:$8 sps:$4 sm:$0xff]  }
 0x15e   :  { %2049 = vmatpush1.bf16.msra.mxu0 %v7364_v30  ;;  %v7421_v30 = vld [vmem:[%s10934_s6 + $0x270] ss:$8 sps:$4 sm:$0xff]  }
 0x15f   :  { %2242 = vmatpush1.bf16.msra.mxu1 %v7367_v32  ;;  %2058 = vmatprep.subr.bf16.mxu0 %v7372_v36  ;;  %v7426_v32 = vld [vmem:[%s10933_s7 + $0x264] ss:$8 sps:$4 sm:$0xff]  }
 0x160   :  { %2251 = vmatprep.subr.bf16.mxu1 %v7375_v37  ;;  %v7429_v36 = vld [vmem:[%s10934_s6 + $0x264] ss:$8 sps:$4 sm:$0xff]  }
 0x161   :  { %v2932_v37 = vld [vmem:[%s10935_s9 + $0x29] sm:$0xff] }
 0x162   :  { %2059 = vmatpush2.bf16.msra.mxu0 %v7370_v40  ;;  %v7424_v40 = vld [vmem:[%s10933_s7 + $0x260] ss:$8 sps:$4 sm:$0xff]   ;;  %2962 = vperm.xlu1 %7060, %v2932_v37   ;;  %v7474_v37 = vld [vmem:[%s10933_s7 + $0x364] ss:$8 sps:$4 sm:$0xff]  }
 0x163   :  { %2252 = vmatpush2.bf16.msra.mxu1 %v7373_v41  ;;  %2060 = vmatprep.subr.bf16.mxu0 %v7378_v42  ;;  %v2933_v41 = vld [vmem:[%s10935_s9 + $0x31] sm:$0xff]  ;;  %v7427_v42 = vld [vmem:[%s10934_s6 + $0x260] ss:$8 sps:$4 sm:$0xff]  }
 0x164   :  { %2253 = vmatprep.subr.bf16.mxu1 %v7381_v33  ;;  %v7432_v33 = vld [vmem:[%s10933_s7 + $0x254] ss:$8 sps:$4 sm:$0xff]   ;;  %2967 = vperm.xlu0 %7064, %v2933_v41  }
 0x166   :  { %2061 = vmatpush2.bf16.msra.mxu0 %v7376_v49  ;;  %v8932_v49 = vpop.permute.xlu0 %1209 }
 0x167   :  { %2254 = vmatpush2.bf16.msra.mxu1 %v7379_v50  ;;  %2062 = vmatprep.subr.bf16.mxu0 %v7384_v51  ;;  %v7435_v50 = vld [vmem:[%s10934_s6 + $0x254] ss:$8 sps:$4 sm:$0xff]   ;;  %v7430_v51 = vld [vmem:[%s10933_s7 + $0x250] ss:$8 sps:$4 sm:$0xff]  }
 0x168   :  { %2255 = vmatprep.subr.bf16.mxu1 %v7387_v52  ;;  %v7433_v52 = vld [vmem:[%s10934_s6 + $0x250] ss:$8 sps:$4 sm:$0xff]  }
 0x16a   :  { %2063 = vmatpush2.bf16.msra.mxu0 %v7382_v53  ;;  %v7438_v53 = vld [vmem:[%s10933_s7 + $0x244] ss:$8 sps:$4 sm:$0xff]  }
 0x16b   :  { %2256 = vmatpush2.bf16.msra.mxu1 %v7385_v56  ;;  %2064 = vmatprep.subr.bf16.mxu0 %v7390_v57  ;;  %v7441_v56 = vld [vmem:[%s10934_s6 + $0x244] ss:$8 sps:$4 sm:$0xff]   ;;  %v8953_v57 = vpop.permute.xlu0 %1224 }
 0x16c   :  { %2257 = vmatprep.subr.bf16.mxu1 %v7393_v58  ;;  %v2934_v58 = vld [vmem:[%s10935_s9 + $0x39] sm:$0x7f] }
 0x16d   :  { %2972 = vperm.xlu1 %7060, %v2934_v58   ;;  %v7478_v58 = vld [vmem:[%s10933_s7 + $0x350] ss:$8 sps:$4 sm:$0xff]  }
 0x16e   :  { %2065 = vmatpush2.bf16.msra.mxu0 %v7388_v59  ;;  %v7436_v59 = vld [vmem:[%s10933_s7 + $0x240] ss:$8 sps:$4 sm:$0xff]  }
 0x16f   :  { %2258 = vmatpush2.bf16.msra.mxu1 %v7391_v60  ;;  %2645 = vmatprep.subr.bf16.mxu0 %v7396_v31  ;;  %v7439_v60 = vld [vmem:[%s10934_s6 + $0x240] ss:$8 sps:$4 sm:$0xff]   ;;  %v7444_v31 = vld [vmem:[%s10933_s7 + $0x2f4] ss:$8 sps:$4 sm:$0xff]  }
 0x170   :  { %2838 = vmatprep.subr.bf16.mxu1 %v7399_v0  ;;  %v7442_v0 = vld [vmem:[%s10933_s7 + $0x2f0] ss:$8 sps:$4 sm:$0xff]  }
 0x171   :  { %2067 = vmatmul.mubr.bf16.vlgmr.msra.gmra.mxu0 %v8427_v20  ;;  %7061 = vset.pattern.permute.xlu1 %v10944_v23 }
 0x172   :  { %2260 = vmatmul.mubr.bf16.vlgmr.msra.gmra.mxu1 %v8425_v19  ;;  %6396 = vmatprep.mubr.msk.bf16.mxu0 %vm894_vm0, %v8466_v62 }
 0x173   :  { %6424 = vmatprep.mubr.msk.bf16.mxu1 %vm894_vm0, %v8464_v61  ;;  %2646 = vmatpush1.bf16.msra.mxu0 %v7394_v2  ;;  %v7450_v2 = vld [vmem:[%s10933_s7 + $0x2e4] ss:$8 sps:$4 sm:$0xff]  }
 0x174   :  { %2839 = vmatpush1.bf16.msra.mxu1 %v7397_v46  ;;  %2647 = vmatprep.subr.bf16.mxu0 %v7402_v47  ;;  %v8981_v46 = vpop.permute.xlu0 %1794  ;;  %v7453_v47 = vld [vmem:[%s10934_s6 + $0x2e4] ss:$8 sps:$4 sm:$0xff]  }
 0x175   :  { %2840 = vmatprep.subr.bf16.mxu1 %v7405_v3  ;;  %v7448_v3 = vld [vmem:[%s10933_s7 + $0x2e0] ss:$8 sps:$4 sm:$0xff]  }
 0x177   :  { %2648 = vmatpush1.bf16.msra.mxu0 %v7400_v4  ;;  %v7451_v4 = vld [vmem:[%s10934_s6 + $0x2e0] ss:$8 sps:$4 sm:$0xff]  }
 0x178   :  { %2841 = vmatpush1.bf16.msra.mxu1 %v7403_v6  ;;  %2649 = vmatprep.subr.bf16.mxu0 %v7408_v7  ;;  %v7459_v6 = vld [vmem:[%s10934_s6 + $0x2d4] ss:$8 sps:$4 sm:$0xff]   ;;  %v8999_v7 = vpop.permute.xlu0 %1809 }
 0x179   :  { %2077 = vmatmul.mubr.bf16.gmra.mxu0 %v8457_v55  ;;  %2842 = vmatprep.subr.bf16.mxu1 %v7411_v44  ;;  %v9001_v44 = vpop.permute.xlu1 %1214 }
 0x17a   :  { %2270 = vmatmul.mubr.bf16.gmra.mxu1 %v8455_v54  ;;  %6397 = vmatprep.mubr.msk.bf16.mxu0 %vm894_vm0, %v8513_v48 }
 0x17b   :  { %6425 = vmatprep.mubr.msk.bf16.mxu1 %vm894_vm0, %v8511_v43  ;;  %2650 = vmatpush1.bf16.msra.mxu0 %v7406_v8  ;;  %v7454_v8 = vld [vmem:[%s10933_s7 + $0x2d0] ss:$8 sps:$4 sm:$0xff]  }
 0x17c   :  { %2843 = vmatpush1.bf16.msra.mxu1 %v7409_v9  ;;  %2651 = vmatprep.subr.bf16.mxu0 %v7414_v15  ;;  %v7457_v9 = vld [vmem:[%s10934_s6 + $0x2d0] ss:$8 sps:$4 sm:$0xff]   ;;  %v7462_v15 = vld [vmem:[%s10933_s7 + $0x2c4] ss:$8 sps:$4 sm:$0xff]  }
 0x17d   :  { %2844 = vmatprep.subr.bf16.mxu1 %v7417_v16  ;;  %v7465_v16 = vld [vmem:[%s10934_s6 + $0x2c4] ss:$8 sps:$4 sm:$0xff]   ;;  %v9015_v17 = vpop.permute.xlu1 %1219 }
 0x17f   :  { %2652 = vmatpush1.bf16.msra.mxu0 %v7412_v21  ;;  %v7460_v21 = vld [vmem:[%s10933_s7 + $0x2c0] ss:$8 sps:$4 sm:$0xff]  }
 0x180   :  { %2845 = vmatpush1.bf16.msra.mxu1 %v7415_v24  ;;  %2653 = vmatprep.subr.bf16.mxu0 %v7420_v25  ;;  %v7468_v24 = vld [vmem:[%s10933_s7 + $0x374] ss:$8 sps:$4 sm:$0xff]   ;;  %v9026_v25 = vpop.permute.xlu0 %1819 }
 0x181   :  { %2087 = vmatmul.mubr.bf16.gmra.mxu0 %v8504_v35  ;;  %2846 = vmatprep.subr.bf16.mxu1 %v7423_v26  ;;  %v7471_v26 = vld [vmem:[%s10934_s6 + $0x374] ss:$8 sps:$4 sm:$0xff]  }
 0x182   :  { %2280 = vmatmul.mubr.bf16.gmra.mxu1 %v8502_v34  ;;  %6398 = vmatprep.mubr.msk.bf16.mxu0 %vm894_vm0, %v8558_v14 }
 0x183   :  { %6426 = vmatprep.mubr.msk.bf16.mxu1 %vm894_vm0, %v8556_v11  ;;  %2654 = vmatpush1.bf16.msra.mxu0 %v7418_v27  ;;  %v9031_v27 = vpop.permute.xlu1 %1229 }
 0x184   :  { %2847 = vmatpush1.bf16.msra.mxu1 %v7421_v30  ;;  %2655 = vmatprep.subr.bf16.mxu0 %v7426_v32  ;;  %v7466_v30 = vld [vmem:[%s10933_s7 + $0x370] ss:$8 sps:$4 sm:$0xff]   ;;  %v3538_v32 = vld [vmem:[%s10935_s9 + $0x8] sm:$0xff]  ;;  %v9049_v41 = vpop.permute.xlu0 %3547 }
 0x185   :  { %2848 = vmatprep.subr.bf16.mxu1 %v7429_v36  ;;  %v7469_v36 = vld [vmem:[%s10934_s6 + $0x370] ss:$8 sps:$4 sm:$0xff]   ;;  %3552 = vperm.xlu1 %7061, %v3538_v32   ;;  %10977 = vst [vmem:[#allocation6_spill] sm:$0xff] %v9049_v41 }
 0x187   :  { %2656 = vmatpush1.bf16.msra.mxu0 %v7424_v40  ;;  %v7477_v40 = vld [vmem:[%s10934_s6 + $0x364] ss:$8 sps:$4 sm:$0xff]  }
 0x188   :  { %2849 = vmatpush1.bf16.msra.mxu1 %v7427_v42  ;;  %2657 = vmatprep.subr.bf16.mxu0 %v7432_v33  ;;  %v9051_v42 = vpop.permute.xlu1 %1789  ;;  %v9059_v33 = vld [vmem:[%s10935_s9 + $0x10] sm:$0xff] }
 0x189   :  { %2097 = vmatmul.mubr.bf16.gmra.mxu0 %v8549_v45  ;;  %2850 = vmatprep.subr.bf16.mxu1 %v7435_v50  ;;  %v7472_v50 = vld [vmem:[%s10933_s7 + $0x360] ss:$8 sps:$4 sm:$0xff]  }
 0x18a   :  { %2290 = vmatmul.mubr.bf16.gmra.mxu1 %v8554_v10  ;;  %6499 = vmatprep.mubr.msk.bf16.mxu0 %vm894_vm0, %v8414_v13 }
 0x18b   :  { %2658 = vmatpush1.bf16.msra.mxu0 %v7430_v51  ;;  %6527 = vmatprep.mubr.msk.bf16.mxu1 %vm894_vm0, %v8412_v12  ;;  %v7475_v51 = vld [vmem:[%s10934_s6 + $0x360] ss:$8 sps:$4 sm:$0xff]  }
 0x18c   :  { %2851 = vmatpush1.bf16.msra.mxu1 %v7433_v52  ;;  %2659 = vmatprep.subr.bf16.mxu0 %v7438_v53  ;;  %v7480_v52 = vld [vmem:[%s10933_s7 + $0x354] ss:$8 sps:$4 sm:$0xff]  }
 0x18d   :  { %2852 = vmatprep.subr.bf16.mxu1 %v7441_v56  ;;  %v7483_v53 = vld [vmem:[%s10934_s6 + $0x354] ss:$8 sps:$4 sm:$0xff]   ;;  %v9075_v56 = vpop.permute.xlu1 %1799  ;;  %3557 = vperm.xlu1 %7061, %v9059_v33  }
 0x18f   :  { %2660 = vmatpush1.bf16.msra.mxu0 %v7436_v59  ;;  %v9081_v59 = vpop.permute.xlu0 %3562 }
 0x190   :  { %2853 = vmatpush1.bf16.msra.mxu1 %v7439_v60  ;;  %2669 = vmatprep.subr.bf16.mxu0 %v7444_v31  ;;  %10978 = vst [vmem:[#allocation7_spill] sm:$0xff] %v9081_v59  ;;  %v7481_v60 = vld [vmem:[%s10934_s6 + $0x350] ss:$8 sps:$4 sm:$0xff]   ;;  %v7486_v31 = vld [vmem:[%s10933_s7 + $0x344] ss:$8 sps:$4 sm:$0xff]  }
 0x191   :  { %2862 = vmatprep.subr.bf16.mxu1 %v7447_v63  ;;  %v7489_v63 = vld [vmem:[%s10934_s6 + $0x344] ss:$8 sps:$4 sm:$0xff]   ;;  %v7576_v59 = vld [vmem:[%s10933_s7 + $0x3d4] ss:$8 sps:$4 sm:$0xff]  }
 0x193   :  { %2670 = vmatpush2.bf16.msra.mxu0 %v7442_v0  ;;  %v9099_v0 = vld [vmem:[%s10935_s9] sm:$0xff] }
 0x194   :  { %2863 = vmatpush2.bf16.msra.mxu1 %v7445_v1  ;;  %2671 = vmatprep.subr.bf16.mxu0 %v7450_v2  ;;  %v7484_v1 = vld [vmem:[%s10933_s7 + $0x340] ss:$8 sps:$4 sm:$0xff]   ;;  %v9106_v2 = vpop.permute.xlu1 %1804 }
 0x195   :  { %2864 = vmatprep.subr.bf16.mxu1 %v7453_v47  ;;  %v3541_v47 = vld [vmem:[%s10935_s9 + $0x20] sm:$0xff]  ;;  %4717 = vperm.xlu0 %7064, %v9099_v0  }
 0x196   :  { %3567 = vperm.xlu1 %7061, %v3541_v47   ;;  %v7511_v47 = vld [vmem:[%s10934_s6 + $0x300] ss:$8 sps:$4 sm:$0xff]  }
 0x197   :  { %2672 = vmatpush2.bf16.msra.mxu0 %v7448_v3  ;;  %v7487_v3 = vld [vmem:[%s10934_s6 + $0x340] ss:$8 sps:$4 sm:$0xff]  }
 0x198   :  { %2865 = vmatpush2.bf16.msra.mxu1 %v7451_v4  ;;  %2673 = vmatprep.subr.bf16.mxu0 %v7456_v5  ;;  %v7492_v4 = vld [vmem:[%s10933_s7 + $0x334] ss:$8 sps:$4 sm:$0xff]  }
 0x199   :  { %2866 = vmatprep.subr.bf16.mxu1 %v7459_v6  ;;  %v7495_v5 = vld [vmem:[%s10934_s6 + $0x334] ss:$8 sps:$4 sm:$0xff]   ;;  %v9120_v6 = vpop.permute.xlu0 %3572 }
 0x19a   :  { %10979 = vst [vmem:[#allocation8_spill] sm:$0xff] %v9120_v6 }
 0x19b   :  { %2674 = vmatpush2.bf16.msra.mxu0 %v7454_v8  ;;  %v7490_v8 = vld [vmem:[%s10933_s7 + $0x330] ss:$8 sps:$4 sm:$0xff]  }
 0x19c   :  { %2867 = vmatpush2.bf16.msra.mxu1 %v7457_v9  ;;  %2675 = vmatprep.subr.bf16.mxu0 %v7462_v15  ;;  %v9126_v9 = vpop.permute.xlu1 %1814  ;;  %v7493_v15 = vld [vmem:[%s10934_s6 + $0x330] ss:$8 sps:$4 sm:$0xff]  }
 0x19d   :  { %2868 = vmatprep.subr.bf16.mxu1 %v7465_v16  ;;  %v7498_v16 = vld [vmem:[%s10933_s7 + $0x324] ss:$8 sps:$4 sm:$0xff]  }
 0x19f   :  { %2676 = vmatpush2.bf16.msra.mxu0 %v7460_v21  ;;  %v7501_v21 = vld [vmem:[%s10934_s6 + $0x324] ss:$8 sps:$4 sm:$0xff]  }
 0x1a0   :  { %2869 = vmatpush2.bf16.msra.mxu1 %v7463_v22  ;;  %3255 = vmatprep.subr.bf16.mxu0 %v7468_v24  ;;  %v9144_v22 = vld [vmem:[%s10935_s9 + $0x18] sm:$0xff]  ;;  %v7496_v24 = vld [vmem:[%s10933_s7 + $0x320] ss:$8 sps:$4 sm:$0xff]   ;;  %v2324_v32 = vpop.permute.xlu1 %2323 }
 0x1a1   :  { %3448 = vmatprep.subr.bf16.mxu1 %v7471_v26  ;;  %v2328_v26 = vpop.permute.xlu0 %2327  ;;  %4729 = vperm.xlu0 %7064, %v9144_v22  }
 0x1a2   :  { %2678 = vmatmul.mubr.bf16.vlgmr.msra.gmra.mxu0 %v8427_v20 }
 0x1a3   :  { %2871 = vmatmul.mubr.bf16.vlgmr.msra.gmra.mxu1 %v8425_v19  ;;  %6500 = vmatprep.mubr.msk.bf16.mxu0 %vm894_vm0, %v8466_v62 }
 0x1a4   :  { %6528 = vmatprep.mubr.msk.bf16.mxu1 %vm894_vm0, %v8464_v61  ;;  %3256 = vmatpush1.bf16.msra.mxu0 %v7466_v30  ;;  %v3543_v30 = vld [vmem:[%s10935_s9 + $0x30] sm:$0xff] }
 0x1a5   :  { %3449 = vmatpush1.bf16.msra.mxu1 %v7469_v36  ;;  %3257 = vmatprep.subr.bf16.mxu0 %v7474_v37  ;;  %v7499_v36 = vld [vmem:[%s10934_s6 + $0x320] ss:$8 sps:$4 sm:$0xff]   ;;  %v7504_v37 = vld [vmem:[%s10933_s7 + $0x314] ss:$8 sps:$4 sm:$0xff]  }
 0x1a6   :  { %3450 = vmatprep.subr.bf16.mxu1 %v7477_v40  ;;  %v2350_v40 = vrot.slane %v2328_v26, 7  ;;  %3577 = vperm.xlu1 %7061, %v3543_v30   ;;  %v7525_v30 = vld [vmem:[%s10934_s6 + $0x3a4] ss:$8 sps:$4 sm:$0xff]  }
 0x1a8   :  { %3258 = vmatpush1.bf16.msra.mxu0 %v7472_v50  ;;  %v7507_v50 = vld [vmem:[%s10934_s6 + $0x314] ss:$8 sps:$4 sm:$0xff]  }
 0x1a9   :  { %3451 = vmatpush1.bf16.msra.mxu1 %v7475_v51  ;;  %3259 = vmatprep.subr.bf16.mxu0 %v7480_v52  ;;  %v9164_v51 = vrot.slane %v2324_v32, 7  ;;  %v7502_v52 = vld [vmem:[%s10933_s7 + $0x310] ss:$8 sps:$4 sm:$0xff]   ;;  %v2340_v32 = vpop.permute.xlu0 %2339 }
 0x1aa   :  { %2688 = vmatmul.mubr.bf16.gmra.mxu0 %v8457_v55  ;;  %3452 = vmatprep.subr.bf16.mxu1 %v7483_v53  ;;  %v7505_v53 = vld [vmem:[%s10934_s6 + $0x310] ss:$8 sps:$4 sm:$0xff]  }
 0x1ab   :  { %2881 = vmatmul.mubr.bf16.gmra.mxu1 %v8455_v54  ;;  %6501 = vmatprep.mubr.msk.bf16.mxu0 %vm894_vm0, %v8513_v48 }
 0x1ac   :  { %6529 = vmatprep.mubr.msk.bf16.mxu1 %vm894_vm0, %v8511_v43  ;;  %3260 = vmatpush1.bf16.msra.mxu0 %v7478_v58  ;;  %v7510_v58 = vld [vmem:[%s10933_s7 + $0x304] ss:$8 sps:$4 sm:$0xff]  }
 0x1ad   :  { %3453 = vmatpush1.bf16.msra.mxu1 %v7481_v60  ;;  %3261 = vmatprep.subr.bf16.mxu0 %v7486_v31  ;;  %v9177_v60 = vsel %vm1265_vm1, %v9164_v51, %v2350_v40  ;;  %v7513_v31 = vld [vmem:[%s10934_s6 + $0x304] ss:$8 sps:$4 sm:$0xff]  }
 0x1ae   :  { %3454 = vmatprep.subr.bf16.mxu1 %v7489_v63  ;;  %v4713_v63 = vld [vmem:[%s10935_s9 + $0x28] sm:$0xff]  ;;  %7063 = vset.pattern.permute.xlu1 %v10941_v28 }
 0x1af   :  { %4737 = vperm.xlu0 %7064, %v4713_v63   ;;  %4095 = vperm.xlu1 %7063, %v9099_v0  }
 0x1b0   :  { %3262 = vmatpush1.bf16.msra.mxu0 %v7484_v1  ;;  %v7508_v1 = vld [vmem:[%s10933_s7 + $0x300] ss:$8 sps:$4 sm:$0xff]  }
 0x1b1   :  { %3455 = vmatpush1.bf16.msra.mxu1 %v7487_v3  ;;  %3263 = vmatprep.subr.bf16.mxu0 %v7492_v4  ;;  %v7516_v3 = vld [vmem:[%s10933_s7 + $0x3b4] ss:$8 sps:$4 sm:$0xff]  }
 0x1b2   :  { %2698 = vmatmul.mubr.bf16.gmra.mxu0 %v8504_v35  ;;  %3456 = vmatprep.subr.bf16.mxu1 %v7495_v5  ;;  %v7519_v4 = vld [vmem:[%s10934_s6 + $0x3b4] ss:$8 sps:$4 sm:$0xff]   ;;  %v2332_v5 = vpop.permute.xlu1 %2331 }
 0x1b3   :  { %2891 = vmatmul.mubr.bf16.gmra.mxu1 %v8502_v34  ;;  %6502 = vmatprep.mubr.msk.bf16.mxu0 %vm894_vm0, %v8558_v14 }
 0x1b4   :  { %6530 = vmatprep.mubr.msk.bf16.mxu1 %vm894_vm0, %v8556_v11  ;;  %3264 = vmatpush1.bf16.msra.mxu0 %v7490_v8  ;;  %v2352_v8 = vrot.slane %v2332_v5, 7 }
 0x1b5   :  { %3457 = vmatpush1.bf16.msra.mxu1 %v7493_v15  ;;  %3265 = vmatprep.subr.bf16.mxu0 %v7498_v16  ;;  %v7514_v15 = vld [vmem:[%s10933_s7 + $0x3b0] ss:$8 sps:$4 sm:$0xff]  }
 0x1b6   :  { %3458 = vmatprep.subr.bf16.mxu1 %v7501_v21  ;;  %v3544_v16 = vld [vmem:[%s10935_s9 + $0x38] sm:$0xff]  ;;  %v9218_v26 = vsel %vm1265_vm1, %v2350_v40, %v2352_v8  ;;  %7066 = vset.pattern.permute.xlu0 %v10944_v23  ;;  %v2336_v0 = vpop.permute.xlu1 %2335  ;;  %v7523_v40 = vld [vmem:[%s10934_s6 + $0x3a0] ss:$8 sps:$4 sm:$0xff]  }
 0x1b7   :  { %v7517_v21 = vld [vmem:[%s10934_s6 + $0x3b0] ss:$8 sps:$4 sm:$0xff]   ;;  %3582 = vperm.xlu0 %7066, %v3544_v16   ;;  %4103 = vperm.xlu1 %7063, %v9059_v33  }
 0x1b8   :  { %3266 = vmatpush1.bf16.msra.mxu0 %v7496_v24  ;;  %v7522_v24 = vld [vmem:[%s10933_s7 + $0x3a4] ss:$8 sps:$4 sm:$0xff]   ;;  %v7526_v33 = vld [vmem:[%s10933_s7 + $0x390] ss:$8 sps:$4 sm:$0xff]  }
 0x1b9   :  { %3459 = vmatpush1.bf16.msra.mxu1 %v7499_v36  ;;  %3267 = vmatprep.subr.bf16.mxu0 %v7504_v37  ;;  %v2354_v36 = vrot.slane %v2336_v0, 7  ;;  %v7520_v37 = vld [vmem:[%s10933_s7 + $0x3a0] ss:$8 sps:$4 sm:$0xff]  }
 0x1ba   :  { %2708 = vmatmul.mubr.bf16.gmra.mxu0 %v8549_v45  ;;  %3460 = vmatprep.subr.bf16.mxu1 %v7507_v50  ;;  %v2356_v50 = vrot.slane %v2340_v32, 7  ;;  %v9279_v32 = vpop.permute.xlu0 %2347 }
 0x1bb   :  { %2901 = vmatmul.mubr.bf16.gmra.mxu1 %v8554_v10  ;;  %6603 = vmatprep.mubr.msk.bf16.mxu0 %vm894_vm0, %v8414_v13  ;;  %10983 = vst [vmem:[#allocation12_spill] sm:$0xff] %v9279_v32 }
 0x1bc   :  { %3268 = vmatpush1.bf16.msra.mxu0 %v7502_v52  ;;  %6631 = vmatprep.mubr.msk.bf16.mxu1 %vm894_vm0, %v8412_v12  ;;  %v7528_v52 = vld [vmem:[%s10933_s7 + $0x394] ss:$8 sps:$4 sm:$0xff]  }
 0x1bd   :  { %3461 = vmatpush1.bf16.msra.mxu1 %v7505_v53  ;;  %3269 = vmatprep.subr.bf16.mxu0 %v7510_v58  ;;  %v9235_v53 = vsel %vm1265_vm1, %v2352_v8, %v2354_v36  ;;  %v7531_v58 = vld [vmem:[%s10934_s6 + $0x394] ss:$8 sps:$4 sm:$0xff]   ;;  %v7535_v8 = vld [vmem:[%s10934_s6 + $0x380] ss:$8 sps:$4 sm:$0xff]  }
 0x1be   :  { %3462 = vmatprep.subr.bf16.mxu1 %v7513_v31  ;;  %v9244_v31 = vsel %vm1265_vm1, %v2354_v36, %v2356_v50  ;;  %4107 = vperm.xlu1 %7063, %v9144_v22   ;;  %v7532_v22 = vld [vmem:[%s10933_s7 + $0x380] ss:$8 sps:$4 sm:$0xff]   ;;  %v7541_v36 = vld [vmem:[%s10934_s6 + $0x430] ss:$8 sps:$4 sm:$0xff]  }
 0x1bf   :  { %10980 = vst [vmem:[#allocation9_spill] sm:$0xff] %v9244_v31  ;;  %v9607_v31 = vld [vmem:[%s10935_s9 + $0x20] sm:$0xff] }
 0x1c0   :  { %3270 = vmatpush1.bf16.msra.mxu0 %v7508_v1  ;;  %v7529_v1 = vld [vmem:[%s10934_s6 + $0x390] ss:$8 sps:$4 sm:$0xff]  }
 0x1c1   :  { %3463 = vmatpush1.bf16.msra.mxu1 %v7511_v47  ;;  %3279 = vmatprep.subr.bf16.mxu0 %v7516_v3  ;;  %v7534_v47 = vld [vmem:[%s10933_s7 + $0x384] ss:$8 sps:$4 sm:$0xff]  }
 0x1c2   :  { %3472 = vmatprep.subr.bf16.mxu1 %v7519_v4  ;;  %v7537_v3 = vld [vmem:[%s10934_s6 + $0x384] ss:$8 sps:$4 sm:$0xff]   ;;  %v9256_v4 = vpop.permute.xlu1 %2343  ;;  %4115 = vperm.xlu1 %7063, %v4713_v63   ;;  %v7543_v63 = vld [vmem:[%s10934_s6 + $0x434] ss:$8 sps:$4 sm:$0xff]  }
 0x1c3   :  { %10981 = vst [vmem:[#allocation10_spill] sm:$0xff] %v9256_v4  ;;  %v10940_v5 = vrot.slane %v9256_v4, 7 }
 0x1c4   :  { %3280 = vmatpush2.bf16.msra.mxu0 %v7514_v15  ;;  %v7540_v15 = vld [vmem:[%s10933_s7 + $0x434] ss:$8 sps:$4 sm:$0xff]  }
 0x1c5   :  { %3473 = vmatpush2.bf16.msra.mxu1 %v7517_v21  ;;  %3281 = vmatprep.subr.bf16.mxu0 %v7522_v24  ;;  %v9271_v16 = vsel %vm1265_vm1, %v2356_v50, %v10940_v5 }
 0x1c6   :  { %3474 = vmatprep.subr.bf16.mxu1 %v7525_v30  ;;  %10982 = vst [vmem:[#allocation11_spill] sm:$0xff] %v9271_v16  ;;  %v7538_v30 = vld [vmem:[%s10933_s7 + $0x430] ss:$8 sps:$4 sm:$0xff]   ;;  %v10989_v16 = vmov 0  }
 0x1c8   :  { %3282 = vmatpush2.bf16.msra.mxu0 %v7520_v37 }
 0x1c9   :  { %3475 = vmatpush2.bf16.msra.mxu1 %v7523_v40  ;;  %3283 = vmatprep.subr.bf16.mxu0 %v7528_v52  ;;  %v7546_v40 = vld [vmem:[%s10933_s7 + $0x424] ss:$8 sps:$4 sm:$0xff]  }
 0x1ca   :  { %3476 = vmatprep.subr.bf16.mxu1 %v7531_v58 }
 0x1cc   :  { %3284 = vmatpush2.bf16.msra.mxu0 %v7526_v33  ;;  %v7549_v33 = vld [vmem:[%s10934_s6 + $0x424] ss:$8 sps:$4 sm:$0xff]  }
 0x1cd   :  { %3477 = vmatpush2.bf16.msra.mxu1 %v7529_v1  ;;  %3285 = vmatprep.subr.bf16.mxu0 %v7534_v47  ;;  %v1181_v1 = vld [vmem:[%s10938_s10 + $0x10] sm:$0xfe] }
 0x1ce   :  { %3478 = vmatprep.subr.bf16.mxu1 %v7537_v3 }
 0x1d0   :  { %3286 = vmatpush2.bf16.msra.mxu0 %v7532_v22  ;;  %v1144_v24 = vpop.f32.mrf.mxu1 }
 0x1d1   :  { %v941_v21 = vpop.f32.mrf.mxu0  ;;  %3479 = vmatpush2.bf16.msra.mxu1 %v7535_v8  ;;  %3803 = vmatprep.subr.bf16.mxu0 %v7540_v15  ;;  %v7544_v15 = vld [vmem:[%s10933_s7 + $0x420] ss:$8 sps:$4 sm:$0xff]  }
 0x1d2   :  { %v1145_v0 = vadd.f32 %v1144_v24, %v941_v21  ;;  %3996 = vmatprep.subr.bf16.mxu1 %v7543_v63  ;;  %v1146_v50 = vpop.f32.mrf.mxu1  ;;  %v1182_v21 = vld [vmem:[%s10938_s10 + $0x18] sm:$0xfe]  ;;  %v7547_v24 = vld [vmem:[%s10934_s6 + $0x420] ss:$8 sps:$4 sm:$0xff]  }
 0x1d3   :  { %v943_v37 = vpop.f32.mrf.mxu0  ;;  %3288 = vmatmul.mubr.bf16.vlgmr.msra.gmra.mxu0 %v8427_v20 }
 0x1d4   :  { %v1237_v52 = vmul.f32 %v8897_v29, %v1145_v0  ;;  %v1147_v58 = vadd.f32 %v1146_v50, %v943_v37  ;;  %3481 = vmatmul.mubr.bf16.vlgmr.msra.gmra.mxu1 %v8425_v19  ;;  %6604 = vmatprep.mubr.msk.bf16.mxu0 %vm894_vm0, %v8466_v62  ;;  %v1148_v3 = vpop.f32.mrf.mxu1 }
 0x1d5   :  { %v945_v47 = vpop.f32.mrf.mxu0  ;;  %6632 = vmatprep.mubr.msk.bf16.mxu1 %vm894_vm0, %v8464_v61  ;;  %3804 = vmatpush1.bf16.msra.mxu0 %v7538_v30 }
 0x1d6   :  { %v1266_v22 = vrot.slane %v1237_v52, 7  ;;  %v9301_v8 = vmul.f32 %v8897_v29, %v1147_v58  ;;  %v1149_v63 = vadd.f32 %v1148_v3, %v945_v47  ;;  %3997 = vmatpush1.bf16.msra.mxu1 %v7541_v36  ;;  %3805 = vmatprep.subr.bf16.mxu0 %v7546_v40  ;;  %v9314_v30 = vpop.f32.mrf.mxu1  ;;  %v7552_v29 = vld [vmem:[%s10933_s7 + $0x414] ss:$8 sps:$4 sm:$0xff]   ;;  %v9324_v52 = vpop.permute.xlu0 %4099 }
 0x1d7   :  { %v9312_v0 = vpop.f32.mrf.mxu0  ;;  %3998 = vmatprep.subr.bf16.mxu1 %v7549_v33  ;;  %v7555_v40 = vld [vmem:[%s10934_s6 + $0x414] ss:$8 sps:$4 sm:$0xff]   ;;  %10984 = vst [vmem:[#allocation13_spill] sm:$0xff] %v9324_v52  ;;  %v7550_v33 = vld [vmem:[%s10933_s7 + $0x410] ss:$8 sps:$4 sm:$0xff]  }
 0x1d8   :  { %v1306_v37 = vadd.f32 %v1266_v22, %v1181_v1  ;;  %v10943_v36 = vrot.slane %v9301_v8, 7  ;;  %v1239_v50 = vmul.f32 %v8932_v49, %v1149_v63  ;;  %v1154_v3 = vpop.f32.mrf.mxu1  ;;  %v7553_v63 = vld [vmem:[%s10934_s6 + $0x410] ss:$8 sps:$4 sm:$0xff]  }
 0x1d9   :  { %v951_v58 = vpop.f32.mrf.mxu0  ;;  %3806 = vmatpush1.bf16.msra.mxu0 %v7544_v15 }
 0x1da   :  { %1320 = vst [vmem:[%s10938_s10 + $0x10] sm:$0xfe] %v1306_v37  ;;  %v1307_v47 = vadd.f32 %v10943_v36, %v1182_v21  ;;  %v1268_v1 = vrot.slane %v1239_v50, 7  ;;  %3999 = vmatpush1.bf16.msra.mxu1 %v7547_v24  ;;  %3807 = vmatprep.subr.bf16.mxu0 %v7552_v29  ;;  %v1155_v5 = vadd.f32 %v1154_v3, %v951_v58  ;;  %v7558_v37 = vld [vmem:[%s10933_s7 + $0x404] ss:$8 sps:$4 sm:$0xff]   ;;  %v1156_v21 = vpop.f32.mrf.mxu1 }
 0x1db   :  { %v953_v28 = vpop.f32.mrf.mxu0  ;;  %3298 = vmatmul.mubr.bf16.gmra.mxu0 %v8457_v55  ;;  %4000 = vmatprep.subr.bf16.mxu1 %v7555_v40  ;;  %v7561_v24 = vld [vmem:[%s10934_s6 + $0x404] ss:$8 sps:$4 sm:$0xff]  }
 0x1dc   :  { %1321 = vst [vmem:[%s10938_s10 + $0x18] sm:$0xfe] %v1307_v47  ;;  %v9344_v15 = vsel %vm1265_vm1, %v1266_v22, %v1268_v1  ;;  %3491 = vmatmul.mubr.bf16.gmra.mxu1 %v8455_v54  ;;  %6605 = vmatprep.mubr.msk.bf16.mxu0 %vm894_vm0, %v8513_v48  ;;  %v1241_v29 = vmul.f32 %v9001_v44, %v1155_v5  ;;  %v7556_v22 = vld [vmem:[%s10933_s7 + $0x400] ss:$8 sps:$4 sm:$0xff]   ;;  %v1158_v40 = vpop.f32.mrf.mxu1  ;;  %v9361_v47 = vpop.permute.xlu0 %4111 }
 0x1dd   :  { %v9354_v50 = vadd.f32 %v1156_v21, %v953_v28  ;;  %v955_v58 = vpop.f32.mrf.mxu0  ;;  %6633 = vmatprep.mubr.msk.bf16.mxu1 %vm894_vm0, %v8511_v43  ;;  %3808 = vmatpush1.bf16.msra.mxu0 %v7550_v33  ;;  %10985 = vst [vmem:[#allocation14_spill] sm:$0xff] %v9361_v47  ;;  %v7559_v28 = vld [vmem:[%s10934_s6 + $0x400] ss:$8 sps:$4 sm:$0xff]   ;;  %v7564_v33 = vld [vmem:[%s10933_s7 + $0x3f4] ss:$8 sps:$4 sm:$0xff]  }
 0x1de   :  { %4001 = vmatpush1.bf16.msra.mxu1 %v7553_v63  ;;  %v1272_v3 = vrot.slane %v1241_v29, 7  ;;  %3809 = vmatprep.subr.bf16.mxu0 %v7558_v37  ;;  %v1159_v5 = vadd.f32 %v1158_v40, %v955_v58  ;;  %v9371_v36 = vpop.f32.mrf.mxu1  ;;  %v7567_v63 = vld [vmem:[%s10934_s6 + $0x3f4] ss:$8 sps:$4 sm:$0xff]   ;;  %v7562_v58 = vld [vmem:[%s10933_s7 + $0x3f0] ss:$8 sps:$4 sm:$0xff]  }
 0x1df   :  { %v9366_v21 = vpop.f32.mrf.mxu0  ;;  %4002 = vmatprep.subr.bf16.mxu1 %v7561_v24  ;;  %v7565_v24 = vld [vmem:[%s10934_s6 + $0x3f0] ss:$8 sps:$4 sm:$0xff]  }
 0x1e0   :  { %v9377_v37 = vsel %vm1265_vm1, %v1268_v1, %v1272_v3  ;;  %v1243_v23 = vmul.f32 %v9015_v17, %v1159_v5  ;;  %v1164_v40 = vpop.f32.mrf.mxu1  ;;  %v7570_v1 = vld [vmem:[%s10933_s7 + $0x3e4] ss:$8 sps:$4 sm:$0xff]   ;;  %v9393_v5 = vpop.permute.xlu0 %4119 }
 0x1e1   :  { %v961_v29 = vpop.f32.mrf.mxu0  ;;  %3810 = vmatpush1.bf16.msra.mxu0 %v7556_v22  ;;  %10986 = vst [vmem:[#allocation15_spill] sm:$0xff] %v9393_v5 }
 0x1e2   :  { %4003 = vmatpush1.bf16.msra.mxu1 %v7559_v28  ;;  %3811 = vmatprep.subr.bf16.mxu0 %v7564_v33  ;;  %v1165_v18 = vadd.f32 %v1164_v40, %v961_v29  ;;  %v1276_v39 = vrot.slane %v1243_v23, 7  ;;  %v1166_v22 = vpop.f32.mrf.mxu1  ;;  %v7573_v28 = vld [vmem:[%s10934_s6 + $0x3e4] ss:$8 sps:$4 sm:$0xff]  }
 0x1e3   :  { %v963_v38 = vpop.f32.mrf.mxu0  ;;  %3308 = vmatmul.mubr.bf16.gmra.mxu0 %v8504_v35  ;;  %4004 = vmatprep.subr.bf16.mxu1 %v7567_v63  ;;  %v4092_v63 = vld [vmem:[%s10935_s9 + $0x38] sm:$0x7f] }
 0x1e4   :  { %3501 = vmatmul.mubr.bf16.gmra.mxu1 %v8502_v34  ;;  %v1245_v33 = vmul.f32 %v8953_v57, %v1165_v18  ;;  %6606 = vmatprep.mubr.msk.bf16.mxu0 %vm894_vm0, %v8558_v14  ;;  %v1167_v23 = vadd.f32 %v1166_v22, %v963_v38  ;;  %v9400_v29 = vsel %vm1265_vm1, %v1272_v3, %v1276_v39  ;;  %v7568_v18 = vld [vmem:[%s10933_s7 + $0x3e0] ss:$8 sps:$4 sm:$0xff]   ;;  %v1168_v41 = vpop.f32.mrf.mxu1 }
 0x1e5   :  { %v965_v40 = vpop.f32.mrf.mxu0  ;;  %6634 = vmatprep.mubr.msk.bf16.mxu1 %vm894_vm0, %v8556_v11  ;;  %3812 = vmatpush1.bf16.msra.mxu0 %v7562_v58  ;;  %v7571_v38 = vld [vmem:[%s10934_s6 + $0x3e0] ss:$8 sps:$4 sm:$0xff]  }
 0x1e6   :  { %v1280_v6 = vrot.slane %v1245_v33, 7  ;;  %4005 = vmatpush1.bf16.msra.mxu1 %v7565_v24  ;;  %3813 = vmatprep.subr.bf16.mxu0 %v7570_v1  ;;  %v1169_v3 = vadd.f32 %v1168_v41, %v965_v40  ;;  %v9417_v58 = vmul.f32 %v8953_v57, %v1167_v23  ;;  %v1170_v5 = vpop.f32.mrf.mxu1  ;;  %v7579_v24 = vld [vmem:[%s10934_s6 + $0x3d4] ss:$8 sps:$4 sm:$0xff]   ;;  %v7574_v57 = vld [vmem:[%s10933_s7 + $0x3d0] ss:$8 sps:$4 sm:$0xff]  }
 0x1e7   :  { %v967_v22 = vpop.f32.mrf.mxu0  ;;  %4006 = vmatprep.subr.bf16.mxu1 %v7573_v28  ;;  %4123 = vperm.xlu1 %7063, %v4092_v63   ;;  %v9429_v28 = vpop.permute.xlu0 %1234  ;;  %v7577_v63 = vld [vmem:[%s10934_s6 + $0x3d0] ss:$8 sps:$4 sm:$0xff]  }
 0x1e8   :  { %v9423_v1 = vsel %vm1265_vm1, %v1276_v39, %v1280_v6  ;;  %v1171_v33 = vadd.f32 %v1170_v5, %v967_v22  ;;  %v1247_v40 = vmul.f32 %v9031_v27, %v1169_v3  ;;  %v1174_v23 = vpop.f32.mrf.mxu1 }
 0x1e9   :  { %v971_v41 = vpop.f32.mrf.mxu0  ;;  %3814 = vmatpush1.bf16.msra.mxu0 %v7568_v18  ;;  %v7582_v18 = vld [vmem:[%s10933_s7 + $0x3c4] ss:$8 sps:$4 sm:$0xff]  }
 0x1ea   :  { %4007 = vmatpush1.bf16.msra.mxu1 %v7571_v38  ;;  %3815 = vmatprep.subr.bf16.mxu0 %v7576_v59  ;;  %v1175_v39 = vadd.f32 %v1174_v23, %v971_v41  ;;  %v9435_v5 = vmul.f32 %v9031_v27, %v1171_v33  ;;  %v1284_v3 = vrot.slane %v1247_v40, 7  ;;  %v1176_v59 = vpop.f32.mrf.mxu1  ;;  %v7585_v38 = vld [vmem:[%s10934_s6 + $0x3c4] ss:$8 sps:$4 sm:$0xff]   ;;  %v7580_v23 = vld [vmem:[%s10933_s7 + $0x3c0] ss:$8 sps:$4 sm:$0xff]  }
 0x1eb   :  { %v973_v47 = vpop.f32.mrf.mxu0  ;;  %3318 = vmatmul.mubr.bf16.gmra.mxu0 %v8549_v45  ;;  %4008 = vmatprep.subr.bf16.mxu1 %v7579_v24 }
 0x1ec   :  { %3511 = vmatmul.mubr.bf16.gmra.mxu1 %v8554_v10  ;;  %6707 = vmatprep.mubr.msk.bf16.mxu0 %vm894_vm0, %v8414_v13  ;;  %v9448_v27 = vadd.f32 %v1176_v59, %v973_v47  ;;  %v9451_v33 = vsel %vm1265_vm1, %v1280_v6, %v1284_v3  ;;  %v10953_v41 = vrot.slane %v9435_v5, 7  ;;  %v1249_v40 = vmul.f32 %v9429_v28, %v1175_v39  ;;  %v1178_v22 = vpop.f32.mrf.mxu1  ;;  %v7588_v39 = vld [vmem:[%s10933_s7 + $0x474] ss:$8 sps:$4 sm:$0xff]  }
 0x1ed   :  { %v975_v24 = vpop.f32.mrf.mxu0  ;;  %3816 = vmatpush1.bf16.msra.mxu0 %v7574_v57  ;;  %6735 = vmatprep.mubr.msk.bf16.mxu1 %vm894_vm0, %v8412_v12  ;;  %v10987_v6 = vrot.slane %v9417_v58, 7  ;;  %v7583_v57 = vld [vmem:[%s10934_s6 + $0x3c0] ss:$8 sps:$4 sm:$0xff]  }
 0x1ee   :  { %4009 = vmatpush1.bf16.msra.mxu1 %v7577_v63  ;;  %v1288_v59 = vrot.slane %v1249_v40, 7  ;;  %3817 = vmatprep.subr.bf16.mxu0 %v7582_v18  ;;  %v7591_v63 = vld [vmem:[%s10934_s6 + $0x474] ss:$8 sps:$4 sm:$0xff]   ;;  %v1179_v22 = vpop.f32.mrf.mxu1  ;;  %v7586_v18 = vld [vmem:[%s10933_s7 + $0x470] ss:$8 sps:$4 sm:$0xff]  }
 0x1ef   :  { %v9465_v47 = vsel %vm1265_vm1, %v10987_v6, %v10953_v41  ;;  %v976_v24 = vpop.f32.mrf.mxu0  ;;  %4010 = vmatprep.subr.bf16.mxu1 %v7585_v38  ;;  %7065 = vset.pattern.permute.xlu1 %v10989_v16  ;;  %v7589_v38 = vld [vmem:[%s10934_s6 + $0x470] ss:$8 sps:$4 sm:$0xff]   ;;  %v7594_v6 = vld [vmem:[%s10933_s7 + $0x464] ss:$8 sps:$4 sm:$0xff]  }
 0x1f0   :  { %10988 = vst [vmem:[#allocation16_spill] sm:$0xff] %v9465_v47  ;;  %v9478_v40 = vsel %vm1265_vm1, %v1284_v3, %v1288_v59  ;;  %v7597_v16 = vld [vmem:[%s10934_s6 + $0x464] ss:$8 sps:$4 sm:$0xff]   ;;  %v7592_v3 = vld [vmem:[%s10933_s7 + $0x460] ss:$8 sps:$4 sm:$0xff]  }
 0x1f1   :  { %3818 = vmatpush1.bf16.msra.mxu0 %v7580_v23  ;;  %v7595_v23 = vld [vmem:[%s10934_s6 + $0x460] ss:$8 sps:$4 sm:$0xff]   ;;  %v7600_v59 = vld [vmem:[%s10933_s7 + $0x454] ss:$8 sps:$4 sm:$0xff]   ;;  %v7601_v24 = vld [vmem:[%s10934_s6 + $0x450] ss:$8 sps:$4 sm:$0xff]  }
 0x1f2   :  { %4011 = vmatpush1.bf16.msra.mxu1 %v7583_v57  ;;  %3827 = vmatprep.subr.bf16.mxu0 %v7588_v39  ;;  %v7603_v57 = vld [vmem:[%s10934_s6 + $0x454] ss:$8 sps:$4 sm:$0xff]   ;;  %v7598_v39 = vld [vmem:[%s10933_s7 + $0x450] ss:$8 sps:$4 sm:$0xff]   ;;  %v7609_v22 = vld [vmem:[%s10934_s6 + $0x444] ss:$8 sps:$4 sm:$0xff]  }
 0x1f3   :  { %4020 = vmatprep.subr.bf16.mxu1 %v7591_v63  ;;  %v7606_v63 = vld [vmem:[%s10933_s7 + $0x444] ss:$8 sps:$4 sm:$0xff]  }
 0x1f5   :  { %3828 = vmatpush2.bf16.msra.mxu0 %v7586_v18  ;;  %v7604_v18 = vld [vmem:[%s10933_s7 + $0x440] ss:$8 sps:$4 sm:$0xff]  }
 0x1f6   :  { %4021 = vmatpush2.bf16.msra.mxu1 %v7589_v38  ;;  %3829 = vmatprep.subr.bf16.mxu0 %v7594_v6  ;;  %v7607_v38 = vld [vmem:[%s10934_s6 + $0x440] ss:$8 sps:$4 sm:$0xff]   ;;  %v7612_v6 = vld [vmem:[%s10933_s7 + $0x4f4] ss:$8 sps:$4 sm:$0xff]  }
 0x1f7   :  { %4022 = vmatprep.subr.bf16.mxu1 %v7597_v16  ;;  %v1151_v16 = vadd.f32 %v9314_v30, %v9312_v0  ;;  %v7610_v30 = vld [vmem:[%s10933_s7 + $0x4f0] ss:$8 sps:$4 sm:$0xff]  }
 0x1f9   :  { %3830 = vmatpush2.bf16.msra.mxu0 %v7592_v3  ;;  %v7615_v3 = vld [vmem:[%s10934_s6 + $0x4f4] ss:$8 sps:$4 sm:$0xff]  }
 0x1fa   :  { %4023 = vmatpush2.bf16.msra.mxu1 %v7595_v23  ;;  %3831 = vmatprep.subr.bf16.mxu0 %v7600_v59  ;;  %v9533_v23 = vld [vmem:[%s10935_s9 + $0x8] sm:$0xff] }
 0x1fb   :  { %4024 = vmatprep.subr.bf16.mxu1 %v7603_v57  ;;  %4721 = vperm.xlu1 %7065, %v9533_v23   ;;  %v9538_v57 = vmul.f32 %v9001_v44, %v9354_v50  ;;  %v7618_v50 = vld [vmem:[%s10933_s7 + $0x4e4] ss:$8 sps:$4 sm:$0xff]  }
 0x1fd   :  { %3832 = vmatpush2.bf16.msra.mxu0 %v7598_v39  ;;  %10990 = vst [vmem:[#allocation17_spill] sm:$0xff] %v9538_v57  ;;  %v10991_v41 = vrot.slane %v9538_v57, 7  ;;  %v7622_v57 = vld [vmem:[%s10933_s7 + $0x4d0] ss:$8 sps:$4 sm:$0xff]  }
 0x1fe   :  { %4025 = vmatpush2.bf16.msra.mxu1 %v7601_v24  ;;  %3833 = vmatprep.subr.bf16.mxu0 %v7606_v63  ;;  %v9546_v63 = vmul.f32 %v8932_v49, %v1151_v16  ;;  %v7619_v16 = vld [vmem:[%s10934_s6 + $0x4e0] ss:$8 sps:$4 sm:$0xff]  }
 0x1ff   :  { %4026 = vmatprep.subr.bf16.mxu1 %v7609_v22  ;;  %v7613_v22 = vld [vmem:[%s10934_s6 + $0x4f0] ss:$8 sps:$4 sm:$0xff]  }
 0x200   :  { %v1729_v39 = vpop.f32.mrf.mxu1  ;;  %v10992_v47 = vrot.slane %v9546_v63, 7 }
 0x201   :  { %v1538_v59 = vpop.f32.mrf.mxu0  ;;  %3834 = vmatpush2.bf16.msra.mxu0 %v7604_v18  ;;  %v9557_v18 = vld [vmem:[%s10935_s9 + $0x10] sm:$0xff] }
 0x202   :  { %4027 = vmatpush2.bf16.msra.mxu1 %v7607_v38  ;;  %v9540_v0 = vadd.f32 %v1729_v39, %v1538_v59  ;;  %4428 = vmatprep.subr.bf16.mxu0 %v7612_v6  ;;  %v1731_v44 = vpop.f32.mrf.mxu1  ;;  %v7621_v6 = vld [vmem:[%s10934_s6 + $0x4e4] ss:$8 sps:$4 sm:$0xff]   ;;  %v1161_v59 = vadd.f32 %v9371_v36, %v9366_v21  ;;  %v7624_v21 = vld [vmem:[%s10933_s7 + $0x4d4] ss:$8 sps:$4 sm:$0xff]   ;;  %v1275_v4 = vsel %vm1265_vm1, %v10992_v47, %v10991_v41  ;;  %v7625_v41 = vld [vmem:[%s10934_s6 + $0x4d0] ss:$8 sps:$4 sm:$0xff]  }
 0x203   :  { %v1540_v24 = vpop.f32.mrf.mxu0  ;;  %4621 = vmatprep.subr.bf16.mxu1 %v7615_v3  ;;  %4725 = vperm.xlu1 %7065, %v9557_v18  }
 0x204   :  { %3836 = vmatmul.mubr.bf16.vlgmr.msra.gmra.mxu0 %v8427_v20  ;;  %v9560_v38 = vadd.f32 %v1731_v44, %v1540_v24  ;;  %v1733_v3 = vpop.f32.mrf.mxu1  ;;  %v7616_v24 = vld [vmem:[%s10933_s7 + $0x4e0] ss:$8 sps:$4 sm:$0xff]  }
 0x205   :  { %v1542_v49 = vpop.f32.mrf.mxu0  ;;  %4029 = vmatmul.mubr.bf16.vlgmr.msra.gmra.mxu1 %v8425_v19  ;;  %6708 = vmatprep.mubr.msk.bf16.mxu0 %vm894_vm0, %v8466_v62 }
 0x206   :  { %6736 = vmatprep.mubr.msk.bf16.mxu1 %vm894_vm0, %v8464_v61  ;;  %4429 = vmatpush1.bf16.msra.mxu0 %v7610_v30  ;;  %v1734_v39 = vadd.f32 %v1733_v3, %v1542_v49  ;;  %v9583_v36 = vpop.f32.mrf.mxu1  ;;  %v9591_v30 = vld [vmem:[%s10938_s10] sm:$0xff]  ;;  %v7627_v3 = vld [vmem:[%s10934_s6 + $0x4d4] ss:$8 sps:$4 sm:$0xff]  }
 0x207   :  { %v9577_v44 = vpop.f32.mrf.mxu0  ;;  %4622 = vmatpush1.bf16.msra.mxu1 %v7613_v22  ;;  %4430 = vmatprep.subr.bf16.mxu0 %v7618_v50  ;;  %v1308_v49 = vadd.f32 %v9591_v30, %v9344_v15  ;;  %v9610_v15 = vmul.f32 %v9015_v17, %v1161_v59  ;;  %v7630_v17 = vld [vmem:[%s10933_s7 + $0x4c4] ss:$8 sps:$4 sm:$0xff]  }
 0x208   :  { %v1824_v22 = vmul.f32 %v8981_v46, %v1734_v39  ;;  %4623 = vmatprep.subr.bf16.mxu1 %v7621_v6  ;;  %v1739_v52 = vpop.f32.mrf.mxu1  ;;  %4733 = vperm.xlu1 %7065, %v9607_v31  }
 0x209   :  { %v1548_v50 = vpop.f32.mrf.mxu0 }
 0x20a   :  { %v9612_v6 = vadd.f32 %v1824_v22, %v1308_v49  ;;  %4431 = vmatpush1.bf16.msra.mxu0 %v7616_v24  ;;  %v1740_v39 = vadd.f32 %v1739_v52, %v1548_v50  ;;  %v1741_v47 = vpop.f32.mrf.mxu1  ;;  %v1310_v52 = vadd.f32 %v9591_v30, %v9377_v37  ;;  %v1311_v49 = vadd.f32 %v9591_v30, %v1275_v4  ;;  %v7628_v4 = vld [vmem:[%s10933_s7 + $0x4c0] ss:$8 sps:$4 sm:$0xff]  }
 0x20b   :  { %v1550_v32 = vpop.f32.mrf.mxu0  ;;  %4624 = vmatpush1.bf16.msra.mxu1 %v7619_v16  ;;  %4432 = vmatprep.subr.bf16.mxu0 %v7624_v21  ;;  %v7633_v21 = vld [vmem:[%s10934_s6 + $0x4c4] ss:$8 sps:$4 sm:$0xff]  }
 0x20c   :  { %3846 = vmatmul.mubr.bf16.gmra.mxu0 %v8457_v55  ;;  %4625 = vmatprep.subr.bf16.mxu1 %v7627_v3  ;;  %v1826_v59 = vmul.f32 %v9075_v56, %v1740_v39  ;;  %v1742_v24 = vadd.f32 %v1741_v47, %v1550_v32  ;;  %v1743_v22 = vpop.f32.mrf.mxu1  ;;  %v7631_v47 = vld [vmem:[%s10934_s6 + $0x4c0] ss:$8 sps:$4 sm:$0xff]  }
 0x20d   :  { %v1552_v16 = vpop.f32.mrf.mxu0  ;;  %4039 = vmatmul.mubr.bf16.gmra.mxu1 %v8455_v54  ;;  %6709 = vmatprep.mubr.msk.bf16.mxu0 %vm894_vm0, %v8513_v48 }
 0x20e   :  { %6737 = vmatprep.mubr.msk.bf16.mxu1 %vm894_vm0, %v8511_v43  ;;  %4433 = vmatpush1.bf16.msra.mxu0 %v7622_v57  ;;  %v9638_v32 = vadd.f32 %v1826_v59, %v1310_v52  ;;  %v1827_v50 = vmul.f32 %v9075_v56, %v1742_v24  ;;  %v1744_v3 = vadd.f32 %v1743_v22, %v1552_v16  ;;  %v9649_v37 = vpop.f32.mrf.mxu1  ;;  %v7636_v57 = vld [vmem:[%s10933_s7 + $0x4b4] ss:$8 sps:$4 sm:$0xff]   ;;  %v10995_v22 = vrot.slane %v9417_v58, 7  ;;  %v7637_v58 = vld [vmem:[%s10934_s6 + $0x4b0] ss:$8 sps:$4 sm:$0xff]  }
 0x20f   :  { %v9644_v39 = vpop.f32.mrf.mxu0  ;;  %4626 = vmatpush1.bf16.msra.mxu1 %v7625_v41  ;;  %4434 = vmatprep.subr.bf16.mxu0 %v7630_v17  ;;  %v1312_v56 = vadd.f32 %v9591_v30, %v9400_v29  ;;  %v7639_v17 = vld [vmem:[%s10934_s6 + $0x4b4] ss:$8 sps:$4 sm:$0xff]   ;;  %v10996_v29 = vrot.slane %v9610_v15, 7 }
 0x210   :  { %10993 = vst [vmem:[#allocation18_spill] sm:$0xff] %v9638_v32  ;;  %v9656_v52 = vadd.f32 %v1827_v50, %v1311_v49  ;;  %4627 = vmatprep.subr.bf16.mxu1 %v7633_v21  ;;  %v1828_v59 = vmul.f32 %v9106_v2, %v1744_v3  ;;  %v1749_v24 = vpop.f32.mrf.mxu1  ;;  %v9665_v16 = vld [vmem:[%s10935_s9 + $0x30] sm:$0xff]  ;;  %v1250_v32 = vmul.f32 %v9429_v28, %v9448_v27 }
 0x211   :  { %v1558_v41 = vpop.f32.mrf.mxu0  ;;  %v1283_v49 = vsel %vm1265_vm1, %v10996_v29, %v10995_v22  ;;  %v7634_v3 = vld [vmem:[%s10933_s7 + $0x4b0] ss:$8 sps:$4 sm:$0xff]   ;;  %4741 = vperm.xlu1 %7065, %v9665_v16   ;;  %v7640_v22 = vld [vmem:[%s10933_s7 + $0x4a0] ss:$8 sps:$4 sm:$0xff]  }
 0x212   :  { %10994 = vst [vmem:[#allocation19_spill] sm:$0xff] %v9656_v52  ;;  %4435 = vmatpush1.bf16.msra.mxu0 %v7628_v4  ;;  %v9672_v21 = vadd.f32 %v1828_v59, %v1312_v56  ;;  %v1750_v50 = vadd.f32 %v1749_v24, %v1558_v41  ;;  %v1751_v4 = vpop.f32.mrf.mxu1  ;;  %v7642_v56 = vld [vmem:[%s10933_s7 + $0x4a4] ss:$8 sps:$4 sm:$0xff]   ;;  %v1314_v59 = vadd.f32 %v9591_v30, %v9423_v1 }
 0x213   :  { %v1560_v52 = vpop.f32.mrf.mxu0  ;;  %4628 = vmatpush1.bf16.msra.mxu1 %v7631_v47  ;;  %4436 = vmatprep.subr.bf16.mxu0 %v7636_v57  ;;  %v7645_v47 = vld [vmem:[%s10934_s6 + $0x4a4] ss:$8 sps:$4 sm:$0xff]   ;;  %v1315_v57 = vadd.f32 %v9591_v30, %v1283_v49  ;;  %v1290_v49 = vrot.slane %v1250_v32, 7 }
 0x214   :  { %v1830_v41 = vmul.f32 %v8999_v7, %v1750_v50  ;;  %3856 = vmatmul.mubr.bf16.gmra.mxu0 %v8504_v35  ;;  %4629 = vmatprep.subr.bf16.mxu1 %v7639_v17  ;;  %v1752_v28 = vadd.f32 %v1751_v4, %v1560_v52  ;;  %v1753_v24 = vpop.f32.mrf.mxu1  ;;  %v7643_v50 = vld [vmem:[%s10934_s6 + $0x4a0] ss:$8 sps:$4 sm:$0xff]  }
 0x215   :  { %v1562_v27 = vpop.f32.mrf.mxu0  ;;  %4049 = vmatmul.mubr.bf16.gmra.mxu1 %v8502_v34  ;;  %6710 = vmatprep.mubr.msk.bf16.mxu0 %vm894_vm0, %v8558_v14 }
 0x216   :  { %v9697_v1 = vadd.f32 %v1830_v41, %v1314_v59  ;;  %6738 = vmatprep.mubr.msk.bf16.mxu1 %vm894_vm0, %v8556_v11  ;;  %4437 = vmatpush1.bf16.msra.mxu0 %v7634_v3  ;;  %v1831_v52 = vmul.f32 %v8999_v7, %v1752_v28  ;;  %v1754_v17 = vadd.f32 %v1753_v24, %v1562_v27  ;;  %v9710_v4 = vpop.f32.mrf.mxu1  ;;  %v7648_v7 = vld [vmem:[%s10933_s7 + $0x494] ss:$8 sps:$4 sm:$0xff]   ;;  %v10997_v41 = vmov 1  }
 0x217   :  { %v9705_v29 = vpop.f32.mrf.mxu0  ;;  %4630 = vmatpush1.bf16.msra.mxu1 %v7637_v58  ;;  %4438 = vmatprep.subr.bf16.mxu0 %v7642_v56  ;;  %v1316_v3 = vadd.f32 %v9591_v30, %v9451_v33  ;;  %v7651_v56 = vld [vmem:[%s10934_s6 + $0x494] ss:$8 sps:$4 sm:$0xff]   ;;  %v7646_v33 = vld [vmem:[%s10933_s7 + $0x490] ss:$8 sps:$4 sm:$0xff]  }
 0x218   :  { %v9717_v59 = vadd.f32 %v1831_v52, %v1315_v57  ;;  %4631 = vmatprep.subr.bf16.mxu1 %v7645_v47  ;;  %v1832_v32 = vmul.f32 %v9126_v9, %v1754_v17  ;;  %7067 = vset.pattern.permute.xlu1 %v10997_v41  ;;  %v1759_v28 = vpop.f32.mrf.mxu1  ;;  %v10998_v57 = vrot.slane %v9435_v5, 7  ;;  %v7649_v17 = vld [vmem:[%s10934_s6 + $0x490] ss:$8 sps:$4 sm:$0xff]  }
 0x219   :  { %v1568_v58 = vpop.f32.mrf.mxu0  ;;  %5328 = vperm.xlu1 %7067, %v9533_v23  }
 0x21a   :  { %4439 = vmatpush1.bf16.msra.mxu0 %v7640_v22  ;;  %v9725_v27 = vadd.f32 %v1832_v32, %v1316_v3  ;;  %v1760_v24 = vadd.f32 %v1759_v28, %v1568_v58  ;;  %v1291_v52 = vsel %vm1265_vm1, %v10998_v57, %v1290_v49  ;;  %v1761_v41 = vpop.f32.mrf.mxu1  ;;  %v7654_v22 = vld [vmem:[%s10933_s7 + $0x484] ss:$8 sps:$4 sm:$0xff]   ;;  %v1318_v3 = vadd.f32 %v9591_v30, %v9478_v40  ;;  %v7652_v28 = vld [vmem:[%s10933_s7 + $0x480] ss:$8 sps:$4 sm:$0xff]  }
 0x21b   :  { %v1570_v47 = vpop.f32.mrf.mxu0  ;;  %4632 = vmatpush1.bf16.msra.mxu1 %v7643_v50  ;;  %4440 = vmatprep.subr.bf16.mxu0 %v7648_v7  ;;  %v7657_v50 = vld [vmem:[%s10934_s6 + $0x484] ss:$8 sps:$4 sm:$0xff]   ;;  %v1319_v58 = vadd.f32 %v9591_v30, %v1291_v52  ;;  %v9764_v52 = vpop.permute.xlu1 %2937 }
 0x21c   :  { %v1834_v32 = vmul.f32 %v9026_v25, %v1760_v24  ;;  %3866 = vmatmul.mubr.bf16.gmra.mxu0 %v8549_v45  ;;  %4633 = vmatprep.subr.bf16.mxu1 %v7651_v56  ;;  %v1762_v5 = vadd.f32 %v1761_v41, %v1570_v47  ;;  %v1763_v7 = vpop.f32.mrf.mxu1  ;;  %v7655_v47 = vld [vmem:[%s10934_s6 + $0x480] ss:$8 sps:$4 sm:$0xff]  }
 0x21d   :  { %v1572_v49 = vpop.f32.mrf.mxu0  ;;  %4059 = vmatmul.mubr.bf16.gmra.mxu1 %v8554_v10  ;;  %6811 = vmatprep.mubr.msk.bf16.mxu0 %vm894_vm0, %v8414_v13  ;;  %v7672_v7 = vld [vmem:[%s10933_s7 + $0x514] ss:$8 sps:$4 sm:$0xff]  }
 0x21e   :  { %v9750_v40 = vadd.f32 %v1834_v32, %v1318_v3  ;;  %4441 = vmatpush1.bf16.msra.mxu0 %v7646_v33  ;;  %6839 = vmatprep.mubr.msk.bf16.mxu1 %vm894_vm0, %v8412_v12  ;;  %v1835_v56 = vmul.f32 %v9026_v25, %v1762_v5  ;;  %v1764_v57 = vpop.f32.mrf.mxu1  ;;  %v7660_v33 = vld [vmem:[%s10933_s7 + $0x534] ss:$8 sps:$4 sm:$0xff]   ;;  %v7666_v3 = vld [vmem:[%s10933_s7 + $0x524] ss:$8 sps:$4 sm:$0xff]   ;;  %v7664_v49 = vld [vmem:[%s10933_s7 + $0x520] ss:$8 sps:$4 sm:$0xff]  }
 0x21f   :  { %v1573_v24 = vpop.f32.mrf.mxu0  ;;  %4634 = vmatpush1.bf16.msra.mxu1 %v7649_v17  ;;  %4442 = vmatprep.subr.bf16.mxu0 %v7654_v22  ;;  %v7663_v25 = vld [vmem:[%s10934_s6 + $0x534] ss:$8 sps:$4 sm:$0xff]   ;;  %v7658_v17 = vld [vmem:[%s10933_s7 + $0x530] ss:$8 sps:$4 sm:$0xff]   ;;  %v9781_v32 = vpop.permute.xlu1 %2947  ;;  %v7669_v5 = vld [vmem:[%s10934_s6 + $0x524] ss:$8 sps:$4 sm:$0xff]  }
 0x220   :  { %v9766_v41 = vadd.f32 %v1835_v56, %v1319_v58  ;;  %4635 = vmatprep.subr.bf16.mxu1 %v7657_v50  ;;  %5333 = vperm.xlu1 %7067, %v9557_v18   ;;  %v7661_v22 = vld [vmem:[%s10934_s6 + $0x530] ss:$8 sps:$4 sm:$0xff]   ;;  %10999 = vst [vmem:[#allocation20_spill] sm:$0xff] %v9781_v32  ;;  %v7667_v50 = vld [vmem:[%s10934_s6 + $0x520] ss:$8 sps:$4 sm:$0xff]   ;;  %v11001_v57 = vmov 2  }
 0x221   :  { %v7675_v58 = vld [vmem:[%s10934_s6 + $0x514] ss:$8 sps:$4 sm:$0xff]   ;;  %v7673_v24 = vld [vmem:[%s10934_s6 + $0x510] ss:$8 sps:$4 sm:$0xff]   ;;  %v11006_v32 = vrot.slane %v9301_v8, 7 }
 0x222   :  { %4443 = vmatpush1.bf16.msra.mxu0 %v7652_v28  ;;  %v7670_v28 = vld [vmem:[%s10933_s7 + $0x510] ss:$8 sps:$4 sm:$0xff]  }
 0x223   :  { %4636 = vmatpush1.bf16.msra.mxu1 %v7655_v47  ;;  %4452 = vmatprep.subr.bf16.mxu0 %v7660_v33  ;;  %v9800_v56 = vpop.permute.xlu1 %2952  ;;  %v7678_v47 = vld [vmem:[%s10933_s7 + $0x504] ss:$8 sps:$4 sm:$0xff]  }
 0x224   :  { %4645 = vmatprep.subr.bf16.mxu1 %v7663_v25  ;;  %5343 = vperm.xlu1 %7067, %v9607_v31   ;;  %11000 = vst [vmem:[#allocation21_spill] sm:$0xff] %v9800_v56  ;;  %v7676_v25 = vld [vmem:[%s10933_s7 + $0x500] ss:$8 sps:$4 sm:$0xff]  }
 0x226   :  { %4453 = vmatpush2.bf16.msra.mxu0 %v7658_v17  ;;  %v7679_v17 = vld [vmem:[%s10934_s6 + $0x500] ss:$8 sps:$4 sm:$0xff]  }
 0x227   :  { %4646 = vmatpush2.bf16.msra.mxu1 %v7661_v22  ;;  %4454 = vmatprep.subr.bf16.mxu0 %v7666_v3  ;;  %v9815_v33 = vpop.permute.xlu1 %2962  ;;  %v7684_v22 = vld [vmem:[%s10933_s7 + $0x5b4] ss:$8 sps:$4 sm:$0xff]  }
 0x228   :  { %4647 = vmatprep.subr.bf16.mxu1 %v7669_v5  ;;  %5353 = vperm.xlu1 %7067, %v9665_v16   ;;  %v7681_v16 = vld [vmem:[%s10934_s6 + $0x504] ss:$8 sps:$4 sm:$0xff]   ;;  %11002 = vst [vmem:[#allocation22_spill] sm:$0xff] %v9815_v33 }
 0x22a   :  { %4455 = vmatpush2.bf16.msra.mxu0 %v7664_v49 }
 0x22b   :  { %4648 = vmatpush2.bf16.msra.mxu1 %v7667_v50  ;;  %4456 = vmatprep.subr.bf16.mxu0 %v7672_v7  ;;  %v9830_v5 = vpop.permute.xlu1 %2972  ;;  %v9836_v50 = vld [vmem:[%s10935_s9] sm:$0xff] }
 0x22c   :  { %4649 = vmatprep.subr.bf16.mxu1 %v7675_v58  ;;  %7069 = vset.pattern.permute.xlu1 %v11001_v57  ;;  %11003 = vst [vmem:[#allocation23_spill] sm:$0xff] %v9830_v5  ;;  %v7682_v58 = vld [vmem:[%s10933_s7 + $0x5b0] ss:$8 sps:$4 sm:$0xff]   ;;  %v7691_v5 = vld [vmem:[%s10934_s6 + $0x5a0] ss:$8 sps:$4 sm:$0xff]  }
 0x22d   :  { %5857 = vperm.xlu1 %7069, %v9533_v23   ;;  %v7687_v23 = vld [vmem:[%s10934_s6 + $0x5b4] ss:$8 sps:$4 sm:$0xff]   ;;  %5323 = vperm.xlu0 %7066, %v9836_v50  }
 0x22e   :  { %4457 = vmatpush2.bf16.msra.mxu0 %v7670_v28 }
 0x22f   :  { %4650 = vmatpush2.bf16.msra.mxu1 %v7673_v24  ;;  %4458 = vmatprep.subr.bf16.mxu0 %v7678_v47  ;;  %v7685_v24 = vld [vmem:[%s10934_s6 + $0x5b0] ss:$8 sps:$4 sm:$0xff]   ;;  %v7690_v47 = vld [vmem:[%s10933_s7 + $0x5a4] ss:$8 sps:$4 sm:$0xff]  }
 0x230   :  { %4651 = vmatprep.subr.bf16.mxu1 %v7681_v16 }
 0x231   :  { %v2068_v3 = vpop.f32.mrf.mxu0  ;;  %5861 = vperm.xlu1 %7069, %v9557_v18  }
 0x232   :  { %4459 = vmatpush2.bf16.msra.mxu0 %v7676_v25  ;;  %v2261_v49 = vpop.f32.mrf.mxu1 }
 0x233   :  { %4652 = vmatpush2.bf16.msra.mxu1 %v7679_v17  ;;  %v2262_v7 = vadd.f32 %v2261_v49, %v2068_v3  ;;  %5038 = vmatprep.subr.bf16.mxu0 %v7684_v22  ;;  %v2070_v28 = vpop.f32.mrf.mxu0  ;;  %v7693_v22 = vld [vmem:[%s10934_s6 + $0x5a4] ss:$8 sps:$4 sm:$0xff]   ;;  %v9853_v3 = vpop.permute.xlu1 %3552 }
 0x234   :  { %5229 = vmatprep.subr.bf16.mxu1 %v7687_v23  ;;  %v2263_v18 = vpop.f32.mrf.mxu1  ;;  %11004 = vst [vmem:[#allocation24_spill] sm:$0xff] %v9853_v3 }
 0x235   :  { %v2370_v16 = vmul.f32 %v9164_v51, %v2262_v7  ;;  %4461 = vmatmul.mubr.bf16.vlgmr.msra.gmra.mxu0 %v8427_v20  ;;  %v2264_v25 = vadd.f32 %v2263_v18, %v2070_v28  ;;  %v2072_v17 = vpop.f32.mrf.mxu0  ;;  %5869 = vperm.xlu1 %7069, %v9607_v31   ;;  %v7688_v28 = vld [vmem:[%s10933_s7 + $0x5a0] ss:$8 sps:$4 sm:$0xff]   ;;  %v1822_v31 = vmul.f32 %v9051_v42, %v9540_v0  ;;  %v7699_v0 = vld [vmem:[%s10934_s6 + $0x594] ss:$8 sps:$4 sm:$0xff]  }
 0x236   :  { %4654 = vmatmul.mubr.bf16.vlgmr.msra.gmra.mxu1 %v8425_v19  ;;  %6812 = vmatprep.mubr.msk.bf16.mxu0 %vm894_vm0, %v8466_v62  ;;  %v2265_v23 = vpop.f32.mrf.mxu1 }
 0x237   :  { %6840 = vmatprep.mubr.msk.bf16.mxu1 %vm894_vm0, %v8464_v61  ;;  %5039 = vmatpush1.bf16.msra.mxu0 %v7682_v58  ;;  %v2371_v49 = vmul.f32 %v9164_v51, %v2264_v25  ;;  %v2266_v7 = vadd.f32 %v2265_v23, %v2072_v17  ;;  %v2074_v18 = vpop.f32.mrf.mxu0  ;;  %v7696_v51 = vld [vmem:[%s10933_s7 + $0x594] ss:$8 sps:$4 sm:$0xff]   ;;  %v1736_v23 = vadd.f32 %v9583_v36, %v9577_v44  ;;  %v9894_v44 = vpop.permute.xlu1 %3557  ;;  %v11005_v36 = vrot.slane %v9546_v63, 7 }
 0x238   :  { %5230 = vmatpush1.bf16.msra.mxu1 %v7685_v24  ;;  %5040 = vmatprep.subr.bf16.mxu0 %v7690_v47  ;;  %v2267_v3 = vpop.f32.mrf.mxu1  ;;  %v9880_v24 = vld [vmem:[%s10935_s9 + $0x18] sm:$0xff]  ;;  %v1823_v47 = vmul.f32 %v9051_v42, %v9560_v38 }
 0x239   :  { %v2372_v58 = vmul.f32 %v9177_v60, %v2266_v7  ;;  %5231 = vmatprep.subr.bf16.mxu1 %v7693_v22  ;;  %v2268_v25 = vadd.f32 %v2267_v3, %v2074_v18  ;;  %v2078_v17 = vpop.f32.mrf.mxu0  ;;  %5338 = vperm.xlu0 %7066, %v9880_v24   ;;  %v1766_v22 = vld [vmem:[%s10938_s10 + $0x10] sm:$0xff]  ;;  %v2403_v3 = vrot.slane %v2370_v16, 1  ;;  %v1271_v61 = vsel %vm1265_vm1, %v11006_v32, %v11005_v36  ;;  %v1767_v63 = vld [vmem:[%s10938_s10 + $0x18] sm:$0xff] }
 0x23a   :  { %v2271_v7 = vpop.f32.mrf.mxu1  ;;  %v7694_v42 = vld [vmem:[%s10933_s7 + $0x590] ss:$8 sps:$4 sm:$0xff]   ;;  %v1836_v62 = vadd.f32 %v1822_v31, %v1766_v22  ;;  %v2406_v16 = vrot.slane %v2371_v49, 1 }
 0x23b   :  { %v2404_v18 = vrot.slane %v2372_v58, 1  ;;  %5041 = vmatpush1.bf16.msra.mxu0 %v7688_v28  ;;  %v2373_v33 = vmul.f32 %v9177_v60, %v2268_v25  ;;  %v2272_v56 = vadd.f32 %v2271_v7, %v2078_v17  ;;  %v2080_v38 = vpop.f32.mrf.mxu0  ;;  %v7697_v60 = vld [vmem:[%s10934_s6 + $0x590] ss:$8 sps:$4 sm:$0xff]   ;;  %v7702_v58 = vld [vmem:[%s10933_s7 + $0x584] ss:$8 sps:$4 sm:$0xff]   ;;  %v1837_v25 = vadd.f32 %v1823_v47, %v1767_v63 }
 0x23c   :  { %5232 = vmatpush1.bf16.msra.mxu1 %v7691_v5  ;;  %5042 = vmatprep.subr.bf16.mxu0 %v7696_v51  ;;  %v2273_v28 = vpop.f32.mrf.mxu1  ;;  %v7705_v51 = vld [vmem:[%s10934_s6 + $0x584] ss:$8 sps:$4 sm:$0xff]   ;;  %v1825_v17 = vmul.f32 %v8981_v46, %v1736_v23  ;;  %v7700_v47 = vld [vmem:[%s10933_s7 + $0x580] ss:$8 sps:$4 sm:$0xff]  }
 0x23d   :  { %v2405_v8 = vsel %vm2402_vm2, %v2403_v3, %v2404_v18  ;;  %v2407_v32 = vrot.slane %v2373_v33, 1  ;;  %v2374_v49 = vmul.f32 %v9218_v26, %v2272_v56  ;;  %4471 = vmatmul.mubr.bf16.gmra.mxu0 %v8457_v55  ;;  %5233 = vmatprep.subr.bf16.mxu1 %v7699_v0  ;;  %v2274_v5 = vadd.f32 %v2273_v28, %v2080_v38  ;;  %v2082_v31 = vpop.f32.mrf.mxu0  ;;  %v9925_v33 = vld [vmem:[%s10935_s9 + $0x28] sm:$0xff]  ;;  %v9934_v3 = vpop.permute.xlu1 %3567 }
 0x23e   :  { %v9917_v7 = vadd.f32 %v2405_v8, %v1836_v62  ;;  %4664 = vmatmul.mubr.bf16.gmra.mxu1 %v8455_v54  ;;  %6813 = vmatprep.mubr.msk.bf16.mxu0 %vm894_vm0, %v8513_v48  ;;  %v2275_v56 = vpop.f32.mrf.mxu1  ;;  %v1309_v38 = vadd.f32 %v9591_v30, %v1271_v61 }
 0x23f   :  { %v2408_v0 = vsel %vm2402_vm2, %v2406_v16, %v2407_v32  ;;  %v2409_v22 = vrot.slane %v2374_v49, 1  ;;  %6841 = vmatprep.mubr.msk.bf16.mxu1 %vm894_vm0, %v8511_v43  ;;  %5043 = vmatpush1.bf16.msra.mxu0 %v7694_v42  ;;  %v2375_v62 = vmul.f32 %v9218_v26, %v2274_v5  ;;  %v2276_v46 = vadd.f32 %v2275_v56, %v2082_v31  ;;  %v2084_v23 = vpop.f32.mrf.mxu0  ;;  %v7703_v42 = vld [vmem:[%s10934_s6 + $0x580] ss:$8 sps:$4 sm:$0xff]   ;;  %v7708_v26 = vld [vmem:[%s10933_s7 + $0x574] ss:$8 sps:$4 sm:$0xff]  }
 0x240   :  { %v9937_v36 = vadd.f32 %v2408_v0, %v1837_v25  ;;  %5234 = vmatpush1.bf16.msra.mxu1 %v7697_v60  ;;  %5044 = vmatprep.subr.bf16.mxu0 %v7702_v58  ;;  %v2277_v16 = vpop.f32.mrf.mxu1  ;;  %v7711_v60 = vld [vmem:[%s10934_s6 + $0x574] ss:$8 sps:$4 sm:$0xff]   ;;  %v1839_v58 = vadd.f32 %v1825_v17, %v1309_v38  ;;  %v1746_v5 = vadd.f32 %v9649_v37, %v9644_v39 }
 0x241   :  { %v2410_v28 = vsel %vm2402_vm2, %v2404_v18, %v2409_v22  ;;  %v2411_v63 = vrot.slane %v2375_v62, 1  ;;  %v2376_v8 = vmul.f32 %v9235_v53, %v2276_v46  ;;  %5235 = vmatprep.subr.bf16.mxu1 %v7705_v51  ;;  %v2278_v61 = vadd.f32 %v2277_v16, %v2084_v23  ;;  %v2088_v49 = vpop.f32.mrf.mxu0  ;;  %5348 = vperm.xlu0 %7066, %v9925_v33   ;;  %v7706_v62 = vld [vmem:[%s10933_s7 + $0x570] ss:$8 sps:$4 sm:$0xff]   ;;  %v9961_v17 = vpop.permute.xlu1 %3577 }
 0x242   :  { %v9954_v31 = vadd.f32 %v2410_v28, %v9612_v6  ;;  %v2281_v18 = vpop.f32.mrf.mxu1  ;;  %11007 = vst [vmem:[#allocation25_spill] sm:$0xff] %v9961_v17  ;;  %v11008_v23 = vld [vmem:[#allocation12_spill] sm:$0xff]  ;;  %v11009_v6 = vrot.slane %v9610_v15, 7  ;;  %v11010_v39 = vld [vmem:[#allocation17_spill] sm:$0xff]  ;;  %v7714_v28 = vld [vmem:[%s10933_s7 + $0x564] ss:$8 sps:$4 sm:$0xff]  }
 0x243   :  { %v2412_v25 = vsel %vm2402_vm2, %v2407_v32, %v2411_v63  ;;  %v2413_v56 = vrot.slane %v2376_v8, 1  ;;  %5045 = vmatpush1.bf16.msra.mxu0 %v7700_v47  ;;  %v2377_v51 = vmul.f32 %v9235_v53, %v2278_v61  ;;  %v2282_v0 = vadd.f32 %v2281_v18, %v2088_v49  ;;  %v2090_v46 = vpop.f32.mrf.mxu0  ;;  %v7709_v53 = vld [vmem:[%s10934_s6 + $0x570] ss:$8 sps:$4 sm:$0xff]  }
 0x244   :  { %v9964_v37 = vrot.slane %v11008_v23, 7  ;;  %v11011_v38 = vrot.slane %v11010_v39, 7  ;;  %v9971_v47 = vadd.f32 %v2412_v25, %v1839_v58  ;;  %5236 = vmatpush1.bf16.msra.mxu1 %v7703_v42  ;;  %5046 = vmatprep.subr.bf16.mxu0 %v7708_v26  ;;  %v2283_v16 = vpop.f32.mrf.mxu1  ;;  %v11012_v61 = vld [vmem:[#allocation9_spill] sm:$0xff]  ;;  %v7717_v26 = vld [vmem:[%s10934_s6 + $0x564] ss:$8 sps:$4 sm:$0xff]   ;;  %v1829_v18 = vmul.f32 %v9106_v2, %v1746_v5 }
 0x245   :  { %v2414_v8 = vsel %vm2402_vm2, %v2409_v22, %v2413_v56  ;;  %v2415_v15 = vrot.slane %v2377_v51, 1  ;;  %v2378_v49 = vmul.f32 %v11012_v61, %v2282_v0  ;;  %4481 = vmatmul.mubr.bf16.gmra.mxu0 %v8504_v35  ;;  %5237 = vmatprep.subr.bf16.mxu1 %v7711_v60  ;;  %v2284_v58 = vadd.f32 %v2283_v16, %v2090_v46  ;;  %v2092_v42 = vpop.f32.mrf.mxu0  ;;  %v11013_v25 = vld [vmem:[#allocation18_spill] sm:$0xff]  ;;  %v11014_v39 = vld [vmem:[#allocation13_spill] sm:$0xff] }
 0x246   :  { %v1279_v32 = vsel %vm1265_vm1, %v11011_v38, %v11009_v6  ;;  %v9987_v23 = vadd.f32 %v2414_v8, %v11013_v25  ;;  %4674 = vmatmul.mubr.bf16.gmra.mxu1 %v8502_v34  ;;  %6814 = vmatprep.mubr.msk.bf16.mxu0 %vm894_vm0, %v8558_v14  ;;  %v2285_v22 = vpop.f32.mrf.mxu1  ;;  %v7712_v2 = vld [vmem:[%s10933_s7 + $0x560] ss:$8 sps:$4 sm:$0xff]   ;;  %v4096_v6 = vpop.permute.xlu1 %4095  ;;  %v7720_v25 = vld [vmem:[%s10933_s7 + $0x554] ss:$8 sps:$4 sm:$0xff]  }
 0x247   :  { %v2416_v51 = vsel %vm2402_vm2, %v2411_v63, %v2415_v15  ;;  %v2417_v60 = vrot.slane %v2378_v49, 1  ;;  %6842 = vmatprep.mubr.msk.bf16.mxu1 %vm894_vm0, %v8556_v11  ;;  %5047 = vmatpush1.bf16.msra.mxu0 %v7706_v62  ;;  %v2379_v0 = vmul.f32 %v11012_v61, %v2284_v58  ;;  %v2286_v46 = vadd.f32 %v2285_v22, %v2092_v42  ;;  %v2094_v5 = vpop.f32.mrf.mxu0  ;;  %v11015_v8 = vld [vmem:[#allocation19_spill] sm:$0xff]  ;;  %v11016_v49 = vld [vmem:[#allocation10_spill] sm:$0xff]  ;;  %v7723_v38 = vld [vmem:[%s10934_s6 + $0x554] ss:$8 sps:$4 sm:$0xff]  }
 0x248   :  { %v1313_v16 = vadd.f32 %v9591_v30, %v1279_v32  ;;  %v10002_v63 = vadd.f32 %v2416_v51, %v11015_v8  ;;  %5238 = vmatpush1.bf16.msra.mxu1 %v7709_v53  ;;  %5048 = vmatprep.subr.bf16.mxu0 %v7714_v28  ;;  %v7715_v62 = vld [vmem:[%s10934_s6 + $0x560] ss:$8 sps:$4 sm:$0xff]   ;;  %v2287_v61 = vpop.f32.mrf.mxu1  ;;  %v11017_v58 = vrot.slane %v11016_v49, 7 }
 0x249   :  { %v2418_v32 = vsel %vm2402_vm2, %v2413_v56, %v2417_v60  ;;  %v2419_v22 = vrot.slane %v2379_v0, 1  ;;  %v11018_v51 = vld [vmem:[#allocation11_spill] sm:$0xff]  ;;  %5239 = vmatprep.subr.bf16.mxu1 %v7717_v26  ;;  %v2288_v28 = vadd.f32 %v2287_v61, %v2094_v5  ;;  %v2098_v8 = vpop.f32.mrf.mxu0  ;;  %7068 = vset.pattern.permute.xlu0 %v11001_v57  ;;  %v10025_v0 = vrot.slane %v4096_v6, 7  ;;  %v7718_v57 = vld [vmem:[%s10933_s7 + $0x550] ss:$8 sps:$4 sm:$0xff]  }
 0x24a   :  { %v2361_v42 = vsel %vm1265_vm1, %v11017_v58, %v9964_v37  ;;  %v2380_v53 = vmul.f32 %v11018_v51, %v2286_v46  ;;  %v1843_v49 = vadd.f32 %v1829_v18, %v1313_v16  ;;  %v1756_v58 = vadd.f32 %v9710_v4, %v9705_v29  ;;  %v2291_v56 = vpop.f32.mrf.mxu1  ;;  %5853 = vperm.xlu0 %7068, %v9836_v50  }
 0x24b   :  { %v10023_v17 = vadd.f32 %v2418_v32, %v9672_v21  ;;  %v2420_v26 = vsel %vm2402_vm2, %v2415_v15, %v2419_v22  ;;  %5049 = vmatpush1.bf16.msra.mxu0 %v7712_v2  ;;  %v2381_v5 = vmul.f32 %v11018_v51, %v2288_v28  ;;  %v2292_v61 = vadd.f32 %v2291_v56, %v2098_v8  ;;  %v2100_v29 = vpop.f32.mrf.mxu0  ;;  %v7721_v21 = vld [vmem:[%s10934_s6 + $0x550] ss:$8 sps:$4 sm:$0xff]   ;;  %v7726_v15 = vld [vmem:[%s10933_s7 + $0x544] ss:$8 sps:$4 sm:$0xff]  }
 0x24c   :  { %v2421_v46 = vrot.slane %v2380_v53, 1  ;;  %v10033_v4 = vadd.f32 %v2420_v26, %v1843_v49  ;;  %5240 = vmatpush1.bf16.msra.mxu1 %v7715_v62  ;;  %5050 = vmatprep.subr.bf16.mxu0 %v7720_v25  ;;  %v2293_v50 = vpop.f32.mrf.mxu1  ;;  %v11019_v18 = vrot.slane %v11014_v39, 7  ;;  %v7729_v51 = vld [vmem:[%s10934_s6 + $0x544] ss:$8 sps:$4 sm:$0xff]   ;;  %v1833_v53 = vmul.f32 %v9126_v9, %v1756_v58  ;;  %v7724_v9 = vld [vmem:[%s10933_s7 + $0x540] ss:$8 sps:$4 sm:$0xff]   ;;  %v4104_v58 = vpop.permute.xlu1 %4103 }
 0x24d   :  { %v2423_v16 = vrot.slane %v2381_v5, 1  ;;  %v2382_v62 = vmul.f32 %v2361_v42, %v2292_v61  ;;  %4491 = vmatmul.mubr.bf16.gmra.mxu0 %v8549_v45  ;;  %5241 = vmatprep.subr.bf16.mxu1 %v7723_v38  ;;  %v2294_v25 = vadd.f32 %v2293_v50, %v2100_v29  ;;  %v2102_v32 = vpop.f32.mrf.mxu0  ;;  %v11020_v26 = vld [vmem:[#allocation16_spill] sm:$0xff]  ;;  %v4128_v29 = vrot.slane %v4104_v58, 7 }
 0x24e   :  { %v10045_v2 = vsel %vm1265_vm1, %v10025_v0, %v11019_v18  ;;  %v2422_v6 = vsel %vm2402_vm2, %v2417_v60, %v2421_v46  ;;  %4684 = vmatmul.mubr.bf16.gmra.mxu1 %v8554_v10  ;;  %6915 = vmatprep.mubr.msk.bf16.mxu0 %vm894_vm0, %v8414_v13  ;;  %v2295_v60 = vpop.f32.mrf.mxu1  ;;  %v1317_v5 = vadd.f32 %v9591_v30, %v11020_v26 }
 0x24f   :  { %v10054_v28 = vadd.f32 %v2422_v6, %v9697_v1  ;;  %v2424_v8 = vsel %vm2402_vm2, %v2419_v22, %v2423_v16  ;;  %v2425_v38 = vrot.slane %v2382_v62, 1  ;;  %5051 = vmatpush1.bf16.msra.mxu0 %v7718_v57  ;;  %6943 = vmatprep.mubr.msk.bf16.mxu1 %vm894_vm0, %v8412_v12  ;;  %v2383_v49 = vmul.f32 %v2361_v42, %v2294_v25  ;;  %v2104_v1 = vpop.f32.mrf.mxu0  ;;  %v7727_v22 = vld [vmem:[%s10934_s6 + $0x540] ss:$8 sps:$4 sm:$0xff]   ;;  %v7732_v57 = vld [vmem:[%s10933_s7 + $0x5f4] ss:$8 sps:$4 sm:$0xff]  }
 0x250   :  { %v2296_v56 = vadd.f32 %v2295_v60, %v2102_v32  ;;  %v10068_v61 = vadd.f32 %v2424_v8, %v9717_v59  ;;  %5242 = vmatpush1.bf16.msra.mxu1 %v7721_v21  ;;  %5052 = vmatprep.subr.bf16.mxu0 %v7726_v15  ;;  %v2297_v42 = vpop.f32.mrf.mxu1  ;;  %v7735_v21 = vld [vmem:[%s10934_s6 + $0x5f4] ss:$8 sps:$4 sm:$0xff]   ;;  %v1847_v15 = vadd.f32 %v1833_v53, %v1317_v5  ;;  %v11021_v62 = vrot.slane %v11014_v39, 7  ;;  %v7730_v60 = vld [vmem:[%s10933_s7 + $0x5f0] ss:$8 sps:$4 sm:$0xff]  }
 0x251   :  { %v2426_v50 = vsel %vm2402_vm2, %v2421_v46, %v2425_v38  ;;  %v2427_v18 = vrot.slane %v2383_v49, 1  ;;  %5243 = vmatprep.subr.bf16.mxu1 %v7729_v51  ;;  %v2298_v59 = vadd.f32 %v2297_v42, %v2104_v1  ;;  %5865 = vperm.xlu0 %7068, %v9880_v24   ;;  %v4108_v24 = vpop.permute.xlu1 %4107  ;;  %v7738_v39 = vld [vmem:[%s10933_s7 + $0x5e4] ss:$8 sps:$4 sm:$0xff]  }
 0x252   :  { %v2384_v30 = vmul.f32 %v9964_v37, %v2296_v56  ;;  %v10083_v6 = vadd.f32 %v2426_v50, %v9725_v27  ;;  %v10088_v25 = vsel %vm1265_vm1, %v11021_v62, %v4128_v29  ;;  %v7733_v27 = vld [vmem:[%s10934_s6 + $0x5f0] ss:$8 sps:$4 sm:$0xff]   ;;  %v7741_v49 = vld [vmem:[%s10934_s6 + $0x5e4] ss:$8 sps:$4 sm:$0xff]   ;;  %v7748_v62 = vld [vmem:[%s10933_s7 + $0x5c0] ss:$8 sps:$4 sm:$0xff]  }
 0x253   :  { %v2428_v46 = vsel %vm2402_vm2, %v2423_v16, %v2427_v18  ;;  %5053 = vmatpush1.bf16.msra.mxu0 %v7724_v9  ;;  %v2385_v51 = vmul.f32 %v9964_v37, %v2298_v59  ;;  %v4130_v16 = vrot.slane %v4108_v24, 7  ;;  %v11022_v56 = vld [vmem:[#allocation14_spill] sm:$0xff]  ;;  %v11023_v59 = vld [vmem:[#allocation15_spill] sm:$0xff] }
 0x254   :  { %v2429_v32 = vrot.slane %v2384_v30, 1  ;;  %v10095_v53 = vadd.f32 %v2428_v46, %v1847_v15  ;;  %5244 = vmatpush1.bf16.msra.mxu1 %v7727_v22  ;;  %5062 = vmatprep.subr.bf16.mxu0 %v7732_v57  ;;  %v4132_v9 = vrot.slane %v11022_v56, 7  ;;  %v7747_v22 = vld [vmem:[%s10934_s6 + $0x5d4] ss:$8 sps:$4 sm:$0xff]   ;;  %v7750_v50 = vld [vmem:[%s10933_s7 + $0x5c4] ss:$8 sps:$4 sm:$0xff]  }
 0x255   :  { %v2431_v8 = vrot.slane %v2385_v51, 1  ;;  %5253 = vmatprep.subr.bf16.mxu1 %v7735_v21  ;;  %5873 = vperm.xlu0 %7068, %v9925_v33   ;;  %v10113_v58 = vsel %vm1265_vm1, %v4128_v29, %v4130_v16  ;;  %v7744_v33 = vld [vmem:[%s10933_s7 + $0x5d4] ss:$8 sps:$4 sm:$0xff]   ;;  %v4116_v57 = vpop.permute.xlu1 %4115  ;;  %v7745_v29 = vld [vmem:[%s10934_s6 + $0x5d0] ss:$8 sps:$4 sm:$0xff]   ;;  %v4136_v21 = vrot.slane %v11023_v59, 7 }
 0x256   :  { %v2430_v37 = vsel %vm2402_vm2, %v2425_v38, %v2429_v32  ;;  %v7736_v38 = vld [vmem:[%s10933_s7 + $0x5e0] ss:$8 sps:$4 sm:$0xff]   ;;  %v10132_v42 = vsel %vm1265_vm1, %v4130_v16, %v4132_v9  ;;  %v7753_v30 = vld [vmem:[%s10934_s6 + $0x5c4] ss:$8 sps:$4 sm:$0xff]   ;;  %v7756_v32 = vld [vmem:[%s10933_s7 + $0x674] ss:$8 sps:$4 sm:$0xff]  }
 0x257   :  { %v10110_v1 = vadd.f32 %v2430_v37, %v9750_v40  ;;  %v2432_v26 = vsel %vm2402_vm2, %v2427_v18, %v2431_v8  ;;  %5063 = vmatpush2.bf16.msra.mxu0 %v7730_v60  ;;  %v7739_v40 = vld [vmem:[%s10934_s6 + $0x5e0] ss:$8 sps:$4 sm:$0xff]   ;;  %v4134_v18 = vrot.slane %v4116_v57, 7  ;;  %v7759_v51 = vld [vmem:[%s10934_s6 + $0x674] ss:$8 sps:$4 sm:$0xff]   ;;  %v2943_v57 = vpop.permute.xlu0 %2942 }
 0x258   :  { %v10120_v5 = vadd.f32 %v2432_v26, %v9766_v41  ;;  %5254 = vmatpush2.bf16.msra.mxu1 %v7733_v27  ;;  %5064 = vmatprep.subr.bf16.mxu0 %v7738_v39  ;;  %v7742_v41 = vld [vmem:[%s10933_s7 + $0x5d0] ss:$8 sps:$4 sm:$0xff]   ;;  %v7751_v46 = vld [vmem:[%s10934_s6 + $0x5c0] ss:$8 sps:$4 sm:$0xff]   ;;  %v7762_v56 = vld [vmem:[%s10933_s7 + $0x664] ss:$8 sps:$4 sm:$0xff]  }
 0x259   :  { %5255 = vmatprep.subr.bf16.mxu1 %v7741_v49  ;;  %v10148_v15 = vsel %vm1265_vm1, %v4132_v9, %v4134_v18  ;;  %v10165_v24 = vsel %vm1265_vm1, %v4134_v18, %v4136_v21  ;;  %v7754_v16 = vld [vmem:[%s10933_s7 + $0x670] ss:$8 sps:$4 sm:$0xff]  }
 0x25a   :  { %v7757_v8 = vld [vmem:[%s10934_s6 + $0x670] ss:$8 sps:$4 sm:$0xff]  }
 0x25b   :  { %5065 = vmatpush2.bf16.msra.mxu0 %v7736_v38 }
 0x25c   :  { %5256 = vmatpush2.bf16.msra.mxu1 %v7739_v40  ;;  %5066 = vmatprep.subr.bf16.mxu0 %v7744_v33  ;;  %v7765_v40 = vld [vmem:[%s10934_s6 + $0x664] ss:$8 sps:$4 sm:$0xff]   ;;  %v11024_v33 = vld [vmem:[#allocation5_spill] sm:$0xff] }
 0x25d   :  { %5257 = vmatprep.subr.bf16.mxu1 %v7747_v22  ;;  %v2911_v22 = vld [vmem:[%s10938_s10] sm:$0xfe] }
 0x25f   :  { %5067 = vmatpush2.bf16.msra.mxu0 %v7742_v41 }
 0x260   :  { %5258 = vmatpush2.bf16.msra.mxu1 %v7745_v29  ;;  %5068 = vmatprep.subr.bf16.mxu0 %v7750_v50  ;;  %v11025_v29 = vld [vmem:[#allocation4_spill] sm:$0xff] }
 0x261   :  { %5259 = vmatprep.subr.bf16.mxu1 %v7753_v30 }
 0x262   :  { %v2679_v60 = vpop.f32.mrf.mxu0 }
 0x263   :  { %5069 = vmatpush2.bf16.msra.mxu0 %v7748_v62  ;;  %v2872_v27 = vpop.f32.mrf.mxu1  ;;  %v7760_v62 = vld [vmem:[%s10933_s7 + $0x660] ss:$8 sps:$4 sm:$0xff]  }
 0x264   :  { %5260 = vmatpush2.bf16.msra.mxu1 %v7751_v46  ;;  %v2873_v39 = vadd.f32 %v2872_v27, %v2679_v60  ;;  %5568 = vmatprep.subr.bf16.mxu0 %v7756_v32  ;;  %v2681_v37 = vpop.f32.mrf.mxu0  ;;  %v2912_v32 = vld [vmem:[%s10938_s10 + $0x8] sm:$0xfe] }
 0x265   :  { %5759 = vmatprep.subr.bf16.mxu1 %v7759_v51  ;;  %v2874_v49 = vpop.f32.mrf.mxu1  ;;  %v7763_v51 = vld [vmem:[%s10934_s6 + $0x660] ss:$8 sps:$4 sm:$0xff]  }
 0x266   :  { %5071 = vmatmul.mubr.bf16.vlgmr.msra.gmra.mxu0 %v8427_v20  ;;  %v2975_v9 = vmul.f32 %v9764_v52, %v2873_v39  ;;  %v2875_v26 = vadd.f32 %v2874_v49, %v2681_v37  ;;  %v2683_v38 = vpop.f32.mrf.mxu0  ;;  %v7771_v49 = vld [vmem:[%s10934_s6 + $0x654] ss:$8 sps:$4 sm:$0xff]  }
 0x267   :  { %5262 = vmatmul.mubr.bf16.vlgmr.msra.gmra.mxu1 %v8425_v19  ;;  %6916 = vmatprep.mubr.msk.bf16.mxu0 %vm894_vm0, %v11024_v33  ;;  %v2876_v41 = vpop.f32.mrf.mxu1 }
 0x268   :  { %6944 = vmatprep.mubr.msk.bf16.mxu1 %vm894_vm0, %v11025_v29  ;;  %5569 = vmatpush1.bf16.msra.mxu0 %v7754_v16  ;;  %v3007_v50 = vrot.slane %v2975_v9, 7  ;;  %v2976_v18 = vmul.f32 %v9764_v52, %v2875_v26  ;;  %v2877_v30 = vadd.f32 %v2876_v41, %v2683_v38  ;;  %v2685_v46 = vpop.f32.mrf.mxu0  ;;  %v7768_v52 = vld [vmem:[%s10933_s7 + $0x654] ss:$8 sps:$4 sm:$0xff]  }
 0x269   :  { %5760 = vmatpush1.bf16.msra.mxu1 %v7757_v8  ;;  %5570 = vmatprep.subr.bf16.mxu0 %v7762_v56  ;;  %v2878_v60 = vpop.f32.mrf.mxu1 }
 0x26a   :  { %v3053_v27 = vadd.f32 %v3007_v50, %v2911_v22  ;;  %v3008_v39 = vrot.slane %v2976_v18, 7  ;;  %5761 = vmatprep.subr.bf16.mxu1 %v7765_v40  ;;  %v2977_v16 = vmul.f32 %v2943_v57, %v2877_v30  ;;  %v2879_v37 = vadd.f32 %v2878_v60, %v2685_v46  ;;  %v2689_v8 = vpop.f32.mrf.mxu0  ;;  %v7766_v40 = vld [vmem:[%s10933_s7 + $0x650] ss:$8 sps:$4 sm:$0xff]   ;;  %v7774_v46 = vld [vmem:[%s10933_s7 + $0x644] ss:$8 sps:$4 sm:$0xff]  }
 0x26b   :  { %v2882_v56 = vpop.f32.mrf.mxu1  ;;  %v7769_v18 = vld [vmem:[%s10934_s6 + $0x650] ss:$8 sps:$4 sm:$0xff]  }
 0x26c   :  { %3069 = vst [vmem:[%s10938_s10] sm:$0xfe] %v3053_v27  ;;  %v3054_v9 = vadd.f32 %v3008_v39, %v2912_v32  ;;  %5571 = vmatpush1.bf16.msra.mxu0 %v7760_v62  ;;  %v3009_v26 = vrot.slane %v2977_v16, 7  ;;  %v2978_v38 = vmul.f32 %v2943_v57, %v2879_v37  ;;  %v2883_v41 = vadd.f32 %v2882_v56, %v2689_v8  ;;  %v2691_v22 = vpop.f32.mrf.mxu0  ;;  %v11026_v32 = vld [vmem:[#allocation20_spill] sm:$0xff]  ;;  %v7777_v27 = vld [vmem:[%s10934_s6 + $0x644] ss:$8 sps:$4 sm:$0xff]  }
 0x26d   :  { %5762 = vmatpush1.bf16.msra.mxu1 %v7763_v51  ;;  %5572 = vmatprep.subr.bf16.mxu0 %v7768_v52  ;;  %v2884_v30 = vpop.f32.mrf.mxu1  ;;  %v5850_v37 = vld [vmem:[%s10935_s9 + $0x30] sm:$0x7f] }
 0x26e   :  { %3070 = vst [vmem:[%s10938_s10 + $0x8] sm:$0xfe] %v3054_v9  ;;  %v3010_v57 = vsel %vm1265_vm1, %v3007_v50, %v3009_v26  ;;  %v3011_v62 = vrot.slane %v2978_v38, 7  ;;  %5079 = vmatmul.mubr.bf16.gmra.mxu0 %v8457_v55  ;;  %5763 = vmatprep.subr.bf16.mxu1 %v7771_v49  ;;  %v2979_v51 = vmul.f32 %v11026_v32, %v2883_v41  ;;  %v2693_v52 = vpop.f32.mrf.mxu0  ;;  %v7772_v9 = vld [vmem:[%s10933_s7 + $0x640] ss:$8 sps:$4 sm:$0xff]  }
 0x26f   :  { %v2885_v60 = vadd.f32 %v2884_v30, %v2691_v22  ;;  %v10227_v16 = vadd.f32 %v3010_v57, %v9917_v7  ;;  %5270 = vmatmul.mubr.bf16.gmra.mxu1 %v8455_v54  ;;  %6917 = vmatprep.mubr.msk.bf16.mxu0 %vm894_vm0, %v8513_v48  ;;  %v2886_v50 = vpop.f32.mrf.mxu1 }
 0x270   :  { %v3012_v8 = vsel %vm1265_vm1, %v3008_v39, %v3011_v62  ;;  %6945 = vmatprep.mubr.msk.bf16.mxu1 %vm894_vm0, %v8511_v43  ;;  %5573 = vmatpush1.bf16.msra.mxu0 %v7766_v40  ;;  %v3013_v49 = vrot.slane %v2979_v51, 7  ;;  %v2887_v56 = vadd.f32 %v2886_v50, %v2693_v52  ;;  %v2695_v38 = vpop.f32.mrf.mxu0  ;;  %v7775_v39 = vld [vmem:[%s10934_s6 + $0x640] ss:$8 sps:$4 sm:$0xff]   ;;  %v7780_v40 = vld [vmem:[%s10933_s7 + $0x634] ss:$8 sps:$4 sm:$0xff]   ;;  %v2958_v50 = vpop.permute.xlu0 %2957 }
 0x271   :  { %v2980_v7 = vmul.f32 %v11026_v32, %v2885_v60  ;;  %v10243_v41 = vadd.f32 %v3012_v8, %v9937_v36  ;;  %5764 = vmatpush1.bf16.msra.mxu1 %v7769_v18  ;;  %5574 = vmatprep.subr.bf16.mxu0 %v7774_v46  ;;  %v2888_v22 = vpop.f32.mrf.mxu1  ;;  %v11027_v32 = vld [vmem:[#allocation21_spill] sm:$0xff] }
 0x272   :  { %v3014_v30 = vsel %vm1265_vm1, %v3009_v26, %v3013_v49  ;;  %5765 = vmatprep.subr.bf16.mxu1 %v7777_v27  ;;  %v2981_v51 = vmul.f32 %v11027_v32, %v2887_v56  ;;  %v2889_v60 = vadd.f32 %v2888_v22, %v2695_v38  ;;  %v2699_v36 = vpop.f32.mrf.mxu0  ;;  %v7783_v18 = vld [vmem:[%s10934_s6 + $0x634] ss:$8 sps:$4 sm:$0xff]   ;;  %5877 = vperm.xlu1 %7069, %v5850_v37   ;;  %v7778_v56 = vld [vmem:[%s10933_s7 + $0x630] ss:$8 sps:$4 sm:$0xff]   ;;  %v7786_v37 = vld [vmem:[%s10933_s7 + $0x624] ss:$8 sps:$4 sm:$0xff]  }
 0x273   :  { %v3015_v57 = vrot.slane %v2980_v7, 7  ;;  %v10257_v46 = vadd.f32 %v3014_v30, %v9954_v31  ;;  %v2892_v52 = vpop.f32.mrf.mxu1  ;;  %v7781_v31 = vld [vmem:[%s10934_s6 + $0x630] ss:$8 sps:$4 sm:$0xff]  }
 0x274   :  { %5575 = vmatpush1.bf16.msra.mxu0 %v7772_v9  ;;  %v3017_v26 = vrot.slane %v2981_v51, 7  ;;  %v2982_v27 = vmul.f32 %v11027_v32, %v2889_v60  ;;  %v2893_v7 = vadd.f32 %v2892_v52, %v2699_v36  ;;  %v2701_v38 = vpop.f32.mrf.mxu0 }
 0x275   :  { %v3016_v8 = vsel %vm1265_vm1, %v3011_v62, %v3015_v57  ;;  %5766 = vmatpush1.bf16.msra.mxu1 %v7775_v39  ;;  %5576 = vmatprep.subr.bf16.mxu0 %v7780_v40  ;;  %v2894_v62 = vpop.f32.mrf.mxu1  ;;  %v7789_v39 = vld [vmem:[%s10934_s6 + $0x624] ss:$8 sps:$4 sm:$0xff]  }
 0x276   :  { %v10265_v22 = vadd.f32 %v3016_v8, %v9971_v47  ;;  %v3018_v9 = vsel %vm1265_vm1, %v3013_v49, %v3017_v26  ;;  %v3019_v30 = vrot.slane %v2982_v27, 7  ;;  %5089 = vmatmul.mubr.bf16.gmra.mxu0 %v8504_v35  ;;  %5767 = vmatprep.subr.bf16.mxu1 %v7783_v18  ;;  %v2983_v32 = vmul.f32 %v2958_v50, %v2893_v7  ;;  %v2703_v51 = vpop.f32.mrf.mxu0 }
 0x277   :  { %v2895_v47 = vadd.f32 %v2894_v62, %v2701_v38  ;;  %v10279_v40 = vadd.f32 %v3018_v9, %v9987_v23  ;;  %5280 = vmatmul.mubr.bf16.gmra.mxu1 %v8502_v34  ;;  %6918 = vmatprep.mubr.msk.bf16.mxu0 %vm894_vm0, %v8558_v14  ;;  %v2896_v49 = vpop.f32.mrf.mxu1  ;;  %v7784_v23 = vld [vmem:[%s10933_s7 + $0x620] ss:$8 sps:$4 sm:$0xff]  }
 0x278   :  { %v3020_v60 = vsel %vm1265_vm1, %v3015_v57, %v3019_v30  ;;  %6946 = vmatprep.mubr.msk.bf16.mxu1 %vm894_vm0, %v8556_v11  ;;  %5577 = vmatpush1.bf16.msra.mxu0 %v7778_v56  ;;  %v3021_v36 = vrot.slane %v2983_v32, 7  ;;  %v2897_v52 = vadd.f32 %v2896_v49, %v2703_v51  ;;  %v2705_v8 = vpop.f32.mrf.mxu0  ;;  %v7787_v57 = vld [vmem:[%s10934_s6 + $0x620] ss:$8 sps:$4 sm:$0xff]   ;;  %v2968_v51 = vpop.permute.xlu0 %2967 }
 0x279   :  { %v2984_v18 = vmul.f32 %v2958_v50, %v2895_v47  ;;  %v10291_v27 = vadd.f32 %v3020_v60, %v10002_v63  ;;  %5768 = vmatpush1.bf16.msra.mxu1 %v7781_v31  ;;  %5578 = vmatprep.subr.bf16.mxu0 %v7786_v37  ;;  %v2898_v7 = vpop.f32.mrf.mxu1  ;;  %v7792_v50 = vld [vmem:[%s10933_s7 + $0x614] ss:$8 sps:$4 sm:$0xff]   ;;  %v11028_v62 = vld [vmem:[#allocation22_spill] sm:$0xff] }
 0x27a   :  { %v3022_v56 = vsel %vm1265_vm1, %v3017_v26, %v3021_v36  ;;  %5769 = vmatprep.subr.bf16.mxu1 %v7789_v39  ;;  %v2985_v9 = vmul.f32 %v11028_v62, %v2897_v52  ;;  %v2899_v32 = vadd.f32 %v2898_v7, %v2705_v8  ;;  %v2709_v63 = vpop.f32.mrf.mxu0  ;;  %v7795_v31 = vld [vmem:[%s10934_s6 + $0x614] ss:$8 sps:$4 sm:$0xff]  }
 0x27b   :  { %v3023_v38 = vrot.slane %v2984_v18, 7  ;;  %v10305_v37 = vadd.f32 %v3022_v56, %v10023_v17  ;;  %v2902_v47 = vpop.f32.mrf.mxu1  ;;  %v7790_v18 = vld [vmem:[%s10933_s7 + $0x610] ss:$8 sps:$4 sm:$0xff]  }
 0x27c   :  { %5579 = vmatpush1.bf16.msra.mxu0 %v7784_v23  ;;  %v3025_v60 = vrot.slane %v2985_v9, 7  ;;  %v2986_v26 = vmul.f32 %v11028_v62, %v2899_v32  ;;  %v2903_v39 = vadd.f32 %v2902_v47, %v2709_v63  ;;  %v2711_v52 = vpop.f32.mrf.mxu0  ;;  %v7793_v17 = vld [vmem:[%s10934_s6 + $0x610] ss:$8 sps:$4 sm:$0xff]   ;;  %v7798_v23 = vld [vmem:[%s10933_s7 + $0x604] ss:$8 sps:$4 sm:$0xff]  }
 0x27d   :  { %v3024_v49 = vsel %vm1265_vm1, %v3019_v30, %v3023_v38  ;;  %5770 = vmatpush1.bf16.msra.mxu1 %v7787_v57  ;;  %5580 = vmatprep.subr.bf16.mxu0 %v7792_v50  ;;  %v2904_v30 = vpop.f32.mrf.mxu1  ;;  %v7801_v57 = vld [vmem:[%s10934_s6 + $0x604] ss:$8 sps:$4 sm:$0xff]  }
 0x27e   :  { %v10313_v8 = vadd.f32 %v3024_v49, %v10033_v4  ;;  %v3026_v7 = vsel %vm1265_vm1, %v3021_v36, %v3025_v60  ;;  %v3027_v56 = vrot.slane %v2986_v26, 7  ;;  %5099 = vmatmul.mubr.bf16.gmra.mxu0 %v8549_v45  ;;  %5771 = vmatprep.subr.bf16.mxu1 %v7795_v31  ;;  %v10323_v62 = vmul.f32 %v2968_v51, %v2903_v39  ;;  %v7802_v49 = vld [vmem:[%s10933_s7 + $0x6b0] ss:$8 sps:$4 sm:$0xff]   ;;  %v7813_v39 = vld [vmem:[%s10934_s6 + $0x6a4] ss:$8 sps:$4 sm:$0xff]  }
 0x27f   :  { %v2905_v4 = vadd.f32 %v2904_v30, %v2711_v52  ;;  %v10329_v50 = vadd.f32 %v3026_v7, %v10054_v28  ;;  %5290 = vmatmul.mubr.bf16.gmra.mxu1 %v8554_v10  ;;  %7019 = vmatprep.mubr.msk.bf16.mxu0 %vm894_vm0, %v8414_v13  ;;  %v7796_v28 = vld [vmem:[%s10933_s7 + $0x600] ss:$8 sps:$4 sm:$0xff]   ;;  %v7805_v26 = vld [vmem:[%s10934_s6 + $0x6b0] ss:$8 sps:$4 sm:$0xff]   ;;  %v7816_v52 = vld [vmem:[%s10933_s7 + $0x694] ss:$8 sps:$4 sm:$0xff]  }
 0x280   :  { %v3028_v36 = vsel %vm1265_vm1, %v3023_v38, %v3027_v56  ;;  %5581 = vmatpush1.bf16.msra.mxu0 %v7790_v18  ;;  %7047 = vmatprep.mubr.msk.bf16.mxu1 %vm894_vm0, %v8412_v12  ;;  %v3029_v9 = vrot.slane %v10323_v62, 7  ;;  %v7799_v13 = vld [vmem:[%s10934_s6 + $0x600] ss:$8 sps:$4 sm:$0xff]   ;;  %v7804_v12 = vld [vmem:[%s10933_s7 + $0x6b4] ss:$8 sps:$4 sm:$0xff]  }
 0x281   :  { %v10338_v32 = vmul.f32 %v2968_v51, %v2905_v4  ;;  %v10344_v63 = vadd.f32 %v3028_v36, %v10068_v61  ;;  %5772 = vmatpush1.bf16.msra.mxu1 %v7793_v17  ;;  %5582 = vmatprep.subr.bf16.mxu0 %v7798_v23  ;;  %v7807_v61 = vld [vmem:[%s10934_s6 + $0x6b4] ss:$8 sps:$4 sm:$0xff]   ;;  %v7811_v18 = vld [vmem:[%s10934_s6 + $0x6a0] ss:$8 sps:$4 sm:$0xff]   ;;  %v7814_v30 = vld [vmem:[%s10933_s7 + $0x690] ss:$8 sps:$4 sm:$0xff]   ;;  %v2713_v23 = vpop.f32.mrf.mxu0  ;;  %v2906_v4 = vpop.f32.mrf.mxu1 }
 0x282   :  { %v3030_v38 = vsel %vm1265_vm1, %v3025_v60, %v3029_v9  ;;  %5773 = vmatprep.subr.bf16.mxu1 %v7801_v57  ;;  %v7819_v17 = vld [vmem:[%s10934_s6 + $0x694] ss:$8 sps:$4 sm:$0xff]   ;;  %v7817_v7 = vld [vmem:[%s10934_s6 + $0x690] ss:$8 sps:$4 sm:$0xff]   ;;  %v7825_v57 = vld [vmem:[%s10934_s6 + $0x684] ss:$8 sps:$4 sm:$0xff]  }
 0x283   :  { %v3031_v31 = vrot.slane %v10338_v32, 7  ;;  %v10360_v47 = vadd.f32 %v3030_v38, %v10083_v6  ;;  %v7810_v6 = vld [vmem:[%s10933_s7 + $0x6a4] ss:$8 sps:$4 sm:$0xff]   ;;  %v7820_v36 = vld [vmem:[%s10933_s7 + $0x680] ss:$8 sps:$4 sm:$0xff]  }
 0x284   :  { %5583 = vmatpush1.bf16.msra.mxu0 %v7796_v28  ;;  %v2715_v28 = vpop.f32.mrf.mxu0 }
 0x285   :  { %v3032_v51 = vsel %vm1265_vm1, %v3027_v56, %v3031_v31  ;;  %5774 = vmatpush1.bf16.msra.mxu1 %v7799_v13  ;;  %5592 = vmatprep.subr.bf16.mxu0 %v7804_v12  ;;  %v7822_v56 = vld [vmem:[%s10933_s7 + $0x684] ss:$8 sps:$4 sm:$0xff]   ;;  %v7823_v13 = vld [vmem:[%s10934_s6 + $0x680] ss:$8 sps:$4 sm:$0xff]   ;;  %v2908_v12 = vpop.f32.mrf.mxu1 }
 0x286   :  { %v10369_v60 = vadd.f32 %v3032_v51, %v10095_v53  ;;  %5783 = vmatprep.subr.bf16.mxu1 %v7807_v61  ;;  %v7808_v53 = vld [vmem:[%s10933_s7 + $0x6a0] ss:$8 sps:$4 sm:$0xff]  }
 0x288   :  { %5593 = vmatpush2.bf16.msra.mxu0 %v7802_v49 }
 0x289   :  { %5784 = vmatpush2.bf16.msra.mxu1 %v7805_v26  ;;  %5594 = vmatprep.subr.bf16.mxu0 %v7810_v6 }
 0x28a   :  { %5785 = vmatprep.subr.bf16.mxu1 %v7813_v39 }
 0x28c   :  { %5595 = vmatpush2.bf16.msra.mxu0 %v7808_v53 }
 0x28d   :  { %5786 = vmatpush2.bf16.msra.mxu1 %v7811_v18  ;;  %5596 = vmatprep.subr.bf16.mxu0 %v7816_v52 }
 0x28e   :  { %5787 = vmatprep.subr.bf16.mxu1 %v7819_v17 }
 0x290   :  { %5597 = vmatpush2.bf16.msra.mxu0 %v7814_v30  ;;  %v11029_v30 = vld [vmem:[#allocation24_spill] sm:$0xff] }
 0x291   :  { %5788 = vmatpush2.bf16.msra.mxu1 %v7817_v7  ;;  %5598 = vmatprep.subr.bf16.mxu0 %v7822_v56 }
 0x292   :  { %5789 = vmatprep.subr.bf16.mxu1 %v7825_v57 }
 0x293   :  { %v3289_v38 = vpop.f32.mrf.mxu0 }
 0x294   :  { %5599 = vmatpush2.bf16.msra.mxu0 %v7820_v36  ;;  %v3482_v61 = vpop.f32.mrf.mxu1 }
 0x295   :  { %5790 = vmatpush2.bf16.msra.mxu1 %v7823_v13  ;;  %v10410_v51 = vadd.f32 %v3482_v61, %v3289_v38  ;;  %v3291_v49 = vpop.f32.mrf.mxu0  ;;  %v10425_v61 = vpop.permute.xlu0 %4717 }
 0x296   :  { %v3484_v26 = vpop.f32.mrf.mxu1 }
 0x297   :  { %5601 = vmatmul.mubr.bf16.vlgmr.msra.gmra.mxu0 %v8427_v20  ;;  %v10413_v6 = vadd.f32 %v3484_v26, %v3291_v49  ;;  %v3293_v39 = vpop.f32.mrf.mxu0 }
 0x298   :  { %5792 = vmatmul.mubr.bf16.vlgmr.msra.gmra.mxu1 %v8425_v19  ;;  %7020 = vmatprep.mubr.msk.bf16.mxu0 %vm894_vm0, %v11024_v33  ;;  %v3486_v53 = vpop.f32.mrf.mxu1 }
 0x299   :  { %7048 = vmatprep.mubr.msk.bf16.mxu1 %vm894_vm0, %v11025_v29  ;;  %v3487_v18 = vadd.f32 %v3486_v53, %v3293_v39  ;;  %v3295_v52 = vpop.f32.mrf.mxu0 }
 0x29a   :  { %v3488_v17 = vpop.f32.mrf.mxu1 }
 0x29b   :  { %v3587_v7 = vmul.f32 %v11029_v30, %v3487_v18  ;;  %v3489_v56 = vadd.f32 %v3488_v17, %v3295_v52  ;;  %v3299_v57 = vpop.f32.mrf.mxu0 }
 0x29c   :  { %v3492_v20 = vpop.f32.mrf.mxu1 }
 0x29d   :  { %v10422_v36 = vadd.f32 %v3587_v7, %v10227_v16  ;;  %v3588_v19 = vmul.f32 %v11029_v30, %v3489_v56  ;;  %v3493_v13 = vadd.f32 %v3492_v20, %v3299_v57  ;;  %v3301_v38 = vpop.f32.mrf.mxu0  ;;  %v11030_v30 = vld [vmem:[#allocation7_spill] sm:$0xff]  ;;  %v10445_v20 = vpop.permute.xlu0 %4729 }
 0x29e   :  { %v3494_v33 = vpop.f32.mrf.mxu1 }
 0x29f   :  { %v10428_v29 = vadd.f32 %v3588_v19, %v10243_v41  ;;  %5609 = vmatmul.mubr.bf16.gmra.mxu0 %v8457_v55  ;;  %v3589_v49 = vmul.f32 %v9894_v44, %v3493_v13  ;;  %v3495_v26 = vadd.f32 %v3494_v33, %v3301_v38  ;;  %v3303_v39 = vpop.f32.mrf.mxu0  ;;  %v2909_v13 = vadd.f32 %v2908_v12, %v2715_v28 }
 0x2a0   :  { %5800 = vmatmul.mubr.bf16.gmra.mxu1 %v8455_v54  ;;  %7021 = vmatprep.mubr.msk.bf16.mxu0 %vm894_vm0, %v8513_v48  ;;  %v3496_v16 = vpop.f32.mrf.mxu1  ;;  %v2907_v48 = vadd.f32 %v2906_v4, %v2713_v23 }
 0x2a1   :  { %7049 = vmatprep.mubr.msk.bf16.mxu1 %vm894_vm0, %v8511_v43  ;;  %v10438_v53 = vadd.f32 %v3589_v49, %v10257_v46  ;;  %v3590_v41 = vmul.f32 %v9894_v44, %v3495_v26  ;;  %v3497_v18 = vadd.f32 %v3496_v16, %v3303_v39  ;;  %v3305_v55 = vpop.f32.mrf.mxu0  ;;  %v11031_v49 = vld [vmem:[#allocation23_spill] sm:$0xff] }
 0x2a2   :  { %v3498_v52 = vpop.f32.mrf.mxu1  ;;  %v2989_v26 = vmul.f32 %v11031_v49, %v2907_v48  ;;  %v2990_v39 = vmul.f32 %v11031_v49, %v2909_v13 }
 0x2a3   :  { %v10442_v17 = vadd.f32 %v3590_v41, %v10265_v22  ;;  %v3591_v54 = vmul.f32 %v11030_v30, %v3497_v18  ;;  %v3499_v7 = vadd.f32 %v3498_v52, %v3305_v55  ;;  %v3309_v56 = vpop.f32.mrf.mxu0  ;;  %v10467_v41 = vpop.permute.xlu0 %4737 }
 0x2a4   :  { %v3502_v57 = vpop.f32.mrf.mxu1 }
 0x2a5   :  { %v10448_v43 = vadd.f32 %v3591_v54, %v10279_v40  ;;  %v3592_v46 = vmul.f32 %v11030_v30, %v3499_v7  ;;  %v3503_v44 = vadd.f32 %v3502_v57, %v3309_v56  ;;  %v3311_v19 = vpop.f32.mrf.mxu0  ;;  %v3035_v56 = vrot.slane %v2990_v39, 7 }
 0x2a6   :  { %v3504_v38 = vpop.f32.mrf.mxu1 }
 0x2a7   :  { %v10452_v22 = vadd.f32 %v3592_v46, %v10291_v27  ;;  %5619 = vmatmul.mubr.bf16.gmra.mxu0 %v8504_v35  ;;  %v3593_v33 = vmul.f32 %v9934_v3, %v3503_v44  ;;  %v3505_v23 = vadd.f32 %v3504_v38, %v3311_v19  ;;  %v3313_v4 = vpop.f32.mrf.mxu0  ;;  %v3583_v38 = vpop.permute.xlu0 %3582 }
 0x2a8   :  { %5810 = vmatmul.mubr.bf16.gmra.mxu1 %v8502_v34  ;;  %7022 = vmatprep.mubr.msk.bf16.mxu0 %vm894_vm0, %v8558_v14  ;;  %v3506_v40 = vpop.f32.mrf.mxu1  ;;  %v11032_v14 = vld [vmem:[#allocation8_spill] sm:$0xff] }
 0x2a9   :  { %7050 = vmatprep.mubr.msk.bf16.mxu1 %vm894_vm0, %v8556_v11  ;;  %v10463_v27 = vadd.f32 %v3593_v33, %v10305_v37  ;;  %v3594_v35 = vmul.f32 %v9934_v3, %v3505_v23  ;;  %v3507_v28 = vadd.f32 %v3506_v40, %v3313_v4  ;;  %v3315_v12 = vpop.f32.mrf.mxu0  ;;  %v3033_v11 = vrot.slane %v2989_v26, 7 }
 0x2aa   :  { %v3508_v16 = vpop.f32.mrf.mxu1 }
 0x2ab   :  { %v10470_v34 = vadd.f32 %v3594_v35, %v10313_v8  ;;  %v3595_v18 = vmul.f32 %v11032_v14, %v3507_v28  ;;  %v3509_v55 = vadd.f32 %v3508_v16, %v3315_v12  ;;  %v3319_v52 = vpop.f32.mrf.mxu0  ;;  %v11033_v8 = vld [vmem:[#allocation25_spill] sm:$0xff] }
 0x2ac   :  { %v3512_v30 = vpop.f32.mrf.mxu1 }
 0x2ad   :  { %v10474_v37 = vadd.f32 %v3595_v18, %v10329_v50  ;;  %v3596_v3 = vmul.f32 %v11032_v14, %v3509_v55  ;;  %v3513_v54 = vadd.f32 %v3512_v30, %v3319_v52  ;;  %v3321_v7 = vpop.f32.mrf.mxu0  ;;  %v3034_v50 = vsel %vm1265_vm1, %v3029_v9, %v3033_v11  ;;  %v11034_v11 = vld [vmem:[#allocation6_spill] sm:$0xff] }
 0x2ae   :  { %v3514_v48 = vpop.f32.mrf.mxu1  ;;  %v3067_v62 = vadd.f32 %v3034_v50, %v10110_v1  ;;  %v3585_v30 = vmul.f32 %v11034_v11, %v10410_v51 }
 0x2af   :  { %v10478_v57 = vadd.f32 %v3596_v3, %v10344_v63  ;;  %5629 = vmatmul.mubr.bf16.gmra.mxu0 %v8549_v45  ;;  %v3597_v46 = vmul.f32 %v11033_v8, %v3513_v54  ;;  %v3515_v44 = vadd.f32 %v3514_v48, %v3321_v7  ;;  %v3323_v19 = vpop.f32.mrf.mxu0  ;;  %v3036_v45 = vsel %vm1265_vm1, %v3031_v31, %v3035_v56 }
 0x2b0   :  { %5820 = vmatmul.mubr.bf16.gmra.mxu1 %v8554_v10  ;;  %v3516_v13 = vpop.f32.mrf.mxu1  ;;  %v3068_v40 = vadd.f32 %v3036_v45, %v10120_v5  ;;  %v3586_v48 = vmul.f32 %v11034_v11, %v10413_v6 }
 0x2b1   :  { %v10487_v33 = vadd.f32 %v3597_v46, %v10360_v47  ;;  %v3598_v63 = vmul.f32 %v11033_v8, %v3515_v44  ;;  %v3517_v23 = vadd.f32 %v3516_v13, %v3323_v19  ;;  %v3325_v4 = vpop.f32.mrf.mxu0  ;;  %v3521_v46 = vld [vmem:[%s10938_s10] sm:$0xff] }
 0x2b2   :  { %v3518_v49 = vpop.f32.mrf.mxu1  ;;  %v3601_v51 = vadd.f32 %v3585_v30, %v3521_v46 }
 0x2b3   :  { %v10495_v9 = vadd.f32 %v3598_v63, %v10369_v60  ;;  %v3599_v10 = vmul.f32 %v3583_v38, %v3517_v23  ;;  %v3519_v26 = vadd.f32 %v3518_v49, %v3325_v4  ;;  %v3522_v23 = vld [vmem:[%s10938_s10 + $0x8] sm:$0xff] }
 0x2b5   :  { %v3615_v47 = vadd.f32 %v3599_v10, %v3067_v62  ;;  %v3600_v35 = vmul.f32 %v3583_v38, %v3519_v26  ;;  %v3602_v10 = vadd.f32 %v3586_v48, %v3522_v23 }
 0x2b7   :  { %3631 = vst [vmem:[%s10938_s10 + $0x70] sm:$0xff] %v3615_v47  ;;  %v3616_v28 = vadd.f32 %v3600_v35, %v3068_v40 }
 0x2b9   :  { %3632 = vst [vmem:[%s10938_s10 + $0x78] sm:$0xff] %v3616_v28 }
 0x2c4   :  { %v3837_v32 = vpop.f32.mrf.mxu0 }
 0x2c5   :  { %v4030_v1 = vpop.f32.mrf.mxu1 }
 0x2c6   :  { %v4031_v31 = vadd.f32 %v4030_v1, %v3837_v32  ;;  %v3839_v60 = vpop.f32.mrf.mxu0 }
 0x2c7   :  { %v4032_v12 = vpop.f32.mrf.mxu1 }
 0x2c8   :  { %v4148_v39 = vmul.f32 %v10025_v0, %v4031_v31  ;;  %v4033_v16 = vadd.f32 %v4032_v12, %v3839_v60  ;;  %v3841_v5 = vpop.f32.mrf.mxu0 }
 0x2c9   :  { %v4034_v14 = vpop.f32.mrf.mxu1 }
 0x2ca   :  { %v4149_v18 = vmul.f32 %v10025_v0, %v4033_v16  ;;  %v4035_v55 = vadd.f32 %v4034_v14, %v3841_v5  ;;  %v3843_v52 = vpop.f32.mrf.mxu0  ;;  %v4180_v44 = vrot.slane %v4148_v39, 1 }
 0x2cb   :  { %v4036_v3 = vpop.f32.mrf.mxu1 }
 0x2cc   :  { %v4150_v54 = vmul.f32 %v10045_v2, %v4035_v55  ;;  %v4037_v7 = vadd.f32 %v4036_v3, %v3843_v52  ;;  %v3847_v56 = vpop.f32.mrf.mxu0  ;;  %v4183_v38 = vrot.slane %v4149_v18, 1 }
 0x2cd   :  { %v4040_v8 = vpop.f32.mrf.mxu1 }
 0x2ce   :  { %v4181_v0 = vrot.slane %v4150_v54, 1  ;;  %v4151_v19 = vmul.f32 %v10045_v2, %v4037_v7  ;;  %v4041_v50 = vadd.f32 %v4040_v8, %v3847_v56  ;;  %v3849_v13 = vpop.f32.mrf.mxu0 }
 0x2cf   :  { %v4042_v63 = vpop.f32.mrf.mxu1 }
 0x2d0   :  { %v4182_v6 = vsel %vm2402_vm2, %v4180_v44, %v4181_v0  ;;  %v4184_v4 = vrot.slane %v4151_v19, 1  ;;  %v4152_v45 = vmul.f32 %v10088_v25, %v4041_v50  ;;  %v4043_v49 = vadd.f32 %v4042_v63, %v3849_v13  ;;  %v3851_v62 = vpop.f32.mrf.mxu0  ;;  %v4124_v13 = vpop.permute.xlu1 %4123 }
 0x2d1   :  { %v10520_v26 = vadd.f32 %v4182_v6, %v3601_v51  ;;  %v4044_v2 = vpop.f32.mrf.mxu1 }
 0x2d2   :  { %v4185_v40 = vsel %vm2402_vm2, %v4183_v38, %v4184_v4  ;;  %v4186_v47 = vrot.slane %v4152_v45, 1  ;;  %v4153_v35 = vmul.f32 %v10088_v25, %v4043_v49  ;;  %v4045_v28 = vadd.f32 %v4044_v2, %v3851_v62  ;;  %v3853_v32 = vpop.f32.mrf.mxu0 }
 0x2d3   :  { %v10524_v1 = vadd.f32 %v4185_v40, %v3602_v10  ;;  %v4046_v31 = vpop.f32.mrf.mxu1  ;;  %v4138_v62 = vrot.slane %v4124_v13, 7 }
 0x2d4   :  { %v4187_v60 = vsel %vm2402_vm2, %v4181_v0, %v4186_v47  ;;  %v4188_v12 = vrot.slane %v4153_v35, 1  ;;  %v4154_v39 = vmul.f32 %v10113_v58, %v4045_v28  ;;  %v4047_v16 = vadd.f32 %v4046_v31, %v3853_v32  ;;  %v3857_v5 = vpop.f32.mrf.mxu0 }
 0x2d5   :  { %v10529_v14 = vadd.f32 %v4187_v60, %v10422_v36  ;;  %v4050_v18 = vpop.f32.mrf.mxu1 }
 0x2d6   :  { %v4189_v55 = vsel %vm2402_vm2, %v4184_v4, %v4188_v12  ;;  %v4190_v52 = vrot.slane %v4154_v39, 1  ;;  %v4155_v25 = vmul.f32 %v10113_v58, %v4047_v16  ;;  %v4051_v11 = vadd.f32 %v4050_v18, %v3857_v5  ;;  %v3859_v30 = vpop.f32.mrf.mxu0 }
 0x2d7   :  { %v10534_v3 = vadd.f32 %v4189_v55, %v10428_v29  ;;  %v4052_v54 = vpop.f32.mrf.mxu1 }
 0x2d8   :  { %v4191_v7 = vsel %vm2402_vm2, %v4186_v47, %v4190_v52  ;;  %v4192_v56 = vrot.slane %v4155_v25, 1  ;;  %v4156_v48 = vmul.f32 %v10132_v42, %v4051_v11  ;;  %v4053_v8 = vadd.f32 %v4052_v54, %v3859_v30  ;;  %v3861_v36 = vpop.f32.mrf.mxu0 }
 0x2d9   :  { %v10539_v46 = vadd.f32 %v4191_v7, %v10438_v53  ;;  %v4054_v44 = vpop.f32.mrf.mxu1 }
 0x2da   :  { %v4193_v0 = vsel %vm2402_vm2, %v4188_v12, %v4192_v56  ;;  %v4194_v58 = vrot.slane %v4156_v48, 1  ;;  %v4157_v19 = vmul.f32 %v10132_v42, %v4053_v8  ;;  %v4055_v50 = vadd.f32 %v4054_v44, %v3861_v36  ;;  %v3863_v29 = vpop.f32.mrf.mxu0 }
 0x2db   :  { %v10544_v51 = vadd.f32 %v4193_v0, %v10442_v17  ;;  %v4056_v38 = vpop.f32.mrf.mxu1 }
 0x2dc   :  { %v4195_v63 = vsel %vm2402_vm2, %v4190_v52, %v4194_v58  ;;  %v4196_v23 = vrot.slane %v4157_v19, 1  ;;  %v4158_v6 = vmul.f32 %v10148_v15, %v4055_v50  ;;  %v4057_v53 = vadd.f32 %v4056_v38, %v3863_v29  ;;  %v3867_v4 = vpop.f32.mrf.mxu0  ;;  %v11037_v29 = vld [vmem:[#allocation2_spill] sm:$0xff] }
 0x2dd   :  { %v10549_v45 = vadd.f32 %v4195_v63, %v10448_v43  ;;  %v4060_v49 = vpop.f32.mrf.mxu1  ;;  %v4722_v63 = vpop.permute.xlu1 %4721 }
 0x2de   :  { %v4197_v42 = vsel %vm2402_vm2, %v4192_v56, %v4196_v23  ;;  %v4198_v10 = vrot.slane %v4158_v6, 1  ;;  %v4159_v2 = vmul.f32 %v10148_v15, %v4057_v53  ;;  %v4061_v17 = vadd.f32 %v4060_v49, %v3867_v4  ;;  %v3869_v40 = vpop.f32.mrf.mxu0 }
 0x2df   :  { %v10554_v47 = vadd.f32 %v4197_v42, %v10452_v22  ;;  %v4062_v35 = vpop.f32.mrf.mxu1  ;;  %v4139_v15 = vsel %vm1265_vm1, %v4136_v21, %v4138_v62  ;;  %v4743_v4 = vrot.slane %v10425_v61, 1  ;;  %v7827_v62 = vld [vmem:[%s10931_s0 + $0x70] sm:$0xff]  ;;  %v7828_v61 = vld [vmem:[%s10931_s0 + $0x78] sm:$0xff] }
 0x2e0   :  { %v4199_v28 = vsel %vm2402_vm2, %v4194_v58, %v4198_v10  ;;  %v4200_v32 = vrot.slane %v4159_v2, 1  ;;  %v4160_v31 = vmul.f32 %v10165_v24, %v4061_v17  ;;  %v4063_v43 = vadd.f32 %v4062_v35, %v3869_v40  ;;  %v3871_v60 = vpop.f32.mrf.mxu0  ;;  %v6011_v58 = vld [vmem:[%s10939_s8] sm:$0x3] }
 0x2e1   :  { %v10559_v12 = vadd.f32 %v4199_v28, %v10463_v27  ;;  %v4064_v39 = vpop.f32.mrf.mxu1  ;;  %v10604_v13 = vrot.slane %v6011_v58, %v11037_v29  ;;  %v4744_v17 = vrot.slane %v4722_v63, 1  ;;  %v4726_v28 = vpop.permute.xlu1 %4725 }
 0x2e2   :  { %v4201_v16 = vsel %vm2402_vm2, %v4196_v23, %v4200_v32  ;;  %v4202_v22 = vrot.slane %v4160_v31, 1  ;;  %v4161_v5 = vmul.f32 %v10165_v24, %v4063_v43  ;;  %v4065_v18 = vadd.f32 %v4064_v39, %v3871_v60  ;;  %v3873_v55 = vpop.f32.mrf.mxu0 }
 0x2e3   :  { %v10567_v52 = vadd.f32 %v4201_v16, %v10470_v34  ;;  %v4066_v25 = vpop.f32.mrf.mxu1  ;;  %v4083_v34 = vld [vmem:[%s10938_s10 + $0x70] sm:$0x7f]  ;;  %11038 = vst [vmem:[#allocation17_spill] sm:$0xff] %v10604_v13  ;;  %v4745_v16 = vsel %vm2402_vm2, %v4743_v4, %v4744_v17 }
 0x2e4   :  { %v4203_v11 = vsel %vm2402_vm2, %v4198_v10, %v4202_v22  ;;  %v4204_v27 = vrot.slane %v4161_v5, 1  ;;  %v4162_v30 = vmul.f32 %v4139_v15, %v4065_v18  ;;  %v4067_v54 = vadd.f32 %v4066_v25, %v3873_v55 }
 0x2e5   :  { %v10571_v59 = vadd.f32 %v4203_v11, %v10474_v37  ;;  %v4084_v37 = vld [vmem:[%s10938_s10 + $0x78] sm:$0x7f] }
 0x2e6   :  { %v4205_v21 = vsel %vm2402_vm2, %v4200_v32, %v4204_v27  ;;  %v4206_v7 = vrot.slane %v4162_v30, 1  ;;  %v4163_v56 = vmul.f32 %v4139_v15, %v4067_v54  ;;  %v4748_v54 = vrot.slane %v10445_v20, 1 }
 0x2e7   :  { %v10575_v24 = vadd.f32 %v4205_v21, %v10478_v57 }
 0x2e8   :  { %v4207_v48 = vsel %vm2402_vm2, %v4202_v22, %v4206_v7  ;;  %v4240_v8 = vadd.f32 %v4206_v7, %v4083_v34  ;;  %v4208_v36 = vrot.slane %v4163_v56, 1  ;;  %v4746_v22 = vrot.slane %v4726_v28, 1 }
 0x2e9   :  { %v10582_v44 = vadd.f32 %v4207_v48, %v10487_v33  ;;  %v11035_v33 = vld [vmem:[#allocation3_spill] sm:$0xff] }
 0x2ea   :  { %4256 = vst [vmem:[%s10938_s10 + $0x70] sm:$0x7f] %v4240_v8  ;;  %v4209_v57 = vsel %vm2402_vm2, %v4204_v27, %v4208_v36  ;;  %v4241_v0 = vadd.f32 %v4208_v36, %v4084_v37  ;;  %v10601_v50 = vrot.slane %v6011_v58, %v11035_v33  ;;  %v4747_v7 = vsel %vm2402_vm2, %v4744_v17, %v4746_v22  ;;  %v4734_v37 = vpop.permute.xlu1 %4733 }
 0x2eb   :  { %v10595_v19 = vadd.f32 %v4209_v57, %v10495_v9 }
 0x2ec   :  { %4257 = vst [vmem:[%s10938_s10 + $0x78] sm:$0x7f] %v4241_v0  ;;  %11036 = vst [vmem:[#allocation12_spill] sm:$0xff] %v10601_v50 }
 0x2f1   :  { %v6009_v38 = vld [vmem:[%s10938_s10 + $0x70] sm:$0xff] }
 0x2f2   :  { %v6037_v23 = vadd.f32 %v10601_v50, %v6009_v38 }
 0x2f3   :  { %v6010_v9 = vld [vmem:[%s10938_s10 + $0x78] sm:$0xff] }
 0x2f4   :  { %v6053_v6 = vmax.f32 %v6037_v23, 0.0  ;;  %v6038_v53 = vadd.f32 %v10604_v13, %v6010_v9  ;;  %v4749_v9 = vsel %vm2402_vm2, %v4746_v22, %v4748_v54  ;;  %v4742_v22 = vpop.permute.xlu1 %4741 }
 0x2f5   :  { %v4462_v49 = vpop.f32.mrf.mxu0 }
 0x2f6   :  { %v6069_v42 = vadd.f32 %v7827_v62, %v6053_v6  ;;  %v6054_v10 = vmax.f32 %v6038_v53, 0.0  ;;  %v4655_v2 = vpop.f32.mrf.mxu1  ;;  %v4750_v6 = vrot.slane %v4734_v37, 1 }
 0x2f7   :  { %v4656_v40 = vadd.f32 %v4655_v2, %v4462_v49  ;;  %v4464_v35 = vpop.f32.mrf.mxu0 }
 0x2f8   :  { %6085 = vst [vmem:[%s10938_s10 + $0x70] sm:$0xff] %v6069_v42  ;;  %v6070_v32 = vadd.f32 %v7828_v61, %v6054_v10  ;;  %v4657_v31 = vpop.f32.mrf.mxu1  ;;  %v4752_v61 = vrot.slane %v10467_v41, 1 }
 0x2f9   :  { %v4764_v43 = vmul.f32 %v4743_v4, %v4656_v40  ;;  %v4658_v60 = vadd.f32 %v4657_v31, %v4464_v35  ;;  %v4466_v39 = vpop.f32.mrf.mxu0 }
 0x2fa   :  { %6086 = vst [vmem:[%s10938_s10 + $0x78] sm:$0xff] %v6070_v32  ;;  %v4659_v15 = vpop.f32.mrf.mxu1 }
 0x2fb   :  { %v4765_v5 = vmul.f32 %v4743_v4, %v4658_v60  ;;  %v4660_v18 = vadd.f32 %v4659_v15, %v4466_v39  ;;  %v4468_v55 = vpop.f32.mrf.mxu0  ;;  %v4796_v56 = vrot.slane %v4764_v43, 7  ;;  %v4751_v43 = vsel %vm2402_vm2, %v4748_v54, %v4750_v6 }
 0x2fc   :  { %v4661_v25 = vpop.f32.mrf.mxu1  ;;  %v4753_v54 = vsel %vm2402_vm2, %v4750_v6, %v4752_v61 }
 0x2fd   :  { %v4766_v11 = vmul.f32 %v4745_v16, %v4660_v18  ;;  %v4662_v27 = vadd.f32 %v4661_v25, %v4468_v55  ;;  %v4472_v30 = vpop.f32.mrf.mxu0  ;;  %v4799_v57 = vrot.slane %v4765_v5, 7 }
 0x2fe   :  { %v4665_v21 = vpop.f32.mrf.mxu1 }
 0x2ff   :  { %v4797_v34 = vrot.slane %v4766_v11, 7  ;;  %v4767_v48 = vmul.f32 %v4745_v16, %v4662_v27  ;;  %v4666_v8 = vadd.f32 %v4665_v21, %v4472_v30  ;;  %v4474_v36 = vpop.f32.mrf.mxu0  ;;  %v4754_v21 = vrot.slane %v4742_v22, 1 }
 0x300   :  { %v4667_v0 = vpop.f32.mrf.mxu1 }
 0x301   :  { %v4798_v58 = vsel %vm1265_vm1, %v4796_v56, %v4797_v34  ;;  %v4800_v33 = vrot.slane %v4767_v48, 7  ;;  %v4768_v29 = vmul.f32 %v4747_v7, %v4666_v8  ;;  %v4668_v38 = vadd.f32 %v4667_v0, %v4474_v36  ;;  %v4476_v63 = vpop.f32.mrf.mxu0 }
 0x302   :  { %v10632_v23 = vadd.f32 %v4798_v58, %v10520_v26  ;;  %v4669_v20 = vpop.f32.mrf.mxu1 }
 0x303   :  { %v4801_v53 = vsel %vm1265_vm1, %v4799_v57, %v4800_v33  ;;  %v4802_v4 = vrot.slane %v4768_v29, 7  ;;  %v4769_v49 = vmul.f32 %v4747_v7, %v4668_v38  ;;  %v4670_v62 = vadd.f32 %v4669_v20, %v4476_v63  ;;  %v4478_v42 = vpop.f32.mrf.mxu0 }
 0x304   :  { %v10637_v10 = vadd.f32 %v4801_v53, %v10524_v1  ;;  %v4671_v2 = vpop.f32.mrf.mxu1  ;;  %v4755_v38 = vsel %vm2402_vm2, %v4752_v61, %v4754_v21 }
 0x305   :  { %v4803_v17 = vsel %vm1265_vm1, %v4797_v34, %v4802_v4  ;;  %v4804_v40 = vrot.slane %v4769_v49, 7  ;;  %v4770_v35 = vmul.f32 %v4749_v9, %v4670_v62  ;;  %v4672_v26 = vadd.f32 %v4671_v2, %v4478_v42  ;;  %v4482_v28 = vpop.f32.mrf.mxu0 }
 0x306   :  { %v10642_v32 = vadd.f32 %v4803_v17, %v10529_v14  ;;  %v4675_v31 = vpop.f32.mrf.mxu1 }
 0x307   :  { %v4805_v60 = vsel %vm1265_vm1, %v4800_v33, %v4804_v40  ;;  %v4806_v39 = vrot.slane %v4770_v35, 7  ;;  %v4771_v1 = vmul.f32 %v4749_v9, %v4672_v26  ;;  %v4676_v15 = vadd.f32 %v4675_v31, %v4482_v28  ;;  %v4484_v16 = vpop.f32.mrf.mxu0 }
 0x308   :  { %v10647_v5 = vadd.f32 %v4805_v60, %v10534_v3  ;;  %v4677_v18 = vpop.f32.mrf.mxu1 }
 0x309   :  { %v4807_v55 = vsel %vm1265_vm1, %v4802_v4, %v4806_v39  ;;  %v4808_v41 = vrot.slane %v4771_v1, 7  ;;  %v4772_v25 = vmul.f32 %v4751_v43, %v4676_v15  ;;  %v4678_v14 = vadd.f32 %v4677_v18, %v4484_v16  ;;  %v4486_v11 = vpop.f32.mrf.mxu0 }
 0x30a   :  { %v10651_v27 = vadd.f32 %v4807_v55, %v10539_v46  ;;  %v4679_v30 = vpop.f32.mrf.mxu1 }
 0x30b   :  { %v4809_v7 = vsel %vm1265_vm1, %v4804_v40, %v4808_v41  ;;  %v4810_v56 = vrot.slane %v4772_v25, 7  ;;  %v4773_v34 = vmul.f32 %v4751_v43, %v4678_v14  ;;  %v4680_v3 = vadd.f32 %v4679_v30, %v4486_v11  ;;  %v4488_v48 = vpop.f32.mrf.mxu0 }
 0x30c   :  { %v10656_v8 = vadd.f32 %v4809_v7, %v10544_v51  ;;  %v4681_v36 = vpop.f32.mrf.mxu1 }
 0x30d   :  { %v4811_v37 = vsel %vm1265_vm1, %v4806_v39, %v4810_v56  ;;  %v4812_v57 = vrot.slane %v4773_v34, 7  ;;  %v4774_v0 = vmul.f32 %v4753_v54, %v4680_v3  ;;  %v4682_v46 = vadd.f32 %v4681_v36, %v4488_v48  ;;  %v4492_v58 = vpop.f32.mrf.mxu0 }
 0x30e   :  { %v10660_v33 = vadd.f32 %v4811_v37, %v10549_v45  ;;  %v4685_v29 = vpop.f32.mrf.mxu1 }
 0x30f   :  { %v4813_v63 = vsel %vm1265_vm1, %v4808_v41, %v4812_v57  ;;  %v4814_v20 = vrot.slane %v4774_v0, 7  ;;  %v4775_v9 = vmul.f32 %v4753_v54, %v4682_v46  ;;  %v4686_v6 = vadd.f32 %v4685_v29, %v4492_v58  ;;  %v4494_v51 = vpop.f32.mrf.mxu0 }
 0x310   :  { %v10665_v53 = vadd.f32 %v4813_v63, %v10554_v47  ;;  %v4687_v4 = vpop.f32.mrf.mxu1 }
 0x311   :  { %v4815_v49 = vsel %vm1265_vm1, %v4810_v56, %v4814_v20  ;;  %v4816_v62 = vrot.slane %v4775_v9, 7  ;;  %v4776_v42 = vmul.f32 %v4755_v38, %v4686_v6  ;;  %v4688_v2 = vadd.f32 %v4687_v4, %v4494_v51  ;;  %v4496_v45 = vpop.f32.mrf.mxu0 }
 0x312   :  { %v10669_v17 = vadd.f32 %v4815_v49, %v10559_v12  ;;  %v4689_v40 = vpop.f32.mrf.mxu1 }
 0x313   :  { %v4817_v35 = vsel %vm1265_vm1, %v4812_v57, %v4816_v62  ;;  %v4818_v26 = vrot.slane %v4776_v42, 7  ;;  %v4777_v28 = vmul.f32 %v4755_v38, %v4688_v2  ;;  %v4690_v61 = vadd.f32 %v4689_v40, %v4496_v45  ;;  %v4498_v31 = vpop.f32.mrf.mxu0  ;;  %v5324_v40 = vpop.permute.xlu0 %5323 }
 0x314   :  { %v10673_v47 = vadd.f32 %v4817_v35, %v10567_v52  ;;  %v4691_v43 = vpop.f32.mrf.mxu1 }
 0x315   :  { %v4819_v60 = vsel %vm1265_vm1, %v4814_v20, %v4818_v26  ;;  %v4820_v39 = vrot.slane %v4777_v28, 7  ;;  %v4778_v1 = vmul.f32 %v4754_v21, %v4690_v61  ;;  %v4692_v15 = vadd.f32 %v4691_v43, %v4498_v31 }
 0x316   :  { %v10677_v16 = vadd.f32 %v4819_v60, %v10571_v59 }
 0x317   :  { %v4821_v12 = vsel %vm1265_vm1, %v4816_v62, %v4820_v39  ;;  %v4822_v22 = vrot.slane %v4778_v1, 7  ;;  %v4779_v18 = vmul.f32 %v4754_v21, %v4692_v15  ;;  %v10713_v60 = vpop.permute.xlu0 %5338 }
 0x318   :  { %11039 = vst [vmem:[#allocation9_spill] sm:$0xff] %v10677_v16  ;;  %v10681_v55 = vadd.f32 %v4821_v12, %v10575_v24 }
 0x319   :  { %v4823_v41 = vsel %vm1265_vm1, %v4818_v26, %v4822_v22  ;;  %v4824_v52 = vrot.slane %v4779_v18, 7 }
 0x31a   :  { %11040 = vst [vmem:[#allocation18_spill] sm:$0xff] %v10681_v55  ;;  %v4852_v25 = vadd.f32 %v4823_v41, %v10582_v44  ;;  %v10687_v44 = vpop.permute.xlu1 %5328 }
 0x31b   :  { %v4825_v14 = vsel %vm1265_vm1, %v4820_v39, %v4824_v52  ;;  %v10715_v18 = vpop.permute.xlu0 %5348 }
 0x31c   :  { %v4853_v11 = vadd.f32 %v4825_v14, %v10595_v19  ;;  %11041 = vst [vmem:[#allocation13_spill] sm:$0xff] %v10715_v18 }
 0x31e   :  { %v10695_v9 = vpop.permute.xlu1 %5333 }
 0x31f   :  { %v5854_v52 = vpop.permute.xlu0 %5853 }
 0x322   :  { %v10705_v62 = vpop.permute.xlu1 %5343 }
 0x326   :  { %v5072_v30 = vpop.f32.mrf.mxu0  ;;  %v5354_v28 = vpop.permute.xlu1 %5353 }
 0x327   :  { %v5263_v54 = vpop.f32.mrf.mxu1  ;;  %v5866_v30 = vpop.permute.xlu0 %5865 }
 0x328   :  { %v5073_v59 = vpop.f32.mrf.mxu0 }
 0x329   :  { %v5264_v7 = vpop.f32.mrf.mxu1 }
 0x32a   :  { %v5074_v56 = vpop.f32.mrf.mxu0  ;;  %v5858_v22 = vpop.permute.xlu1 %5857 }
 0x32b   :  { %v5265_v34 = vpop.f32.mrf.mxu1 }
 0x32c   :  { %v5076_v3 = vpop.f32.mrf.mxu0 }
 0x32d   :  { %v5267_v21 = vpop.f32.mrf.mxu1 }
 0x32e   :  { %v5080_v48 = vpop.f32.mrf.mxu0  ;;  %v5862_v14 = vpop.permute.xlu1 %5861 }
 0x32f   :  { %v5271_v24 = vpop.f32.mrf.mxu1 }
 0x330   :  { %v5082_v36 = vpop.f32.mrf.mxu0 }
 0x331   :  { %v5273_v37 = vpop.f32.mrf.mxu1 }
 0x332   :  { %v5084_v57 = vpop.f32.mrf.mxu0  ;;  %v5870_v54 = vpop.permute.xlu1 %5869  ;;  %v5274_v55 = vadd.f32 %v5273_v37, %v5082_v36 }
 0x333   :  { %v5275_v0 = vpop.f32.mrf.mxu1 }
 0x334   :  { %v5086_v46 = vpop.f32.mrf.mxu0  ;;  %v5276_v13 = vadd.f32 %v5275_v0, %v5084_v57  ;;  %v5359_v36 = vmul.f32 %v10687_v44, %v5274_v55 }
 0x335   :  { %v5277_v58 = vpop.f32.mrf.mxu1 }
 0x336   :  { %v5090_v29 = vpop.f32.mrf.mxu0  ;;  %v5278_v50 = vadd.f32 %v5277_v58, %v5086_v46  ;;  %v5360_v46 = vmul.f32 %v10695_v9, %v5276_v13 }
 0x337   :  { %v5281_v19 = vpop.f32.mrf.mxu1 }
 0x338   :  { %v10689_v38 = vpop.f32.mrf.mxu0  ;;  %v5361_v58 = vmul.f32 %v10695_v9, %v5278_v50  ;;  %v5373_v9 = vadd.f32 %v5359_v36, %v10647_v5  ;;  %v11043_v36 = vld [vmem:[#allocation12_spill] sm:$0xff] }
 0x339   :  { %v10691_v63 = vpop.f32.mrf.mxu1 }
 0x33a   :  { %v10693_v20 = vpop.f32.mrf.mxu0 }
 0x33b   :  { %v10697_v6 = vpop.f32.mrf.mxu1 }
 0x33c   :  { %v10699_v51 = vpop.f32.mrf.mxu0 }
 0x33d   :  { %v10701_v4 = vpop.f32.mrf.mxu1 }
 0x33e   :  { %v10703_v49 = vpop.f32.mrf.mxu0  ;;  %v5288_v50 = vadd.f32 %v10701_v4, %v10699_v51 }
 0x33f   :  { %v10707_v42 = vpop.f32.mrf.mxu1 }
 0x340   :  { %v10709_v2 = vpop.f32.mrf.mxu0 }
 0x341   :  { %v10711_v45 = vpop.f32.mrf.mxu1 }
 0x342   :  { %v5104_v35 = vpop.f32.mrf.mxu0 }
 0x343   :  { %v5295_v26 = vpop.f32.mrf.mxu1 }
 0x344   :  { %v5296_v61 = vadd.f32 %v5295_v26, %v5104_v35  ;;  %v5106_v31 = vpop.f32.mrf.mxu0  ;;  %v5874_v35 = vpop.permute.xlu0 %5873  ;;  %v5266_v26 = vadd.f32 %v5265_v34, %v5074_v56 }
 0x345   :  { %v5297_v43 = vpop.f32.mrf.mxu1  ;;  %v5888_v16 = vrot.slane %v5874_v35, 7 }
 0x346   :  { %v5368_v39 = vmul.f32 %v5354_v28, %v5296_v61  ;;  %v5298_v1 = vadd.f32 %v5297_v43, %v5106_v31  ;;  %v5882_v61 = vrot.slane %v5862_v14, 7  ;;  %v5268_v31 = vadd.f32 %v5267_v21, %v5076_v3 }
 0x348   :  { %v5382_v15 = vadd.f32 %v5368_v39, %v4852_v25  ;;  %v5369_v12 = vmul.f32 %v5354_v28, %v5298_v1  ;;  %v5880_v25 = vrot.slane %v5858_v22, 7  ;;  %v5879_v39 = vrot.slane %v5854_v52, 7 }
 0x349   :  { %v5886_v1 = vrot.slane %v5870_v54, 7  ;;  %v5356_v22 = vmul.f32 %v5324_v40, %v5266_v26  ;;  %v5357_v21 = vmul.f32 %v5324_v40, %v5268_v31  ;;  %v5282_v52 = vadd.f32 %v5281_v19, %v5090_v29 }
 0x34a   :  { %5396 = vst [vmem:[%s10938_s10 + $0x60] sm:$0xff] %v5382_v15  ;;  %v5383_v41 = vadd.f32 %v5369_v12, %v4853_v11  ;;  %v5884_v11 = vrot.slane %v5866_v30, 7  ;;  %v5878_v15 = vpop.permute.xlu1 %5877  ;;  %v5272_v12 = vadd.f32 %v5271_v24, %v5080_v48  ;;  %v5883_v34 = vsel %vm1265_vm1, %v5880_v25, %v5882_v61 }
 0x34b   :  { %v5890_v3 = vrot.slane %v5878_v15, 7  ;;  %v10734_v0 = vsel %vm1265_vm1, %v5886_v1, %v5888_v16  ;;  %v5284_v29 = vadd.f32 %v10691_v63, %v10689_v38  ;;  %v5286_v19 = vadd.f32 %v10697_v6, %v10693_v20 }
 0x34c   :  { %5397 = vst [vmem:[%s10938_s10 + $0x68] sm:$0xff] %v5383_v41  ;;  %v10726_v30 = vsel %vm1265_vm1, %v5882_v61, %v5884_v11  ;;  %v10729_v48 = vsel %vm1265_vm1, %v5884_v11, %v5886_v1  ;;  %v5358_v24 = vmul.f32 %v10687_v44, %v5272_v12  ;;  %v5371_v35 = vadd.f32 %v5357_v21, %v10637_v10 }
 0x34d   :  { %v5362_v13 = vmul.f32 %v10713_v60, %v5282_v52  ;;  %v5363_v10 = vmul.f32 %v10713_v60, %v5284_v29  ;;  %v5364_v61 = vmul.f32 %v10705_v62, %v5286_v19  ;;  %v5365_v1 = vmul.f32 %v10705_v62, %v5288_v50 }
 0x34e   :  { %v5372_v20 = vadd.f32 %v5358_v24, %v10642_v32  ;;  %v11042_v24 = vld [vmem:[#allocation13_spill] sm:$0xff] }
 0x34f   :  { %v10761_v5 = vadd.f32 %v5362_v13, %v10660_v33  ;;  %v5294_v33 = vadd.f32 %v10711_v45, %v10709_v2 }
 0x357   :  { %v5602_v59 = vpop.f32.mrf.mxu0 }
 0x358   :  { %v5793_v7 = vpop.f32.mrf.mxu1  ;;  %v5881_v59 = vsel %vm1265_vm1, %v5879_v39, %v5880_v25  ;;  %v10744_v25 = vsel %vm1265_vm1, %v5888_v16, %v5890_v3  ;;  %v10756_v16 = vadd.f32 %v5361_v58, %v10656_v8 }
 0x359   :  { %v5603_v28 = vpop.f32.mrf.mxu0 }
 0x35a   :  { %v5794_v43 = vpop.f32.mrf.mxu1  ;;  %v10753_v28 = vadd.f32 %v5360_v46, %v10651_v27  ;;  %v5292_v27 = vadd.f32 %v10707_v42, %v10703_v49 }
 0x35b   :  { %v5604_v41 = vpop.f32.mrf.mxu0 }
 0x35c   :  { %v5795_v18 = vpop.f32.mrf.mxu1 }
 0x35d   :  { %v5796_v7 = vadd.f32 %v5795_v18, %v5604_v41  ;;  %v5606_v56 = vpop.f32.mrf.mxu0  ;;  %v5370_v18 = vadd.f32 %v5356_v22, %v10632_v23 }
 0x35e   :  { %v5797_v14 = vpop.f32.mrf.mxu1 }
 0x35f   :  { %v5798_v37 = vadd.f32 %v5797_v14, %v5606_v56  ;;  %v5610_v57 = vpop.f32.mrf.mxu0  ;;  %v5899_v54 = vmul.f32 %v5879_v39, %v5796_v7  ;;  %v10771_v7 = vadd.f32 %v5364_v61, %v10669_v17  ;;  %v10777_v14 = vadd.f32 %v5365_v1, %v10673_v47  ;;  %v11044_v47 = vld [vmem:[#allocation17_spill] sm:$0xff] }
 0x360   :  { %v5801_v40 = vpop.f32.mrf.mxu1 }
 0x361   :  { %v5802_v55 = vadd.f32 %v5801_v40, %v5610_v57  ;;  %v5612_v44 = vpop.f32.mrf.mxu0  ;;  %v5900_v38 = vmul.f32 %v5879_v39, %v5798_v37  ;;  %v5927_v4 = vrot.slane %v5899_v54, 1 }
 0x362   :  { %v5803_v63 = vpop.f32.mrf.mxu1 }
 0x363   :  { %v5901_v23 = vmul.f32 %v5881_v59, %v5802_v55  ;;  %v5804_v6 = vadd.f32 %v5803_v63, %v5612_v44  ;;  %v5614_v26 = vpop.f32.mrf.mxu0  ;;  %v5930_v8 = vrot.slane %v5900_v38, 1  ;;  %v7829_v38 = vld [vmem:[%s10931_s0] sm:$0xff] }
 0x364   :  { %v5805_v51 = vpop.f32.mrf.mxu1 }
 0x365   :  { %v5928_v31 = vrot.slane %v5901_v23, 1  ;;  %v5902_v43 = vmul.f32 %v5881_v59, %v5804_v6  ;;  %v5806_v32 = vadd.f32 %v5805_v51, %v5614_v26  ;;  %v5616_v39 = vpop.f32.mrf.mxu0  ;;  %v10768_v59 = vadd.f32 %v5363_v10, %v10665_v53 }
 0x366   :  { %v5807_v11 = vpop.f32.mrf.mxu1  ;;  %v10780_v53 = vmul.f32 %v11042_v24, %v5292_v27 }
 0x367   :  { %v5929_v60 = vsel %vm2402_vm2, %v5927_v4, %v5928_v31  ;;  %v5931_v15 = vrot.slane %v5902_v43, 1  ;;  %v5903_v12 = vmul.f32 %v5883_v34, %v5806_v32  ;;  %v5808_v41 = vadd.f32 %v5807_v11, %v5616_v39  ;;  %v5620_v22 = vpop.f32.mrf.mxu0 }
 0x368   :  { %v5967_v62 = vadd.f32 %v5929_v60, %v5370_v18  ;;  %v5811_v56 = vpop.f32.mrf.mxu1 }
 0x369   :  { %v5932_v49 = vsel %vm2402_vm2, %v5930_v8, %v5931_v15  ;;  %v5933_v42 = vrot.slane %v5903_v12, 1  ;;  %v5904_v3 = vmul.f32 %v5883_v34, %v5808_v41  ;;  %v5812_v21 = vadd.f32 %v5811_v56, %v5620_v22  ;;  %v5622_v52 = vpop.f32.mrf.mxu0  ;;  %v7831_v12 = vld [vmem:[%s10931_s0 + $0x10] sm:$0xff] }
 0x36a   :  { %v6023_v17 = vadd.f32 %v11043_v36, %v5967_v62  ;;  %v5968_v37 = vadd.f32 %v5932_v49, %v5371_v35  ;;  %v5813_v57 = vpop.f32.mrf.mxu1  ;;  %v10786_v34 = vmul.f32 %v11042_v24, %v5294_v33 }
 0x36b   :  { %v5934_v2 = vsel %vm2402_vm2, %v5928_v31, %v5933_v42  ;;  %v5935_v45 = vrot.slane %v5904_v3, 1  ;;  %v5905_v46 = vmul.f32 %v10726_v30, %v5812_v21  ;;  %v5814_v58 = vadd.f32 %v5813_v57, %v5622_v52  ;;  %v5624_v29 = vpop.f32.mrf.mxu0  ;;  %v7832_v21 = vld [vmem:[%s10931_s0 + $0x18] sm:$0xff] }
 0x36c   :  { %v6039_v19 = vmax.f32 %v6023_v17, 0.0  ;;  %v6024_v40 = vadd.f32 %v11044_v47, %v5968_v37  ;;  %v5969_v18 = vadd.f32 %v5934_v2, %v5372_v20  ;;  %v5815_v54 = vpop.f32.mrf.mxu1 }
 0x36d   :  { %v5936_v55 = vsel %vm2402_vm2, %v5931_v15, %v5935_v45  ;;  %v5937_v44 = vrot.slane %v5905_v46, 1  ;;  %v5906_v35 = vmul.f32 %v10726_v30, %v5814_v58  ;;  %v5816_v13 = vadd.f32 %v5815_v54, %v5624_v29  ;;  %v5626_v50 = vpop.f32.mrf.mxu0  ;;  %v7830_v30 = vld [vmem:[%s10931_s0 + $0x8] sm:$0xff]  ;;  %v7833_v29 = vld [vmem:[%s10931_s0 + $0x20] sm:$0xff] }
 0x36e   :  { %v6055_v63 = vadd.f32 %v7829_v38, %v6039_v19  ;;  %v6040_v23 = vmax.f32 %v6024_v40, 0.0  ;;  %v6025_v6 = vadd.f32 %v11043_v36, %v5969_v18  ;;  %v5970_v26 = vadd.f32 %v5936_v55, %v5373_v9  ;;  %v5817_v10 = vpop.f32.mrf.mxu1 }
 0x36f   :  { %v5938_v20 = vsel %vm2402_vm2, %v5933_v42, %v5937_v44  ;;  %v5939_v61 = vrot.slane %v5906_v35, 1  ;;  %v5907_v51 = vmul.f32 %v10729_v48, %v5816_v13  ;;  %v5818_v4 = vadd.f32 %v5817_v10, %v5626_v50  ;;  %v5630_v31 = vpop.f32.mrf.mxu0  ;;  %v7834_v13 = vld [vmem:[%s10931_s0 + $0x28] sm:$0xff] }
 0x370   :  { %6071 = vst [vmem:[%s10938_s10] sm:$0xff] %v6055_v63  ;;  %v6056_v43 = vadd.f32 %v7830_v30, %v6040_v23  ;;  %v6041_v32 = vmax.f32 %v6025_v6, 0.0  ;;  %v6026_v9 = vadd.f32 %v11044_v47, %v5970_v26  ;;  %v5971_v39 = vadd.f32 %v5938_v20, %v10753_v28  ;;  %v5821_v1 = vpop.f32.mrf.mxu1  ;;  %v11045_v23 = vld [vmem:[#allocation9_spill] sm:$0xff]  ;;  %v11046_v30 = vld [vmem:[#allocation18_spill] sm:$0xff] }
 0x371   :  { %v5940_v27 = vsel %vm2402_vm2, %v5935_v45, %v5939_v61  ;;  %v5941_v8 = vrot.slane %v5907_v51, 1  ;;  %v5908_v11 = vmul.f32 %v10729_v48, %v5818_v4  ;;  %v5822_v60 = vadd.f32 %v5821_v1, %v5630_v31  ;;  %v5632_v15 = vpop.f32.mrf.mxu0 }
 0x372   :  { %6072 = vst [vmem:[%s10938_s10 + $0x8] sm:$0xff] %v6056_v43  ;;  %v6057_v41 = vadd.f32 %v7831_v12, %v6041_v32  ;;  %v6042_v22 = vmax.f32 %v6026_v9, 0.0  ;;  %v6027_v28 = vadd.f32 %v11043_v36, %v5971_v39  ;;  %v5972_v33 = vadd.f32 %v5940_v27, %v10756_v16  ;;  %v5823_v62 = vpop.f32.mrf.mxu1  ;;  %v7836_v39 = vld [vmem:[%s10931_s0 + $0x38] sm:$0xff] }
 0x373   :  { %v5942_v56 = vsel %vm2402_vm2, %v5937_v44, %v5941_v8  ;;  %v5943_v48 = vrot.slane %v5908_v11, 1  ;;  %v5909_v49 = vmul.f32 %v10734_v0, %v5822_v60  ;;  %v5824_v42 = vadd.f32 %v5823_v62, %v5632_v15  ;;  %v5634_v3 = vpop.f32.mrf.mxu0  ;;  %v7837_v15 = vld [vmem:[%s10931_s0 + $0x40] sm:$0xff] }
 0x374   :  { %6073 = vst [vmem:[%s10938_s10 + $0x10] sm:$0xff] %v6057_v41  ;;  %v6058_v52 = vadd.f32 %v7832_v21, %v6042_v22  ;;  %v6043_v24 = vmax.f32 %v6027_v28, 0.0  ;;  %v6028_v16 = vadd.f32 %v11044_v47, %v5972_v33  ;;  %v5973_v17 = vadd.f32 %v5942_v56, %v10761_v5  ;;  %v5825_v37 = vpop.f32.mrf.mxu1  ;;  %v7838_v33 = vld [vmem:[%s10931_s0 + $0x48] sm:$0xff] }
 0x375   :  { %v5944_v57 = vsel %vm2402_vm2, %v5939_v61, %v5943_v48  ;;  %v5945_v2 = vrot.slane %v5909_v49, 1  ;;  %v5910_v45 = vmul.f32 %v10734_v0, %v5824_v42  ;;  %v5826_v46 = vadd.f32 %v5825_v37, %v5634_v3  ;;  %v5636_v58 = vpop.f32.mrf.mxu0  ;;  %v7835_v61 = vld [vmem:[%s10931_s0 + $0x30] sm:$0xff] }
 0x376   :  { %6074 = vst [vmem:[%s10938_s10 + $0x18] sm:$0xff] %v6058_v52  ;;  %v6059_v19 = vadd.f32 %v7833_v29, %v6043_v24  ;;  %v6044_v40 = vmax.f32 %v6028_v16, 0.0  ;;  %v6029_v5 = vadd.f32 %v11043_v36, %v5973_v17  ;;  %v5974_v18 = vadd.f32 %v5944_v57, %v10768_v59  ;;  %v5827_v54 = vpop.f32.mrf.mxu1  ;;  %v7839_v49 = vld [vmem:[%s10931_s0 + $0x50] sm:$0xff]  ;;  %v7840_v52 = vld [vmem:[%s10931_s0 + $0x58] sm:$0xff] }
 0x377   :  { %v5946_v55 = vsel %vm2402_vm2, %v5941_v8, %v5945_v2  ;;  %v5947_v0 = vrot.slane %v5910_v45, 1  ;;  %v5911_v44 = vmul.f32 %v10744_v25, %v5826_v46  ;;  %v5828_v35 = vadd.f32 %v5827_v54, %v5636_v58 }
 0x378   :  { %6075 = vst [vmem:[%s10938_s10 + $0x20] sm:$0xff] %v6059_v19  ;;  %v6060_v50 = vadd.f32 %v7834_v13, %v6044_v40  ;;  %v6045_v38 = vmax.f32 %v6029_v5, 0.0  ;;  %v6030_v63 = vadd.f32 %v11044_v47, %v5974_v18  ;;  %v5975_v59 = vadd.f32 %v5946_v55, %v10771_v7 }
 0x379   :  { %v5380_v6 = vadd.f32 %v10780_v53, %v11045_v23  ;;  %v5948_v26 = vsel %vm2402_vm2, %v5943_v48, %v5947_v0  ;;  %v5949_v10 = vrot.slane %v5911_v44, 1  ;;  %v5912_v20 = vmul.f32 %v10744_v25, %v5828_v35  ;;  %v5842_v53 = vld [vmem:[%s10938_s10 + $0x60] sm:$0x7f] }
 0x37a   :  { %6076 = vst [vmem:[%s10938_s10 + $0x28] sm:$0xff] %v6060_v50  ;;  %v6061_v51 = vadd.f32 %v7835_v61, %v6045_v38  ;;  %v6046_v4 = vmax.f32 %v6030_v63, 0.0  ;;  %v6031_v7 = vadd.f32 %v11043_v36, %v5975_v59  ;;  %v5976_v31 = vadd.f32 %v5948_v26, %v10777_v14 }
 0x37b   :  { %v5381_v25 = vadd.f32 %v10786_v34, %v11046_v30  ;;  %v5950_v43 = vsel %vm2402_vm2, %v5945_v2, %v5949_v10  ;;  %v5979_v32 = vadd.f32 %v5949_v10, %v5842_v53  ;;  %v5951_v9 = vrot.slane %v5912_v20, 1  ;;  %v5843_v34 = vld [vmem:[%s10938_s10 + $0x68] sm:$0x7f]  ;;  %v7841_v2 = vld [vmem:[%s10931_s0 + $0x60] sm:$0xff] }
 0x37c   :  { %6077 = vst [vmem:[%s10938_s10 + $0x30] sm:$0xff] %v6061_v51  ;;  %v6062_v14 = vadd.f32 %v7836_v39, %v6046_v4  ;;  %v6047_v1 = vmax.f32 %v6031_v7, 0.0  ;;  %v6032_v27 = vadd.f32 %v11044_v47, %v5976_v31  ;;  %v5977_v8 = vadd.f32 %v5950_v43, %v5380_v6 }
 0x37d   :  { %5993 = vst [vmem:[%s10938_s10 + $0x60] sm:$0x7f] %v5979_v32  ;;  %v5952_v11 = vsel %vm2402_vm2, %v5947_v0, %v5951_v9  ;;  %v5980_v60 = vadd.f32 %v5951_v9, %v5843_v34 }
 0x37e   :  { %6078 = vst [vmem:[%s10938_s10 + $0x38] sm:$0xff] %v6062_v14  ;;  %v6063_v12 = vadd.f32 %v7837_v15, %v6047_v1  ;;  %v6048_v41 = vmax.f32 %v6032_v27, 0.0  ;;  %v6033_v22 = vadd.f32 %v11043_v36, %v5977_v8  ;;  %v5978_v28 = vadd.f32 %v5952_v11, %v5381_v25 }
 0x37f   :  { %5994 = vst [vmem:[%s10938_s10 + $0x68] sm:$0x7f] %v5980_v60 }
 0x380   :  { %6079 = vst [vmem:[%s10938_s10 + $0x40] sm:$0xff] %v6063_v12  ;;  %v6064_v62 = vadd.f32 %v7838_v33, %v6048_v41  ;;  %v6049_v56 = vmax.f32 %v6033_v22, 0.0  ;;  %v6034_v48 = vadd.f32 %v11044_v47, %v5978_v28 }
 0x382   :  { %6080 = vst [vmem:[%s10938_s10 + $0x48] sm:$0xff] %v6064_v62  ;;  %v6065_v42 = vadd.f32 %v7839_v49, %v6049_v56  ;;  %v6050_v3 = vmax.f32 %v6034_v48, 0.0 }
 0x384   :  { %v6007_v21 = vld [vmem:[%s10938_s10 + $0x60] sm:$0xff]  ;;  %6081 = vst [vmem:[%s10938_s10 + $0x50] sm:$0xff] %v6065_v42  ;;  %v6066_v24 = vadd.f32 %v7840_v52, %v6050_v3 }
 0x385   :  { %v6035_v16 = vadd.f32 %v11043_v36, %v6007_v21  ;;  %v7842_v36 = vld [vmem:[%s10931_s0 + $0x68] sm:$0xff] }
 0x386   :  { %v6008_v17 = vld [vmem:[%s10938_s10 + $0x68] sm:$0xff]  ;;  %6082 = vst [vmem:[%s10938_s10 + $0x58] sm:$0xff] %v6066_v24 }
 0x387   :  { %v6051_v37 = vmax.f32 %v6035_v16, 0.0  ;;  %v6036_v57 = vadd.f32 %v11044_v47, %v6008_v17 }
 0x389   :  { %v6067_v45 = vadd.f32 %v7841_v2, %v6051_v37  ;;  %v6052_v46 = vmax.f32 %v6036_v57, 0.0 }
 0x38b   :  { %6083 = vst [vmem:[%s10938_s10 + $0x60] sm:$0xff] %v6067_v45  ;;  %v6068_v58 = vadd.f32 %v7842_v36, %v6052_v46 }
 0x38d   :  { %6084 = vst [vmem:[%s10938_s10 + $0x68] sm:$0xff] %v6068_v58 }

</bundles_post_ra>
